<compile_context>
chip_gen: v7x
topology: tpu7x:2x2x1
jax: 0.10.0
libtpu: 0.0.40
codegen_flags: <defaults>
</compile_context>

<pallas_src>
import functools

import jax
import jax.numpy as jnp
from jax import lax
from jax.experimental import pallas as pl
from jax.experimental.pallas import tpu as pltpu  # noqa: F401  (TPU backend)

# stand-ins for pcf.* feature-column indices of `inputs`
# columns: [x, y, tw_open, tw_close, visit_duration, arrival_deadline]
OPEN_IDX, CLOSE_IDX, DUR_IDX, ARR_IDX = 2, 3, 4, 5
NEG_INF = -1.0e9
TINY = 1.0e-30


# ----------------------------------------------------------------------------
# small in-kernel helpers (traced inside the Pallas kernels)
# ----------------------------------------------------------------------------
def _iota(shape, dim):
    return lax.broadcasted_iota(jnp.int32, shape, dim)


def _dot(a, b):
    return jnp.dot(a, b, preferred_element_type=jnp.float32)


def _dot_t(a, b):
    # a @ b.T  (transposed-operand matmul; MXU handles it natively)
    return jnp.dot(a, b.T, preferred_element_type=jnp.float32)


def _softmax_rows(logits):
    m = jnp.max(logits, axis=-1, keepdims=True)
    e = jnp.exp(logits - m)
    return e * pl.reciprocal(jnp.sum(e, axis=-1, keepdims=True), approx=True)


def _max2(x):
    return jnp.max(jnp.max(x, axis=1, keepdims=True), axis=0, keepdims=True)


def _min2(x):
    return jnp.min(jnp.min(x, axis=1, keepdims=True), axis=0, keepdims=True)


def _sum2(x):
    return jnp.sum(jnp.sum(x, axis=1, keepdims=True), axis=0, keepdims=True)


def _unpack_statics(dist_ref, dist_t_ref, srows_ref, open_col_ref, close_col_ref,
                    dur_col_ref, enc_base_ref, dynw_ref, wqkv_ref, wx_ref, wh_ref,
                    wb_ref, wref_ref, wqp_ref, vrow_ref):
    srows = srows_ref[...]
    return dict(
        dist=dist_ref[...], dist_t=dist_t_ref[...],
        open_row=srows[0:1, :], close_row=srows[1:2, :],
        dur_row=srows[2:3, :], lim_row=srows[3:4, :],
        open_col=open_col_ref[...], close_col=close_col_ref[...],
        dur_col=dur_col_ref[...],
        enc_base=enc_base_ref[...], dynw=dynw_ref[...], wqkv=wqkv_ref[...],
        wx=wx_ref[...], wh=wh_ref[...], wb=wb_ref[...],
        wref=wref_ref[...], wqp=wqp_ref[...], vrow=vrow_ref[...])


def _feasibility(mask, pres, time_col, s, n, first_step):
    """ModelUtils.feasibility_control, vectorised over the beam slots (rows)."""
    kb = mask.shape[0]
    oh = (_iota((kb, n), 1) == pres).astype(jnp.float32)
    drow = _dot(oh, s["dist"])                               # dist[pres, :] per beam
    arrive = drow + time_col
    wait = jnp.maximum(0.0, s["open_row"] - arrive)
    c1 = ((arrive + wait) <= s["close_row"]).astype(jnp.float32)
    c2 = ((arrive + wait) <= s["lim_row"]).astype(jnp.float32)   # deadline folded in lim
    m = mask
    if not first_step:
        m = m * (1.0 - oh)                                    # mask the current node
    return m * c1 * c2


def _one_step_update(pres, fut, time_col, s, n):
    """ModelUtils.one_step_update: advance present_time to the chosen node."""
    kb = pres.shape[0]
    ohp = (_iota((kb, n), 1) == pres).astype(jnp.float32)
    ohf = (_iota((kb, n), 1) == fut).astype(jnp.float32)
    drow = _dot(ohp, s["dist"])
    d_pf = jnp.sum(drow * ohf, axis=-1, keepdims=True)
    open_f = jnp.sum(s["open_row"] * ohf, axis=-1, keepdims=True)
    dur_f = jnp.sum(s["dur_row"] * ohf, axis=-1, keepdims=True)
    arrive = d_pf + time_col
    wait = jnp.maximum(0.0, open_f - arrive)
    return arrive + wait + dur_f


def _dyn_inputs(pres_11, time_11, s, n):
    """Fused DynamicFeatures + dyn embedding + concat with the static embedding.

    Returns the encoder input x (N, H) and the lookahead 'future present time'
    column fpt (N, 1) reused by the adjacency matrix."""
    # TODO(synk): DynamicFeatures is not provided in the reference; the features
    # are the synthetic [arrival, wait, tw-slack, present-time] set.
    oh_col = (_iota((n, 1), 0) == pres_11).astype(jnp.float32)
    dcol = _dot(s["dist_t"], oh_col)                          # dist[pres, :] as column
    arr_c = dcol + time_11
    wait_c = jnp.maximum(0.0, s["open_col"] - arr_c)
    slack_c = s["close_col"] - (arr_c + wait_c)
    dynw = s["dynw"]
    emb2 = (arr_c * dynw[0:1, :] + wait_c * dynw[1:2, :]
            + slack_c * dynw[2:3, :] + time_11 * dynw[3:4, :])
    x = s["enc_base"] + emb2                                  # == cat(emb1, emb2)
    fpt_c = arr_c + wait_c + s["dur_col"]
    return x, fpt_c


def _adjacency(mask_row, fpt_c, s, n):
    """Lookahead.adjacency_matrix for one beam (2-D, N x N)."""
    arr = s["dist"] + fpt_c                                   # arr[i, j] = dist[i, j] + fpt[i]
    wait = jnp.maximum(0.0, s["open_col"] - arr)
    reach = arr + wait
    c1 = (reach <= s["close_row"]).astype(jnp.float32)
    c2 = (reach <= s["lim_row"]).astype(jnp.float32)
    adj = mask_row * c1 * c2
    eye = _iota((n, n), 0) == _iota((n, n), 1)
    return jnp.where(eye, 1.0, adj)


def _lstm(x_rows, h_rows, c_rows, s, hdim):
    """LSTM cell, batched over all beam slots (rows)."""
    gates = _dot(x_rows, s["wx"]) + _dot(h_rows, s["wh"]) + s["wb"]
    i = jax.nn.sigmoid(gates[:, 0:hdim])
    f = jax.nn.sigmoid(gates[:, hdim:2 * hdim])
    g = jnp.tanh(gates[:, 2 * hdim:3 * hdim])
    o = jax.nn.sigmoid(gates[:, 3 * hdim:4 * hdim])
    c_new = f * c_rows + i * g
    return o * jnp.tanh(c_new), c_new


def _encode_pass(kb, n, hdim, mask_cur, time_cur, pres_cur, s):
    """Synthetic graph-attention encoder for every beam.

    The Wq|Wk|Wv projection of all beams is batched into one (kb*N, 3H) matmul
    (beam rows stacked along sublanes; N is a multiple of 8 so all per-beam
    slices are sublane-tile aligned).  Attention itself stays per-beam because
    each beam has its own adjacency mask."""
    xs, adjs = [], []
    for k in range(kb):
        x_k, fpt_c = _dyn_inputs(pres_cur[k:k + 1, :], time_cur[k:k + 1, :], s, n)
        adjs.append(_adjacency(mask_cur[k:k + 1, :], fpt_c, s, n))
        xs.append(x_k)
    x_all = jnp.concatenate(xs, axis=0)                       # (kb*N, H)
    qkv_all = _dot(x_all, s["wqkv"])                          # single fused projection
    inv_sqrt = 1.0 / (hdim ** 0.5)
    out = []
    for k in range(kb):
        qkv = qkv_all[k * n:(k + 1) * n, :]
        q = qkv[:, 0:hdim]
        kk = qkv[:, hdim:2 * hdim]
        v = qkv[:, 2 * hdim:3 * hdim]
        sc = _dot_t(q, kk) * inv_sqrt
        sc = jnp.where(adjs[k] > 0.0, sc, NEG_INF)
        attn = _softmax_rows(sc)
        out.append(jnp.tanh(_dot(attn, v) + xs[k]))
    return out


def _decode_and_score(kb, n, hdim, mask_cur, time_cur, pres_cur, slp_cur, alive_cur,
                      enc_old_list, h_prev, c_prev, s):
    """Encoder (fresh adjacency) + batched LSTM + pointer + log-space scores."""
    enc_new_list = _encode_pass(kb, n, hdim, mask_cur, time_cur, pres_cur, s)
    rows1 = _iota((kb, 1), 0)

    # decoder input: gather row pres[k] from the *previous* encoder outputs
    dec_in = jnp.zeros((kb, hdim), jnp.float32)
    for k in range(kb):
        oh_row = (_iota((1, n), 1) == pres_cur[k:k + 1, :]).astype(jnp.float32)
        row_k = (rows1 == k).astype(jnp.float32)
        dec_in = dec_in + row_k * _dot(oh_row, enc_old_list[k])

    # LSTM cell + pointer query projection, batched over all beam slots
    h_new, c_new = _lstm(dec_in, h_prev, c_prev, s, hdim)
    hq = _dot(h_new, s["wqp"])                                # (kb, H)

    # pointer reference projection batched over beams: one (kb*N, H) matmul
    enc_all = jnp.concatenate(enc_new_list, axis=0)           # (kb*N, H)
    uref_all = _dot(enc_all, s["wref"])                       # (kb*N, H)

    pol_mat = jnp.zeros((kb, n), jnp.float32)
    score_mat = jnp.full((kb, n), NEG_INF, jnp.float32)
    for k in range(kb):
        mask_row = mask_cur[k:k + 1, :]
        u = jnp.tanh(uref_all[k * n:(k + 1) * n, :] + hq[k:k + 1, :])   # (N, H)
        logits = _dot_t(s["vrow"], u)                         # (1, N) = v^T u^T
        logits = jnp.where(mask_row > 0.0, logits, NEG_INF)
        pol_row = _softmax_rows(logits)
        valid = (mask_row > 0.0) & (alive_cur[k:k + 1, :] > 0.0)
        score_row = jnp.where(
            valid, slp_cur[k:k + 1, :] + jnp.log(jnp.maximum(pol_row, TINY)), NEG_INF)
        row_k = rows1 == k
        pol_mat = jnp.where(row_k, pol_row, pol_mat)
        score_mat = jnp.where(row_k, score_row, score_mat)
    return enc_new_list, h_new, c_new, pol_mat, score_mat


def _select_and_emit(kb, n, mask_new, time_new, pres_new, slp_in,
                     h_new, c_new, enc_new_list, pol_mat, score_mat,
                     mask_o, time_o, pres_o, alive_o, slp_o, h_o, c_o, enc_o,
                     fut_o, logsel_o, beamid_o):
    """Greedy log-space top-k over the flattened (beam, node) scores followed by
    the parent-beam gather ('index_select') of every carried state array."""
    rows1_i = _iota((kb, 1), 0)
    rows1_f = rows1_i.astype(jnp.float32)
    rows_f = _iota((kb, n), 0).astype(jnp.float32)
    lanes_f = _iota((kb, n), 1).astype(jnp.float32)
    beam_lanes_f = _iota((1, kb), 1).astype(jnp.float32)
    hdim = h_new.shape[1]
    pres_f = pres_new.astype(jnp.float32)

    work = score_mat
    bid_vec = jnp.zeros((kb, 1), jnp.int32)
    act_vec = jnp.zeros((kb, 1), jnp.int32)
    lsel_vec = jnp.zeros((kb, 1), jnp.float32)
    alive_vec = jnp.zeros((kb, 1), jnp.float32)
    mask_child = jnp.zeros((kb, n), jnp.float32)
    time_child = jnp.zeros((kb, 1), jnp.float32)
    pres_child = jnp.zeros((kb, 1), jnp.int32)
    slp_child = jnp.zeros((kb, 1), jnp.float32)
    h_child = jnp.zeros((kb, hdim), jnp.float32)
    c_child = jnp.zeros((kb, hdim), jnp.float32)

    for t in range(kb):
        m_t = _max2(work)                                            # (1, 1)
        is_max = work >= m_t
        row_has = jnp.max(jnp.where(is_max, 1.0, 0.0), axis=1, keepdims=True)
        b_f = jnp.min(jnp.where(row_has > 0.5, rows1_f, float(kb)),
                      axis=0, keepdims=True)                         # parent beam
        a_f = _min2(jnp.where(is_max & (rows_f == b_f), lanes_f, float(n)))
        selmask = (rows_f == b_f) & (lanes_f == a_f)
        p_t = _sum2(jnp.where(selmask, pol_mat, 0.0))
        ok_t = (m_t > 0.5 * NEG_INF).astype(jnp.float32)             # valid pick?
        logp_t = jnp.log(jnp.maximum(p_t, TINY))
        work = jnp.where(selmask, NEG_INF, work)

        row_t = rows1_i == t
        bid_vec = jnp.where(row_t, b_f.astype(jnp.int32), bid_vec)
        act_vec = jnp.where(row_t, a_f.astype(jnp.int32), act_vec)
        lsel_vec = jnp.where(row_t, logp_t, lsel_vec)
        alive_vec = jnp.where(row_t, ok_t, alive_vec)

        # parent-beam gather: one-hot matmuls for the wide state arrays,
        # tiny weighted sums for the (kb, 1) scalars and the 3-D encoder state.
        poh = (beam_lanes_f == b_f).astype(jnp.float32)              # (1, kb)
        p_mask = _dot(poh, mask_new)                                 # (1, N)
        p_h = _dot(poh, h_new)                                       # (1, H)
        p_c = _dot(poh, c_new)                                       # (1, H)
        p_time = jnp.zeros((1, 1), jnp.float32)
        p_slp = jnp.zeros((1, 1), jnp.float32)
        p_pres = jnp.zeros((1, 1), jnp.float32)
        p_enc = jnp.zeros_like(enc_new_list[0])
        for j in range(kb):
            w = (b_f == float(j)).astype(jnp.float32)                # (1, 1)
            p_time = p_time + w * time_new[j:j + 1, :]
            p_slp = p_slp + w * slp_in[j:j + 1, :]
            p_pres = p_pres + w * pres_f[j:j + 1, :]
            p_enc = p_enc + w * enc_new_list[j]

        mask_child = jnp.where(row_t, p_mask * ok_t, mask_child)    # dead child => mask 0
        time_child = jnp.where(row_t, p_time, time_child)
        pres_child = jnp.where(row_t, p_pres.astype(jnp.int32), pres_child)
        slp_child = jnp.where(row_t, p_slp + logp_t, slp_child)
        h_child = jnp.where(row_t, p_h, h_child)
        c_child = jnp.where(row_t, p_c, c_child)
        enc_o[t] = p_enc

    mask_o[...] = mask_child
    time_o[...] = time_child
    pres_o[...] = pres_child
    alive_o[...] = alive_vec
    slp_o[...] = slp_child
    h_o[...] = h_child
    c_o[...] = c_child
    fut_o[...] = act_vec
    logsel_o[...] = lsel_vec
    beamid_o[...] = bid_vec


# ----------------------------------------------------------------------------
# Fused Pallas kernels (single invocation, whole-array VMEM residency)
# ----------------------------------------------------------------------------
def _step_kernel(dist_ref, dist_t_ref, srows_ref, open_col_ref, close_col_ref,
                 dur_col_ref, enc_base_ref, dynw_ref, wqkv_ref, wx_ref, wh_ref,
                 wb_ref, wref_ref, wqp_ref, vrow_ref,
                 mask_ref, time_ref, pres_ref, alive_ref, slp_ref, h_ref, c_ref,
                 enc_ref, fut_ref,
                 mask_o, time_o, pres_o, alive_o, slp_o, h_o, c_o, enc_o, fut_o,
                 logsel_o, beamid_o, ended_o, aliveafter_o, *, kb, n, hdim):
    s = _unpack_statics(dist_ref, dist_t_ref, srows_ref, open_col_ref, close_col_ref,
                        dur_col_ref, enc_base_ref, dynw_ref, wqkv_ref, wx_ref, wh_ref,
                        wb_ref, wref_ref, wqp_ref, vrow_ref)
    mask_in = mask_ref[...]
    time_in = time_ref[...]
    pres_in = pres_ref[...]
    alive_in = alive_ref[...]
    slp_in = slp_ref[...]
    h_in = h_ref[...]
    c_in = c_ref[...]
    fut_in = fut_ref[...]

    # 1) one_step_update: every beam moves to its pending future action.
    time_new = _one_step_update(pres_in, fut_in, time_in, s, n)
    pres_new = fut_in

    # 2) feasibility_control (not first step); detect finished beams.
    mask_new = _feasibility(mask_in, pres_new, time_new, s, n, first_step=False)
    mask_new = mask_new * alive_in
    last = jnp.sum(mask_new * (_iota((1, n), 1) == (n - 1)).astype(jnp.float32),
                   axis=-1, keepdims=True)
    ended = alive_in * (last <= 0.5).astype(jnp.float32)
    alive_after = alive_in * (last > 0.5).astype(jnp.float32)
    ended_o[...] = ended
    aliveafter_o[...] = alive_after

    # 3) adjacency + dyn features + encoder + LSTM + pointer + scoring.
    enc_old_list = [enc_ref[k] for k in range(kb)]
    enc_new_list, h_new, c_new, pol_mat, score_mat = _decode_and_score(
        kb, n, hdim, mask_new, time_new, pres_new, slp_in, alive_after,
        enc_old_list, h_in, c_in, s)

    # 4) greedy log-space top-k selection + beam re-indexing.
    _select_and_emit(kb, n, mask_new, time_new, pres_new, slp_in,
                     h_new, c_new, enc_new_list, pol_mat, score_mat,
                     mask_o, time_o, pres_o, alive_o, slp_o, h_o, c_o, enc_o,
                     fut_o, logsel_o, beamid_o)


def _init_kernel(dist_ref, dist_t_ref, srows_ref, open_col_ref, close_col_ref,
                 dur_col_ref, enc_base_ref, dynw_ref, wqkv_ref, wx_ref, wh_ref,
                 wb_ref, wref_ref, wqp_ref, vrow_ref, h0_ref, c0_ref, t0_ref,
                 mask_o, time_o, pres_o, alive_o, slp_o, h_o, c_o, enc_o, fut_o,
                 logsel_o, beamid_o, aliveafter_o, *, kb, n, hdim):
    s = _unpack_statics(dist_ref, dist_t_ref, srows_ref, open_col_ref, close_col_ref,
                        dur_col_ref, enc_base_ref, dynw_ref, wqkv_ref, wx_ref, wh_ref,
                        wb_ref, wref_ref, wqp_ref, vrow_ref)
    time0 = t0_ref[...]                                          # (K, 1) start_time
    alive0 = (_iota((kb, 1), 0) == 0).astype(jnp.float32)        # only slot 0 is live
    mask0 = (_iota((kb, n), 0) == 0).astype(jnp.float32)
    pres0 = jnp.zeros((kb, 1), jnp.int32)
    slp0 = jnp.zeros((kb, 1), jnp.float32)

    # feasibility_control(first_step=True) + first encoder pass
    mask1 = _feasibility(mask0, pres0, time0, s, n, first_step=True) * alive0
    enc1_list = _encode_pass(kb, n, hdim, mask1, time0, pres0, s)

    # second feasibility (masks the start node) + "done" bookkeeping
    mask2 = _feasibility(mask1, pres0, time0, s, n, first_step=False) * alive0
    last = jnp.sum(mask2 * (_iota((1, n), 1) == (n - 1)).astype(jnp.float32),
                   axis=-1, keepdims=True)
    aliveafter_o[...] = alive0 * (last > 0.5).astype(jnp.float32)

    # full decode pass + first greedy selection (expands beam 0 into K slots)
    h_prev = jnp.zeros((kb, hdim), jnp.float32) + h0_ref[...]
    c_prev = jnp.zeros((kb, hdim), jnp.float32) + c0_ref[...]
    enc_new_list, h_new, c_new, pol_mat, score_mat = _decode_and_score(
        kb, n, hdim, mask2, time0, pres0, slp0, alive0,
        enc1_list, h_prev, c_prev, s)
    _select_and_emit(kb, n, mask2, time0, pres0, slp0,
                     h_new, c_new, enc_new_list, pol_mat, score_mat,
                     mask_o, time_o, pres_o, alive_o, slp_o, h_o, c_o, enc_o,
                     fut_o, logsel_o, beamid_o)


# ----------------------------------------------------------------------------
# Fixed-shape on-device driver (lax.while_loop, one pallas_call per step)
# ----------------------------------------------------------------------------
def _state_out_shapes(kb, n, hdim):
    f32, i32 = jnp.float32, jnp.int32
    return (jax.ShapeDtypeStruct((kb, n), f32),        # mask
            jax.ShapeDtypeStruct((kb, 1), f32),        # present_time
            jax.ShapeDtypeStruct((kb, 1), i32),        # present action
            jax.ShapeDtypeStruct((kb, 1), f32),        # alive flag
            jax.ShapeDtypeStruct((kb, 1), f32),        # sum_log_probs
            jax.ShapeDtypeStruct((kb, hdim), f32),     # dec hidden h
            jax.ShapeDtypeStruct((kb, hdim), f32),     # dec hidden c
            jax.ShapeDtypeStruct((kb, n, hdim), f32),  # enc_outputs
            jax.ShapeDtypeStruct((kb, 1), i32),        # pending future action
            jax.ShapeDtypeStruct((kb, 1), f32),        # pending log prob
            jax.ShapeDtypeStruct((kb, 1), i32))        # parent beam id


@functools.partial(jax.jit, static_argnames=("beam_size",))
def _beam_search_run(params, inputs0, data_scaled0, dist_mat, start_time, *, beam_size):
    n, _ = inputs0.shape
    hdim = params["enc_wq"].shape[0]
    h2 = params["sta_w"].shape[1]
    kb = beam_size
    f32 = jnp.float32

    # ----- loop-invariant precompute (done once, outside the step kernel) -----
    tw_open = inputs0[:, OPEN_IDX]
    tw_close = inputs0[:, CLOSE_IDX]
    dur = inputs0[:, DUR_IDX]
    ttime = inputs0[0, ARR_IDX]
    dlast = dist_mat[:, -1]
    lim = ttime - dur - dlast                        # deadline folded per node
    srows = jnp.stack([tw_open, tw_close, dur, lim], axis=0).astype(f32)
    open_col = tw_open[:, None].astype(f32)
    close_col = tw_close[:, None].astype(f32)
    dur_col = dur[:, None].astype(f32)
    dist_t = dist_mat.T.astype(f32)

    # emb1 (static embedding) is loop-invariant; fold it (and the dyn bias) into
    # enc_base, and pad dyn_w into the second half of H so that enc_inputs =
    # enc_base + dyn_features @ dyn_w  ==  cat(emb1, emb2).
    emb1 = data_scaled0 @ params["sta_w"] + params["sta_b"]
    enc_base = jnp.concatenate(
        [emb1, jnp.broadcast_to(params["dyn_b"], (n, h2))], axis=1).astype(f32)
    dynw = jnp.concatenate(
        [jnp.zeros((params["dyn_w"].shape[0], h2), f32), params["dyn_w"]], axis=1)
    wqkv = jnp.concatenate(
        [params["enc_wq"], params["enc_wk"], params["enc_wv"]], axis=1)

    statics = (dist_mat.astype(f32), dist_t, srows, open_col, close_col, dur_col,
               enc_base, dynw, wqkv, params["lstm_wx"], params["lstm_wh"],
               params["lstm_b"], params["ptr_wref"], params["ptr_wq"], params["ptr_v"])

    # ----- fused init kernel (two feasibility / two encoder passes, first
    # decode and the first greedy selection) ----------------------------------
    t0 = jnp.full((kb, 1), start_time, f32)
    init_call = pl.pallas_call(
        functools.partial(_init_kernel, kb=kb, n=n, hdim=hdim),
        out_shape=_state_out_shapes(kb, n, hdim)
        + (jax.ShapeDtypeStruct((kb, 1), f32),))
    (mask, btime, pres, alive, slp, hdec, cdec, enc, fut, logsel, _bid0,
     alive_after0) = init_call(*statics, params["h0"], params["c0"], t0)

    step_call = pl.pallas_call(
        functools.partial(_step_kernel, kb=kb, n=n, hdim=hdim),
        out_shape=_state_out_shapes(kb, n, hdim)
        + (jax.ShapeDtypeStruct((kb, 1), f32),
           jax.ShapeDtypeStruct((kb, 1), f32)))

    maxf = kb * n                                   # upper bound on finished beams
    blact = jnp.zeros((kb, n), jnp.int32)           # blactions (column 0 = start node 0)
    bllog = jnp.zeros((kb, n), f32)                 # bllog_probs
    fin_a = jnp.zeros((maxf, n), jnp.int32)
    fin_l = jnp.zeros((maxf, n), f32)
    fin_cnt = jnp.int32(0)
    done0 = jnp.sum(alive_after0) < 0.5
    carry0 = (jnp.int32(0), done0, mask, btime, pres, alive, slp, hdec, cdec, enc,
              fut, logsel, blact, bllog, fin_a, fin_l, fin_cnt)

    def cond_fn(carry):
        step, done = carry[0], carry[1]
        return jnp.logical_and(jnp.logical_not(done), step < n - 1)

    def body_fn(carry):
        (step, _done, mask, btime, pres, alive, slp, hdec, cdec, enc, fut, logsel,
         blact, bllog, fin_a, fin_l, fin_cnt) = carry
        (mask_n, btime_n, pres_n, alive_n, slp_n, hdec_n, cdec_n, enc_n, fut_n,
         logsel_n, beamid, ended, alive_after) = step_call(
             *statics, mask, btime, pres, alive, slp, hdec, cdec, enc, fut)

        # record the action just executed and its (pending) log-prob
        bllog = lax.dynamic_update_slice_in_dim(bllog, logsel, step, axis=1)
        blact = lax.dynamic_update_slice_in_dim(blact, fut, step + 1, axis=1)
        step = step + 1
        done = jnp.sum(alive_after) < 0.5

        # finished beams -> fixed-size final buffers (no host sync)
        def _rec(i):
            def rec(args):
                fa, fl, cnt = args
                fa = lax.dynamic_update_slice_in_dim(fa, blact[i:i + 1, :], cnt, axis=0)
                fl = lax.dynamic_update_slice_in_dim(fl, bllog[i:i + 1, :], cnt, axis=0)
                return fa, fl, cnt + 1
            return rec
        for i in range(kb):
            fin_a, fin_l, fin_cnt = lax.cond(
                ended[i, 0] > 0.5, _rec(i), lambda a: a, (fin_a, fin_l, fin_cnt))

        # re-index the bookkeeping rows by parent beam id (device-side gather)
        bid = beamid[:, 0]
        blact = jnp.take(blact, bid, axis=0)
        bllog = jnp.take(bllog, bid, axis=0)
        return (step, done, mask_n, btime_n, pres_n, alive_n, slp_n, hdec_n, cdec_n,
                enc_n, fut_n, logsel_n, blact, bllog, fin_a, fin_l, fin_cnt)

    out = lax.while_loop(cond_fn, body_fn, carry0)
    return out[14], out[15], out[16]                 # fin_actions, fin_log_probs, count


# ----------------------------------------------------------------------------
# Public wrapper mirroring BeamSearch.forward
# ----------------------------------------------------------------------------
class BeamSearchPallas:
    """JAX / Pallas port of BeamSearch.forward (greedy inference)."""

    def __init__(self, params, hidden):
        self.params = params
        self.hidden = hidden

    def forward(self, inputs, data_scaled, start_time, dist_mat, infer_type, beam_size):
        if infer_type != "greedy":
            # TODO(synk): stochastic (Categorical / multinomial) sampling not ported.
            raise NotImplementedError("only greedy inference is implemented")
        fin_a, fin_l, fin_cnt = _beam_search_run(
            self.params, inputs[0], data_scaled[0], dist_mat,
            jnp.float32(start_time), beam_size=int(beam_size))
        cnt = int(jax.device_get(fin_cnt))           # the only host sync, at the end
        return fin_a[:cnt], fin_l[:cnt]


# ----------------------------------------------------------------------------
# Deterministic parameter init (shapes implied by the forward pass)
# ----------------------------------------------------------------------------
def init_params(key, feat_dim, dyn_dim, hidden):
    H, H2 = hidden, hidden // 2
    ks = jax.random.split(key, 10)
    nrm = lambda k, shape: (0.1 * jax.random.normal(k, shape)).astype(jnp.float32)
    return {
        "sta_w": nrm(ks[0], (feat_dim, H2)), "sta_b": jnp.zeros((1, H2), jnp.float32),
        "dyn_w": nrm(ks[1], (dyn_dim, H2)), "dyn_b": jnp.zeros((1, H2), jnp.float32),
        "enc_wq": nrm(ks[2], (H, H)), "enc_wk": nrm(ks[3], (H, H)), "enc_wv": nrm(ks[4], (H, H)),
        "lstm_wx": nrm(ks[5], (H, 4 * H)), "lstm_wh": nrm(ks[6], (H, 4 * H)),
        "lstm_b": jnp.zeros((1, 4 * H), jnp.float32),
        "ptr_wref": nrm(ks[7], (H, H)), "ptr_wq": nrm(ks[8], (H, H)),
        "ptr_v": nrm(ks[9], (1, H)),
        "h0": jnp.zeros((1, H), jnp.float32), "c0": jnp.zeros((1, H), jnp.float32),
    }


if __name__ == "__main__":
    N, F, DYNF, H = 16, 6, 4, 32
    deadline = 8.0

    key = jax.random.PRNGKey(0)
    k1, k2, k3, k4, kp = jax.random.split(key, 5)
    coords = jax.random.uniform(k1, (N, 2), dtype=jnp.float32)
    dist_mat = jnp.sqrt(jnp.sum((coords[:, None, :] - coords[None, :, :]) ** 2, axis=-1))
    tw_open = jax.random.uniform(k2, (N,), minval=0.0, maxval=2.0, dtype=jnp.float32)
    tw_close = tw_open + jax.random.uniform(k3, (N,), minval=1.5, maxval=3.0, dtype=jnp.float32)
    dur = jax.random.uniform(k4, (N,), minval=0.05, maxval=0.2, dtype=jnp.float32)
    # node 0 = start, node N-1 = end depot: wide windows, zero service duration
    tw_open = tw_open.at[0].set(0.0).at[N - 1].set(0.0)
    tw_close = tw_close.at[0].set(deadline).at[N - 1].set(deadline)
    dur = dur.at[0].set(0.0).at[N - 1].set(0.0)

    inputs0 = jnp.stack([coords[:, 0], coords[:, 1], tw_open, tw_close, dur,
                         jnp.full((N,), deadline, jnp.float32)], axis=1)
    inputs = inputs0[None]                                        # (1, N, F)
    data_scaled = inputs / jnp.maximum(jnp.max(jnp.abs(inputs), axis=1, keepdims=True), 1e-6)

    params = init_params(kp, F, DYNF, H)
    model = BeamSearchPallas(params, H)

    actions, log_probs = model.forward(inputs, data_scaled, start_time=0.0,
                                       dist_mat=dist_mat, infer_type="greedy",
                                       beam_size=3)
    jax.block_until_ready(actions)
    jax.block_until_ready(log_probs)
    print("KERNEL_OK")
</pallas_src>

<mosaic_0001>
module attributes {stable_mosaic.version = 11 : i64} {
  func.func @_step_kernel(%arg0: memref<16x16xf32, #tpu.memory_space<vmem>>, %arg1: memref<16x16xf32, #tpu.memory_space<vmem>>, %arg2: memref<4x16xf32, #tpu.memory_space<vmem>>, %arg3: memref<16x1xf32, #tpu.memory_space<vmem>>, %arg4: memref<16x1xf32, #tpu.memory_space<vmem>>, %arg5: memref<16x1xf32, #tpu.memory_space<vmem>>, %arg6: memref<16x32xf32, #tpu.memory_space<vmem>>, %arg7: memref<4x32xf32, #tpu.memory_space<vmem>>, %arg8: memref<32x96xf32, #tpu.memory_space<vmem>>, %arg9: memref<32x128xf32, #tpu.memory_space<vmem>>, %arg10: memref<32x128xf32, #tpu.memory_space<vmem>>, %arg11: memref<1x128xf32, #tpu.memory_space<vmem>>, %arg12: memref<32x32xf32, #tpu.memory_space<vmem>>, %arg13: memref<32x32xf32, #tpu.memory_space<vmem>>, %arg14: memref<1x32xf32, #tpu.memory_space<vmem>>, %arg15: memref<3x16xf32, #tpu.memory_space<vmem>>, %arg16: memref<3x1xf32, #tpu.memory_space<vmem>>, %arg17: memref<3x1xi32, #tpu.memory_space<vmem>>, %arg18: memref<3x1xf32, #tpu.memory_space<vmem>>, %arg19: memref<3x1xf32, #tpu.memory_space<vmem>>, %arg20: memref<3x32xf32, #tpu.memory_space<vmem>>, %arg21: memref<3x32xf32, #tpu.memory_space<vmem>>, %arg22: memref<3x16x32xf32, #tpu.memory_space<vmem>>, %arg23: memref<3x1xi32, #tpu.memory_space<vmem>>, %arg24: memref<3x16xf32, #tpu.memory_space<vmem>>, %arg25: memref<3x1xf32, #tpu.memory_space<vmem>>, %arg26: memref<3x1xi32, #tpu.memory_space<vmem>>, %arg27: memref<3x1xf32, #tpu.memory_space<vmem>>, %arg28: memref<3x1xf32, #tpu.memory_space<vmem>>, %arg29: memref<3x32xf32, #tpu.memory_space<vmem>>, %arg30: memref<3x32xf32, #tpu.memory_space<vmem>>, %arg31: memref<3x16x32xf32, #tpu.memory_space<vmem>>, %arg32: memref<3x1xi32, #tpu.memory_space<vmem>>, %arg33: memref<3x1xf32, #tpu.memory_space<vmem>>, %arg34: memref<3x1xi32, #tpu.memory_space<vmem>>, %arg35: memref<3x1xf32, #tpu.memory_space<vmem>>, %arg36: memref<3x1xf32, #tpu.memory_space<vmem>>) attributes {dimension_semantics = [], scalar_prefetch = 0 : i64, scratch_operands = 0 : i64, tpu.core_type = #tpu.core_type<tc>} {
    %c0 = arith.constant 0 : index
    %c0_0 = arith.constant 0 : index
    %0 = vector.load %arg2[%c0, %c0_0] : memref<4x16xf32, #tpu.memory_space<vmem>>, vector<4x16xf32>
    %c0_1 = arith.constant 0 : index
    %c0_2 = arith.constant 0 : index
    %1 = vector.load %arg0[%c0_1, %c0_2] : memref<16x16xf32, #tpu.memory_space<vmem>>, vector<16x16xf32>
    %c0_3 = arith.constant 0 : index
    %c0_4 = arith.constant 0 : index
    %2 = vector.load %arg1[%c0_3, %c0_4] : memref<16x16xf32, #tpu.memory_space<vmem>>, vector<16x16xf32>
    %3 = vector.extract_strided_slice %0 {offsets = [0, 0], sizes = [1, 16], strides = [1, 1]} : vector<4x16xf32> to vector<1x16xf32>
    %4 = vector.extract_strided_slice %0 {offsets = [1, 0], sizes = [1, 16], strides = [1, 1]} : vector<4x16xf32> to vector<1x16xf32>
    %5 = vector.extract_strided_slice %0 {offsets = [2, 0], sizes = [1, 16], strides = [1, 1]} : vector<4x16xf32> to vector<1x16xf32>
    %6 = vector.extract_strided_slice %0 {offsets = [3, 0], sizes = [1, 16], strides = [1, 1]} : vector<4x16xf32> to vector<1x16xf32>
    %c0_5 = arith.constant 0 : index
    %c0_6 = arith.constant 0 : index
    %7 = vector.load %arg3[%c0_5, %c0_6] : memref<16x1xf32, #tpu.memory_space<vmem>>, vector<16x1xf32>
    %c0_7 = arith.constant 0 : index
    %c0_8 = arith.constant 0 : index
    %8 = vector.load %arg4[%c0_7, %c0_8] : memref<16x1xf32, #tpu.memory_space<vmem>>, vector<16x1xf32>
    %c0_9 = arith.constant 0 : index
    %c0_10 = arith.constant 0 : index
    %9 = vector.load %arg5[%c0_9, %c0_10] : memref<16x1xf32, #tpu.memory_space<vmem>>, vector<16x1xf32>
    %c0_11 = arith.constant 0 : index
    %c0_12 = arith.constant 0 : index
    %10 = vector.load %arg6[%c0_11, %c0_12] : memref<16x32xf32, #tpu.memory_space<vmem>>, vector<16x32xf32>
    %c0_13 = arith.constant 0 : index
    %c0_14 = arith.constant 0 : index
    %11 = vector.load %arg7[%c0_13, %c0_14] : memref<4x32xf32, #tpu.memory_space<vmem>>, vector<4x32xf32>
    %c0_15 = arith.constant 0 : index
    %c0_16 = arith.constant 0 : index
    %12 = vector.load %arg8[%c0_15, %c0_16] : memref<32x96xf32, #tpu.memory_space<vmem>>, vector<32x96xf32>
    %c0_17 = arith.constant 0 : index
    %c0_18 = arith.constant 0 : index
    %13 = vector.load %arg9[%c0_17, %c0_18] : memref<32x128xf32, #tpu.memory_space<vmem>>, vector<32x128xf32>
    %c0_19 = arith.constant 0 : index
    %c0_20 = arith.constant 0 : index
    %14 = vector.load %arg10[%c0_19, %c0_20] : memref<32x128xf32, #tpu.memory_space<vmem>>, vector<32x128xf32>
    %c0_21 = arith.constant 0 : index
    %c0_22 = arith.constant 0 : index
    %15 = vector.load %arg11[%c0_21, %c0_22] : memref<1x128xf32, #tpu.memory_space<vmem>>, vector<1x128xf32>
    %c0_23 = arith.constant 0 : index
    %c0_24 = arith.constant 0 : index
    %16 = vector.load %arg12[%c0_23, %c0_24] : memref<32x32xf32, #tpu.memory_space<vmem>>, vector<32x32xf32>
    %c0_25 = arith.constant 0 : index
    %c0_26 = arith.constant 0 : index
    %17 = vector.load %arg13[%c0_25, %c0_26] : memref<32x32xf32, #tpu.memory_space<vmem>>, vector<32x32xf32>
    %c0_27 = arith.constant 0 : index
    %c0_28 = arith.constant 0 : index
    %18 = vector.load %arg14[%c0_27, %c0_28] : memref<1x32xf32, #tpu.memory_space<vmem>>, vector<1x32xf32>
    %c0_29 = arith.constant 0 : index
    %c0_30 = arith.constant 0 : index
    %19 = vector.load %arg15[%c0_29, %c0_30] : memref<3x16xf32, #tpu.memory_space<vmem>>, vector<3x16xf32>
    %c0_31 = arith.constant 0 : index
    %c0_32 = arith.constant 0 : index
    %20 = vector.load %arg16[%c0_31, %c0_32] : memref<3x1xf32, #tpu.memory_space<vmem>>, vector<3x1xf32>
    %c0_33 = arith.constant 0 : index
    %c0_34 = arith.constant 0 : index
    %21 = vector.load %arg17[%c0_33, %c0_34] : memref<3x1xi32, #tpu.memory_space<vmem>>, vector<3x1xi32>
    %c0_35 = arith.constant 0 : index
    %c0_36 = arith.constant 0 : index
    %22 = vector.load %arg18[%c0_35, %c0_36] : memref<3x1xf32, #tpu.memory_space<vmem>>, vector<3x1xf32>
    %c0_37 = arith.constant 0 : index
    %c0_38 = arith.constant 0 : index
    %23 = vector.load %arg19[%c0_37, %c0_38] : memref<3x1xf32, #tpu.memory_space<vmem>>, vector<3x1xf32>
    %c0_39 = arith.constant 0 : index
    %c0_40 = arith.constant 0 : index
    %24 = vector.load %arg20[%c0_39, %c0_40] : memref<3x32xf32, #tpu.memory_space<vmem>>, vector<3x32xf32>
    %c0_41 = arith.constant 0 : index
    %c0_42 = arith.constant 0 : index
    %25 = vector.load %arg21[%c0_41, %c0_42] : memref<3x32xf32, #tpu.memory_space<vmem>>, vector<3x32xf32>
    %c0_43 = arith.constant 0 : index
    %c0_44 = arith.constant 0 : index
    %26 = vector.load %arg23[%c0_43, %c0_44] : memref<3x1xi32, #tpu.memory_space<vmem>>, vector<3x1xi32>
    %27 = tpu.iota {dimensions = array<i32: 1>} : vector<3x16xi32>
    %28 = vector.broadcast %21 : vector<3x1xi32> to vector<3x16xi32>
    %29 = arith.cmpi eq, %27, %28 : vector<3x16xi32>
    %30 = arith.extui %29 : vector<3x16xi1> to vector<3x16xi32>
    %31 = arith.sitofp %30 : vector<3x16xi32> to vector<3x16xf32>
    %32 = tpu.iota {dimensions = array<i32: 1>} : vector<3x16xi32>
    %33 = vector.broadcast %26 : vector<3x1xi32> to vector<3x16xi32>
    %34 = arith.cmpi eq, %32, %33 : vector<3x16xi32>
    %35 = arith.extui %34 : vector<3x16xi1> to vector<3x16xi32>
    %36 = arith.sitofp %35 : vector<3x16xi32> to vector<3x16xf32>
    %cst = arith.constant dense<0.000000e+00> : vector<3x16xf32>
    %37 = tpu.matmul %31, %1, %cst {dimension_numbers = #tpu.dot_dimension_numbers<[1], [0], [0], [1], [0, 0, 1, 1], [], []>} : vector<3x16xf32>, vector<16x16xf32>, vector<3x16xf32> -> vector<3x16xf32>
    %38 = arith.mulf %37, %36 : vector<3x16xf32>
    %cst_45 = arith.constant dense<0.000000e+00> : vector<3xf32>
    %39 = vector.multi_reduction <add>, %38, %cst_45 [1] : vector<3x16xf32> to vector<3xf32>
    %40 = vector.shape_cast %39 : vector<3xf32> to vector<3x1xf32>
    %41 = vector.broadcast %3 : vector<1x16xf32> to vector<3x16xf32>
    %42 = arith.mulf %41, %36 : vector<3x16xf32>
    %cst_46 = arith.constant dense<0.000000e+00> : vector<3xf32>
    %43 = vector.multi_reduction <add>, %42, %cst_46 [1] : vector<3x16xf32> to vector<3xf32>
    %44 = vector.shape_cast %43 : vector<3xf32> to vector<3x1xf32>
    %45 = vector.broadcast %5 : vector<1x16xf32> to vector<3x16xf32>
    %46 = arith.mulf %45, %36 : vector<3x16xf32>
    %cst_47 = arith.constant dense<0.000000e+00> : vector<3xf32>
    %47 = vector.multi_reduction <add>, %46, %cst_47 [1] : vector<3x16xf32> to vector<3xf32>
    %48 = vector.shape_cast %47 : vector<3xf32> to vector<3x1xf32>
    %49 = arith.addf %40, %20 : vector<3x1xf32>
    %50 = arith.subf %44, %49 : vector<3x1xf32>
    %cst_48 = arith.constant 0.000000e+00 : f32
    %51 = vector.broadcast %cst_48 : f32 to vector<3x1xf32>
    %52 = arith.maximumf %51, %50 : vector<3x1xf32>
    %53 = arith.addf %49, %52 : vector<3x1xf32>
    %54 = arith.addf %53, %48 : vector<3x1xf32>
    %55 = tpu.iota {dimensions = array<i32: 1>} : vector<3x16xi32>
    %56 = vector.broadcast %26 : vector<3x1xi32> to vector<3x16xi32>
    %57 = arith.cmpi eq, %55, %56 : vector<3x16xi32>
    %58 = arith.extui %57 : vector<3x16xi1> to vector<3x16xi32>
    %59 = arith.sitofp %58 : vector<3x16xi32> to vector<3x16xf32>
    %cst_49 = arith.constant dense<0.000000e+00> : vector<3x16xf32>
    %60 = tpu.matmul %59, %1, %cst_49 {dimension_numbers = #tpu.dot_dimension_numbers<[1], [0], [0], [1], [0, 0, 1, 1], [], []>} : vector<3x16xf32>, vector<16x16xf32>, vector<3x16xf32> -> vector<3x16xf32>
    %61 = vector.broadcast %54 : vector<3x1xf32> to vector<3x16xf32>
    %62 = arith.addf %60, %61 : vector<3x16xf32>
    %63 = vector.broadcast %3 : vector<1x16xf32> to vector<3x16xf32>
    %64 = arith.subf %63, %62 : vector<3x16xf32>
    %cst_50 = arith.constant 0.000000e+00 : f32
    %65 = vector.broadcast %cst_50 : f32 to vector<3x16xf32>
    %66 = arith.maximumf %65, %64 : vector<3x16xf32>
    %67 = arith.addf %62, %66 : vector<3x16xf32>
    %68 = vector.broadcast %4 : vector<1x16xf32> to vector<3x16xf32>
    %69 = arith.cmpf ole, %67, %68 : vector<3x16xf32>
    %70 = arith.extui %69 : vector<3x16xi1> to vector<3x16xi32>
    %71 = arith.sitofp %70 : vector<3x16xi32> to vector<3x16xf32>
    %72 = arith.addf %62, %66 : vector<3x16xf32>
    %73 = vector.broadcast %6 : vector<1x16xf32> to vector<3x16xf32>
    %74 = arith.cmpf ole, %72, %73 : vector<3x16xf32>
    %75 = arith.extui %74 : vector<3x16xi1> to vector<3x16xi32>
    %76 = arith.sitofp %75 : vector<3x16xi32> to vector<3x16xf32>
    %cst_51 = arith.constant 1.000000e+00 : f32
    %77 = vector.broadcast %cst_51 : f32 to vector<3x16xf32>
    %78 = arith.subf %77, %59 : vector<3x16xf32>
    %79 = arith.mulf %19, %78 : vector<3x16xf32>
    %80 = arith.mulf %79, %71 : vector<3x16xf32>
    %81 = arith.mulf %80, %76 : vector<3x16xf32>
    %82 = vector.broadcast %22 : vector<3x1xf32> to vector<3x16xf32>
    %83 = arith.mulf %81, %82 : vector<3x16xf32>
    %84 = tpu.iota {dimensions = array<i32: 1>} : vector<1x16xi32>
    %c15_i32 = arith.constant 15 : i32
    %85 = vector.broadcast %c15_i32 : i32 to vector<1x16xi32>
    %86 = arith.cmpi eq, %84, %85 : vector<1x16xi32>
    %87 = arith.extui %86 : vector<1x16xi1> to vector<1x16xi32>
    %88 = arith.sitofp %87 : vector<1x16xi32> to vector<1x16xf32>
    %89 = vector.broadcast %88 : vector<1x16xf32> to vector<3x16xf32>
    %90 = arith.mulf %83, %89 : vector<3x16xf32>
    %cst_52 = arith.constant dense<0.000000e+00> : vector<3xf32>
    %91 = vector.multi_reduction <add>, %90, %cst_52 [1] : vector<3x16xf32> to vector<3xf32>
    %92 = vector.shape_cast %91 : vector<3xf32> to vector<3x1xf32>
    %cst_53 = arith.constant 5.000000e-01 : f32
    %93 = vector.broadcast %cst_53 : f32 to vector<3x1xf32>
    %94 = arith.cmpf ole, %92, %93 : vector<3x1xf32>
    %95 = arith.extui %94 : vector<3x1xi1> to vector<3x1xi32>
    %96 = arith.sitofp %95 : vector<3x1xi32> to vector<3x1xf32>
    %97 = arith.mulf %22, %96 : vector<3x1xf32>
    %cst_54 = arith.constant 5.000000e-01 : f32
    %98 = vector.broadcast %cst_54 : f32 to vector<3x1xf32>
    %99 = arith.cmpf ogt, %92, %98 : vector<3x1xf32>
    %100 = arith.extui %99 : vector<3x1xi1> to vector<3x1xi32>
    %101 = arith.sitofp %100 : vector<3x1xi32> to vector<3x1xf32>
    %102 = arith.mulf %22, %101 : vector<3x1xf32>
    %c0_55 = arith.constant 0 : index
    %c0_56 = arith.constant 0 : index
    %103 = vector.load %arg35[%c0_55, %c0_56] : memref<3x1xf32, #tpu.memory_space<vmem>>, vector<3x1xf32>
    tpu.vector_store %arg35[%c0_55, %c0_56], %97 {strides = array<i32>} : memref<3x1xf32, #tpu.memory_space<vmem>>, vector<3x1xf32>,
    %c0_57 = arith.constant 0 : index
    %c0_58 = arith.constant 0 : index
    %104 = vector.load %arg36[%c0_57, %c0_58] : memref<3x1xf32, #tpu.memory_space<vmem>>, vector<3x1xf32>
    tpu.vector_store %arg36[%c0_57, %c0_58], %102 {strides = array<i32>} : memref<3x1xf32, #tpu.memory_space<vmem>>, vector<3x1xf32>,
    %c0_59 = arith.constant 0 : index
    %c0_60 = arith.constant 0 : index
    %c0_61 = arith.constant 0 : index
    %105 = vector.load %arg22[%c0_59, %c0_60, %c0_61] : memref<3x16x32xf32, #tpu.memory_space<vmem>>, vector<1x16x32xf32>
    %106 = vector.shape_cast %105 : vector<1x16x32xf32> to vector<16x32xf32>
    %c1 = arith.constant 1 : index
    %c0_62 = arith.constant 0 : index
    %c0_63 = arith.constant 0 : index
    %107 = vector.load %arg22[%c1, %c0_62, %c0_63] : memref<3x16x32xf32, #tpu.memory_space<vmem>>, vector<1x16x32xf32>
    %108 = vector.shape_cast %107 : vector<1x16x32xf32> to vector<16x32xf32>
    %c2 = arith.constant 2 : index
    %c0_64 = arith.constant 0 : index
    %c0_65 = arith.constant 0 : index
    %109 = vector.load %arg22[%c2, %c0_64, %c0_65] : memref<3x16x32xf32, #tpu.memory_space<vmem>>, vector<1x16x32xf32>
    %110 = vector.shape_cast %109 : vector<1x16x32xf32> to vector<16x32xf32>
    %111 = vector.extract_strided_slice %26 {offsets = [0, 0], sizes = [1, 1], strides = [1, 1]} : vector<3x1xi32> to vector<1x1xi32>
    %112 = vector.extract_strided_slice %54 {offsets = [0, 0], sizes = [1, 1], strides = [1, 1]} : vector<3x1xf32> to vector<1x1xf32>
    %113 = tpu.iota {dimensions = array<i32: 0>} : vector<16x1xi32>
    %114 = vector.broadcast %111 : vector<1x1xi32> to vector<16x1xi32>
    %115 = arith.cmpi eq, %113, %114 : vector<16x1xi32>
    %116 = arith.extui %115 : vector<16x1xi1> to vector<16x1xi32>
    %117 = arith.sitofp %116 : vector<16x1xi32> to vector<16x1xf32>
    %cst_66 = arith.constant dense<0.000000e+00> : vector<16x1xf32>
    %118 = tpu.matmul %2, %117, %cst_66 {dimension_numbers = #tpu.dot_dimension_numbers<[1], [0], [0], [1], [0, 0, 1, 1], [], []>} : vector<16x16xf32>, vector<16x1xf32>, vector<16x1xf32> -> vector<16x1xf32>
    %119 = vector.broadcast %112 : vector<1x1xf32> to vector<16x1xf32>
    %120 = arith.addf %118, %119 : vector<16x1xf32>
    %121 = arith.subf %7, %120 : vector<16x1xf32>
    %cst_67 = arith.constant 0.000000e+00 : f32
    %122 = vector.broadcast %cst_67 : f32 to vector<16x1xf32>
    %123 = arith.maximumf %122, %121 : vector<16x1xf32>
    %124 = arith.addf %120, %123 : vector<16x1xf32>
    %125 = arith.subf %8, %124 : vector<16x1xf32>
    %126 = vector.extract_strided_slice %11 {offsets = [0, 0], sizes = [1, 32], strides = [1, 1]} : vector<4x32xf32> to vector<1x32xf32>
    %127 = vector.broadcast %120 : vector<16x1xf32> to vector<16x32xf32>
    %128 = vector.broadcast %126 : vector<1x32xf32> to vector<16x32xf32>
    %129 = arith.mulf %127, %128 : vector<16x32xf32>
    %130 = vector.extract_strided_slice %11 {offsets = [1, 0], sizes = [1, 32], strides = [1, 1]} : vector<4x32xf32> to vector<1x32xf32>
    %131 = vector.broadcast %123 : vector<16x1xf32> to vector<16x32xf32>
    %132 = vector.broadcast %130 : vector<1x32xf32> to vector<16x32xf32>
    %133 = arith.mulf %131, %132 : vector<16x32xf32>
    %134 = arith.addf %129, %133 : vector<16x32xf32>
    %135 = vector.extract_strided_slice %11 {offsets = [2, 0], sizes = [1, 32], strides = [1, 1]} : vector<4x32xf32> to vector<1x32xf32>
    %136 = vector.broadcast %125 : vector<16x1xf32> to vector<16x32xf32>
    %137 = vector.broadcast %135 : vector<1x32xf32> to vector<16x32xf32>
    %138 = arith.mulf %136, %137 : vector<16x32xf32>
    %139 = arith.addf %134, %138 : vector<16x32xf32>
    %140 = vector.extract_strided_slice %11 {offsets = [3, 0], sizes = [1, 32], strides = [1, 1]} : vector<4x32xf32> to vector<1x32xf32>
    %141 = vector.broadcast %112 : vector<1x1xf32> to vector<1x32xf32>
    %142 = arith.mulf %141, %140 : vector<1x32xf32>
    %143 = vector.broadcast %142 : vector<1x32xf32> to vector<16x32xf32>
    %144 = arith.addf %139, %143 : vector<16x32xf32>
    %145 = arith.addf %10, %144 : vector<16x32xf32>
    %146 = arith.addf %120, %123 : vector<16x1xf32>
    %147 = arith.addf %146, %9 : vector<16x1xf32>
    %148 = vector.extract_strided_slice %83 {offsets = [0, 0], sizes = [1, 16], strides = [1, 1]} : vector<3x16xf32> to vector<1x16xf32>
    %149 = vector.broadcast %147 : vector<16x1xf32> to vector<16x16xf32>
    %150 = arith.addf %1, %149 : vector<16x16xf32>
    %151 = vector.broadcast %7 : vector<16x1xf32> to vector<16x16xf32>
    %152 = arith.subf %151, %150 : vector<16x16xf32>
    %cst_68 = arith.constant 0.000000e+00 : f32
    %153 = vector.broadcast %cst_68 : f32 to vector<16x16xf32>
    %154 = arith.maximumf %153, %152 : vector<16x16xf32>
    %155 = arith.addf %150, %154 : vector<16x16xf32>
    %156 = vector.broadcast %4 : vector<1x16xf32> to vector<16x16xf32>
    %157 = arith.cmpf ole, %155, %156 : vector<16x16xf32>
    %158 = arith.extui %157 : vector<16x16xi1> to vector<16x16xi32>
    %159 = arith.sitofp %158 : vector<16x16xi32> to vector<16x16xf32>
    %160 = vector.broadcast %6 : vector<1x16xf32> to vector<16x16xf32>
    %161 = arith.cmpf ole, %155, %160 : vector<16x16xf32>
    %162 = arith.extui %161 : vector<16x16xi1> to vector<16x16xi32>
    %163 = arith.sitofp %162 : vector<16x16xi32> to vector<16x16xf32>
    %164 = vector.broadcast %148 : vector<1x16xf32> to vector<16x16xf32>
    %165 = arith.mulf %164, %159 : vector<16x16xf32>
    %166 = arith.mulf %165, %163 : vector<16x16xf32>
    %167 = tpu.iota {dimensions = array<i32: 0>} : vector<16x16xi32>
    %168 = tpu.iota {dimensions = array<i32: 1>} : vector<16x16xi32>
    %169 = arith.cmpi eq, %167, %168 : vector<16x16xi32>
    %cst_69 = arith.constant 1.000000e+00 : f32
    %170 = vector.broadcast %cst_69 : f32 to vector<16x16xf32>
    %171 = arith.select %169, %170, %166 : vector<16x16xi1>, vector<16x16xf32>
    %172 = vector.extract_strided_slice %26 {offsets = [1, 0], sizes = [1, 1], strides = [1, 1]} : vector<3x1xi32> to vector<1x1xi32>
    %173 = vector.extract_strided_slice %54 {offsets = [1, 0], sizes = [1, 1], strides = [1, 1]} : vector<3x1xf32> to vector<1x1xf32>
    %174 = tpu.iota {dimensions = array<i32: 0>} : vector<16x1xi32>
    %175 = vector.broadcast %172 : vector<1x1xi32> to vector<16x1xi32>
    %176 = arith.cmpi eq, %174, %175 : vector<16x1xi32>
    %177 = arith.extui %176 : vector<16x1xi1> to vector<16x1xi32>
    %178 = arith.sitofp %177 : vector<16x1xi32> to vector<16x1xf32>
    %cst_70 = arith.constant dense<0.000000e+00> : vector<16x1xf32>
    %179 = tpu.matmul %2, %178, %cst_70 {dimension_numbers = #tpu.dot_dimension_numbers<[1], [0], [0], [1], [0, 0, 1, 1], [], []>} : vector<16x16xf32>, vector<16x1xf32>, vector<16x1xf32> -> vector<16x1xf32>
    %180 = vector.broadcast %173 : vector<1x1xf32> to vector<16x1xf32>
    %181 = arith.addf %179, %180 : vector<16x1xf32>
    %182 = arith.subf %7, %181 : vector<16x1xf32>
    %cst_71 = arith.constant 0.000000e+00 : f32
    %183 = vector.broadcast %cst_71 : f32 to vector<16x1xf32>
    %184 = arith.maximumf %183, %182 : vector<16x1xf32>
    %185 = arith.addf %181, %184 : vector<16x1xf32>
    %186 = arith.subf %8, %185 : vector<16x1xf32>
    %187 = vector.extract_strided_slice %11 {offsets = [0, 0], sizes = [1, 32], strides = [1, 1]} : vector<4x32xf32> to vector<1x32xf32>
    %188 = vector.broadcast %181 : vector<16x1xf32> to vector<16x32xf32>
    %189 = vector.broadcast %187 : vector<1x32xf32> to vector<16x32xf32>
    %190 = arith.mulf %188, %189 : vector<16x32xf32>
    %191 = vector.extract_strided_slice %11 {offsets = [1, 0], sizes = [1, 32], strides = [1, 1]} : vector<4x32xf32> to vector<1x32xf32>
    %192 = vector.broadcast %184 : vector<16x1xf32> to vector<16x32xf32>
    %193 = vector.broadcast %191 : vector<1x32xf32> to vector<16x32xf32>
    %194 = arith.mulf %192, %193 : vector<16x32xf32>
    %195 = arith.addf %190, %194 : vector<16x32xf32>
    %196 = vector.extract_strided_slice %11 {offsets = [2, 0], sizes = [1, 32], strides = [1, 1]} : vector<4x32xf32> to vector<1x32xf32>
    %197 = vector.broadcast %186 : vector<16x1xf32> to vector<16x32xf32>
    %198 = vector.broadcast %196 : vector<1x32xf32> to vector<16x32xf32>
    %199 = arith.mulf %197, %198 : vector<16x32xf32>
    %200 = arith.addf %195, %199 : vector<16x32xf32>
    %201 = vector.extract_strided_slice %11 {offsets = [3, 0], sizes = [1, 32], strides = [1, 1]} : vector<4x32xf32> to vector<1x32xf32>
    %202 = vector.broadcast %173 : vector<1x1xf32> to vector<1x32xf32>
    %203 = arith.mulf %202, %201 : vector<1x32xf32>
    %204 = vector.broadcast %203 : vector<1x32xf32> to vector<16x32xf32>
    %205 = arith.addf %200, %204 : vector<16x32xf32>
    %206 = arith.addf %10, %205 : vector<16x32xf32>
    %207 = arith.addf %181, %184 : vector<16x1xf32>
    %208 = arith.addf %207, %9 : vector<16x1xf32>
    %209 = vector.extract_strided_slice %83 {offsets = [1, 0], sizes = [1, 16], strides = [1, 1]} : vector<3x16xf32> to vector<1x16xf32>
    %210 = vector.broadcast %208 : vector<16x1xf32> to vector<16x16xf32>
    %211 = arith.addf %1, %210 : vector<16x16xf32>
    %212 = vector.broadcast %7 : vector<16x1xf32> to vector<16x16xf32>
    %213 = arith.subf %212, %211 : vector<16x16xf32>
    %cst_72 = arith.constant 0.000000e+00 : f32
    %214 = vector.broadcast %cst_72 : f32 to vector<16x16xf32>
    %215 = arith.maximumf %214, %213 : vector<16x16xf32>
    %216 = arith.addf %211, %215 : vector<16x16xf32>
    %217 = vector.broadcast %4 : vector<1x16xf32> to vector<16x16xf32>
    %218 = arith.cmpf ole, %216, %217 : vector<16x16xf32>
    %219 = arith.extui %218 : vector<16x16xi1> to vector<16x16xi32>
    %220 = arith.sitofp %219 : vector<16x16xi32> to vector<16x16xf32>
    %221 = vector.broadcast %6 : vector<1x16xf32> to vector<16x16xf32>
    %222 = arith.cmpf ole, %216, %221 : vector<16x16xf32>
    %223 = arith.extui %222 : vector<16x16xi1> to vector<16x16xi32>
    %224 = arith.sitofp %223 : vector<16x16xi32> to vector<16x16xf32>
    %225 = vector.broadcast %209 : vector<1x16xf32> to vector<16x16xf32>
    %226 = arith.mulf %225, %220 : vector<16x16xf32>
    %227 = arith.mulf %226, %224 : vector<16x16xf32>
    %228 = tpu.iota {dimensions = array<i32: 0>} : vector<16x16xi32>
    %229 = tpu.iota {dimensions = array<i32: 1>} : vector<16x16xi32>
    %230 = arith.cmpi eq, %228, %229 : vector<16x16xi32>
    %cst_73 = arith.constant 1.000000e+00 : f32
    %231 = vector.broadcast %cst_73 : f32 to vector<16x16xf32>
    %232 = arith.select %230, %231, %227 : vector<16x16xi1>, vector<16x16xf32>
    %233 = vector.extract_strided_slice %26 {offsets = [2, 0], sizes = [1, 1], strides = [1, 1]} : vector<3x1xi32> to vector<1x1xi32>
    %234 = vector.extract_strided_slice %54 {offsets = [2, 0], sizes = [1, 1], strides = [1, 1]} : vector<3x1xf32> to vector<1x1xf32>
    %235 = tpu.iota {dimensions = array<i32: 0>} : vector<16x1xi32>
    %236 = vector.broadcast %233 : vector<1x1xi32> to vector<16x1xi32>
    %237 = arith.cmpi eq, %235, %236 : vector<16x1xi32>
    %238 = arith.extui %237 : vector<16x1xi1> to vector<16x1xi32>
    %239 = arith.sitofp %238 : vector<16x1xi32> to vector<16x1xf32>
    %cst_74 = arith.constant dense<0.000000e+00> : vector<16x1xf32>
    %240 = tpu.matmul %2, %239, %cst_74 {dimension_numbers = #tpu.dot_dimension_numbers<[1], [0], [0], [1], [0, 0, 1, 1], [], []>} : vector<16x16xf32>, vector<16x1xf32>, vector<16x1xf32> -> vector<16x1xf32>
    %241 = vector.broadcast %234 : vector<1x1xf32> to vector<16x1xf32>
    %242 = arith.addf %240, %241 : vector<16x1xf32>
    %243 = arith.subf %7, %242 : vector<16x1xf32>
    %cst_75 = arith.constant 0.000000e+00 : f32
    %244 = vector.broadcast %cst_75 : f32 to vector<16x1xf32>
    %245 = arith.maximumf %244, %243 : vector<16x1xf32>
    %246 = arith.addf %242, %245 : vector<16x1xf32>
    %247 = arith.subf %8, %246 : vector<16x1xf32>
    %248 = vector.extract_strided_slice %11 {offsets = [0, 0], sizes = [1, 32], strides = [1, 1]} : vector<4x32xf32> to vector<1x32xf32>
    %249 = vector.broadcast %242 : vector<16x1xf32> to vector<16x32xf32>
    %250 = vector.broadcast %248 : vector<1x32xf32> to vector<16x32xf32>
    %251 = arith.mulf %249, %250 : vector<16x32xf32>
    %252 = vector.extract_strided_slice %11 {offsets = [1, 0], sizes = [1, 32], strides = [1, 1]} : vector<4x32xf32> to vector<1x32xf32>
    %253 = vector.broadcast %245 : vector<16x1xf32> to vector<16x32xf32>
    %254 = vector.broadcast %252 : vector<1x32xf32> to vector<16x32xf32>
    %255 = arith.mulf %253, %254 : vector<16x32xf32>
    %256 = arith.addf %251, %255 : vector<16x32xf32>
    %257 = vector.extract_strided_slice %11 {offsets = [2, 0], sizes = [1, 32], strides = [1, 1]} : vector<4x32xf32> to vector<1x32xf32>
    %258 = vector.broadcast %247 : vector<16x1xf32> to vector<16x32xf32>
    %259 = vector.broadcast %257 : vector<1x32xf32> to vector<16x32xf32>
    %260 = arith.mulf %258, %259 : vector<16x32xf32>
    %261 = arith.addf %256, %260 : vector<16x32xf32>
    %262 = vector.extract_strided_slice %11 {offsets = [3, 0], sizes = [1, 32], strides = [1, 1]} : vector<4x32xf32> to vector<1x32xf32>
    %263 = vector.broadcast %234 : vector<1x1xf32> to vector<1x32xf32>
    %264 = arith.mulf %263, %262 : vector<1x32xf32>
    %265 = vector.broadcast %264 : vector<1x32xf32> to vector<16x32xf32>
    %266 = arith.addf %261, %265 : vector<16x32xf32>
    %267 = arith.addf %10, %266 : vector<16x32xf32>
    %268 = arith.addf %242, %245 : vector<16x1xf32>
    %269 = arith.addf %268, %9 : vector<16x1xf32>
    %270 = vector.extract_strided_slice %83 {offsets = [2, 0], sizes = [1, 16], strides = [1, 1]} : vector<3x16xf32> to vector<1x16xf32>
    %271 = vector.broadcast %269 : vector<16x1xf32> to vector<16x16xf32>
    %272 = arith.addf %1, %271 : vector<16x16xf32>
    %273 = vector.broadcast %7 : vector<16x1xf32> to vector<16x16xf32>
    %274 = arith.subf %273, %272 : vector<16x16xf32>
    %cst_76 = arith.constant 0.000000e+00 : f32
    %275 = vector.broadcast %cst_76 : f32 to vector<16x16xf32>
    %276 = arith.maximumf %275, %274 : vector<16x16xf32>
    %277 = arith.addf %272, %276 : vector<16x16xf32>
    %278 = vector.broadcast %4 : vector<1x16xf32> to vector<16x16xf32>
    %279 = arith.cmpf ole, %277, %278 : vector<16x16xf32>
    %280 = arith.extui %279 : vector<16x16xi1> to vector<16x16xi32>
    %281 = arith.sitofp %280 : vector<16x16xi32> to vector<16x16xf32>
    %282 = vector.broadcast %6 : vector<1x16xf32> to vector<16x16xf32>
    %283 = arith.cmpf ole, %277, %282 : vector<16x16xf32>
    %284 = arith.extui %283 : vector<16x16xi1> to vector<16x16xi32>
    %285 = arith.sitofp %284 : vector<16x16xi32> to vector<16x16xf32>
    %286 = vector.broadcast %270 : vector<1x16xf32> to vector<16x16xf32>
    %287 = arith.mulf %286, %281 : vector<16x16xf32>
    %288 = arith.mulf %287, %285 : vector<16x16xf32>
    %289 = tpu.iota {dimensions = array<i32: 0>} : vector<16x16xi32>
    %290 = tpu.iota {dimensions = array<i32: 1>} : vector<16x16xi32>
    %291 = arith.cmpi eq, %289, %290 : vector<16x16xi32>
    %cst_77 = arith.constant 1.000000e+00 : f32
    %292 = vector.broadcast %cst_77 : f32 to vector<16x16xf32>
    %293 = arith.select %291, %292, %288 : vector<16x16xi1>, vector<16x16xf32>
    %294 = tpu.concatenate %145, %206, %267 in 0 : vector<16x32xf32>, vector<16x32xf32>, vector<16x32xf32> -> vector<48x32xf32>
    %cst_78 = arith.constant dense<0.000000e+00> : vector<48x96xf32>
    %295 = tpu.matmul %294, %12, %cst_78 {dimension_numbers = #tpu.dot_dimension_numbers<[1], [0], [0], [1], [0, 0, 1, 1], [], []>} : vector<48x32xf32>, vector<32x96xf32>, vector<48x96xf32> -> vector<48x96xf32>
    %296 = vector.extract_strided_slice %295 {offsets = [0, 0], sizes = [16, 96], strides = [1, 1]} : vector<48x96xf32> to vector<16x96xf32>
    %297 = vector.extract_strided_slice %296 {offsets = [0, 0], sizes = [16, 32], strides = [1, 1]} : vector<16x96xf32> to vector<16x32xf32>
    %298 = vector.extract_strided_slice %296 {offsets = [0, 32], sizes = [16, 32], strides = [1, 1]} : vector<16x96xf32> to vector<16x32xf32>
    %299 = vector.extract_strided_slice %296 {offsets = [0, 64], sizes = [16, 32], strides = [1, 1]} : vector<16x96xf32> to vector<16x32xf32>
    %300 = tpu.transpose %298, [1, 0] : vector<16x32xf32> -> vector<32x16xf32>
    %cst_79 = arith.constant dense<0.000000e+00> : vector<16x16xf32>
    %301 = tpu.matmul %297, %300, %cst_79 {dimension_numbers = #tpu.dot_dimension_numbers<[1], [0], [0], [1], [0, 0, 1, 1], [], []>} : vector<16x32xf32>, vector<32x16xf32>, vector<16x16xf32> -> vector<16x16xf32>
    %cst_80 = arith.constant 0.176776692 : f32
    %302 = vector.broadcast %cst_80 : f32 to vector<16x16xf32>
    %303 = arith.mulf %301, %302 : vector<16x16xf32>
    %cst_81 = arith.constant 0.000000e+00 : f32
    %304 = vector.broadcast %cst_81 : f32 to vector<16x16xf32>
    %305 = arith.cmpf ogt, %171, %304 : vector<16x16xf32>
    %cst_82 = arith.constant -1.000000e+09 : f32
    %306 = vector.broadcast %cst_82 : f32 to vector<16x16xf32>
    %307 = arith.select %305, %303, %306 : vector<16x16xi1>, vector<16x16xf32>
    %cst_83 = arith.constant dense<0xFF800000> : vector<16xf32>
    %308 = vector.multi_reduction <maximumf>, %307, %cst_83 [1] : vector<16x16xf32> to vector<16xf32>
    %309 = vector.shape_cast %308 : vector<16xf32> to vector<16x1xf32>
    %310 = vector.broadcast %309 : vector<16x1xf32> to vector<16x16xf32>
    %311 = arith.subf %307, %310 : vector<16x16xf32>
    %312 = math.exp %311 : vector<16x16xf32>
    %cst_84 = arith.constant dense<0.000000e+00> : vector<16xf32>
    %313 = vector.multi_reduction <add>, %312, %cst_84 [1] : vector<16x16xf32> to vector<16xf32>
    %314 = vector.shape_cast %313 : vector<16xf32> to vector<16x1xf32>
    %315 = tpu.reciprocal %314 {approx = true} : vector<16x1xf32> -> vector<16x1xf32>
    %316 = vector.broadcast %315 : vector<16x1xf32> to vector<16x16xf32>
    %317 = arith.mulf %312, %316 : vector<16x16xf32>
    %cst_85 = arith.constant dense<0.000000e+00> : vector<16x32xf32>
    %318 = tpu.matmul %317, %299, %cst_85 {dimension_numbers = #tpu.dot_dimension_numbers<[1], [0], [0], [1], [0, 0, 1, 1], [], []>} : vector<16x16xf32>, vector<16x32xf32>, vector<16x32xf32> -> vector<16x32xf32>
    %319 = arith.addf %318, %145 : vector<16x32xf32>
    %320 = math.tanh %319 : vector<16x32xf32>
    %321 = vector.extract_strided_slice %295 {offsets = [16, 0], sizes = [16, 96], strides = [1, 1]} : vector<48x96xf32> to vector<16x96xf32>
    %322 = vector.extract_strided_slice %321 {offsets = [0, 0], sizes = [16, 32], strides = [1, 1]} : vector<16x96xf32> to vector<16x32xf32>
    %323 = vector.extract_strided_slice %321 {offsets = [0, 32], sizes = [16, 32], strides = [1, 1]} : vector<16x96xf32> to vector<16x32xf32>
    %324 = vector.extract_strided_slice %321 {offsets = [0, 64], sizes = [16, 32], strides = [1, 1]} : vector<16x96xf32> to vector<16x32xf32>
    %325 = tpu.transpose %323, [1, 0] : vector<16x32xf32> -> vector<32x16xf32>
    %cst_86 = arith.constant dense<0.000000e+00> : vector<16x16xf32>
    %326 = tpu.matmul %322, %325, %cst_86 {dimension_numbers = #tpu.dot_dimension_numbers<[1], [0], [0], [1], [0, 0, 1, 1], [], []>} : vector<16x32xf32>, vector<32x16xf32>, vector<16x16xf32> -> vector<16x16xf32>
    %cst_87 = arith.constant 0.176776692 : f32
    %327 = vector.broadcast %cst_87 : f32 to vector<16x16xf32>
    %328 = arith.mulf %326, %327 : vector<16x16xf32>
    %cst_88 = arith.constant 0.000000e+00 : f32
    %329 = vector.broadcast %cst_88 : f32 to vector<16x16xf32>
    %330 = arith.cmpf ogt, %232, %329 : vector<16x16xf32>
    %cst_89 = arith.constant -1.000000e+09 : f32
    %331 = vector.broadcast %cst_89 : f32 to vector<16x16xf32>
    %332 = arith.select %330, %328, %331 : vector<16x16xi1>, vector<16x16xf32>
    %cst_90 = arith.constant dense<0xFF800000> : vector<16xf32>
    %333 = vector.multi_reduction <maximumf>, %332, %cst_90 [1] : vector<16x16xf32> to vector<16xf32>
    %334 = vector.shape_cast %333 : vector<16xf32> to vector<16x1xf32>
    %335 = vector.broadcast %334 : vector<16x1xf32> to vector<16x16xf32>
    %336 = arith.subf %332, %335 : vector<16x16xf32>
    %337 = math.exp %336 : vector<16x16xf32>
    %cst_91 = arith.constant dense<0.000000e+00> : vector<16xf32>
    %338 = vector.multi_reduction <add>, %337, %cst_91 [1] : vector<16x16xf32> to vector<16xf32>
    %339 = vector.shape_cast %338 : vector<16xf32> to vector<16x1xf32>
    %340 = tpu.reciprocal %339 {approx = true} : vector<16x1xf32> -> vector<16x1xf32>
    %341 = vector.broadcast %340 : vector<16x1xf32> to vector<16x16xf32>
    %342 = arith.mulf %337, %341 : vector<16x16xf32>
    %cst_92 = arith.constant dense<0.000000e+00> : vector<16x32xf32>
    %343 = tpu.matmul %342, %324, %cst_92 {dimension_numbers = #tpu.dot_dimension_numbers<[1], [0], [0], [1], [0, 0, 1, 1], [], []>} : vector<16x16xf32>, vector<16x32xf32>, vector<16x32xf32> -> vector<16x32xf32>
    %344 = arith.addf %343, %206 : vector<16x32xf32>
    %345 = math.tanh %344 : vector<16x32xf32>
    %346 = vector.extract_strided_slice %295 {offsets = [32, 0], sizes = [16, 96], strides = [1, 1]} : vector<48x96xf32> to vector<16x96xf32>
    %347 = vector.extract_strided_slice %346 {offsets = [0, 0], sizes = [16, 32], strides = [1, 1]} : vector<16x96xf32> to vector<16x32xf32>
    %348 = vector.extract_strided_slice %346 {offsets = [0, 32], sizes = [16, 32], strides = [1, 1]} : vector<16x96xf32> to vector<16x32xf32>
    %349 = vector.extract_strided_slice %346 {offsets = [0, 64], sizes = [16, 32], strides = [1, 1]} : vector<16x96xf32> to vector<16x32xf32>
    %350 = tpu.transpose %348, [1, 0] : vector<16x32xf32> -> vector<32x16xf32>
    %cst_93 = arith.constant dense<0.000000e+00> : vector<16x16xf32>
    %351 = tpu.matmul %347, %350, %cst_93 {dimension_numbers = #tpu.dot_dimension_numbers<[1], [0], [0], [1], [0, 0, 1, 1], [], []>} : vector<16x32xf32>, vector<32x16xf32>, vector<16x16xf32> -> vector<16x16xf32>
    %cst_94 = arith.constant 0.176776692 : f32
    %352 = vector.broadcast %cst_94 : f32 to vector<16x16xf32>
    %353 = arith.mulf %351, %352 : vector<16x16xf32>
    %cst_95 = arith.constant 0.000000e+00 : f32
    %354 = vector.broadcast %cst_95 : f32 to vector<16x16xf32>
    %355 = arith.cmpf ogt, %293, %354 : vector<16x16xf32>
    %cst_96 = arith.constant -1.000000e+09 : f32
    %356 = vector.broadcast %cst_96 : f32 to vector<16x16xf32>
    %357 = arith.select %355, %353, %356 : vector<16x16xi1>, vector<16x16xf32>
    %cst_97 = arith.constant dense<0xFF800000> : vector<16xf32>
    %358 = vector.multi_reduction <maximumf>, %357, %cst_97 [1] : vector<16x16xf32> to vector<16xf32>
    %359 = vector.shape_cast %358 : vector<16xf32> to vector<16x1xf32>
    %360 = vector.broadcast %359 : vector<16x1xf32> to vector<16x16xf32>
    %361 = arith.subf %357, %360 : vector<16x16xf32>
    %362 = math.exp %361 : vector<16x16xf32>
    %cst_98 = arith.constant dense<0.000000e+00> : vector<16xf32>
    %363 = vector.multi_reduction <add>, %362, %cst_98 [1] : vector<16x16xf32> to vector<16xf32>
    %364 = vector.shape_cast %363 : vector<16xf32> to vector<16x1xf32>
    %365 = tpu.reciprocal %364 {approx = true} : vector<16x1xf32> -> vector<16x1xf32>
    %366 = vector.broadcast %365 : vector<16x1xf32> to vector<16x16xf32>
    %367 = arith.mulf %362, %366 : vector<16x16xf32>
    %cst_99 = arith.constant dense<0.000000e+00> : vector<16x32xf32>
    %368 = tpu.matmul %367, %349, %cst_99 {dimension_numbers = #tpu.dot_dimension_numbers<[1], [0], [0], [1], [0, 0, 1, 1], [], []>} : vector<16x16xf32>, vector<16x32xf32>, vector<16x32xf32> -> vector<16x32xf32>
    %369 = arith.addf %368, %267 : vector<16x32xf32>
    %370 = math.tanh %369 : vector<16x32xf32>
    %371 = tpu.iota {dimensions = array<i32: 0>} : vector<3x1xi32>
    %cst_100 = arith.constant 0.000000e+00 : f32
    %372 = vector.broadcast %cst_100 : f32 to vector<3x32xf32>
    %373 = tpu.iota {dimensions = array<i32: 1>} : vector<1x16xi32>
    %374 = vector.extract_strided_slice %26 {offsets = [0, 0], sizes = [1, 1], strides = [1, 1]} : vector<3x1xi32> to vector<1x1xi32>
    %375 = vector.broadcast %374 : vector<1x1xi32> to vector<1x16xi32>
    %376 = arith.cmpi eq, %373, %375 : vector<1x16xi32>
    %377 = arith.extui %376 : vector<1x16xi1> to vector<1x16xi32>
    %378 = arith.sitofp %377 : vector<1x16xi32> to vector<1x16xf32>
    %c0_i32 = arith.constant 0 : i32
    %379 = vector.broadcast %c0_i32 : i32 to vector<3x1xi32>
    %380 = arith.cmpi eq, %371, %379 : vector<3x1xi32>
    %381 = arith.extui %380 : vector<3x1xi1> to vector<3x1xi32>
    %382 = arith.sitofp %381 : vector<3x1xi32> to vector<3x1xf32>
    %cst_101 = arith.constant dense<0.000000e+00> : vector<1x32xf32>
    %383 = tpu.matmul %378, %106, %cst_101 {dimension_numbers = #tpu.dot_dimension_numbers<[1], [0], [0], [1], [0, 0, 1, 1], [], []>} : vector<1x16xf32>, vector<16x32xf32>, vector<1x32xf32> -> vector<1x32xf32>
    %384 = vector.broadcast %382 : vector<3x1xf32> to vector<3x32xf32>
    %385 = vector.broadcast %383 : vector<1x32xf32> to vector<3x32xf32>
    %386 = arith.mulf %384, %385 : vector<3x32xf32>
    %387 = arith.addf %372, %386 : vector<3x32xf32>
    %388 = tpu.iota {dimensions = array<i32: 1>} : vector<1x16xi32>
    %389 = vector.extract_strided_slice %26 {offsets = [1, 0], sizes = [1, 1], strides = [1, 1]} : vector<3x1xi32> to vector<1x1xi32>
    %390 = vector.broadcast %389 : vector<1x1xi32> to vector<1x16xi32>
    %391 = arith.cmpi eq, %388, %390 : vector<1x16xi32>
    %392 = arith.extui %391 : vector<1x16xi1> to vector<1x16xi32>
    %393 = arith.sitofp %392 : vector<1x16xi32> to vector<1x16xf32>
    %c1_i32 = arith.constant 1 : i32
    %394 = vector.broadcast %c1_i32 : i32 to vector<3x1xi32>
    %395 = arith.cmpi eq, %371, %394 : vector<3x1xi32>
    %396 = arith.extui %395 : vector<3x1xi1> to vector<3x1xi32>
    %397 = arith.sitofp %396 : vector<3x1xi32> to vector<3x1xf32>
    %cst_102 = arith.constant dense<0.000000e+00> : vector<1x32xf32>
    %398 = tpu.matmul %393, %108, %cst_102 {dimension_numbers = #tpu.dot_dimension_numbers<[1], [0], [0], [1], [0, 0, 1, 1], [], []>} : vector<1x16xf32>, vector<16x32xf32>, vector<1x32xf32> -> vector<1x32xf32>
    %399 = vector.broadcast %397 : vector<3x1xf32> to vector<3x32xf32>
    %400 = vector.broadcast %398 : vector<1x32xf32> to vector<3x32xf32>
    %401 = arith.mulf %399, %400 : vector<3x32xf32>
    %402 = arith.addf %387, %401 : vector<3x32xf32>
    %403 = tpu.iota {dimensions = array<i32: 1>} : vector<1x16xi32>
    %404 = vector.extract_strided_slice %26 {offsets = [2, 0], sizes = [1, 1], strides = [1, 1]} : vector<3x1xi32> to vector<1x1xi32>
    %405 = vector.broadcast %404 : vector<1x1xi32> to vector<1x16xi32>
    %406 = arith.cmpi eq, %403, %405 : vector<1x16xi32>
    %407 = arith.extui %406 : vector<1x16xi1> to vector<1x16xi32>
    %408 = arith.sitofp %407 : vector<1x16xi32> to vector<1x16xf32>
    %c2_i32 = arith.constant 2 : i32
    %409 = vector.broadcast %c2_i32 : i32 to vector<3x1xi32>
    %410 = arith.cmpi eq, %371, %409 : vector<3x1xi32>
    %411 = arith.extui %410 : vector<3x1xi1> to vector<3x1xi32>
    %412 = arith.sitofp %411 : vector<3x1xi32> to vector<3x1xf32>
    %cst_103 = arith.constant dense<0.000000e+00> : vector<1x32xf32>
    %413 = tpu.matmul %408, %110, %cst_103 {dimension_numbers = #tpu.dot_dimension_numbers<[1], [0], [0], [1], [0, 0, 1, 1], [], []>} : vector<1x16xf32>, vector<16x32xf32>, vector<1x32xf32> -> vector<1x32xf32>
    %414 = vector.broadcast %412 : vector<3x1xf32> to vector<3x32xf32>
    %415 = vector.broadcast %413 : vector<1x32xf32> to vector<3x32xf32>
    %416 = arith.mulf %414, %415 : vector<3x32xf32>
    %417 = arith.addf %402, %416 : vector<3x32xf32>
    %cst_104 = arith.constant dense<0.000000e+00> : vector<3x128xf32>
    %418 = tpu.matmul %417, %13, %cst_104 {dimension_numbers = #tpu.dot_dimension_numbers<[1], [0], [0], [1], [0, 0, 1, 1], [], []>} : vector<3x32xf32>, vector<32x128xf32>, vector<3x128xf32> -> vector<3x128xf32>
    %cst_105 = arith.constant dense<0.000000e+00> : vector<3x128xf32>
    %419 = tpu.matmul %24, %14, %cst_105 {dimension_numbers = #tpu.dot_dimension_numbers<[1], [0], [0], [1], [0, 0, 1, 1], [], []>} : vector<3x32xf32>, vector<32x128xf32>, vector<3x128xf32> -> vector<3x128xf32>
    %420 = arith.addf %418, %419 : vector<3x128xf32>
    %421 = vector.broadcast %15 : vector<1x128xf32> to vector<3x128xf32>
    %422 = arith.addf %420, %421 : vector<3x128xf32>
    %423 = vector.extract_strided_slice %422 {offsets = [0, 0], sizes = [3, 32], strides = [1, 1]} : vector<3x128xf32> to vector<3x32xf32>
    %424 = arith.negf %423 : vector<3x32xf32>
    %425 = math.exp %424 : vector<3x32xf32>
    %cst_106 = arith.constant 1.000000e+00 : f32
    %426 = vector.broadcast %cst_106 : f32 to vector<3x32xf32>
    %427 = arith.addf %426, %425 : vector<3x32xf32>
    %428 = arith.divf %426, %427 : vector<3x32xf32>
    %429 = vector.extract_strided_slice %422 {offsets = [0, 32], sizes = [3, 32], strides = [1, 1]} : vector<3x128xf32> to vector<3x32xf32>
    %430 = arith.negf %429 : vector<3x32xf32>
    %431 = math.exp %430 : vector<3x32xf32>
    %cst_107 = arith.constant 1.000000e+00 : f32
    %432 = vector.broadcast %cst_107 : f32 to vector<3x32xf32>
    %433 = arith.addf %432, %431 : vector<3x32xf32>
    %434 = arith.divf %432, %433 : vector<3x32xf32>
    %435 = vector.extract_strided_slice %422 {offsets = [0, 64], sizes = [3, 32], strides = [1, 1]} : vector<3x128xf32> to vector<3x32xf32>
    %436 = math.tanh %435 : vector<3x32xf32>
    %437 = vector.extract_strided_slice %422 {offsets = [0, 96], sizes = [3, 32], strides = [1, 1]} : vector<3x128xf32> to vector<3x32xf32>
    %438 = arith.negf %437 : vector<3x32xf32>
    %439 = math.exp %438 : vector<3x32xf32>
    %cst_108 = arith.constant 1.000000e+00 : f32
    %440 = vector.broadcast %cst_108 : f32 to vector<3x32xf32>
    %441 = arith.addf %440, %439 : vector<3x32xf32>
    %442 = arith.divf %440, %441 : vector<3x32xf32>
    %443 = arith.mulf %434, %25 : vector<3x32xf32>
    %444 = arith.mulf %428, %436 : vector<3x32xf32>
    %445 = arith.addf %443, %444 : vector<3x32xf32>
    %446 = math.tanh %445 : vector<3x32xf32>
    %447 = arith.mulf %442, %446 : vector<3x32xf32>
    %cst_109 = arith.constant dense<0.000000e+00> : vector<3x32xf32>
    %448 = tpu.matmul %447, %17, %cst_109 {dimension_numbers = #tpu.dot_dimension_numbers<[1], [0], [0], [1], [0, 0, 1, 1], [], []>} : vector<3x32xf32>, vector<32x32xf32>, vector<3x32xf32> -> vector<3x32xf32>
    %449 = tpu.concatenate %320, %345, %370 in 0 : vector<16x32xf32>, vector<16x32xf32>, vector<16x32xf32> -> vector<48x32xf32>
    %cst_110 = arith.constant dense<0.000000e+00> : vector<48x32xf32>
    %450 = tpu.matmul %449, %16, %cst_110 {dimension_numbers = #tpu.dot_dimension_numbers<[1], [0], [0], [1], [0, 0, 1, 1], [], []>} : vector<48x32xf32>, vector<32x32xf32>, vector<48x32xf32> -> vector<48x32xf32>
    %cst_111 = arith.constant 0.000000e+00 : f32
    %451 = vector.broadcast %cst_111 : f32 to vector<3x16xf32>
    %cst_112 = arith.constant -1.000000e+09 : f32
    %452 = vector.broadcast %cst_112 : f32 to vector<3x16xf32>
    %453 = vector.extract_strided_slice %83 {offsets = [0, 0], sizes = [1, 16], strides = [1, 1]} : vector<3x16xf32> to vector<1x16xf32>
    %454 = vector.extract_strided_slice %450 {offsets = [0, 0], sizes = [16, 32], strides = [1, 1]} : vector<48x32xf32> to vector<16x32xf32>
    %455 = vector.extract_strided_slice %448 {offsets = [0, 0], sizes = [1, 32], strides = [1, 1]} : vector<3x32xf32> to vector<1x32xf32>
    %456 = vector.broadcast %455 : vector<1x32xf32> to vector<16x32xf32>
    %457 = arith.addf %454, %456 : vector<16x32xf32>
    %458 = math.tanh %457 : vector<16x32xf32>
    %459 = tpu.transpose %458, [1, 0] : vector<16x32xf32> -> vector<32x16xf32>
    %cst_113 = arith.constant dense<0.000000e+00> : vector<1x16xf32>
    %460 = tpu.matmul %18, %459, %cst_113 {dimension_numbers = #tpu.dot_dimension_numbers<[1], [0], [0], [1], [0, 0, 1, 1], [], []>} : vector<1x32xf32>, vector<32x16xf32>, vector<1x16xf32> -> vector<1x16xf32>
    %cst_114 = arith.constant 0.000000e+00 : f32
    %461 = vector.broadcast %cst_114 : f32 to vector<1x16xf32>
    %462 = arith.cmpf ogt, %453, %461 : vector<1x16xf32>
    %cst_115 = arith.constant -1.000000e+09 : f32
    %463 = vector.broadcast %cst_115 : f32 to vector<1x16xf32>
    %464 = arith.select %462, %460, %463 : vector<1x16xi1>, vector<1x16xf32>
    %cst_116 = arith.constant dense<0xFF800000> : vector<1xf32>
    %465 = vector.multi_reduction <maximumf>, %464, %cst_116 [1] : vector<1x16xf32> to vector<1xf32>
    %466 = vector.shape_cast %465 : vector<1xf32> to vector<1x1xf32>
    %467 = vector.broadcast %466 : vector<1x1xf32> to vector<1x16xf32>
    %468 = arith.subf %464, %467 : vector<1x16xf32>
    %469 = math.exp %468 : vector<1x16xf32>
    %cst_117 = arith.constant dense<0.000000e+00> : vector<1xf32>
    %470 = vector.multi_reduction <add>, %469, %cst_117 [1] : vector<1x16xf32> to vector<1xf32>
    %471 = vector.shape_cast %470 : vector<1xf32> to vector<1x1xf32>
    %472 = tpu.reciprocal %471 {approx = true} : vector<1x1xf32> -> vector<1x1xf32>
    %473 = vector.broadcast %472 : vector<1x1xf32> to vector<1x16xf32>
    %474 = arith.mulf %469, %473 : vector<1x16xf32>
    %cst_118 = arith.constant 0.000000e+00 : f32
    %475 = vector.broadcast %cst_118 : f32 to vector<1x16xf32>
    %476 = arith.cmpf ogt, %453, %475 : vector<1x16xf32>
    %477 = vector.extract_strided_slice %102 {offsets = [0, 0], sizes = [1, 1], strides = [1, 1]} : vector<3x1xf32> to vector<1x1xf32>
    %cst_119 = arith.constant 0.000000e+00 : f32
    %478 = vector.broadcast %cst_119 : f32 to vector<1x1xf32>
    %479 = arith.cmpf ogt, %477, %478 : vector<1x1xf32>
    %480 = vector.broadcast %479 : vector<1x1xi1> to vector<1x16xi1>
    %481 = arith.andi %476, %480 : vector<1x16xi1>
    %482 = vector.extract_strided_slice %23 {offsets = [0, 0], sizes = [1, 1], strides = [1, 1]} : vector<3x1xf32> to vector<1x1xf32>
    %cst_120 = arith.constant 1.000000e-30 : f32
    %483 = vector.broadcast %cst_120 : f32 to vector<1x16xf32>
    %484 = arith.maximumf %474, %483 : vector<1x16xf32>
    %485 = math.log %484 : vector<1x16xf32>
    %486 = vector.broadcast %482 : vector<1x1xf32> to vector<1x16xf32>
    %487 = arith.addf %486, %485 : vector<1x16xf32>
    %cst_121 = arith.constant -1.000000e+09 : f32
    %488 = vector.broadcast %cst_121 : f32 to vector<1x16xf32>
    %489 = arith.select %481, %487, %488 : vector<1x16xi1>, vector<1x16xf32>
    %c0_i32_122 = arith.constant 0 : i32
    %490 = vector.broadcast %c0_i32_122 : i32 to vector<3x1xi32>
    %491 = arith.cmpi eq, %371, %490 : vector<3x1xi32>
    %492 = vector.shape_cast %491 : vector<3x1xi1> to vector<3x1xi1>
    %493 = vector.broadcast %492 : vector<3x1xi1> to vector<3x16xi1>
    %494 = vector.shape_cast %474 : vector<1x16xf32> to vector<1x16xf32>
    %495 = vector.broadcast %494 : vector<1x16xf32> to vector<3x16xf32>
    %496 = arith.select %493, %495, %451 : vector<3x16xi1>, vector<3x16xf32>
    %497 = vector.shape_cast %491 : vector<3x1xi1> to vector<3x1xi1>
    %498 = vector.broadcast %497 : vector<3x1xi1> to vector<3x16xi1>
    %499 = vector.shape_cast %489 : vector<1x16xf32> to vector<1x16xf32>
    %500 = vector.broadcast %499 : vector<1x16xf32> to vector<3x16xf32>
    %501 = arith.select %498, %500, %452 : vector<3x16xi1>, vector<3x16xf32>
    %502 = vector.extract_strided_slice %83 {offsets = [1, 0], sizes = [1, 16], strides = [1, 1]} : vector<3x16xf32> to vector<1x16xf32>
    %503 = vector.extract_strided_slice %450 {offsets = [16, 0], sizes = [16, 32], strides = [1, 1]} : vector<48x32xf32> to vector<16x32xf32>
    %504 = vector.extract_strided_slice %448 {offsets = [1, 0], sizes = [1, 32], strides = [1, 1]} : vector<3x32xf32> to vector<1x32xf32>
    %505 = vector.broadcast %504 : vector<1x32xf32> to vector<16x32xf32>
    %506 = arith.addf %503, %505 : vector<16x32xf32>
    %507 = math.tanh %506 : vector<16x32xf32>
    %508 = tpu.transpose %507, [1, 0] : vector<16x32xf32> -> vector<32x16xf32>
    %cst_123 = arith.constant dense<0.000000e+00> : vector<1x16xf32>
    %509 = tpu.matmul %18, %508, %cst_123 {dimension_numbers = #tpu.dot_dimension_numbers<[1], [0], [0], [1], [0, 0, 1, 1], [], []>} : vector<1x32xf32>, vector<32x16xf32>, vector<1x16xf32> -> vector<1x16xf32>
    %cst_124 = arith.constant 0.000000e+00 : f32
    %510 = vector.broadcast %cst_124 : f32 to vector<1x16xf32>
    %511 = arith.cmpf ogt, %502, %510 : vector<1x16xf32>
    %cst_125 = arith.constant -1.000000e+09 : f32
    %512 = vector.broadcast %cst_125 : f32 to vector<1x16xf32>
    %513 = arith.select %511, %509, %512 : vector<1x16xi1>, vector<1x16xf32>
    %cst_126 = arith.constant dense<0xFF800000> : vector<1xf32>
    %514 = vector.multi_reduction <maximumf>, %513, %cst_126 [1] : vector<1x16xf32> to vector<1xf32>
    %515 = vector.shape_cast %514 : vector<1xf32> to vector<1x1xf32>
    %516 = vector.broadcast %515 : vector<1x1xf32> to vector<1x16xf32>
    %517 = arith.subf %513, %516 : vector<1x16xf32>
    %518 = math.exp %517 : vector<1x16xf32>
    %cst_127 = arith.constant dense<0.000000e+00> : vector<1xf32>
    %519 = vector.multi_reduction <add>, %518, %cst_127 [1] : vector<1x16xf32> to vector<1xf32>
    %520 = vector.shape_cast %519 : vector<1xf32> to vector<1x1xf32>
    %521 = tpu.reciprocal %520 {approx = true} : vector<1x1xf32> -> vector<1x1xf32>
    %522 = vector.broadcast %521 : vector<1x1xf32> to vector<1x16xf32>
    %523 = arith.mulf %518, %522 : vector<1x16xf32>
    %cst_128 = arith.constant 0.000000e+00 : f32
    %524 = vector.broadcast %cst_128 : f32 to vector<1x16xf32>
    %525 = arith.cmpf ogt, %502, %524 : vector<1x16xf32>
    %526 = vector.extract_strided_slice %102 {offsets = [1, 0], sizes = [1, 1], strides = [1, 1]} : vector<3x1xf32> to vector<1x1xf32>
    %cst_129 = arith.constant 0.000000e+00 : f32
    %527 = vector.broadcast %cst_129 : f32 to vector<1x1xf32>
    %528 = arith.cmpf ogt, %526, %527 : vector<1x1xf32>
    %529 = vector.broadcast %528 : vector<1x1xi1> to vector<1x16xi1>
    %530 = arith.andi %525, %529 : vector<1x16xi1>
    %531 = vector.extract_strided_slice %23 {offsets = [1, 0], sizes = [1, 1], strides = [1, 1]} : vector<3x1xf32> to vector<1x1xf32>
    %cst_130 = arith.constant 1.000000e-30 : f32
    %532 = vector.broadcast %cst_130 : f32 to vector<1x16xf32>
    %533 = arith.maximumf %523, %532 : vector<1x16xf32>
    %534 = math.log %533 : vector<1x16xf32>
    %535 = vector.broadcast %531 : vector<1x1xf32> to vector<1x16xf32>
    %536 = arith.addf %535, %534 : vector<1x16xf32>
    %cst_131 = arith.constant -1.000000e+09 : f32
    %537 = vector.broadcast %cst_131 : f32 to vector<1x16xf32>
    %538 = arith.select %530, %536, %537 : vector<1x16xi1>, vector<1x16xf32>
    %c1_i32_132 = arith.constant 1 : i32
    %539 = vector.broadcast %c1_i32_132 : i32 to vector<3x1xi32>
    %540 = arith.cmpi eq, %371, %539 : vector<3x1xi32>
    %541 = vector.shape_cast %540 : vector<3x1xi1> to vector<3x1xi1>
    %542 = vector.broadcast %541 : vector<3x1xi1> to vector<3x16xi1>
    %543 = vector.shape_cast %523 : vector<1x16xf32> to vector<1x16xf32>
    %544 = vector.broadcast %543 : vector<1x16xf32> to vector<3x16xf32>
    %545 = arith.select %542, %544, %496 : vector<3x16xi1>, vector<3x16xf32>
    %546 = vector.shape_cast %540 : vector<3x1xi1> to vector<3x1xi1>
    %547 = vector.broadcast %546 : vector<3x1xi1> to vector<3x16xi1>
    %548 = vector.shape_cast %538 : vector<1x16xf32> to vector<1x16xf32>
    %549 = vector.broadcast %548 : vector<1x16xf32> to vector<3x16xf32>
    %550 = arith.select %547, %549, %501 : vector<3x16xi1>, vector<3x16xf32>
    %551 = vector.extract_strided_slice %83 {offsets = [2, 0], sizes = [1, 16], strides = [1, 1]} : vector<3x16xf32> to vector<1x16xf32>
    %552 = vector.extract_strided_slice %450 {offsets = [32, 0], sizes = [16, 32], strides = [1, 1]} : vector<48x32xf32> to vector<16x32xf32>
    %553 = vector.extract_strided_slice %448 {offsets = [2, 0], sizes = [1, 32], strides = [1, 1]} : vector<3x32xf32> to vector<1x32xf32>
    %554 = vector.broadcast %553 : vector<1x32xf32> to vector<16x32xf32>
    %555 = arith.addf %552, %554 : vector<16x32xf32>
    %556 = math.tanh %555 : vector<16x32xf32>
    %557 = tpu.transpose %556, [1, 0] : vector<16x32xf32> -> vector<32x16xf32>
    %cst_133 = arith.constant dense<0.000000e+00> : vector<1x16xf32>
    %558 = tpu.matmul %18, %557, %cst_133 {dimension_numbers = #tpu.dot_dimension_numbers<[1], [0], [0], [1], [0, 0, 1, 1], [], []>} : vector<1x32xf32>, vector<32x16xf32>, vector<1x16xf32> -> vector<1x16xf32>
    %cst_134 = arith.constant 0.000000e+00 : f32
    %559 = vector.broadcast %cst_134 : f32 to vector<1x16xf32>
    %560 = arith.cmpf ogt, %551, %559 : vector<1x16xf32>
    %cst_135 = arith.constant -1.000000e+09 : f32
    %561 = vector.broadcast %cst_135 : f32 to vector<1x16xf32>
    %562 = arith.select %560, %558, %561 : vector<1x16xi1>, vector<1x16xf32>
    %cst_136 = arith.constant dense<0xFF800000> : vector<1xf32>
    %563 = vector.multi_reduction <maximumf>, %562, %cst_136 [1] : vector<1x16xf32> to vector<1xf32>
    %564 = vector.shape_cast %563 : vector<1xf32> to vector<1x1xf32>
    %565 = vector.broadcast %564 : vector<1x1xf32> to vector<1x16xf32>
    %566 = arith.subf %562, %565 : vector<1x16xf32>
    %567 = math.exp %566 : vector<1x16xf32>
    %cst_137 = arith.constant dense<0.000000e+00> : vector<1xf32>
    %568 = vector.multi_reduction <add>, %567, %cst_137 [1] : vector<1x16xf32> to vector<1xf32>
    %569 = vector.shape_cast %568 : vector<1xf32> to vector<1x1xf32>
    %570 = tpu.reciprocal %569 {approx = true} : vector<1x1xf32> -> vector<1x1xf32>
    %571 = vector.broadcast %570 : vector<1x1xf32> to vector<1x16xf32>
    %572 = arith.mulf %567, %571 : vector<1x16xf32>
    %cst_138 = arith.constant 0.000000e+00 : f32
    %573 = vector.broadcast %cst_138 : f32 to vector<1x16xf32>
    %574 = arith.cmpf ogt, %551, %573 : vector<1x16xf32>
    %575 = vector.extract_strided_slice %102 {offsets = [2, 0], sizes = [1, 1], strides = [1, 1]} : vector<3x1xf32> to vector<1x1xf32>
    %cst_139 = arith.constant 0.000000e+00 : f32
    %576 = vector.broadcast %cst_139 : f32 to vector<1x1xf32>
    %577 = arith.cmpf ogt, %575, %576 : vector<1x1xf32>
    %578 = vector.broadcast %577 : vector<1x1xi1> to vector<1x16xi1>
    %579 = arith.andi %574, %578 : vector<1x16xi1>
    %580 = vector.extract_strided_slice %23 {offsets = [2, 0], sizes = [1, 1], strides = [1, 1]} : vector<3x1xf32> to vector<1x1xf32>
    %cst_140 = arith.constant 1.000000e-30 : f32
    %581 = vector.broadcast %cst_140 : f32 to vector<1x16xf32>
    %582 = arith.maximumf %572, %581 : vector<1x16xf32>
    %583 = math.log %582 : vector<1x16xf32>
    %584 = vector.broadcast %580 : vector<1x1xf32> to vector<1x16xf32>
    %585 = arith.addf %584, %583 : vector<1x16xf32>
    %cst_141 = arith.constant -1.000000e+09 : f32
    %586 = vector.broadcast %cst_141 : f32 to vector<1x16xf32>
    %587 = arith.select %579, %585, %586 : vector<1x16xi1>, vector<1x16xf32>
    %c2_i32_142 = arith.constant 2 : i32
    %588 = vector.broadcast %c2_i32_142 : i32 to vector<3x1xi32>
    %589 = arith.cmpi eq, %371, %588 : vector<3x1xi32>
    %590 = vector.shape_cast %589 : vector<3x1xi1> to vector<3x1xi1>
    %591 = vector.broadcast %590 : vector<3x1xi1> to vector<3x16xi1>
    %592 = vector.shape_cast %572 : vector<1x16xf32> to vector<1x16xf32>
    %593 = vector.broadcast %592 : vector<1x16xf32> to vector<3x16xf32>
    %594 = arith.select %591, %593, %545 : vector<3x16xi1>, vector<3x16xf32>
    %595 = vector.shape_cast %589 : vector<3x1xi1> to vector<3x1xi1>
    %596 = vector.broadcast %595 : vector<3x1xi1> to vector<3x16xi1>
    %597 = vector.shape_cast %587 : vector<1x16xf32> to vector<1x16xf32>
    %598 = vector.broadcast %597 : vector<1x16xf32> to vector<3x16xf32>
    %599 = arith.select %596, %598, %550 : vector<3x16xi1>, vector<3x16xf32>
    %600 = tpu.iota {dimensions = array<i32: 0>} : vector<3x1xi32>
    %601 = arith.sitofp %600 : vector<3x1xi32> to vector<3x1xf32>
    %602 = tpu.iota {dimensions = array<i32: 0>} : vector<3x16xi32>
    %603 = arith.sitofp %602 : vector<3x16xi32> to vector<3x16xf32>
    %604 = tpu.iota {dimensions = array<i32: 1>} : vector<3x16xi32>
    %605 = arith.sitofp %604 : vector<3x16xi32> to vector<3x16xf32>
    %606 = tpu.iota {dimensions = array<i32: 1>} : vector<1x3xi32>
    %607 = arith.sitofp %606 : vector<1x3xi32> to vector<1x3xf32>
    %608 = arith.sitofp %26 : vector<3x1xi32> to vector<3x1xf32>
    %c0_i32_143 = arith.constant 0 : i32
    %609 = vector.broadcast %c0_i32_143 : i32 to vector<3x1xi32>
    %c0_i32_144 = arith.constant 0 : i32
    %610 = vector.broadcast %c0_i32_144 : i32 to vector<3x1xi32>
    %cst_145 = arith.constant 0.000000e+00 : f32
    %611 = vector.broadcast %cst_145 : f32 to vector<3x1xf32>
    %cst_146 = arith.constant 0.000000e+00 : f32
    %612 = vector.broadcast %cst_146 : f32 to vector<3x1xf32>
    %cst_147 = arith.constant 0.000000e+00 : f32
    %613 = vector.broadcast %cst_147 : f32 to vector<3x16xf32>
    %cst_148 = arith.constant 0.000000e+00 : f32
    %614 = vector.broadcast %cst_148 : f32 to vector<3x1xf32>
    %c0_i32_149 = arith.constant 0 : i32
    %615 = vector.broadcast %c0_i32_149 : i32 to vector<3x1xi32>
    %cst_150 = arith.constant 0.000000e+00 : f32
    %616 = vector.broadcast %cst_150 : f32 to vector<3x1xf32>
    %cst_151 = arith.constant 0.000000e+00 : f32
    %617 = vector.broadcast %cst_151 : f32 to vector<3x32xf32>
    %cst_152 = arith.constant 0.000000e+00 : f32
    %618 = vector.broadcast %cst_152 : f32 to vector<3x32xf32>
    %cst_153 = arith.constant dense<0xFF800000> : vector<3xf32>
    %619 = vector.multi_reduction <maximumf>, %599, %cst_153 [1] : vector<3x16xf32> to vector<3xf32>
    %620 = vector.shape_cast %619 : vector<3xf32> to vector<3x1xf32>
    %cst_154 = arith.constant dense<0xFF800000> : vector<1xf32>
    %621 = vector.multi_reduction <maximumf>, %620, %cst_154 [0] : vector<3x1xf32> to vector<1xf32>
    %622 = vector.shape_cast %621 : vector<1xf32> to vector<1x1xf32>
    %623 = vector.broadcast %622 : vector<1x1xf32> to vector<3x16xf32>
    %624 = arith.cmpf oge, %599, %623 : vector<3x16xf32>
    %cst_155 = arith.constant 1.000000e+00 : f32
    %cst_156 = arith.constant 0.000000e+00 : f32
    %625 = vector.broadcast %cst_155 : f32 to vector<3x16xf32>
    %626 = vector.broadcast %cst_156 : f32 to vector<3x16xf32>
    %627 = arith.select %624, %625, %626 : vector<3x16xi1>, vector<3x16xf32>
    %cst_157 = arith.constant dense<0xFF800000> : vector<3xf32>
    %628 = vector.multi_reduction <maximumf>, %627, %cst_157 [1] : vector<3x16xf32> to vector<3xf32>
    %629 = vector.shape_cast %628 : vector<3xf32> to vector<3x1xf32>
    %cst_158 = arith.constant 5.000000e-01 : f32
    %630 = vector.broadcast %cst_158 : f32 to vector<3x1xf32>
    %631 = arith.cmpf ogt, %629, %630 : vector<3x1xf32>
    %cst_159 = arith.constant 3.000000e+00 : f32
    %632 = vector.broadcast %cst_159 : f32 to vector<3x1xf32>
    %633 = arith.select %631, %601, %632 : vector<3x1xi1>, vector<3x1xf32>
    %cst_160 = arith.constant dense<0x7F800000> : vector<1xf32>
    %634 = vector.multi_reduction <minimumf>, %633, %cst_160 [0] : vector<3x1xf32> to vector<1xf32>
    %635 = vector.shape_cast %634 : vector<1xf32> to vector<1x1xf32>
    %636 = vector.broadcast %635 : vector<1x1xf32> to vector<3x16xf32>
    %637 = arith.cmpf oeq, %603, %636 : vector<3x16xf32>
    %638 = arith.andi %624, %637 : vector<3x16xi1>
    %cst_161 = arith.constant 1.600000e+01 : f32
    %639 = vector.broadcast %cst_161 : f32 to vector<3x16xf32>
    %640 = arith.select %638, %605, %639 : vector<3x16xi1>, vector<3x16xf32>
    %cst_162 = arith.constant dense<0x7F800000> : vector<3xf32>
    %641 = vector.multi_reduction <minimumf>, %640, %cst_162 [1] : vector<3x16xf32> to vector<3xf32>
    %642 = vector.shape_cast %641 : vector<3xf32> to vector<3x1xf32>
    %cst_163 = arith.constant dense<0x7F800000> : vector<1xf32>
    %643 = vector.multi_reduction <minimumf>, %642, %cst_163 [0] : vector<3x1xf32> to vector<1xf32>
    %644 = vector.shape_cast %643 : vector<1xf32> to vector<1x1xf32>
    %645 = vector.broadcast %635 : vector<1x1xf32> to vector<3x16xf32>
    %646 = arith.cmpf oeq, %603, %645 : vector<3x16xf32>
    %647 = vector.broadcast %644 : vector<1x1xf32> to vector<3x16xf32>
    %648 = arith.cmpf oeq, %605, %647 : vector<3x16xf32>
    %649 = arith.andi %646, %648 : vector<3x16xi1>
    %cst_164 = arith.constant 0.000000e+00 : f32
    %650 = vector.broadcast %cst_164 : f32 to vector<3x16xf32>
    %651 = arith.select %649, %594, %650 : vector<3x16xi1>, vector<3x16xf32>
    %cst_165 = arith.constant dense<0.000000e+00> : vector<3xf32>
    %652 = vector.multi_reduction <add>, %651, %cst_165 [1] : vector<3x16xf32> to vector<3xf32>
    %653 = vector.shape_cast %652 : vector<3xf32> to vector<3x1xf32>
    %cst_166 = arith.constant dense<0.000000e+00> : vector<1xf32>
    %654 = vector.multi_reduction <add>, %653, %cst_166 [0] : vector<3x1xf32> to vector<1xf32>
    %655 = vector.shape_cast %654 : vector<1xf32> to vector<1x1xf32>
    %cst_167 = arith.constant -5.000000e+08 : f32
    %656 = vector.broadcast %cst_167 : f32 to vector<1x1xf32>
    %657 = arith.cmpf ogt, %622, %656 : vector<1x1xf32>
    %658 = arith.extui %657 : vector<1x1xi1> to vector<1x1xi32>
    %659 = arith.sitofp %658 : vector<1x1xi32> to vector<1x1xf32>
    %cst_168 = arith.constant 1.000000e-30 : f32
    %660 = vector.broadcast %cst_168 : f32 to vector<1x1xf32>
    %661 = arith.maximumf %655, %660 : vector<1x1xf32>
    %662 = math.log %661 : vector<1x1xf32>
    %cst_169 = arith.constant -1.000000e+09 : f32
    %663 = vector.broadcast %cst_169 : f32 to vector<3x16xf32>
    %664 = arith.select %649, %663, %599 : vector<3x16xi1>, vector<3x16xf32>
    %c0_i32_170 = arith.constant 0 : i32
    %665 = vector.broadcast %c0_i32_170 : i32 to vector<3x1xi32>
    %666 = arith.cmpi eq, %600, %665 : vector<3x1xi32>
    %667 = arith.fptosi %635 : vector<1x1xf32> to vector<1x1xi32>
    %668 = vector.shape_cast %667 : vector<1x1xi32> to vector<1x1xi32>
    %669 = vector.broadcast %668 : vector<1x1xi32> to vector<3x1xi32>
    %670 = arith.select %666, %669, %609 : vector<3x1xi1>, vector<3x1xi32>
    %671 = arith.fptosi %644 : vector<1x1xf32> to vector<1x1xi32>
    %672 = vector.shape_cast %671 : vector<1x1xi32> to vector<1x1xi32>
    %673 = vector.broadcast %672 : vector<1x1xi32> to vector<3x1xi32>
    %674 = arith.select %666, %673, %610 : vector<3x1xi1>, vector<3x1xi32>
    %675 = vector.shape_cast %662 : vector<1x1xf32> to vector<1x1xf32>
    %676 = vector.broadcast %675 : vector<1x1xf32> to vector<3x1xf32>
    %677 = arith.select %666, %676, %611 : vector<3x1xi1>, vector<3x1xf32>
    %678 = vector.shape_cast %659 : vector<1x1xf32> to vector<1x1xf32>
    %679 = vector.broadcast %678 : vector<1x1xf32> to vector<3x1xf32>
    %680 = arith.select %666, %679, %612 : vector<3x1xi1>, vector<3x1xf32>
    %681 = vector.broadcast %635 : vector<1x1xf32> to vector<1x3xf32>
    %682 = arith.cmpf oeq, %607, %681 : vector<1x3xf32>
    %683 = arith.extui %682 : vector<1x3xi1> to vector<1x3xi32>
    %684 = arith.sitofp %683 : vector<1x3xi32> to vector<1x3xf32>
    %cst_171 = arith.constant dense<0.000000e+00> : vector<1x16xf32>
    %685 = tpu.matmul %684, %83, %cst_171 {dimension_numbers = #tpu.dot_dimension_numbers<[1], [0], [0], [1], [0, 0, 1, 1], [], []>} : vector<1x3xf32>, vector<3x16xf32>, vector<1x16xf32> -> vector<1x16xf32>
    %cst_172 = arith.constant dense<0.000000e+00> : vector<1x32xf32>
    %686 = tpu.matmul %684, %447, %cst_172 {dimension_numbers = #tpu.dot_dimension_numbers<[1], [0], [0], [1], [0, 0, 1, 1], [], []>} : vector<1x3xf32>, vector<3x32xf32>, vector<1x32xf32> -> vector<1x32xf32>
    %cst_173 = arith.constant dense<0.000000e+00> : vector<1x32xf32>
    %687 = tpu.matmul %684, %445, %cst_173 {dimension_numbers = #tpu.dot_dimension_numbers<[1], [0], [0], [1], [0, 0, 1, 1], [], []>} : vector<1x3xf32>, vector<3x32xf32>, vector<1x32xf32> -> vector<1x32xf32>
    %cst_174 = arith.constant 0.000000e+00 : f32
    %688 = vector.broadcast %cst_174 : f32 to vector<1x1xf32>
    %cst_175 = arith.constant 0.000000e+00 : f32
    %689 = vector.broadcast %cst_175 : f32 to vector<1x1xf32>
    %cst_176 = arith.constant 0.000000e+00 : f32
    %690 = vector.broadcast %cst_176 : f32 to vector<1x1xf32>
    %cst_177 = arith.constant 0.000000e+00 : f32
    %691 = vector.broadcast %cst_177 : f32 to vector<16x32xf32>
    %cst_178 = arith.constant 0.000000e+00 : f32
    %692 = vector.broadcast %cst_178 : f32 to vector<1x1xf32>
    %693 = arith.cmpf oeq, %635, %692 : vector<1x1xf32>
    %694 = arith.extui %693 : vector<1x1xi1> to vector<1x1xi32>
    %695 = arith.sitofp %694 : vector<1x1xi32> to vector<1x1xf32>
    %696 = vector.extract_strided_slice %54 {offsets = [0, 0], sizes = [1, 1], strides = [1, 1]} : vector<3x1xf32> to vector<1x1xf32>
    %697 = arith.mulf %695, %696 : vector<1x1xf32>
    %698 = arith.addf %688, %697 : vector<1x1xf32>
    %699 = vector.extract_strided_slice %23 {offsets = [0, 0], sizes = [1, 1], strides = [1, 1]} : vector<3x1xf32> to vector<1x1xf32>
    %700 = arith.mulf %695, %699 : vector<1x1xf32>
    %701 = arith.addf %689, %700 : vector<1x1xf32>
    %702 = vector.extract_strided_slice %608 {offsets = [0, 0], sizes = [1, 1], strides = [1, 1]} : vector<3x1xf32> to vector<1x1xf32>
    %703 = arith.mulf %695, %702 : vector<1x1xf32>
    %704 = arith.addf %690, %703 : vector<1x1xf32>
    %705 = vector.broadcast %695 : vector<1x1xf32> to vector<16x32xf32>
    %706 = arith.mulf %705, %320 : vector<16x32xf32>
    %707 = arith.addf %691, %706 : vector<16x32xf32>
    %cst_179 = arith.constant 1.000000e+00 : f32
    %708 = vector.broadcast %cst_179 : f32 to vector<1x1xf32>
    %709 = arith.cmpf oeq, %635, %708 : vector<1x1xf32>
    %710 = arith.extui %709 : vector<1x1xi1> to vector<1x1xi32>
    %711 = arith.sitofp %710 : vector<1x1xi32> to vector<1x1xf32>
    %712 = vector.extract_strided_slice %54 {offsets = [1, 0], sizes = [1, 1], strides = [1, 1]} : vector<3x1xf32> to vector<1x1xf32>
    %713 = arith.mulf %711, %712 : vector<1x1xf32>
    %714 = arith.addf %698, %713 : vector<1x1xf32>
    %715 = vector.extract_strided_slice %23 {offsets = [1, 0], sizes = [1, 1], strides = [1, 1]} : vector<3x1xf32> to vector<1x1xf32>
    %716 = arith.mulf %711, %715 : vector<1x1xf32>
    %717 = arith.addf %701, %716 : vector<1x1xf32>
    %718 = vector.extract_strided_slice %608 {offsets = [1, 0], sizes = [1, 1], strides = [1, 1]} : vector<3x1xf32> to vector<1x1xf32>
    %719 = arith.mulf %711, %718 : vector<1x1xf32>
    %720 = arith.addf %704, %719 : vector<1x1xf32>
    %721 = vector.broadcast %711 : vector<1x1xf32> to vector<16x32xf32>
    %722 = arith.mulf %721, %345 : vector<16x32xf32>
    %723 = arith.addf %707, %722 : vector<16x32xf32>
    %cst_180 = arith.constant 2.000000e+00 : f32
    %724 = vector.broadcast %cst_180 : f32 to vector<1x1xf32>
    %725 = arith.cmpf oeq, %635, %724 : vector<1x1xf32>
    %726 = arith.extui %725 : vector<1x1xi1> to vector<1x1xi32>
    %727 = arith.sitofp %726 : vector<1x1xi32> to vector<1x1xf32>
    %728 = vector.extract_strided_slice %54 {offsets = [2, 0], sizes = [1, 1], strides = [1, 1]} : vector<3x1xf32> to vector<1x1xf32>
    %729 = arith.mulf %727, %728 : vector<1x1xf32>
    %730 = arith.addf %714, %729 : vector<1x1xf32>
    %731 = vector.extract_strided_slice %23 {offsets = [2, 0], sizes = [1, 1], strides = [1, 1]} : vector<3x1xf32> to vector<1x1xf32>
    %732 = arith.mulf %727, %731 : vector<1x1xf32>
    %733 = arith.addf %717, %732 : vector<1x1xf32>
    %734 = vector.extract_strided_slice %608 {offsets = [2, 0], sizes = [1, 1], strides = [1, 1]} : vector<3x1xf32> to vector<1x1xf32>
    %735 = arith.mulf %727, %734 : vector<1x1xf32>
    %736 = arith.addf %720, %735 : vector<1x1xf32>
    %737 = vector.broadcast %727 : vector<1x1xf32> to vector<16x32xf32>
    %738 = arith.mulf %737, %370 : vector<16x32xf32>
    %739 = arith.addf %723, %738 : vector<16x32xf32>
    %740 = vector.broadcast %659 : vector<1x1xf32> to vector<1x16xf32>
    %741 = arith.mulf %685, %740 : vector<1x16xf32>
    %742 = vector.shape_cast %666 : vector<3x1xi1> to vector<3x1xi1>
    %743 = vector.broadcast %742 : vector<3x1xi1> to vector<3x16xi1>
    %744 = vector.shape_cast %741 : vector<1x16xf32> to vector<1x16xf32>
    %745 = vector.broadcast %744 : vector<1x16xf32> to vector<3x16xf32>
    %746 = arith.select %743, %745, %613 : vector<3x16xi1>, vector<3x16xf32>
    %747 = vector.shape_cast %730 : vector<1x1xf32> to vector<1x1xf32>
    %748 = vector.broadcast %747 : vector<1x1xf32> to vector<3x1xf32>
    %749 = arith.select %666, %748, %614 : vector<3x1xi1>, vector<3x1xf32>
    %750 = arith.fptosi %736 : vector<1x1xf32> to vector<1x1xi32>
    %751 = vector.shape_cast %750 : vector<1x1xi32> to vector<1x1xi32>
    %752 = vector.broadcast %751 : vector<1x1xi32> to vector<3x1xi32>
    %753 = arith.select %666, %752, %615 : vector<3x1xi1>, vector<3x1xi32>
    %754 = arith.addf %733, %662 : vector<1x1xf32>
    %755 = vector.shape_cast %754 : vector<1x1xf32> to vector<1x1xf32>
    %756 = vector.broadcast %755 : vector<1x1xf32> to vector<3x1xf32>
    %757 = arith.select %666, %756, %616 : vector<3x1xi1>, vector<3x1xf32>
    %758 = vector.shape_cast %666 : vector<3x1xi1> to vector<3x1xi1>
    %759 = vector.broadcast %758 : vector<3x1xi1> to vector<3x32xi1>
    %760 = vector.shape_cast %686 : vector<1x32xf32> to vector<1x32xf32>
    %761 = vector.broadcast %760 : vector<1x32xf32> to vector<3x32xf32>
    %762 = arith.select %759, %761, %617 : vector<3x32xi1>, vector<3x32xf32>
    %763 = vector.shape_cast %666 : vector<3x1xi1> to vector<3x1xi1>
    %764 = vector.broadcast %763 : vector<3x1xi1> to vector<3x32xi1>
    %765 = vector.shape_cast %687 : vector<1x32xf32> to vector<1x32xf32>
    %766 = vector.broadcast %765 : vector<1x32xf32> to vector<3x32xf32>
    %767 = arith.select %764, %766, %618 : vector<3x32xi1>, vector<3x32xf32>
    %c0_181 = arith.constant 0 : index
    %c0_182 = arith.constant 0 : index
    %c0_183 = arith.constant 0 : index
    %768 = vector.load %arg31[%c0_181, %c0_182, %c0_183] : memref<3x16x32xf32, #tpu.memory_space<vmem>>, vector<1x16x32xf32>
    %769 = vector.shape_cast %768 : vector<1x16x32xf32> to vector<16x32xf32>
    %770 = vector.shape_cast %739 : vector<16x32xf32> to vector<1x16x32xf32>
    tpu.vector_store %arg31[%c0_181, %c0_182, %c0_183], %770 {strides = array<i32>} : memref<3x16x32xf32, #tpu.memory_space<vmem>>, vector<1x16x32xf32>,
    %cst_184 = arith.constant dense<0xFF800000> : vector<3xf32>
    %771 = vector.multi_reduction <maximumf>, %664, %cst_184 [1] : vector<3x16xf32> to vector<3xf32>
    %772 = vector.shape_cast %771 : vector<3xf32> to vector<3x1xf32>
    %cst_185 = arith.constant dense<0xFF800000> : vector<1xf32>
    %773 = vector.multi_reduction <maximumf>, %772, %cst_185 [0] : vector<3x1xf32> to vector<1xf32>
    %774 = vector.shape_cast %773 : vector<1xf32> to vector<1x1xf32>
    %775 = vector.broadcast %774 : vector<1x1xf32> to vector<3x16xf32>
    %776 = arith.cmpf oge, %664, %775 : vector<3x16xf32>
    %cst_186 = arith.constant 1.000000e+00 : f32
    %cst_187 = arith.constant 0.000000e+00 : f32
    %777 = vector.broadcast %cst_186 : f32 to vector<3x16xf32>
    %778 = vector.broadcast %cst_187 : f32 to vector<3x16xf32>
    %779 = arith.select %776, %777, %778 : vector<3x16xi1>, vector<3x16xf32>
    %cst_188 = arith.constant dense<0xFF800000> : vector<3xf32>
    %780 = vector.multi_reduction <maximumf>, %779, %cst_188 [1] : vector<3x16xf32> to vector<3xf32>
    %781 = vector.shape_cast %780 : vector<3xf32> to vector<3x1xf32>
    %cst_189 = arith.constant 5.000000e-01 : f32
    %782 = vector.broadcast %cst_189 : f32 to vector<3x1xf32>
    %783 = arith.cmpf ogt, %781, %782 : vector<3x1xf32>
    %cst_190 = arith.constant 3.000000e+00 : f32
    %784 = vector.broadcast %cst_190 : f32 to vector<3x1xf32>
    %785 = arith.select %783, %601, %784 : vector<3x1xi1>, vector<3x1xf32>
    %cst_191 = arith.constant dense<0x7F800000> : vector<1xf32>
    %786 = vector.multi_reduction <minimumf>, %785, %cst_191 [0] : vector<3x1xf32> to vector<1xf32>
    %787 = vector.shape_cast %786 : vector<1xf32> to vector<1x1xf32>
    %788 = vector.broadcast %787 : vector<1x1xf32> to vector<3x16xf32>
    %789 = arith.cmpf oeq, %603, %788 : vector<3x16xf32>
    %790 = arith.andi %776, %789 : vector<3x16xi1>
    %cst_192 = arith.constant 1.600000e+01 : f32
    %791 = vector.broadcast %cst_192 : f32 to vector<3x16xf32>
    %792 = arith.select %790, %605, %791 : vector<3x16xi1>, vector<3x16xf32>
    %cst_193 = arith.constant dense<0x7F800000> : vector<3xf32>
    %793 = vector.multi_reduction <minimumf>, %792, %cst_193 [1] : vector<3x16xf32> to vector<3xf32>
    %794 = vector.shape_cast %793 : vector<3xf32> to vector<3x1xf32>
    %cst_194 = arith.constant dense<0x7F800000> : vector<1xf32>
    %795 = vector.multi_reduction <minimumf>, %794, %cst_194 [0] : vector<3x1xf32> to vector<1xf32>
    %796 = vector.shape_cast %795 : vector<1xf32> to vector<1x1xf32>
    %797 = vector.broadcast %787 : vector<1x1xf32> to vector<3x16xf32>
    %798 = arith.cmpf oeq, %603, %797 : vector<3x16xf32>
    %799 = vector.broadcast %796 : vector<1x1xf32> to vector<3x16xf32>
    %800 = arith.cmpf oeq, %605, %799 : vector<3x16xf32>
    %801 = arith.andi %798, %800 : vector<3x16xi1>
    %cst_195 = arith.constant 0.000000e+00 : f32
    %802 = vector.broadcast %cst_195 : f32 to vector<3x16xf32>
    %803 = arith.select %801, %594, %802 : vector<3x16xi1>, vector<3x16xf32>
    %cst_196 = arith.constant dense<0.000000e+00> : vector<3xf32>
    %804 = vector.multi_reduction <add>, %803, %cst_196 [1] : vector<3x16xf32> to vector<3xf32>
    %805 = vector.shape_cast %804 : vector<3xf32> to vector<3x1xf32>
    %cst_197 = arith.constant dense<0.000000e+00> : vector<1xf32>
    %806 = vector.multi_reduction <add>, %805, %cst_197 [0] : vector<3x1xf32> to vector<1xf32>
    %807 = vector.shape_cast %806 : vector<1xf32> to vector<1x1xf32>
    %cst_198 = arith.constant -5.000000e+08 : f32
    %808 = vector.broadcast %cst_198 : f32 to vector<1x1xf32>
    %809 = arith.cmpf ogt, %774, %808 : vector<1x1xf32>
    %810 = arith.extui %809 : vector<1x1xi1> to vector<1x1xi32>
    %811 = arith.sitofp %810 : vector<1x1xi32> to vector<1x1xf32>
    %cst_199 = arith.constant 1.000000e-30 : f32
    %812 = vector.broadcast %cst_199 : f32 to vector<1x1xf32>
    %813 = arith.maximumf %807, %812 : vector<1x1xf32>
    %814 = math.log %813 : vector<1x1xf32>
    %cst_200 = arith.constant -1.000000e+09 : f32
    %815 = vector.broadcast %cst_200 : f32 to vector<3x16xf32>
    %816 = arith.select %801, %815, %664 : vector<3x16xi1>, vector<3x16xf32>
    %c1_i32_201 = arith.constant 1 : i32
    %817 = vector.broadcast %c1_i32_201 : i32 to vector<3x1xi32>
    %818 = arith.cmpi eq, %600, %817 : vector<3x1xi32>
    %819 = arith.fptosi %787 : vector<1x1xf32> to vector<1x1xi32>
    %820 = vector.shape_cast %819 : vector<1x1xi32> to vector<1x1xi32>
    %821 = vector.broadcast %820 : vector<1x1xi32> to vector<3x1xi32>
    %822 = arith.select %818, %821, %670 : vector<3x1xi1>, vector<3x1xi32>
    %823 = arith.fptosi %796 : vector<1x1xf32> to vector<1x1xi32>
    %824 = vector.shape_cast %823 : vector<1x1xi32> to vector<1x1xi32>
    %825 = vector.broadcast %824 : vector<1x1xi32> to vector<3x1xi32>
    %826 = arith.select %818, %825, %674 : vector<3x1xi1>, vector<3x1xi32>
    %827 = vector.shape_cast %814 : vector<1x1xf32> to vector<1x1xf32>
    %828 = vector.broadcast %827 : vector<1x1xf32> to vector<3x1xf32>
    %829 = arith.select %818, %828, %677 : vector<3x1xi1>, vector<3x1xf32>
    %830 = vector.shape_cast %811 : vector<1x1xf32> to vector<1x1xf32>
    %831 = vector.broadcast %830 : vector<1x1xf32> to vector<3x1xf32>
    %832 = arith.select %818, %831, %680 : vector<3x1xi1>, vector<3x1xf32>
    %833 = vector.broadcast %787 : vector<1x1xf32> to vector<1x3xf32>
    %834 = arith.cmpf oeq, %607, %833 : vector<1x3xf32>
    %835 = arith.extui %834 : vector<1x3xi1> to vector<1x3xi32>
    %836 = arith.sitofp %835 : vector<1x3xi32> to vector<1x3xf32>
    %cst_202 = arith.constant dense<0.000000e+00> : vector<1x16xf32>
    %837 = tpu.matmul %836, %83, %cst_202 {dimension_numbers = #tpu.dot_dimension_numbers<[1], [0], [0], [1], [0, 0, 1, 1], [], []>} : vector<1x3xf32>, vector<3x16xf32>, vector<1x16xf32> -> vector<1x16xf32>
    %cst_203 = arith.constant dense<0.000000e+00> : vector<1x32xf32>
    %838 = tpu.matmul %836, %447, %cst_203 {dimension_numbers = #tpu.dot_dimension_numbers<[1], [0], [0], [1], [0, 0, 1, 1], [], []>} : vector<1x3xf32>, vector<3x32xf32>, vector<1x32xf32> -> vector<1x32xf32>
    %cst_204 = arith.constant dense<0.000000e+00> : vector<1x32xf32>
    %839 = tpu.matmul %836, %445, %cst_204 {dimension_numbers = #tpu.dot_dimension_numbers<[1], [0], [0], [1], [0, 0, 1, 1], [], []>} : vector<1x3xf32>, vector<3x32xf32>, vector<1x32xf32> -> vector<1x32xf32>
    %cst_205 = arith.constant 0.000000e+00 : f32
    %840 = vector.broadcast %cst_205 : f32 to vector<1x1xf32>
    %cst_206 = arith.constant 0.000000e+00 : f32
    %841 = vector.broadcast %cst_206 : f32 to vector<1x1xf32>
    %cst_207 = arith.constant 0.000000e+00 : f32
    %842 = vector.broadcast %cst_207 : f32 to vector<1x1xf32>
    %cst_208 = arith.constant 0.000000e+00 : f32
    %843 = vector.broadcast %cst_208 : f32 to vector<16x32xf32>
    %cst_209 = arith.constant 0.000000e+00 : f32
    %844 = vector.broadcast %cst_209 : f32 to vector<1x1xf32>
    %845 = arith.cmpf oeq, %787, %844 : vector<1x1xf32>
    %846 = arith.extui %845 : vector<1x1xi1> to vector<1x1xi32>
    %847 = arith.sitofp %846 : vector<1x1xi32> to vector<1x1xf32>
    %848 = vector.extract_strided_slice %54 {offsets = [0, 0], sizes = [1, 1], strides = [1, 1]} : vector<3x1xf32> to vector<1x1xf32>
    %849 = arith.mulf %847, %848 : vector<1x1xf32>
    %850 = arith.addf %840, %849 : vector<1x1xf32>
    %851 = vector.extract_strided_slice %23 {offsets = [0, 0], sizes = [1, 1], strides = [1, 1]} : vector<3x1xf32> to vector<1x1xf32>
    %852 = arith.mulf %847, %851 : vector<1x1xf32>
    %853 = arith.addf %841, %852 : vector<1x1xf32>
    %854 = vector.extract_strided_slice %608 {offsets = [0, 0], sizes = [1, 1], strides = [1, 1]} : vector<3x1xf32> to vector<1x1xf32>
    %855 = arith.mulf %847, %854 : vector<1x1xf32>
    %856 = arith.addf %842, %855 : vector<1x1xf32>
    %857 = vector.broadcast %847 : vector<1x1xf32> to vector<16x32xf32>
    %858 = arith.mulf %857, %320 : vector<16x32xf32>
    %859 = arith.addf %843, %858 : vector<16x32xf32>
    %cst_210 = arith.constant 1.000000e+00 : f32
    %860 = vector.broadcast %cst_210 : f32 to vector<1x1xf32>
    %861 = arith.cmpf oeq, %787, %860 : vector<1x1xf32>
    %862 = arith.extui %861 : vector<1x1xi1> to vector<1x1xi32>
    %863 = arith.sitofp %862 : vector<1x1xi32> to vector<1x1xf32>
    %864 = vector.extract_strided_slice %54 {offsets = [1, 0], sizes = [1, 1], strides = [1, 1]} : vector<3x1xf32> to vector<1x1xf32>
    %865 = arith.mulf %863, %864 : vector<1x1xf32>
    %866 = arith.addf %850, %865 : vector<1x1xf32>
    %867 = vector.extract_strided_slice %23 {offsets = [1, 0], sizes = [1, 1], strides = [1, 1]} : vector<3x1xf32> to vector<1x1xf32>
    %868 = arith.mulf %863, %867 : vector<1x1xf32>
    %869 = arith.addf %853, %868 : vector<1x1xf32>
    %870 = vector.extract_strided_slice %608 {offsets = [1, 0], sizes = [1, 1], strides = [1, 1]} : vector<3x1xf32> to vector<1x1xf32>
    %871 = arith.mulf %863, %870 : vector<1x1xf32>
    %872 = arith.addf %856, %871 : vector<1x1xf32>
    %873 = vector.broadcast %863 : vector<1x1xf32> to vector<16x32xf32>
    %874 = arith.mulf %873, %345 : vector<16x32xf32>
    %875 = arith.addf %859, %874 : vector<16x32xf32>
    %cst_211 = arith.constant 2.000000e+00 : f32
    %876 = vector.broadcast %cst_211 : f32 to vector<1x1xf32>
    %877 = arith.cmpf oeq, %787, %876 : vector<1x1xf32>
    %878 = arith.extui %877 : vector<1x1xi1> to vector<1x1xi32>
    %879 = arith.sitofp %878 : vector<1x1xi32> to vector<1x1xf32>
    %880 = vector.extract_strided_slice %54 {offsets = [2, 0], sizes = [1, 1], strides = [1, 1]} : vector<3x1xf32> to vector<1x1xf32>
    %881 = arith.mulf %879, %880 : vector<1x1xf32>
    %882 = arith.addf %866, %881 : vector<1x1xf32>
    %883 = vector.extract_strided_slice %23 {offsets = [2, 0], sizes = [1, 1], strides = [1, 1]} : vector<3x1xf32> to vector<1x1xf32>
    %884 = arith.mulf %879, %883 : vector<1x1xf32>
    %885 = arith.addf %869, %884 : vector<1x1xf32>
    %886 = vector.extract_strided_slice %608 {offsets = [2, 0], sizes = [1, 1], strides = [1, 1]} : vector<3x1xf32> to vector<1x1xf32>
    %887 = arith.mulf %879, %886 : vector<1x1xf32>
    %888 = arith.addf %872, %887 : vector<1x1xf32>
    %889 = vector.broadcast %879 : vector<1x1xf32> to vector<16x32xf32>
    %890 = arith.mulf %889, %370 : vector<16x32xf32>
    %891 = arith.addf %875, %890 : vector<16x32xf32>
    %892 = vector.broadcast %811 : vector<1x1xf32> to vector<1x16xf32>
    %893 = arith.mulf %837, %892 : vector<1x16xf32>
    %894 = vector.shape_cast %818 : vector<3x1xi1> to vector<3x1xi1>
    %895 = vector.broadcast %894 : vector<3x1xi1> to vector<3x16xi1>
    %896 = vector.shape_cast %893 : vector<1x16xf32> to vector<1x16xf32>
    %897 = vector.broadcast %896 : vector<1x16xf32> to vector<3x16xf32>
    %898 = arith.select %895, %897, %746 : vector<3x16xi1>, vector<3x16xf32>
    %899 = vector.shape_cast %882 : vector<1x1xf32> to vector<1x1xf32>
    %900 = vector.broadcast %899 : vector<1x1xf32> to vector<3x1xf32>
    %901 = arith.select %818, %900, %749 : vector<3x1xi1>, vector<3x1xf32>
    %902 = arith.fptosi %888 : vector<1x1xf32> to vector<1x1xi32>
    %903 = vector.shape_cast %902 : vector<1x1xi32> to vector<1x1xi32>
    %904 = vector.broadcast %903 : vector<1x1xi32> to vector<3x1xi32>
    %905 = arith.select %818, %904, %753 : vector<3x1xi1>, vector<3x1xi32>
    %906 = arith.addf %885, %814 : vector<1x1xf32>
    %907 = vector.shape_cast %906 : vector<1x1xf32> to vector<1x1xf32>
    %908 = vector.broadcast %907 : vector<1x1xf32> to vector<3x1xf32>
    %909 = arith.select %818, %908, %757 : vector<3x1xi1>, vector<3x1xf32>
    %910 = vector.shape_cast %818 : vector<3x1xi1> to vector<3x1xi1>
    %911 = vector.broadcast %910 : vector<3x1xi1> to vector<3x32xi1>
    %912 = vector.shape_cast %838 : vector<1x32xf32> to vector<1x32xf32>
    %913 = vector.broadcast %912 : vector<1x32xf32> to vector<3x32xf32>
    %914 = arith.select %911, %913, %762 : vector<3x32xi1>, vector<3x32xf32>
    %915 = vector.shape_cast %818 : vector<3x1xi1> to vector<3x1xi1>
    %916 = vector.broadcast %915 : vector<3x1xi1> to vector<3x32xi1>
    %917 = vector.shape_cast %839 : vector<1x32xf32> to vector<1x32xf32>
    %918 = vector.broadcast %917 : vector<1x32xf32> to vector<3x32xf32>
    %919 = arith.select %916, %918, %767 : vector<3x32xi1>, vector<3x32xf32>
    %c1_212 = arith.constant 1 : index
    %c0_213 = arith.constant 0 : index
    %c0_214 = arith.constant 0 : index
    %920 = vector.load %arg31[%c1_212, %c0_213, %c0_214] : memref<3x16x32xf32, #tpu.memory_space<vmem>>, vector<1x16x32xf32>
    %921 = vector.shape_cast %920 : vector<1x16x32xf32> to vector<16x32xf32>
    %922 = vector.shape_cast %891 : vector<16x32xf32> to vector<1x16x32xf32>
    tpu.vector_store %arg31[%c1_212, %c0_213, %c0_214], %922 {strides = array<i32>} : memref<3x16x32xf32, #tpu.memory_space<vmem>>, vector<1x16x32xf32>,
    %cst_215 = arith.constant dense<0xFF800000> : vector<3xf32>
    %923 = vector.multi_reduction <maximumf>, %816, %cst_215 [1] : vector<3x16xf32> to vector<3xf32>
    %924 = vector.shape_cast %923 : vector<3xf32> to vector<3x1xf32>
    %cst_216 = arith.constant dense<0xFF800000> : vector<1xf32>
    %925 = vector.multi_reduction <maximumf>, %924, %cst_216 [0] : vector<3x1xf32> to vector<1xf32>
    %926 = vector.shape_cast %925 : vector<1xf32> to vector<1x1xf32>
    %927 = vector.broadcast %926 : vector<1x1xf32> to vector<3x16xf32>
    %928 = arith.cmpf oge, %816, %927 : vector<3x16xf32>
    %cst_217 = arith.constant 1.000000e+00 : f32
    %cst_218 = arith.constant 0.000000e+00 : f32
    %929 = vector.broadcast %cst_217 : f32 to vector<3x16xf32>
    %930 = vector.broadcast %cst_218 : f32 to vector<3x16xf32>
    %931 = arith.select %928, %929, %930 : vector<3x16xi1>, vector<3x16xf32>
    %cst_219 = arith.constant dense<0xFF800000> : vector<3xf32>
    %932 = vector.multi_reduction <maximumf>, %931, %cst_219 [1] : vector<3x16xf32> to vector<3xf32>
    %933 = vector.shape_cast %932 : vector<3xf32> to vector<3x1xf32>
    %cst_220 = arith.constant 5.000000e-01 : f32
    %934 = vector.broadcast %cst_220 : f32 to vector<3x1xf32>
    %935 = arith.cmpf ogt, %933, %934 : vector<3x1xf32>
    %cst_221 = arith.constant 3.000000e+00 : f32
    %936 = vector.broadcast %cst_221 : f32 to vector<3x1xf32>
    %937 = arith.select %935, %601, %936 : vector<3x1xi1>, vector<3x1xf32>
    %cst_222 = arith.constant dense<0x7F800000> : vector<1xf32>
    %938 = vector.multi_reduction <minimumf>, %937, %cst_222 [0] : vector<3x1xf32> to vector<1xf32>
    %939 = vector.shape_cast %938 : vector<1xf32> to vector<1x1xf32>
    %940 = vector.broadcast %939 : vector<1x1xf32> to vector<3x16xf32>
    %941 = arith.cmpf oeq, %603, %940 : vector<3x16xf32>
    %942 = arith.andi %928, %941 : vector<3x16xi1>
    %cst_223 = arith.constant 1.600000e+01 : f32
    %943 = vector.broadcast %cst_223 : f32 to vector<3x16xf32>
    %944 = arith.select %942, %605, %943 : vector<3x16xi1>, vector<3x16xf32>
    %cst_224 = arith.constant dense<0x7F800000> : vector<3xf32>
    %945 = vector.multi_reduction <minimumf>, %944, %cst_224 [1] : vector<3x16xf32> to vector<3xf32>
    %946 = vector.shape_cast %945 : vector<3xf32> to vector<3x1xf32>
    %cst_225 = arith.constant dense<0x7F800000> : vector<1xf32>
    %947 = vector.multi_reduction <minimumf>, %946, %cst_225 [0] : vector<3x1xf32> to vector<1xf32>
    %948 = vector.shape_cast %947 : vector<1xf32> to vector<1x1xf32>
    %949 = vector.broadcast %939 : vector<1x1xf32> to vector<3x16xf32>
    %950 = arith.cmpf oeq, %603, %949 : vector<3x16xf32>
    %951 = vector.broadcast %948 : vector<1x1xf32> to vector<3x16xf32>
    %952 = arith.cmpf oeq, %605, %951 : vector<3x16xf32>
    %953 = arith.andi %950, %952 : vector<3x16xi1>
    %cst_226 = arith.constant 0.000000e+00 : f32
    %954 = vector.broadcast %cst_226 : f32 to vector<3x16xf32>
    %955 = arith.select %953, %594, %954 : vector<3x16xi1>, vector<3x16xf32>
    %cst_227 = arith.constant dense<0.000000e+00> : vector<3xf32>
    %956 = vector.multi_reduction <add>, %955, %cst_227 [1] : vector<3x16xf32> to vector<3xf32>
    %957 = vector.shape_cast %956 : vector<3xf32> to vector<3x1xf32>
    %cst_228 = arith.constant dense<0.000000e+00> : vector<1xf32>
    %958 = vector.multi_reduction <add>, %957, %cst_228 [0] : vector<3x1xf32> to vector<1xf32>
    %959 = vector.shape_cast %958 : vector<1xf32> to vector<1x1xf32>
    %cst_229 = arith.constant -5.000000e+08 : f32
    %960 = vector.broadcast %cst_229 : f32 to vector<1x1xf32>
    %961 = arith.cmpf ogt, %926, %960 : vector<1x1xf32>
    %962 = arith.extui %961 : vector<1x1xi1> to vector<1x1xi32>
    %963 = arith.sitofp %962 : vector<1x1xi32> to vector<1x1xf32>
    %cst_230 = arith.constant 1.000000e-30 : f32
    %964 = vector.broadcast %cst_230 : f32 to vector<1x1xf32>
    %965 = arith.maximumf %959, %964 : vector<1x1xf32>
    %966 = math.log %965 : vector<1x1xf32>
    %c2_i32_231 = arith.constant 2 : i32
    %967 = vector.broadcast %c2_i32_231 : i32 to vector<3x1xi32>
    %968 = arith.cmpi eq, %600, %967 : vector<3x1xi32>
    %969 = arith.fptosi %939 : vector<1x1xf32> to vector<1x1xi32>
    %970 = vector.shape_cast %969 : vector<1x1xi32> to vector<1x1xi32>
    %971 = vector.broadcast %970 : vector<1x1xi32> to vector<3x1xi32>
    %972 = arith.select %968, %971, %822 : vector<3x1xi1>, vector<3x1xi32>
    %973 = arith.fptosi %948 : vector<1x1xf32> to vector<1x1xi32>
    %974 = vector.shape_cast %973 : vector<1x1xi32> to vector<1x1xi32>
    %975 = vector.broadcast %974 : vector<1x1xi32> to vector<3x1xi32>
    %976 = arith.select %968, %975, %826 : vector<3x1xi1>, vector<3x1xi32>
    %977 = vector.shape_cast %966 : vector<1x1xf32> to vector<1x1xf32>
    %978 = vector.broadcast %977 : vector<1x1xf32> to vector<3x1xf32>
    %979 = arith.select %968, %978, %829 : vector<3x1xi1>, vector<3x1xf32>
    %980 = vector.shape_cast %963 : vector<1x1xf32> to vector<1x1xf32>
    %981 = vector.broadcast %980 : vector<1x1xf32> to vector<3x1xf32>
    %982 = arith.select %968, %981, %832 : vector<3x1xi1>, vector<3x1xf32>
    %983 = vector.broadcast %939 : vector<1x1xf32> to vector<1x3xf32>
    %984 = arith.cmpf oeq, %607, %983 : vector<1x3xf32>
    %985 = arith.extui %984 : vector<1x3xi1> to vector<1x3xi32>
    %986 = arith.sitofp %985 : vector<1x3xi32> to vector<1x3xf32>
    %cst_232 = arith.constant dense<0.000000e+00> : vector<1x16xf32>
    %987 = tpu.matmul %986, %83, %cst_232 {dimension_numbers = #tpu.dot_dimension_numbers<[1], [0], [0], [1], [0, 0, 1, 1], [], []>} : vector<1x3xf32>, vector<3x16xf32>, vector<1x16xf32> -> vector<1x16xf32>
    %cst_233 = arith.constant dense<0.000000e+00> : vector<1x32xf32>
    %988 = tpu.matmul %986, %447, %cst_233 {dimension_numbers = #tpu.dot_dimension_numbers<[1], [0], [0], [1], [0, 0, 1, 1], [], []>} : vector<1x3xf32>, vector<3x32xf32>, vector<1x32xf32> -> vector<1x32xf32>
    %cst_234 = arith.constant dense<0.000000e+00> : vector<1x32xf32>
    %989 = tpu.matmul %986, %445, %cst_234 {dimension_numbers = #tpu.dot_dimension_numbers<[1], [0], [0], [1], [0, 0, 1, 1], [], []>} : vector<1x3xf32>, vector<3x32xf32>, vector<1x32xf32> -> vector<1x32xf32>
    %cst_235 = arith.constant 0.000000e+00 : f32
    %990 = vector.broadcast %cst_235 : f32 to vector<1x1xf32>
    %cst_236 = arith.constant 0.000000e+00 : f32
    %991 = vector.broadcast %cst_236 : f32 to vector<1x1xf32>
    %cst_237 = arith.constant 0.000000e+00 : f32
    %992 = vector.broadcast %cst_237 : f32 to vector<1x1xf32>
    %cst_238 = arith.constant 0.000000e+00 : f32
    %993 = vector.broadcast %cst_238 : f32 to vector<16x32xf32>
    %cst_239 = arith.constant 0.000000e+00 : f32
    %994 = vector.broadcast %cst_239 : f32 to vector<1x1xf32>
    %995 = arith.cmpf oeq, %939, %994 : vector<1x1xf32>
    %996 = arith.extui %995 : vector<1x1xi1> to vector<1x1xi32>
    %997 = arith.sitofp %996 : vector<1x1xi32> to vector<1x1xf32>
    %998 = vector.extract_strided_slice %54 {offsets = [0, 0], sizes = [1, 1], strides = [1, 1]} : vector<3x1xf32> to vector<1x1xf32>
    %999 = arith.mulf %997, %998 : vector<1x1xf32>
    %1000 = arith.addf %990, %999 : vector<1x1xf32>
    %1001 = vector.extract_strided_slice %23 {offsets = [0, 0], sizes = [1, 1], strides = [1, 1]} : vector<3x1xf32> to vector<1x1xf32>
    %1002 = arith.mulf %997, %1001 : vector<1x1xf32>
    %1003 = arith.addf %991, %1002 : vector<1x1xf32>
    %1004 = vector.extract_strided_slice %608 {offsets = [0, 0], sizes = [1, 1], strides = [1, 1]} : vector<3x1xf32> to vector<1x1xf32>
    %1005 = arith.mulf %997, %1004 : vector<1x1xf32>
    %1006 = arith.addf %992, %1005 : vector<1x1xf32>
    %1007 = vector.broadcast %997 : vector<1x1xf32> to vector<16x32xf32>
    %1008 = arith.mulf %1007, %320 : vector<16x32xf32>
    %1009 = arith.addf %993, %1008 : vector<16x32xf32>
    %cst_240 = arith.constant 1.000000e+00 : f32
    %1010 = vector.broadcast %cst_240 : f32 to vector<1x1xf32>
    %1011 = arith.cmpf oeq, %939, %1010 : vector<1x1xf32>
    %1012 = arith.extui %1011 : vector<1x1xi1> to vector<1x1xi32>
    %1013 = arith.sitofp %1012 : vector<1x1xi32> to vector<1x1xf32>
    %1014 = vector.extract_strided_slice %54 {offsets = [1, 0], sizes = [1, 1], strides = [1, 1]} : vector<3x1xf32> to vector<1x1xf32>
    %1015 = arith.mulf %1013, %1014 : vector<1x1xf32>
    %1016 = arith.addf %1000, %1015 : vector<1x1xf32>
    %1017 = vector.extract_strided_slice %23 {offsets = [1, 0], sizes = [1, 1], strides = [1, 1]} : vector<3x1xf32> to vector<1x1xf32>
    %1018 = arith.mulf %1013, %1017 : vector<1x1xf32>
    %1019 = arith.addf %1003, %1018 : vector<1x1xf32>
    %1020 = vector.extract_strided_slice %608 {offsets = [1, 0], sizes = [1, 1], strides = [1, 1]} : vector<3x1xf32> to vector<1x1xf32>
    %1021 = arith.mulf %1013, %1020 : vector<1x1xf32>
    %1022 = arith.addf %1006, %1021 : vector<1x1xf32>
    %1023 = vector.broadcast %1013 : vector<1x1xf32> to vector<16x32xf32>
    %1024 = arith.mulf %1023, %345 : vector<16x32xf32>
    %1025 = arith.addf %1009, %1024 : vector<16x32xf32>
    %cst_241 = arith.constant 2.000000e+00 : f32
    %1026 = vector.broadcast %cst_241 : f32 to vector<1x1xf32>
    %1027 = arith.cmpf oeq, %939, %1026 : vector<1x1xf32>
    %1028 = arith.extui %1027 : vector<1x1xi1> to vector<1x1xi32>
    %1029 = arith.sitofp %1028 : vector<1x1xi32> to vector<1x1xf32>
    %1030 = vector.extract_strided_slice %54 {offsets = [2, 0], sizes = [1, 1], strides = [1, 1]} : vector<3x1xf32> to vector<1x1xf32>
    %1031 = arith.mulf %1029, %1030 : vector<1x1xf32>
    %1032 = arith.addf %1016, %1031 : vector<1x1xf32>
    %1033 = vector.extract_strided_slice %23 {offsets = [2, 0], sizes = [1, 1], strides = [1, 1]} : vector<3x1xf32> to vector<1x1xf32>
    %1034 = arith.mulf %1029, %1033 : vector<1x1xf32>
    %1035 = arith.addf %1019, %1034 : vector<1x1xf32>
    %1036 = vector.extract_strided_slice %608 {offsets = [2, 0], sizes = [1, 1], strides = [1, 1]} : vector<3x1xf32> to vector<1x1xf32>
    %1037 = arith.mulf %1029, %1036 : vector<1x1xf32>
    %1038 = arith.addf %1022, %1037 : vector<1x1xf32>
    %1039 = vector.broadcast %1029 : vector<1x1xf32> to vector<16x32xf32>
    %1040 = arith.mulf %1039, %370 : vector<16x32xf32>
    %1041 = arith.addf %1025, %1040 : vector<16x32xf32>
    %1042 = vector.broadcast %963 : vector<1x1xf32> to vector<1x16xf32>
    %1043 = arith.mulf %987, %1042 : vector<1x16xf32>
    %1044 = vector.shape_cast %968 : vector<3x1xi1> to vector<3x1xi1>
    %1045 = vector.broadcast %1044 : vector<3x1xi1> to vector<3x16xi1>
    %1046 = vector.shape_cast %1043 : vector<1x16xf32> to vector<1x16xf32>
    %1047 = vector.broadcast %1046 : vector<1x16xf32> to vector<3x16xf32>
    %1048 = arith.select %1045, %1047, %898 : vector<3x16xi1>, vector<3x16xf32>
    %1049 = vector.shape_cast %1032 : vector<1x1xf32> to vector<1x1xf32>
    %1050 = vector.broadcast %1049 : vector<1x1xf32> to vector<3x1xf32>
    %1051 = arith.select %968, %1050, %901 : vector<3x1xi1>, vector<3x1xf32>
    %1052 = arith.fptosi %1038 : vector<1x1xf32> to vector<1x1xi32>
    %1053 = vector.shape_cast %1052 : vector<1x1xi32> to vector<1x1xi32>
    %1054 = vector.broadcast %1053 : vector<1x1xi32> to vector<3x1xi32>
    %1055 = arith.select %968, %1054, %905 : vector<3x1xi1>, vector<3x1xi32>
    %1056 = arith.addf %1035, %966 : vector<1x1xf32>
    %1057 = vector.shape_cast %1056 : vector<1x1xf32> to vector<1x1xf32>
    %1058 = vector.broadcast %1057 : vector<1x1xf32> to vector<3x1xf32>
    %1059 = arith.select %968, %1058, %909 : vector<3x1xi1>, vector<3x1xf32>
    %1060 = vector.shape_cast %968 : vector<3x1xi1> to vector<3x1xi1>
    %1061 = vector.broadcast %1060 : vector<3x1xi1> to vector<3x32xi1>
    %1062 = vector.shape_cast %988 : vector<1x32xf32> to vector<1x32xf32>
    %1063 = vector.broadcast %1062 : vector<1x32xf32> to vector<3x32xf32>
    %1064 = arith.select %1061, %1063, %914 : vector<3x32xi1>, vector<3x32xf32>
    %1065 = vector.shape_cast %968 : vector<3x1xi1> to vector<3x1xi1>
    %1066 = vector.broadcast %1065 : vector<3x1xi1> to vector<3x32xi1>
    %1067 = vector.shape_cast %989 : vector<1x32xf32> to vector<1x32xf32>
    %1068 = vector.broadcast %1067 : vector<1x32xf32> to vector<3x32xf32>
    %1069 = arith.select %1066, %1068, %919 : vector<3x32xi1>, vector<3x32xf32>
    %c2_242 = arith.constant 2 : index
    %c0_243 = arith.constant 0 : index
    %c0_244 = arith.constant 0 : index
    %1070 = vector.load %arg31[%c2_242, %c0_243, %c0_244] : memref<3x16x32xf32, #tpu.memory_space<vmem>>, vector<1x16x32xf32>
    %1071 = vector.shape_cast %1070 : vector<1x16x32xf32> to vector<16x32xf32>
    %1072 = vector.shape_cast %1041 : vector<16x32xf32> to vector<1x16x32xf32>
    tpu.vector_store %arg31[%c2_242, %c0_243, %c0_244], %1072 {strides = array<i32>} : memref<3x16x32xf32, #tpu.memory_space<vmem>>, vector<1x16x32xf32>,
    %c0_245 = arith.constant 0 : index
    %c0_246 = arith.constant 0 : index
    %1073 = vector.load %arg24[%c0_245, %c0_246] : memref<3x16xf32, #tpu.memory_space<vmem>>, vector<3x16xf32>
    tpu.vector_store %arg24[%c0_245, %c0_246], %1048 {strides = array<i32>} : memref<3x16xf32, #tpu.memory_space<vmem>>, vector<3x16xf32>,
    %c0_247 = arith.constant 0 : index
    %c0_248 = arith.constant 0 : index
    %1074 = vector.load %arg25[%c0_247, %c0_248] : memref<3x1xf32, #tpu.memory_space<vmem>>, vector<3x1xf32>
    tpu.vector_store %arg25[%c0_247, %c0_248], %1051 {strides = array<i32>} : memref<3x1xf32, #tpu.memory_space<vmem>>, vector<3x1xf32>,
    %c0_249 = arith.constant 0 : index
    %c0_250 = arith.constant 0 : index
    %1075 = vector.load %arg26[%c0_249, %c0_250] : memref<3x1xi32, #tpu.memory_space<vmem>>, vector<3x1xi32>
    tpu.vector_store %arg26[%c0_249, %c0_250], %1055 {strides = array<i32>} : memref<3x1xi32, #tpu.memory_space<vmem>>, vector<3x1xi32>,
    %c0_251 = arith.constant 0 : index
    %c0_252 = arith.constant 0 : index
    %1076 = vector.load %arg27[%c0_251, %c0_252] : memref<3x1xf32, #tpu.memory_space<vmem>>, vector<3x1xf32>
    tpu.vector_store %arg27[%c0_251, %c0_252], %982 {strides = array<i32>} : memref<3x1xf32, #tpu.memory_space<vmem>>, vector<3x1xf32>,
    %c0_253 = arith.constant 0 : index
    %c0_254 = arith.constant 0 : index
    %1077 = vector.load %arg28[%c0_253, %c0_254] : memref<3x1xf32, #tpu.memory_space<vmem>>, vector<3x1xf32>
    tpu.vector_store %arg28[%c0_253, %c0_254], %1059 {strides = array<i32>} : memref<3x1xf32, #tpu.memory_space<vmem>>, vector<3x1xf32>,
    %c0_255 = arith.constant 0 : index
    %c0_256 = arith.constant 0 : index
    %1078 = vector.load %arg29[%c0_255, %c0_256] : memref<3x32xf32, #tpu.memory_space<vmem>>, vector<3x32xf32>
    tpu.vector_store %arg29[%c0_255, %c0_256], %1064 {strides = array<i32>} : memref<3x32xf32, #tpu.memory_space<vmem>>, vector<3x32xf32>,
    %c0_257 = arith.constant 0 : index
    %c0_258 = arith.constant 0 : index
    %1079 = vector.load %arg30[%c0_257, %c0_258] : memref<3x32xf32, #tpu.memory_space<vmem>>, vector<3x32xf32>
    tpu.vector_store %arg30[%c0_257, %c0_258], %1069 {strides = array<i32>} : memref<3x32xf32, #tpu.memory_space<vmem>>, vector<3x32xf32>,
    %c0_259 = arith.constant 0 : index
    %c0_260 = arith.constant 0 : index
    %1080 = vector.load %arg32[%c0_259, %c0_260] : memref<3x1xi32, #tpu.memory_space<vmem>>, vector<3x1xi32>
    tpu.vector_store %arg32[%c0_259, %c0_260], %976 {strides = array<i32>} : memref<3x1xi32, #tpu.memory_space<vmem>>, vector<3x1xi32>,
    %c0_261 = arith.constant 0 : index
    %c0_262 = arith.constant 0 : index
    %1081 = vector.load %arg33[%c0_261, %c0_262] : memref<3x1xf32, #tpu.memory_space<vmem>>, vector<3x1xf32>
    tpu.vector_store %arg33[%c0_261, %c0_262], %979 {strides = array<i32>} : memref<3x1xf32, #tpu.memory_space<vmem>>, vector<3x1xf32>,
    %c0_263 = arith.constant 0 : index
    %c0_264 = arith.constant 0 : index
    %1082 = vector.load %arg34[%c0_263, %c0_264] : memref<3x1xi32, #tpu.memory_space<vmem>>, vector<3x1xi32>
    tpu.vector_store %arg34[%c0_263, %c0_264], %972 {strides = array<i32>} : memref<3x1xi32, #tpu.memory_space<vmem>>, vector<3x1xi32>,
    return
  }
}

module attributes {stable_mosaic.version = 11 : i64} {
  func.func @_init_kernel(%arg0: memref<16x16xf32, #tpu.memory_space<vmem>>, %arg1: memref<16x16xf32, #tpu.memory_space<vmem>>, %arg2: memref<4x16xf32, #tpu.memory_space<vmem>>, %arg3: memref<16x1xf32, #tpu.memory_space<vmem>>, %arg4: memref<16x1xf32, #tpu.memory_space<vmem>>, %arg5: memref<16x1xf32, #tpu.memory_space<vmem>>, %arg6: memref<16x32xf32, #tpu.memory_space<vmem>>, %arg7: memref<4x32xf32, #tpu.memory_space<vmem>>, %arg8: memref<32x96xf32, #tpu.memory_space<vmem>>, %arg9: memref<32x128xf32, #tpu.memory_space<vmem>>, %arg10: memref<32x128xf32, #tpu.memory_space<vmem>>, %arg11: memref<1x128xf32, #tpu.memory_space<vmem>>, %arg12: memref<32x32xf32, #tpu.memory_space<vmem>>, %arg13: memref<32x32xf32, #tpu.memory_space<vmem>>, %arg14: memref<1x32xf32, #tpu.memory_space<vmem>>, %arg15: memref<1x32xf32, #tpu.memory_space<vmem>>, %arg16: memref<1x32xf32, #tpu.memory_space<vmem>>, %arg17: memref<3x1xf32, #tpu.memory_space<vmem>>, %arg18: memref<3x16xf32, #tpu.memory_space<vmem>>, %arg19: memref<3x1xf32, #tpu.memory_space<vmem>>, %arg20: memref<3x1xi32, #tpu.memory_space<vmem>>, %arg21: memref<3x1xf32, #tpu.memory_space<vmem>>, %arg22: memref<3x1xf32, #tpu.memory_space<vmem>>, %arg23: memref<3x32xf32, #tpu.memory_space<vmem>>, %arg24: memref<3x32xf32, #tpu.memory_space<vmem>>, %arg25: memref<3x16x32xf32, #tpu.memory_space<vmem>>, %arg26: memref<3x1xi32, #tpu.memory_space<vmem>>, %arg27: memref<3x1xf32, #tpu.memory_space<vmem>>, %arg28: memref<3x1xi32, #tpu.memory_space<vmem>>, %arg29: memref<3x1xf32, #tpu.memory_space<vmem>>) attributes {dimension_semantics = [], scalar_prefetch = 0 : i64, scratch_operands = 0 : i64, tpu.core_type = #tpu.core_type<tc>} {
    %c0 = arith.constant 0 : index
    %c0_0 = arith.constant 0 : index
    %0 = vector.load %arg2[%c0, %c0_0] : memref<4x16xf32, #tpu.memory_space<vmem>>, vector<4x16xf32>
    %c0_1 = arith.constant 0 : index
    %c0_2 = arith.constant 0 : index
    %1 = vector.load %arg0[%c0_1, %c0_2] : memref<16x16xf32, #tpu.memory_space<vmem>>, vector<16x16xf32>
    %c0_3 = arith.constant 0 : index
    %c0_4 = arith.constant 0 : index
    %2 = vector.load %arg1[%c0_3, %c0_4] : memref<16x16xf32, #tpu.memory_space<vmem>>, vector<16x16xf32>
    %3 = vector.extract_strided_slice %0 {offsets = [0, 0], sizes = [1, 16], strides = [1, 1]} : vector<4x16xf32> to vector<1x16xf32>
    %4 = vector.extract_strided_slice %0 {offsets = [1, 0], sizes = [1, 16], strides = [1, 1]} : vector<4x16xf32> to vector<1x16xf32>
    %5 = vector.extract_strided_slice %0 {offsets = [3, 0], sizes = [1, 16], strides = [1, 1]} : vector<4x16xf32> to vector<1x16xf32>
    %c0_5 = arith.constant 0 : index
    %c0_6 = arith.constant 0 : index
    %6 = vector.load %arg3[%c0_5, %c0_6] : memref<16x1xf32, #tpu.memory_space<vmem>>, vector<16x1xf32>
    %c0_7 = arith.constant 0 : index
    %c0_8 = arith.constant 0 : index
    %7 = vector.load %arg4[%c0_7, %c0_8] : memref<16x1xf32, #tpu.memory_space<vmem>>, vector<16x1xf32>
    %c0_9 = arith.constant 0 : index
    %c0_10 = arith.constant 0 : index
    %8 = vector.load %arg5[%c0_9, %c0_10] : memref<16x1xf32, #tpu.memory_space<vmem>>, vector<16x1xf32>
    %c0_11 = arith.constant 0 : index
    %c0_12 = arith.constant 0 : index
    %9 = vector.load %arg6[%c0_11, %c0_12] : memref<16x32xf32, #tpu.memory_space<vmem>>, vector<16x32xf32>
    %c0_13 = arith.constant 0 : index
    %c0_14 = arith.constant 0 : index
    %10 = vector.load %arg7[%c0_13, %c0_14] : memref<4x32xf32, #tpu.memory_space<vmem>>, vector<4x32xf32>
    %c0_15 = arith.constant 0 : index
    %c0_16 = arith.constant 0 : index
    %11 = vector.load %arg8[%c0_15, %c0_16] : memref<32x96xf32, #tpu.memory_space<vmem>>, vector<32x96xf32>
    %c0_17 = arith.constant 0 : index
    %c0_18 = arith.constant 0 : index
    %12 = vector.load %arg9[%c0_17, %c0_18] : memref<32x128xf32, #tpu.memory_space<vmem>>, vector<32x128xf32>
    %c0_19 = arith.constant 0 : index
    %c0_20 = arith.constant 0 : index
    %13 = vector.load %arg10[%c0_19, %c0_20] : memref<32x128xf32, #tpu.memory_space<vmem>>, vector<32x128xf32>
    %c0_21 = arith.constant 0 : index
    %c0_22 = arith.constant 0 : index
    %14 = vector.load %arg11[%c0_21, %c0_22] : memref<1x128xf32, #tpu.memory_space<vmem>>, vector<1x128xf32>
    %c0_23 = arith.constant 0 : index
    %c0_24 = arith.constant 0 : index
    %15 = vector.load %arg12[%c0_23, %c0_24] : memref<32x32xf32, #tpu.memory_space<vmem>>, vector<32x32xf32>
    %c0_25 = arith.constant 0 : index
    %c0_26 = arith.constant 0 : index
    %16 = vector.load %arg13[%c0_25, %c0_26] : memref<32x32xf32, #tpu.memory_space<vmem>>, vector<32x32xf32>
    %c0_27 = arith.constant 0 : index
    %c0_28 = arith.constant 0 : index
    %17 = vector.load %arg14[%c0_27, %c0_28] : memref<1x32xf32, #tpu.memory_space<vmem>>, vector<1x32xf32>
    %c0_29 = arith.constant 0 : index
    %c0_30 = arith.constant 0 : index
    %18 = vector.load %arg17[%c0_29, %c0_30] : memref<3x1xf32, #tpu.memory_space<vmem>>, vector<3x1xf32>
    %19 = tpu.iota {dimensions = array<i32: 0>} : vector<3x1xi32>
    %c0_i32 = arith.constant 0 : i32
    %20 = vector.broadcast %c0_i32 : i32 to vector<3x1xi32>
    %21 = arith.cmpi eq, %19, %20 : vector<3x1xi32>
    %22 = arith.extui %21 : vector<3x1xi1> to vector<3x1xi32>
    %23 = arith.sitofp %22 : vector<3x1xi32> to vector<3x1xf32>
    %24 = tpu.iota {dimensions = array<i32: 0>} : vector<3x16xi32>
    %c0_i32_31 = arith.constant 0 : i32
    %25 = vector.broadcast %c0_i32_31 : i32 to vector<3x16xi32>
    %26 = arith.cmpi eq, %24, %25 : vector<3x16xi32>
    %27 = arith.extui %26 : vector<3x16xi1> to vector<3x16xi32>
    %28 = arith.sitofp %27 : vector<3x16xi32> to vector<3x16xf32>
    %c0_i32_32 = arith.constant 0 : i32
    %29 = vector.broadcast %c0_i32_32 : i32 to vector<3x1xi32>
    %cst = arith.constant 0.000000e+00 : f32
    %30 = vector.broadcast %cst : f32 to vector<3x1xf32>
    %31 = tpu.iota {dimensions = array<i32: 1>} : vector<3x16xi32>
    %32 = vector.broadcast %29 : vector<3x1xi32> to vector<3x16xi32>
    %33 = arith.cmpi eq, %31, %32 : vector<3x16xi32>
    %34 = arith.extui %33 : vector<3x16xi1> to vector<3x16xi32>
    %35 = arith.sitofp %34 : vector<3x16xi32> to vector<3x16xf32>
    %cst_33 = arith.constant dense<0.000000e+00> : vector<3x16xf32>
    %36 = tpu.matmul %35, %1, %cst_33 {dimension_numbers = #tpu.dot_dimension_numbers<[1], [0], [0], [1], [0, 0, 1, 1], [], []>} : vector<3x16xf32>, vector<16x16xf32>, vector<3x16xf32> -> vector<3x16xf32>
    %37 = vector.broadcast %18 : vector<3x1xf32> to vector<3x16xf32>
    %38 = arith.addf %36, %37 : vector<3x16xf32>
    %39 = vector.broadcast %3 : vector<1x16xf32> to vector<3x16xf32>
    %40 = arith.subf %39, %38 : vector<3x16xf32>
    %cst_34 = arith.constant 0.000000e+00 : f32
    %41 = vector.broadcast %cst_34 : f32 to vector<3x16xf32>
    %42 = arith.maximumf %41, %40 : vector<3x16xf32>
    %43 = arith.addf %38, %42 : vector<3x16xf32>
    %44 = vector.broadcast %4 : vector<1x16xf32> to vector<3x16xf32>
    %45 = arith.cmpf ole, %43, %44 : vector<3x16xf32>
    %46 = arith.extui %45 : vector<3x16xi1> to vector<3x16xi32>
    %47 = arith.sitofp %46 : vector<3x16xi32> to vector<3x16xf32>
    %48 = arith.addf %38, %42 : vector<3x16xf32>
    %49 = vector.broadcast %5 : vector<1x16xf32> to vector<3x16xf32>
    %50 = arith.cmpf ole, %48, %49 : vector<3x16xf32>
    %51 = arith.extui %50 : vector<3x16xi1> to vector<3x16xi32>
    %52 = arith.sitofp %51 : vector<3x16xi32> to vector<3x16xf32>
    %53 = arith.mulf %28, %47 : vector<3x16xf32>
    %54 = arith.mulf %53, %52 : vector<3x16xf32>
    %55 = vector.broadcast %23 : vector<3x1xf32> to vector<3x16xf32>
    %56 = arith.mulf %54, %55 : vector<3x16xf32>
    %57 = vector.extract_strided_slice %29 {offsets = [0, 0], sizes = [1, 1], strides = [1, 1]} : vector<3x1xi32> to vector<1x1xi32>
    %58 = vector.extract_strided_slice %18 {offsets = [0, 0], sizes = [1, 1], strides = [1, 1]} : vector<3x1xf32> to vector<1x1xf32>
    %59 = tpu.iota {dimensions = array<i32: 0>} : vector<16x1xi32>
    %60 = vector.broadcast %57 : vector<1x1xi32> to vector<16x1xi32>
    %61 = arith.cmpi eq, %59, %60 : vector<16x1xi32>
    %62 = arith.extui %61 : vector<16x1xi1> to vector<16x1xi32>
    %63 = arith.sitofp %62 : vector<16x1xi32> to vector<16x1xf32>
    %cst_35 = arith.constant dense<0.000000e+00> : vector<16x1xf32>
    %64 = tpu.matmul %2, %63, %cst_35 {dimension_numbers = #tpu.dot_dimension_numbers<[1], [0], [0], [1], [0, 0, 1, 1], [], []>} : vector<16x16xf32>, vector<16x1xf32>, vector<16x1xf32> -> vector<16x1xf32>
    %65 = vector.broadcast %58 : vector<1x1xf32> to vector<16x1xf32>
    %66 = arith.addf %64, %65 : vector<16x1xf32>
    %67 = arith.subf %6, %66 : vector<16x1xf32>
    %cst_36 = arith.constant 0.000000e+00 : f32
    %68 = vector.broadcast %cst_36 : f32 to vector<16x1xf32>
    %69 = arith.maximumf %68, %67 : vector<16x1xf32>
    %70 = arith.addf %66, %69 : vector<16x1xf32>
    %71 = arith.subf %7, %70 : vector<16x1xf32>
    %72 = vector.extract_strided_slice %10 {offsets = [0, 0], sizes = [1, 32], strides = [1, 1]} : vector<4x32xf32> to vector<1x32xf32>
    %73 = vector.broadcast %66 : vector<16x1xf32> to vector<16x32xf32>
    %74 = vector.broadcast %72 : vector<1x32xf32> to vector<16x32xf32>
    %75 = arith.mulf %73, %74 : vector<16x32xf32>
    %76 = vector.extract_strided_slice %10 {offsets = [1, 0], sizes = [1, 32], strides = [1, 1]} : vector<4x32xf32> to vector<1x32xf32>
    %77 = vector.broadcast %69 : vector<16x1xf32> to vector<16x32xf32>
    %78 = vector.broadcast %76 : vector<1x32xf32> to vector<16x32xf32>
    %79 = arith.mulf %77, %78 : vector<16x32xf32>
    %80 = arith.addf %75, %79 : vector<16x32xf32>
    %81 = vector.extract_strided_slice %10 {offsets = [2, 0], sizes = [1, 32], strides = [1, 1]} : vector<4x32xf32> to vector<1x32xf32>
    %82 = vector.broadcast %71 : vector<16x1xf32> to vector<16x32xf32>
    %83 = vector.broadcast %81 : vector<1x32xf32> to vector<16x32xf32>
    %84 = arith.mulf %82, %83 : vector<16x32xf32>
    %85 = arith.addf %80, %84 : vector<16x32xf32>
    %86 = vector.extract_strided_slice %10 {offsets = [3, 0], sizes = [1, 32], strides = [1, 1]} : vector<4x32xf32> to vector<1x32xf32>
    %87 = vector.broadcast %58 : vector<1x1xf32> to vector<1x32xf32>
    %88 = arith.mulf %87, %86 : vector<1x32xf32>
    %89 = vector.broadcast %88 : vector<1x32xf32> to vector<16x32xf32>
    %90 = arith.addf %85, %89 : vector<16x32xf32>
    %91 = arith.addf %9, %90 : vector<16x32xf32>
    %92 = arith.addf %66, %69 : vector<16x1xf32>
    %93 = arith.addf %92, %8 : vector<16x1xf32>
    %94 = vector.extract_strided_slice %56 {offsets = [0, 0], sizes = [1, 16], strides = [1, 1]} : vector<3x16xf32> to vector<1x16xf32>
    %95 = vector.broadcast %93 : vector<16x1xf32> to vector<16x16xf32>
    %96 = arith.addf %1, %95 : vector<16x16xf32>
    %97 = vector.broadcast %6 : vector<16x1xf32> to vector<16x16xf32>
    %98 = arith.subf %97, %96 : vector<16x16xf32>
    %cst_37 = arith.constant 0.000000e+00 : f32
    %99 = vector.broadcast %cst_37 : f32 to vector<16x16xf32>
    %100 = arith.maximumf %99, %98 : vector<16x16xf32>
    %101 = arith.addf %96, %100 : vector<16x16xf32>
    %102 = vector.broadcast %4 : vector<1x16xf32> to vector<16x16xf32>
    %103 = arith.cmpf ole, %101, %102 : vector<16x16xf32>
    %104 = arith.extui %103 : vector<16x16xi1> to vector<16x16xi32>
    %105 = arith.sitofp %104 : vector<16x16xi32> to vector<16x16xf32>
    %106 = vector.broadcast %5 : vector<1x16xf32> to vector<16x16xf32>
    %107 = arith.cmpf ole, %101, %106 : vector<16x16xf32>
    %108 = arith.extui %107 : vector<16x16xi1> to vector<16x16xi32>
    %109 = arith.sitofp %108 : vector<16x16xi32> to vector<16x16xf32>
    %110 = vector.broadcast %94 : vector<1x16xf32> to vector<16x16xf32>
    %111 = arith.mulf %110, %105 : vector<16x16xf32>
    %112 = arith.mulf %111, %109 : vector<16x16xf32>
    %113 = tpu.iota {dimensions = array<i32: 0>} : vector<16x16xi32>
    %114 = tpu.iota {dimensions = array<i32: 1>} : vector<16x16xi32>
    %115 = arith.cmpi eq, %113, %114 : vector<16x16xi32>
    %cst_38 = arith.constant 1.000000e+00 : f32
    %116 = vector.broadcast %cst_38 : f32 to vector<16x16xf32>
    %117 = arith.select %115, %116, %112 : vector<16x16xi1>, vector<16x16xf32>
    %118 = vector.extract_strided_slice %29 {offsets = [1, 0], sizes = [1, 1], strides = [1, 1]} : vector<3x1xi32> to vector<1x1xi32>
    %119 = vector.extract_strided_slice %18 {offsets = [1, 0], sizes = [1, 1], strides = [1, 1]} : vector<3x1xf32> to vector<1x1xf32>
    %120 = tpu.iota {dimensions = array<i32: 0>} : vector<16x1xi32>
    %121 = vector.broadcast %118 : vector<1x1xi32> to vector<16x1xi32>
    %122 = arith.cmpi eq, %120, %121 : vector<16x1xi32>
    %123 = arith.extui %122 : vector<16x1xi1> to vector<16x1xi32>
    %124 = arith.sitofp %123 : vector<16x1xi32> to vector<16x1xf32>
    %cst_39 = arith.constant dense<0.000000e+00> : vector<16x1xf32>
    %125 = tpu.matmul %2, %124, %cst_39 {dimension_numbers = #tpu.dot_dimension_numbers<[1], [0], [0], [1], [0, 0, 1, 1], [], []>} : vector<16x16xf32>, vector<16x1xf32>, vector<16x1xf32> -> vector<16x1xf32>
    %126 = vector.broadcast %119 : vector<1x1xf32> to vector<16x1xf32>
    %127 = arith.addf %125, %126 : vector<16x1xf32>
    %128 = arith.subf %6, %127 : vector<16x1xf32>
    %cst_40 = arith.constant 0.000000e+00 : f32
    %129 = vector.broadcast %cst_40 : f32 to vector<16x1xf32>
    %130 = arith.maximumf %129, %128 : vector<16x1xf32>
    %131 = arith.addf %127, %130 : vector<16x1xf32>
    %132 = arith.subf %7, %131 : vector<16x1xf32>
    %133 = vector.extract_strided_slice %10 {offsets = [0, 0], sizes = [1, 32], strides = [1, 1]} : vector<4x32xf32> to vector<1x32xf32>
    %134 = vector.broadcast %127 : vector<16x1xf32> to vector<16x32xf32>
    %135 = vector.broadcast %133 : vector<1x32xf32> to vector<16x32xf32>
    %136 = arith.mulf %134, %135 : vector<16x32xf32>
    %137 = vector.extract_strided_slice %10 {offsets = [1, 0], sizes = [1, 32], strides = [1, 1]} : vector<4x32xf32> to vector<1x32xf32>
    %138 = vector.broadcast %130 : vector<16x1xf32> to vector<16x32xf32>
    %139 = vector.broadcast %137 : vector<1x32xf32> to vector<16x32xf32>
    %140 = arith.mulf %138, %139 : vector<16x32xf32>
    %141 = arith.addf %136, %140 : vector<16x32xf32>
    %142 = vector.extract_strided_slice %10 {offsets = [2, 0], sizes = [1, 32], strides = [1, 1]} : vector<4x32xf32> to vector<1x32xf32>
    %143 = vector.broadcast %132 : vector<16x1xf32> to vector<16x32xf32>
    %144 = vector.broadcast %142 : vector<1x32xf32> to vector<16x32xf32>
    %145 = arith.mulf %143, %144 : vector<16x32xf32>
    %146 = arith.addf %141, %145 : vector<16x32xf32>
    %147 = vector.extract_strided_slice %10 {offsets = [3, 0], sizes = [1, 32], strides = [1, 1]} : vector<4x32xf32> to vector<1x32xf32>
    %148 = vector.broadcast %119 : vector<1x1xf32> to vector<1x32xf32>
    %149 = arith.mulf %148, %147 : vector<1x32xf32>
    %150 = vector.broadcast %149 : vector<1x32xf32> to vector<16x32xf32>
    %151 = arith.addf %146, %150 : vector<16x32xf32>
    %152 = arith.addf %9, %151 : vector<16x32xf32>
    %153 = arith.addf %127, %130 : vector<16x1xf32>
    %154 = arith.addf %153, %8 : vector<16x1xf32>
    %155 = vector.extract_strided_slice %56 {offsets = [1, 0], sizes = [1, 16], strides = [1, 1]} : vector<3x16xf32> to vector<1x16xf32>
    %156 = vector.broadcast %154 : vector<16x1xf32> to vector<16x16xf32>
    %157 = arith.addf %1, %156 : vector<16x16xf32>
    %158 = vector.broadcast %6 : vector<16x1xf32> to vector<16x16xf32>
    %159 = arith.subf %158, %157 : vector<16x16xf32>
    %cst_41 = arith.constant 0.000000e+00 : f32
    %160 = vector.broadcast %cst_41 : f32 to vector<16x16xf32>
    %161 = arith.maximumf %160, %159 : vector<16x16xf32>
    %162 = arith.addf %157, %161 : vector<16x16xf32>
    %163 = vector.broadcast %4 : vector<1x16xf32> to vector<16x16xf32>
    %164 = arith.cmpf ole, %162, %163 : vector<16x16xf32>
    %165 = arith.extui %164 : vector<16x16xi1> to vector<16x16xi32>
    %166 = arith.sitofp %165 : vector<16x16xi32> to vector<16x16xf32>
    %167 = vector.broadcast %5 : vector<1x16xf32> to vector<16x16xf32>
    %168 = arith.cmpf ole, %162, %167 : vector<16x16xf32>
    %169 = arith.extui %168 : vector<16x16xi1> to vector<16x16xi32>
    %170 = arith.sitofp %169 : vector<16x16xi32> to vector<16x16xf32>
    %171 = vector.broadcast %155 : vector<1x16xf32> to vector<16x16xf32>
    %172 = arith.mulf %171, %166 : vector<16x16xf32>
    %173 = arith.mulf %172, %170 : vector<16x16xf32>
    %174 = tpu.iota {dimensions = array<i32: 0>} : vector<16x16xi32>
    %175 = tpu.iota {dimensions = array<i32: 1>} : vector<16x16xi32>
    %176 = arith.cmpi eq, %174, %175 : vector<16x16xi32>
    %cst_42 = arith.constant 1.000000e+00 : f32
    %177 = vector.broadcast %cst_42 : f32 to vector<16x16xf32>
    %178 = arith.select %176, %177, %173 : vector<16x16xi1>, vector<16x16xf32>
    %179 = vector.extract_strided_slice %29 {offsets = [2, 0], sizes = [1, 1], strides = [1, 1]} : vector<3x1xi32> to vector<1x1xi32>
    %180 = vector.extract_strided_slice %18 {offsets = [2, 0], sizes = [1, 1], strides = [1, 1]} : vector<3x1xf32> to vector<1x1xf32>
    %181 = tpu.iota {dimensions = array<i32: 0>} : vector<16x1xi32>
    %182 = vector.broadcast %179 : vector<1x1xi32> to vector<16x1xi32>
    %183 = arith.cmpi eq, %181, %182 : vector<16x1xi32>
    %184 = arith.extui %183 : vector<16x1xi1> to vector<16x1xi32>
    %185 = arith.sitofp %184 : vector<16x1xi32> to vector<16x1xf32>
    %cst_43 = arith.constant dense<0.000000e+00> : vector<16x1xf32>
    %186 = tpu.matmul %2, %185, %cst_43 {dimension_numbers = #tpu.dot_dimension_numbers<[1], [0], [0], [1], [0, 0, 1, 1], [], []>} : vector<16x16xf32>, vector<16x1xf32>, vector<16x1xf32> -> vector<16x1xf32>
    %187 = vector.broadcast %180 : vector<1x1xf32> to vector<16x1xf32>
    %188 = arith.addf %186, %187 : vector<16x1xf32>
    %189 = arith.subf %6, %188 : vector<16x1xf32>
    %cst_44 = arith.constant 0.000000e+00 : f32
    %190 = vector.broadcast %cst_44 : f32 to vector<16x1xf32>
    %191 = arith.maximumf %190, %189 : vector<16x1xf32>
    %192 = arith.addf %188, %191 : vector<16x1xf32>
    %193 = arith.subf %7, %192 : vector<16x1xf32>
    %194 = vector.extract_strided_slice %10 {offsets = [0, 0], sizes = [1, 32], strides = [1, 1]} : vector<4x32xf32> to vector<1x32xf32>
    %195 = vector.broadcast %188 : vector<16x1xf32> to vector<16x32xf32>
    %196 = vector.broadcast %194 : vector<1x32xf32> to vector<16x32xf32>
    %197 = arith.mulf %195, %196 : vector<16x32xf32>
    %198 = vector.extract_strided_slice %10 {offsets = [1, 0], sizes = [1, 32], strides = [1, 1]} : vector<4x32xf32> to vector<1x32xf32>
    %199 = vector.broadcast %191 : vector<16x1xf32> to vector<16x32xf32>
    %200 = vector.broadcast %198 : vector<1x32xf32> to vector<16x32xf32>
    %201 = arith.mulf %199, %200 : vector<16x32xf32>
    %202 = arith.addf %197, %201 : vector<16x32xf32>
    %203 = vector.extract_strided_slice %10 {offsets = [2, 0], sizes = [1, 32], strides = [1, 1]} : vector<4x32xf32> to vector<1x32xf32>
    %204 = vector.broadcast %193 : vector<16x1xf32> to vector<16x32xf32>
    %205 = vector.broadcast %203 : vector<1x32xf32> to vector<16x32xf32>
    %206 = arith.mulf %204, %205 : vector<16x32xf32>
    %207 = arith.addf %202, %206 : vector<16x32xf32>
    %208 = vector.extract_strided_slice %10 {offsets = [3, 0], sizes = [1, 32], strides = [1, 1]} : vector<4x32xf32> to vector<1x32xf32>
    %209 = vector.broadcast %180 : vector<1x1xf32> to vector<1x32xf32>
    %210 = arith.mulf %209, %208 : vector<1x32xf32>
    %211 = vector.broadcast %210 : vector<1x32xf32> to vector<16x32xf32>
    %212 = arith.addf %207, %211 : vector<16x32xf32>
    %213 = arith.addf %9, %212 : vector<16x32xf32>
    %214 = arith.addf %188, %191 : vector<16x1xf32>
    %215 = arith.addf %214, %8 : vector<16x1xf32>
    %216 = vector.extract_strided_slice %56 {offsets = [2, 0], sizes = [1, 16], strides = [1, 1]} : vector<3x16xf32> to vector<1x16xf32>
    %217 = vector.broadcast %215 : vector<16x1xf32> to vector<16x16xf32>
    %218 = arith.addf %1, %217 : vector<16x16xf32>
    %219 = vector.broadcast %6 : vector<16x1xf32> to vector<16x16xf32>
    %220 = arith.subf %219, %218 : vector<16x16xf32>
    %cst_45 = arith.constant 0.000000e+00 : f32
    %221 = vector.broadcast %cst_45 : f32 to vector<16x16xf32>
    %222 = arith.maximumf %221, %220 : vector<16x16xf32>
    %223 = arith.addf %218, %222 : vector<16x16xf32>
    %224 = vector.broadcast %4 : vector<1x16xf32> to vector<16x16xf32>
    %225 = arith.cmpf ole, %223, %224 : vector<16x16xf32>
    %226 = arith.extui %225 : vector<16x16xi1> to vector<16x16xi32>
    %227 = arith.sitofp %226 : vector<16x16xi32> to vector<16x16xf32>
    %228 = vector.broadcast %5 : vector<1x16xf32> to vector<16x16xf32>
    %229 = arith.cmpf ole, %223, %228 : vector<16x16xf32>
    %230 = arith.extui %229 : vector<16x16xi1> to vector<16x16xi32>
    %231 = arith.sitofp %230 : vector<16x16xi32> to vector<16x16xf32>
    %232 = vector.broadcast %216 : vector<1x16xf32> to vector<16x16xf32>
    %233 = arith.mulf %232, %227 : vector<16x16xf32>
    %234 = arith.mulf %233, %231 : vector<16x16xf32>
    %235 = tpu.iota {dimensions = array<i32: 0>} : vector<16x16xi32>
    %236 = tpu.iota {dimensions = array<i32: 1>} : vector<16x16xi32>
    %237 = arith.cmpi eq, %235, %236 : vector<16x16xi32>
    %cst_46 = arith.constant 1.000000e+00 : f32
    %238 = vector.broadcast %cst_46 : f32 to vector<16x16xf32>
    %239 = arith.select %237, %238, %234 : vector<16x16xi1>, vector<16x16xf32>
    %240 = tpu.concatenate %91, %152, %213 in 0 : vector<16x32xf32>, vector<16x32xf32>, vector<16x32xf32> -> vector<48x32xf32>
    %cst_47 = arith.constant dense<0.000000e+00> : vector<48x96xf32>
    %241 = tpu.matmul %240, %11, %cst_47 {dimension_numbers = #tpu.dot_dimension_numbers<[1], [0], [0], [1], [0, 0, 1, 1], [], []>} : vector<48x32xf32>, vector<32x96xf32>, vector<48x96xf32> -> vector<48x96xf32>
    %242 = vector.extract_strided_slice %241 {offsets = [0, 0], sizes = [16, 96], strides = [1, 1]} : vector<48x96xf32> to vector<16x96xf32>
    %243 = vector.extract_strided_slice %242 {offsets = [0, 0], sizes = [16, 32], strides = [1, 1]} : vector<16x96xf32> to vector<16x32xf32>
    %244 = vector.extract_strided_slice %242 {offsets = [0, 32], sizes = [16, 32], strides = [1, 1]} : vector<16x96xf32> to vector<16x32xf32>
    %245 = vector.extract_strided_slice %242 {offsets = [0, 64], sizes = [16, 32], strides = [1, 1]} : vector<16x96xf32> to vector<16x32xf32>
    %246 = tpu.transpose %244, [1, 0] : vector<16x32xf32> -> vector<32x16xf32>
    %cst_48 = arith.constant dense<0.000000e+00> : vector<16x16xf32>
    %247 = tpu.matmul %243, %246, %cst_48 {dimension_numbers = #tpu.dot_dimension_numbers<[1], [0], [0], [1], [0, 0, 1, 1], [], []>} : vector<16x32xf32>, vector<32x16xf32>, vector<16x16xf32> -> vector<16x16xf32>
    %cst_49 = arith.constant 0.176776692 : f32
    %248 = vector.broadcast %cst_49 : f32 to vector<16x16xf32>
    %249 = arith.mulf %247, %248 : vector<16x16xf32>
    %cst_50 = arith.constant 0.000000e+00 : f32
    %250 = vector.broadcast %cst_50 : f32 to vector<16x16xf32>
    %251 = arith.cmpf ogt, %117, %250 : vector<16x16xf32>
    %cst_51 = arith.constant -1.000000e+09 : f32
    %252 = vector.broadcast %cst_51 : f32 to vector<16x16xf32>
    %253 = arith.select %251, %249, %252 : vector<16x16xi1>, vector<16x16xf32>
    %cst_52 = arith.constant dense<0xFF800000> : vector<16xf32>
    %254 = vector.multi_reduction <maximumf>, %253, %cst_52 [1] : vector<16x16xf32> to vector<16xf32>
    %255 = vector.shape_cast %254 : vector<16xf32> to vector<16x1xf32>
    %256 = vector.broadcast %255 : vector<16x1xf32> to vector<16x16xf32>
    %257 = arith.subf %253, %256 : vector<16x16xf32>
    %258 = math.exp %257 : vector<16x16xf32>
    %cst_53 = arith.constant dense<0.000000e+00> : vector<16xf32>
    %259 = vector.multi_reduction <add>, %258, %cst_53 [1] : vector<16x16xf32> to vector<16xf32>
    %260 = vector.shape_cast %259 : vector<16xf32> to vector<16x1xf32>
    %261 = tpu.reciprocal %260 {approx = true} : vector<16x1xf32> -> vector<16x1xf32>
    %262 = vector.broadcast %261 : vector<16x1xf32> to vector<16x16xf32>
    %263 = arith.mulf %258, %262 : vector<16x16xf32>
    %cst_54 = arith.constant dense<0.000000e+00> : vector<16x32xf32>
    %264 = tpu.matmul %263, %245, %cst_54 {dimension_numbers = #tpu.dot_dimension_numbers<[1], [0], [0], [1], [0, 0, 1, 1], [], []>} : vector<16x16xf32>, vector<16x32xf32>, vector<16x32xf32> -> vector<16x32xf32>
    %265 = arith.addf %264, %91 : vector<16x32xf32>
    %266 = math.tanh %265 : vector<16x32xf32>
    %267 = vector.extract_strided_slice %241 {offsets = [16, 0], sizes = [16, 96], strides = [1, 1]} : vector<48x96xf32> to vector<16x96xf32>
    %268 = vector.extract_strided_slice %267 {offsets = [0, 0], sizes = [16, 32], strides = [1, 1]} : vector<16x96xf32> to vector<16x32xf32>
    %269 = vector.extract_strided_slice %267 {offsets = [0, 32], sizes = [16, 32], strides = [1, 1]} : vector<16x96xf32> to vector<16x32xf32>
    %270 = vector.extract_strided_slice %267 {offsets = [0, 64], sizes = [16, 32], strides = [1, 1]} : vector<16x96xf32> to vector<16x32xf32>
    %271 = tpu.transpose %269, [1, 0] : vector<16x32xf32> -> vector<32x16xf32>
    %cst_55 = arith.constant dense<0.000000e+00> : vector<16x16xf32>
    %272 = tpu.matmul %268, %271, %cst_55 {dimension_numbers = #tpu.dot_dimension_numbers<[1], [0], [0], [1], [0, 0, 1, 1], [], []>} : vector<16x32xf32>, vector<32x16xf32>, vector<16x16xf32> -> vector<16x16xf32>
    %cst_56 = arith.constant 0.176776692 : f32
    %273 = vector.broadcast %cst_56 : f32 to vector<16x16xf32>
    %274 = arith.mulf %272, %273 : vector<16x16xf32>
    %cst_57 = arith.constant 0.000000e+00 : f32
    %275 = vector.broadcast %cst_57 : f32 to vector<16x16xf32>
    %276 = arith.cmpf ogt, %178, %275 : vector<16x16xf32>
    %cst_58 = arith.constant -1.000000e+09 : f32
    %277 = vector.broadcast %cst_58 : f32 to vector<16x16xf32>
    %278 = arith.select %276, %274, %277 : vector<16x16xi1>, vector<16x16xf32>
    %cst_59 = arith.constant dense<0xFF800000> : vector<16xf32>
    %279 = vector.multi_reduction <maximumf>, %278, %cst_59 [1] : vector<16x16xf32> to vector<16xf32>
    %280 = vector.shape_cast %279 : vector<16xf32> to vector<16x1xf32>
    %281 = vector.broadcast %280 : vector<16x1xf32> to vector<16x16xf32>
    %282 = arith.subf %278, %281 : vector<16x16xf32>
    %283 = math.exp %282 : vector<16x16xf32>
    %cst_60 = arith.constant dense<0.000000e+00> : vector<16xf32>
    %284 = vector.multi_reduction <add>, %283, %cst_60 [1] : vector<16x16xf32> to vector<16xf32>
    %285 = vector.shape_cast %284 : vector<16xf32> to vector<16x1xf32>
    %286 = tpu.reciprocal %285 {approx = true} : vector<16x1xf32> -> vector<16x1xf32>
    %287 = vector.broadcast %286 : vector<16x1xf32> to vector<16x16xf32>
    %288 = arith.mulf %283, %287 : vector<16x16xf32>
    %cst_61 = arith.constant dense<0.000000e+00> : vector<16x32xf32>
    %289 = tpu.matmul %288, %270, %cst_61 {dimension_numbers = #tpu.dot_dimension_numbers<[1], [0], [0], [1], [0, 0, 1, 1], [], []>} : vector<16x16xf32>, vector<16x32xf32>, vector<16x32xf32> -> vector<16x32xf32>
    %290 = arith.addf %289, %152 : vector<16x32xf32>
    %291 = math.tanh %290 : vector<16x32xf32>
    %292 = vector.extract_strided_slice %241 {offsets = [32, 0], sizes = [16, 96], strides = [1, 1]} : vector<48x96xf32> to vector<16x96xf32>
    %293 = vector.extract_strided_slice %292 {offsets = [0, 0], sizes = [16, 32], strides = [1, 1]} : vector<16x96xf32> to vector<16x32xf32>
    %294 = vector.extract_strided_slice %292 {offsets = [0, 32], sizes = [16, 32], strides = [1, 1]} : vector<16x96xf32> to vector<16x32xf32>
    %295 = vector.extract_strided_slice %292 {offsets = [0, 64], sizes = [16, 32], strides = [1, 1]} : vector<16x96xf32> to vector<16x32xf32>
    %296 = tpu.transpose %294, [1, 0] : vector<16x32xf32> -> vector<32x16xf32>
    %cst_62 = arith.constant dense<0.000000e+00> : vector<16x16xf32>
    %297 = tpu.matmul %293, %296, %cst_62 {dimension_numbers = #tpu.dot_dimension_numbers<[1], [0], [0], [1], [0, 0, 1, 1], [], []>} : vector<16x32xf32>, vector<32x16xf32>, vector<16x16xf32> -> vector<16x16xf32>
    %cst_63 = arith.constant 0.176776692 : f32
    %298 = vector.broadcast %cst_63 : f32 to vector<16x16xf32>
    %299 = arith.mulf %297, %298 : vector<16x16xf32>
    %cst_64 = arith.constant 0.000000e+00 : f32
    %300 = vector.broadcast %cst_64 : f32 to vector<16x16xf32>
    %301 = arith.cmpf ogt, %239, %300 : vector<16x16xf32>
    %cst_65 = arith.constant -1.000000e+09 : f32
    %302 = vector.broadcast %cst_65 : f32 to vector<16x16xf32>
    %303 = arith.select %301, %299, %302 : vector<16x16xi1>, vector<16x16xf32>
    %cst_66 = arith.constant dense<0xFF800000> : vector<16xf32>
    %304 = vector.multi_reduction <maximumf>, %303, %cst_66 [1] : vector<16x16xf32> to vector<16xf32>
    %305 = vector.shape_cast %304 : vector<16xf32> to vector<16x1xf32>
    %306 = vector.broadcast %305 : vector<16x1xf32> to vector<16x16xf32>
    %307 = arith.subf %303, %306 : vector<16x16xf32>
    %308 = math.exp %307 : vector<16x16xf32>
    %cst_67 = arith.constant dense<0.000000e+00> : vector<16xf32>
    %309 = vector.multi_reduction <add>, %308, %cst_67 [1] : vector<16x16xf32> to vector<16xf32>
    %310 = vector.shape_cast %309 : vector<16xf32> to vector<16x1xf32>
    %311 = tpu.reciprocal %310 {approx = true} : vector<16x1xf32> -> vector<16x1xf32>
    %312 = vector.broadcast %311 : vector<16x1xf32> to vector<16x16xf32>
    %313 = arith.mulf %308, %312 : vector<16x16xf32>
    %cst_68 = arith.constant dense<0.000000e+00> : vector<16x32xf32>
    %314 = tpu.matmul %313, %295, %cst_68 {dimension_numbers = #tpu.dot_dimension_numbers<[1], [0], [0], [1], [0, 0, 1, 1], [], []>} : vector<16x16xf32>, vector<16x32xf32>, vector<16x32xf32> -> vector<16x32xf32>
    %315 = arith.addf %314, %213 : vector<16x32xf32>
    %316 = math.tanh %315 : vector<16x32xf32>
    %317 = tpu.iota {dimensions = array<i32: 1>} : vector<3x16xi32>
    %318 = vector.broadcast %29 : vector<3x1xi32> to vector<3x16xi32>
    %319 = arith.cmpi eq, %317, %318 : vector<3x16xi32>
    %320 = arith.extui %319 : vector<3x16xi1> to vector<3x16xi32>
    %321 = arith.sitofp %320 : vector<3x16xi32> to vector<3x16xf32>
    %cst_69 = arith.constant dense<0.000000e+00> : vector<3x16xf32>
    %322 = tpu.matmul %321, %1, %cst_69 {dimension_numbers = #tpu.dot_dimension_numbers<[1], [0], [0], [1], [0, 0, 1, 1], [], []>} : vector<3x16xf32>, vector<16x16xf32>, vector<3x16xf32> -> vector<3x16xf32>
    %323 = vector.broadcast %18 : vector<3x1xf32> to vector<3x16xf32>
    %324 = arith.addf %322, %323 : vector<3x16xf32>
    %325 = vector.broadcast %3 : vector<1x16xf32> to vector<3x16xf32>
    %326 = arith.subf %325, %324 : vector<3x16xf32>
    %cst_70 = arith.constant 0.000000e+00 : f32
    %327 = vector.broadcast %cst_70 : f32 to vector<3x16xf32>
    %328 = arith.maximumf %327, %326 : vector<3x16xf32>
    %329 = arith.addf %324, %328 : vector<3x16xf32>
    %330 = vector.broadcast %4 : vector<1x16xf32> to vector<3x16xf32>
    %331 = arith.cmpf ole, %329, %330 : vector<3x16xf32>
    %332 = arith.extui %331 : vector<3x16xi1> to vector<3x16xi32>
    %333 = arith.sitofp %332 : vector<3x16xi32> to vector<3x16xf32>
    %334 = arith.addf %324, %328 : vector<3x16xf32>
    %335 = vector.broadcast %5 : vector<1x16xf32> to vector<3x16xf32>
    %336 = arith.cmpf ole, %334, %335 : vector<3x16xf32>
    %337 = arith.extui %336 : vector<3x16xi1> to vector<3x16xi32>
    %338 = arith.sitofp %337 : vector<3x16xi32> to vector<3x16xf32>
    %cst_71 = arith.constant 1.000000e+00 : f32
    %339 = vector.broadcast %cst_71 : f32 to vector<3x16xf32>
    %340 = arith.subf %339, %321 : vector<3x16xf32>
    %341 = arith.mulf %56, %340 : vector<3x16xf32>
    %342 = arith.mulf %341, %333 : vector<3x16xf32>
    %343 = arith.mulf %342, %338 : vector<3x16xf32>
    %344 = vector.broadcast %23 : vector<3x1xf32> to vector<3x16xf32>
    %345 = arith.mulf %343, %344 : vector<3x16xf32>
    %346 = tpu.iota {dimensions = array<i32: 1>} : vector<1x16xi32>
    %c15_i32 = arith.constant 15 : i32
    %347 = vector.broadcast %c15_i32 : i32 to vector<1x16xi32>
    %348 = arith.cmpi eq, %346, %347 : vector<1x16xi32>
    %349 = arith.extui %348 : vector<1x16xi1> to vector<1x16xi32>
    %350 = arith.sitofp %349 : vector<1x16xi32> to vector<1x16xf32>
    %351 = vector.broadcast %350 : vector<1x16xf32> to vector<3x16xf32>
    %352 = arith.mulf %345, %351 : vector<3x16xf32>
    %cst_72 = arith.constant dense<0.000000e+00> : vector<3xf32>
    %353 = vector.multi_reduction <add>, %352, %cst_72 [1] : vector<3x16xf32> to vector<3xf32>
    %354 = vector.shape_cast %353 : vector<3xf32> to vector<3x1xf32>
    %cst_73 = arith.constant 5.000000e-01 : f32
    %355 = vector.broadcast %cst_73 : f32 to vector<3x1xf32>
    %356 = arith.cmpf ogt, %354, %355 : vector<3x1xf32>
    %357 = arith.extui %356 : vector<3x1xi1> to vector<3x1xi32>
    %358 = arith.sitofp %357 : vector<3x1xi32> to vector<3x1xf32>
    %359 = arith.mulf %23, %358 : vector<3x1xf32>
    %c0_74 = arith.constant 0 : index
    %c0_75 = arith.constant 0 : index
    %360 = vector.load %arg29[%c0_74, %c0_75] : memref<3x1xf32, #tpu.memory_space<vmem>>, vector<3x1xf32>
    tpu.vector_store %arg29[%c0_74, %c0_75], %359 {strides = array<i32>} : memref<3x1xf32, #tpu.memory_space<vmem>>, vector<3x1xf32>,
    %cst_76 = arith.constant 0.000000e+00 : f32
    %361 = vector.broadcast %cst_76 : f32 to vector<3x32xf32>
    %c0_77 = arith.constant 0 : index
    %c0_78 = arith.constant 0 : index
    %362 = vector.load %arg15[%c0_77, %c0_78] : memref<1x32xf32, #tpu.memory_space<vmem>>, vector<1x32xf32>
    %363 = vector.broadcast %362 : vector<1x32xf32> to vector<3x32xf32>
    %364 = arith.addf %361, %363 : vector<3x32xf32>
    %cst_79 = arith.constant 0.000000e+00 : f32
    %365 = vector.broadcast %cst_79 : f32 to vector<3x32xf32>
    %c0_80 = arith.constant 0 : index
    %c0_81 = arith.constant 0 : index
    %366 = vector.load %arg16[%c0_80, %c0_81] : memref<1x32xf32, #tpu.memory_space<vmem>>, vector<1x32xf32>
    %367 = vector.broadcast %366 : vector<1x32xf32> to vector<3x32xf32>
    %368 = arith.addf %365, %367 : vector<3x32xf32>
    %369 = vector.extract_strided_slice %29 {offsets = [0, 0], sizes = [1, 1], strides = [1, 1]} : vector<3x1xi32> to vector<1x1xi32>
    %370 = vector.extract_strided_slice %18 {offsets = [0, 0], sizes = [1, 1], strides = [1, 1]} : vector<3x1xf32> to vector<1x1xf32>
    %371 = tpu.iota {dimensions = array<i32: 0>} : vector<16x1xi32>
    %372 = vector.broadcast %369 : vector<1x1xi32> to vector<16x1xi32>
    %373 = arith.cmpi eq, %371, %372 : vector<16x1xi32>
    %374 = arith.extui %373 : vector<16x1xi1> to vector<16x1xi32>
    %375 = arith.sitofp %374 : vector<16x1xi32> to vector<16x1xf32>
    %cst_82 = arith.constant dense<0.000000e+00> : vector<16x1xf32>
    %376 = tpu.matmul %2, %375, %cst_82 {dimension_numbers = #tpu.dot_dimension_numbers<[1], [0], [0], [1], [0, 0, 1, 1], [], []>} : vector<16x16xf32>, vector<16x1xf32>, vector<16x1xf32> -> vector<16x1xf32>
    %377 = vector.broadcast %370 : vector<1x1xf32> to vector<16x1xf32>
    %378 = arith.addf %376, %377 : vector<16x1xf32>
    %379 = arith.subf %6, %378 : vector<16x1xf32>
    %cst_83 = arith.constant 0.000000e+00 : f32
    %380 = vector.broadcast %cst_83 : f32 to vector<16x1xf32>
    %381 = arith.maximumf %380, %379 : vector<16x1xf32>
    %382 = arith.addf %378, %381 : vector<16x1xf32>
    %383 = arith.subf %7, %382 : vector<16x1xf32>
    %384 = vector.extract_strided_slice %10 {offsets = [0, 0], sizes = [1, 32], strides = [1, 1]} : vector<4x32xf32> to vector<1x32xf32>
    %385 = vector.broadcast %378 : vector<16x1xf32> to vector<16x32xf32>
    %386 = vector.broadcast %384 : vector<1x32xf32> to vector<16x32xf32>
    %387 = arith.mulf %385, %386 : vector<16x32xf32>
    %388 = vector.extract_strided_slice %10 {offsets = [1, 0], sizes = [1, 32], strides = [1, 1]} : vector<4x32xf32> to vector<1x32xf32>
    %389 = vector.broadcast %381 : vector<16x1xf32> to vector<16x32xf32>
    %390 = vector.broadcast %388 : vector<1x32xf32> to vector<16x32xf32>
    %391 = arith.mulf %389, %390 : vector<16x32xf32>
    %392 = arith.addf %387, %391 : vector<16x32xf32>
    %393 = vector.extract_strided_slice %10 {offsets = [2, 0], sizes = [1, 32], strides = [1, 1]} : vector<4x32xf32> to vector<1x32xf32>
    %394 = vector.broadcast %383 : vector<16x1xf32> to vector<16x32xf32>
    %395 = vector.broadcast %393 : vector<1x32xf32> to vector<16x32xf32>
    %396 = arith.mulf %394, %395 : vector<16x32xf32>
    %397 = arith.addf %392, %396 : vector<16x32xf32>
    %398 = vector.extract_strided_slice %10 {offsets = [3, 0], sizes = [1, 32], strides = [1, 1]} : vector<4x32xf32> to vector<1x32xf32>
    %399 = vector.broadcast %370 : vector<1x1xf32> to vector<1x32xf32>
    %400 = arith.mulf %399, %398 : vector<1x32xf32>
    %401 = vector.broadcast %400 : vector<1x32xf32> to vector<16x32xf32>
    %402 = arith.addf %397, %401 : vector<16x32xf32>
    %403 = arith.addf %9, %402 : vector<16x32xf32>
    %404 = arith.addf %378, %381 : vector<16x1xf32>
    %405 = arith.addf %404, %8 : vector<16x1xf32>
    %406 = vector.extract_strided_slice %345 {offsets = [0, 0], sizes = [1, 16], strides = [1, 1]} : vector<3x16xf32> to vector<1x16xf32>
    %407 = vector.broadcast %405 : vector<16x1xf32> to vector<16x16xf32>
    %408 = arith.addf %1, %407 : vector<16x16xf32>
    %409 = vector.broadcast %6 : vector<16x1xf32> to vector<16x16xf32>
    %410 = arith.subf %409, %408 : vector<16x16xf32>
    %cst_84 = arith.constant 0.000000e+00 : f32
    %411 = vector.broadcast %cst_84 : f32 to vector<16x16xf32>
    %412 = arith.maximumf %411, %410 : vector<16x16xf32>
    %413 = arith.addf %408, %412 : vector<16x16xf32>
    %414 = vector.broadcast %4 : vector<1x16xf32> to vector<16x16xf32>
    %415 = arith.cmpf ole, %413, %414 : vector<16x16xf32>
    %416 = arith.extui %415 : vector<16x16xi1> to vector<16x16xi32>
    %417 = arith.sitofp %416 : vector<16x16xi32> to vector<16x16xf32>
    %418 = vector.broadcast %5 : vector<1x16xf32> to vector<16x16xf32>
    %419 = arith.cmpf ole, %413, %418 : vector<16x16xf32>
    %420 = arith.extui %419 : vector<16x16xi1> to vector<16x16xi32>
    %421 = arith.sitofp %420 : vector<16x16xi32> to vector<16x16xf32>
    %422 = vector.broadcast %406 : vector<1x16xf32> to vector<16x16xf32>
    %423 = arith.mulf %422, %417 : vector<16x16xf32>
    %424 = arith.mulf %423, %421 : vector<16x16xf32>
    %425 = tpu.iota {dimensions = array<i32: 0>} : vector<16x16xi32>
    %426 = tpu.iota {dimensions = array<i32: 1>} : vector<16x16xi32>
    %427 = arith.cmpi eq, %425, %426 : vector<16x16xi32>
    %cst_85 = arith.constant 1.000000e+00 : f32
    %428 = vector.broadcast %cst_85 : f32 to vector<16x16xf32>
    %429 = arith.select %427, %428, %424 : vector<16x16xi1>, vector<16x16xf32>
    %430 = vector.extract_strided_slice %29 {offsets = [1, 0], sizes = [1, 1], strides = [1, 1]} : vector<3x1xi32> to vector<1x1xi32>
    %431 = vector.extract_strided_slice %18 {offsets = [1, 0], sizes = [1, 1], strides = [1, 1]} : vector<3x1xf32> to vector<1x1xf32>
    %432 = tpu.iota {dimensions = array<i32: 0>} : vector<16x1xi32>
    %433 = vector.broadcast %430 : vector<1x1xi32> to vector<16x1xi32>
    %434 = arith.cmpi eq, %432, %433 : vector<16x1xi32>
    %435 = arith.extui %434 : vector<16x1xi1> to vector<16x1xi32>
    %436 = arith.sitofp %435 : vector<16x1xi32> to vector<16x1xf32>
    %cst_86 = arith.constant dense<0.000000e+00> : vector<16x1xf32>
    %437 = tpu.matmul %2, %436, %cst_86 {dimension_numbers = #tpu.dot_dimension_numbers<[1], [0], [0], [1], [0, 0, 1, 1], [], []>} : vector<16x16xf32>, vector<16x1xf32>, vector<16x1xf32> -> vector<16x1xf32>
    %438 = vector.broadcast %431 : vector<1x1xf32> to vector<16x1xf32>
    %439 = arith.addf %437, %438 : vector<16x1xf32>
    %440 = arith.subf %6, %439 : vector<16x1xf32>
    %cst_87 = arith.constant 0.000000e+00 : f32
    %441 = vector.broadcast %cst_87 : f32 to vector<16x1xf32>
    %442 = arith.maximumf %441, %440 : vector<16x1xf32>
    %443 = arith.addf %439, %442 : vector<16x1xf32>
    %444 = arith.subf %7, %443 : vector<16x1xf32>
    %445 = vector.extract_strided_slice %10 {offsets = [0, 0], sizes = [1, 32], strides = [1, 1]} : vector<4x32xf32> to vector<1x32xf32>
    %446 = vector.broadcast %439 : vector<16x1xf32> to vector<16x32xf32>
    %447 = vector.broadcast %445 : vector<1x32xf32> to vector<16x32xf32>
    %448 = arith.mulf %446, %447 : vector<16x32xf32>
    %449 = vector.extract_strided_slice %10 {offsets = [1, 0], sizes = [1, 32], strides = [1, 1]} : vector<4x32xf32> to vector<1x32xf32>
    %450 = vector.broadcast %442 : vector<16x1xf32> to vector<16x32xf32>
    %451 = vector.broadcast %449 : vector<1x32xf32> to vector<16x32xf32>
    %452 = arith.mulf %450, %451 : vector<16x32xf32>
    %453 = arith.addf %448, %452 : vector<16x32xf32>
    %454 = vector.extract_strided_slice %10 {offsets = [2, 0], sizes = [1, 32], strides = [1, 1]} : vector<4x32xf32> to vector<1x32xf32>
    %455 = vector.broadcast %444 : vector<16x1xf32> to vector<16x32xf32>
    %456 = vector.broadcast %454 : vector<1x32xf32> to vector<16x32xf32>
    %457 = arith.mulf %455, %456 : vector<16x32xf32>
    %458 = arith.addf %453, %457 : vector<16x32xf32>
    %459 = vector.extract_strided_slice %10 {offsets = [3, 0], sizes = [1, 32], strides = [1, 1]} : vector<4x32xf32> to vector<1x32xf32>
    %460 = vector.broadcast %431 : vector<1x1xf32> to vector<1x32xf32>
    %461 = arith.mulf %460, %459 : vector<1x32xf32>
    %462 = vector.broadcast %461 : vector<1x32xf32> to vector<16x32xf32>
    %463 = arith.addf %458, %462 : vector<16x32xf32>
    %464 = arith.addf %9, %463 : vector<16x32xf32>
    %465 = arith.addf %439, %442 : vector<16x1xf32>
    %466 = arith.addf %465, %8 : vector<16x1xf32>
    %467 = vector.extract_strided_slice %345 {offsets = [1, 0], sizes = [1, 16], strides = [1, 1]} : vector<3x16xf32> to vector<1x16xf32>
    %468 = vector.broadcast %466 : vector<16x1xf32> to vector<16x16xf32>
    %469 = arith.addf %1, %468 : vector<16x16xf32>
    %470 = vector.broadcast %6 : vector<16x1xf32> to vector<16x16xf32>
    %471 = arith.subf %470, %469 : vector<16x16xf32>
    %cst_88 = arith.constant 0.000000e+00 : f32
    %472 = vector.broadcast %cst_88 : f32 to vector<16x16xf32>
    %473 = arith.maximumf %472, %471 : vector<16x16xf32>
    %474 = arith.addf %469, %473 : vector<16x16xf32>
    %475 = vector.broadcast %4 : vector<1x16xf32> to vector<16x16xf32>
    %476 = arith.cmpf ole, %474, %475 : vector<16x16xf32>
    %477 = arith.extui %476 : vector<16x16xi1> to vector<16x16xi32>
    %478 = arith.sitofp %477 : vector<16x16xi32> to vector<16x16xf32>
    %479 = vector.broadcast %5 : vector<1x16xf32> to vector<16x16xf32>
    %480 = arith.cmpf ole, %474, %479 : vector<16x16xf32>
    %481 = arith.extui %480 : vector<16x16xi1> to vector<16x16xi32>
    %482 = arith.sitofp %481 : vector<16x16xi32> to vector<16x16xf32>
    %483 = vector.broadcast %467 : vector<1x16xf32> to vector<16x16xf32>
    %484 = arith.mulf %483, %478 : vector<16x16xf32>
    %485 = arith.mulf %484, %482 : vector<16x16xf32>
    %486 = tpu.iota {dimensions = array<i32: 0>} : vector<16x16xi32>
    %487 = tpu.iota {dimensions = array<i32: 1>} : vector<16x16xi32>
    %488 = arith.cmpi eq, %486, %487 : vector<16x16xi32>
    %cst_89 = arith.constant 1.000000e+00 : f32
    %489 = vector.broadcast %cst_89 : f32 to vector<16x16xf32>
    %490 = arith.select %488, %489, %485 : vector<16x16xi1>, vector<16x16xf32>
    %491 = vector.extract_strided_slice %29 {offsets = [2, 0], sizes = [1, 1], strides = [1, 1]} : vector<3x1xi32> to vector<1x1xi32>
    %492 = vector.extract_strided_slice %18 {offsets = [2, 0], sizes = [1, 1], strides = [1, 1]} : vector<3x1xf32> to vector<1x1xf32>
    %493 = tpu.iota {dimensions = array<i32: 0>} : vector<16x1xi32>
    %494 = vector.broadcast %491 : vector<1x1xi32> to vector<16x1xi32>
    %495 = arith.cmpi eq, %493, %494 : vector<16x1xi32>
    %496 = arith.extui %495 : vector<16x1xi1> to vector<16x1xi32>
    %497 = arith.sitofp %496 : vector<16x1xi32> to vector<16x1xf32>
    %cst_90 = arith.constant dense<0.000000e+00> : vector<16x1xf32>
    %498 = tpu.matmul %2, %497, %cst_90 {dimension_numbers = #tpu.dot_dimension_numbers<[1], [0], [0], [1], [0, 0, 1, 1], [], []>} : vector<16x16xf32>, vector<16x1xf32>, vector<16x1xf32> -> vector<16x1xf32>
    %499 = vector.broadcast %492 : vector<1x1xf32> to vector<16x1xf32>
    %500 = arith.addf %498, %499 : vector<16x1xf32>
    %501 = arith.subf %6, %500 : vector<16x1xf32>
    %cst_91 = arith.constant 0.000000e+00 : f32
    %502 = vector.broadcast %cst_91 : f32 to vector<16x1xf32>
    %503 = arith.maximumf %502, %501 : vector<16x1xf32>
    %504 = arith.addf %500, %503 : vector<16x1xf32>
    %505 = arith.subf %7, %504 : vector<16x1xf32>
    %506 = vector.extract_strided_slice %10 {offsets = [0, 0], sizes = [1, 32], strides = [1, 1]} : vector<4x32xf32> to vector<1x32xf32>
    %507 = vector.broadcast %500 : vector<16x1xf32> to vector<16x32xf32>
    %508 = vector.broadcast %506 : vector<1x32xf32> to vector<16x32xf32>
    %509 = arith.mulf %507, %508 : vector<16x32xf32>
    %510 = vector.extract_strided_slice %10 {offsets = [1, 0], sizes = [1, 32], strides = [1, 1]} : vector<4x32xf32> to vector<1x32xf32>
    %511 = vector.broadcast %503 : vector<16x1xf32> to vector<16x32xf32>
    %512 = vector.broadcast %510 : vector<1x32xf32> to vector<16x32xf32>
    %513 = arith.mulf %511, %512 : vector<16x32xf32>
    %514 = arith.addf %509, %513 : vector<16x32xf32>
    %515 = vector.extract_strided_slice %10 {offsets = [2, 0], sizes = [1, 32], strides = [1, 1]} : vector<4x32xf32> to vector<1x32xf32>
    %516 = vector.broadcast %505 : vector<16x1xf32> to vector<16x32xf32>
    %517 = vector.broadcast %515 : vector<1x32xf32> to vector<16x32xf32>
    %518 = arith.mulf %516, %517 : vector<16x32xf32>
    %519 = arith.addf %514, %518 : vector<16x32xf32>
    %520 = vector.extract_strided_slice %10 {offsets = [3, 0], sizes = [1, 32], strides = [1, 1]} : vector<4x32xf32> to vector<1x32xf32>
    %521 = vector.broadcast %492 : vector<1x1xf32> to vector<1x32xf32>
    %522 = arith.mulf %521, %520 : vector<1x32xf32>
    %523 = vector.broadcast %522 : vector<1x32xf32> to vector<16x32xf32>
    %524 = arith.addf %519, %523 : vector<16x32xf32>
    %525 = arith.addf %9, %524 : vector<16x32xf32>
    %526 = arith.addf %500, %503 : vector<16x1xf32>
    %527 = arith.addf %526, %8 : vector<16x1xf32>
    %528 = vector.extract_strided_slice %345 {offsets = [2, 0], sizes = [1, 16], strides = [1, 1]} : vector<3x16xf32> to vector<1x16xf32>
    %529 = vector.broadcast %527 : vector<16x1xf32> to vector<16x16xf32>
    %530 = arith.addf %1, %529 : vector<16x16xf32>
    %531 = vector.broadcast %6 : vector<16x1xf32> to vector<16x16xf32>
    %532 = arith.subf %531, %530 : vector<16x16xf32>
    %cst_92 = arith.constant 0.000000e+00 : f32
    %533 = vector.broadcast %cst_92 : f32 to vector<16x16xf32>
    %534 = arith.maximumf %533, %532 : vector<16x16xf32>
    %535 = arith.addf %530, %534 : vector<16x16xf32>
    %536 = vector.broadcast %4 : vector<1x16xf32> to vector<16x16xf32>
    %537 = arith.cmpf ole, %535, %536 : vector<16x16xf32>
    %538 = arith.extui %537 : vector<16x16xi1> to vector<16x16xi32>
    %539 = arith.sitofp %538 : vector<16x16xi32> to vector<16x16xf32>
    %540 = vector.broadcast %5 : vector<1x16xf32> to vector<16x16xf32>
    %541 = arith.cmpf ole, %535, %540 : vector<16x16xf32>
    %542 = arith.extui %541 : vector<16x16xi1> to vector<16x16xi32>
    %543 = arith.sitofp %542 : vector<16x16xi32> to vector<16x16xf32>
    %544 = vector.broadcast %528 : vector<1x16xf32> to vector<16x16xf32>
    %545 = arith.mulf %544, %539 : vector<16x16xf32>
    %546 = arith.mulf %545, %543 : vector<16x16xf32>
    %547 = tpu.iota {dimensions = array<i32: 0>} : vector<16x16xi32>
    %548 = tpu.iota {dimensions = array<i32: 1>} : vector<16x16xi32>
    %549 = arith.cmpi eq, %547, %548 : vector<16x16xi32>
    %cst_93 = arith.constant 1.000000e+00 : f32
    %550 = vector.broadcast %cst_93 : f32 to vector<16x16xf32>
    %551 = arith.select %549, %550, %546 : vector<16x16xi1>, vector<16x16xf32>
    %552 = tpu.concatenate %403, %464, %525 in 0 : vector<16x32xf32>, vector<16x32xf32>, vector<16x32xf32> -> vector<48x32xf32>
    %cst_94 = arith.constant dense<0.000000e+00> : vector<48x96xf32>
    %553 = tpu.matmul %552, %11, %cst_94 {dimension_numbers = #tpu.dot_dimension_numbers<[1], [0], [0], [1], [0, 0, 1, 1], [], []>} : vector<48x32xf32>, vector<32x96xf32>, vector<48x96xf32> -> vector<48x96xf32>
    %554 = vector.extract_strided_slice %553 {offsets = [0, 0], sizes = [16, 96], strides = [1, 1]} : vector<48x96xf32> to vector<16x96xf32>
    %555 = vector.extract_strided_slice %554 {offsets = [0, 0], sizes = [16, 32], strides = [1, 1]} : vector<16x96xf32> to vector<16x32xf32>
    %556 = vector.extract_strided_slice %554 {offsets = [0, 32], sizes = [16, 32], strides = [1, 1]} : vector<16x96xf32> to vector<16x32xf32>
    %557 = vector.extract_strided_slice %554 {offsets = [0, 64], sizes = [16, 32], strides = [1, 1]} : vector<16x96xf32> to vector<16x32xf32>
    %558 = tpu.transpose %556, [1, 0] : vector<16x32xf32> -> vector<32x16xf32>
    %cst_95 = arith.constant dense<0.000000e+00> : vector<16x16xf32>
    %559 = tpu.matmul %555, %558, %cst_95 {dimension_numbers = #tpu.dot_dimension_numbers<[1], [0], [0], [1], [0, 0, 1, 1], [], []>} : vector<16x32xf32>, vector<32x16xf32>, vector<16x16xf32> -> vector<16x16xf32>
    %cst_96 = arith.constant 0.176776692 : f32
    %560 = vector.broadcast %cst_96 : f32 to vector<16x16xf32>
    %561 = arith.mulf %559, %560 : vector<16x16xf32>
    %cst_97 = arith.constant 0.000000e+00 : f32
    %562 = vector.broadcast %cst_97 : f32 to vector<16x16xf32>
    %563 = arith.cmpf ogt, %429, %562 : vector<16x16xf32>
    %cst_98 = arith.constant -1.000000e+09 : f32
    %564 = vector.broadcast %cst_98 : f32 to vector<16x16xf32>
    %565 = arith.select %563, %561, %564 : vector<16x16xi1>, vector<16x16xf32>
    %cst_99 = arith.constant dense<0xFF800000> : vector<16xf32>
    %566 = vector.multi_reduction <maximumf>, %565, %cst_99 [1] : vector<16x16xf32> to vector<16xf32>
    %567 = vector.shape_cast %566 : vector<16xf32> to vector<16x1xf32>
    %568 = vector.broadcast %567 : vector<16x1xf32> to vector<16x16xf32>
    %569 = arith.subf %565, %568 : vector<16x16xf32>
    %570 = math.exp %569 : vector<16x16xf32>
    %cst_100 = arith.constant dense<0.000000e+00> : vector<16xf32>
    %571 = vector.multi_reduction <add>, %570, %cst_100 [1] : vector<16x16xf32> to vector<16xf32>
    %572 = vector.shape_cast %571 : vector<16xf32> to vector<16x1xf32>
    %573 = tpu.reciprocal %572 {approx = true} : vector<16x1xf32> -> vector<16x1xf32>
    %574 = vector.broadcast %573 : vector<16x1xf32> to vector<16x16xf32>
    %575 = arith.mulf %570, %574 : vector<16x16xf32>
    %cst_101 = arith.constant dense<0.000000e+00> : vector<16x32xf32>
    %576 = tpu.matmul %575, %557, %cst_101 {dimension_numbers = #tpu.dot_dimension_numbers<[1], [0], [0], [1], [0, 0, 1, 1], [], []>} : vector<16x16xf32>, vector<16x32xf32>, vector<16x32xf32> -> vector<16x32xf32>
    %577 = arith.addf %576, %403 : vector<16x32xf32>
    %578 = math.tanh %577 : vector<16x32xf32>
    %579 = vector.extract_strided_slice %553 {offsets = [16, 0], sizes = [16, 96], strides = [1, 1]} : vector<48x96xf32> to vector<16x96xf32>
    %580 = vector.extract_strided_slice %579 {offsets = [0, 0], sizes = [16, 32], strides = [1, 1]} : vector<16x96xf32> to vector<16x32xf32>
    %581 = vector.extract_strided_slice %579 {offsets = [0, 32], sizes = [16, 32], strides = [1, 1]} : vector<16x96xf32> to vector<16x32xf32>
    %582 = vector.extract_strided_slice %579 {offsets = [0, 64], sizes = [16, 32], strides = [1, 1]} : vector<16x96xf32> to vector<16x32xf32>
    %583 = tpu.transpose %581, [1, 0] : vector<16x32xf32> -> vector<32x16xf32>
    %cst_102 = arith.constant dense<0.000000e+00> : vector<16x16xf32>
    %584 = tpu.matmul %580, %583, %cst_102 {dimension_numbers = #tpu.dot_dimension_numbers<[1], [0], [0], [1], [0, 0, 1, 1], [], []>} : vector<16x32xf32>, vector<32x16xf32>, vector<16x16xf32> -> vector<16x16xf32>
    %cst_103 = arith.constant 0.176776692 : f32
    %585 = vector.broadcast %cst_103 : f32 to vector<16x16xf32>
    %586 = arith.mulf %584, %585 : vector<16x16xf32>
    %cst_104 = arith.constant 0.000000e+00 : f32
    %587 = vector.broadcast %cst_104 : f32 to vector<16x16xf32>
    %588 = arith.cmpf ogt, %490, %587 : vector<16x16xf32>
    %cst_105 = arith.constant -1.000000e+09 : f32
    %589 = vector.broadcast %cst_105 : f32 to vector<16x16xf32>
    %590 = arith.select %588, %586, %589 : vector<16x16xi1>, vector<16x16xf32>
    %cst_106 = arith.constant dense<0xFF800000> : vector<16xf32>
    %591 = vector.multi_reduction <maximumf>, %590, %cst_106 [1] : vector<16x16xf32> to vector<16xf32>
    %592 = vector.shape_cast %591 : vector<16xf32> to vector<16x1xf32>
    %593 = vector.broadcast %592 : vector<16x1xf32> to vector<16x16xf32>
    %594 = arith.subf %590, %593 : vector<16x16xf32>
    %595 = math.exp %594 : vector<16x16xf32>
    %cst_107 = arith.constant dense<0.000000e+00> : vector<16xf32>
    %596 = vector.multi_reduction <add>, %595, %cst_107 [1] : vector<16x16xf32> to vector<16xf32>
    %597 = vector.shape_cast %596 : vector<16xf32> to vector<16x1xf32>
    %598 = tpu.reciprocal %597 {approx = true} : vector<16x1xf32> -> vector<16x1xf32>
    %599 = vector.broadcast %598 : vector<16x1xf32> to vector<16x16xf32>
    %600 = arith.mulf %595, %599 : vector<16x16xf32>
    %cst_108 = arith.constant dense<0.000000e+00> : vector<16x32xf32>
    %601 = tpu.matmul %600, %582, %cst_108 {dimension_numbers = #tpu.dot_dimension_numbers<[1], [0], [0], [1], [0, 0, 1, 1], [], []>} : vector<16x16xf32>, vector<16x32xf32>, vector<16x32xf32> -> vector<16x32xf32>
    %602 = arith.addf %601, %464 : vector<16x32xf32>
    %603 = math.tanh %602 : vector<16x32xf32>
    %604 = vector.extract_strided_slice %553 {offsets = [32, 0], sizes = [16, 96], strides = [1, 1]} : vector<48x96xf32> to vector<16x96xf32>
    %605 = vector.extract_strided_slice %604 {offsets = [0, 0], sizes = [16, 32], strides = [1, 1]} : vector<16x96xf32> to vector<16x32xf32>
    %606 = vector.extract_strided_slice %604 {offsets = [0, 32], sizes = [16, 32], strides = [1, 1]} : vector<16x96xf32> to vector<16x32xf32>
    %607 = vector.extract_strided_slice %604 {offsets = [0, 64], sizes = [16, 32], strides = [1, 1]} : vector<16x96xf32> to vector<16x32xf32>
    %608 = tpu.transpose %606, [1, 0] : vector<16x32xf32> -> vector<32x16xf32>
    %cst_109 = arith.constant dense<0.000000e+00> : vector<16x16xf32>
    %609 = tpu.matmul %605, %608, %cst_109 {dimension_numbers = #tpu.dot_dimension_numbers<[1], [0], [0], [1], [0, 0, 1, 1], [], []>} : vector<16x32xf32>, vector<32x16xf32>, vector<16x16xf32> -> vector<16x16xf32>
    %cst_110 = arith.constant 0.176776692 : f32
    %610 = vector.broadcast %cst_110 : f32 to vector<16x16xf32>
    %611 = arith.mulf %609, %610 : vector<16x16xf32>
    %cst_111 = arith.constant 0.000000e+00 : f32
    %612 = vector.broadcast %cst_111 : f32 to vector<16x16xf32>
    %613 = arith.cmpf ogt, %551, %612 : vector<16x16xf32>
    %cst_112 = arith.constant -1.000000e+09 : f32
    %614 = vector.broadcast %cst_112 : f32 to vector<16x16xf32>
    %615 = arith.select %613, %611, %614 : vector<16x16xi1>, vector<16x16xf32>
    %cst_113 = arith.constant dense<0xFF800000> : vector<16xf32>
    %616 = vector.multi_reduction <maximumf>, %615, %cst_113 [1] : vector<16x16xf32> to vector<16xf32>
    %617 = vector.shape_cast %616 : vector<16xf32> to vector<16x1xf32>
    %618 = vector.broadcast %617 : vector<16x1xf32> to vector<16x16xf32>
    %619 = arith.subf %615, %618 : vector<16x16xf32>
    %620 = math.exp %619 : vector<16x16xf32>
    %cst_114 = arith.constant dense<0.000000e+00> : vector<16xf32>
    %621 = vector.multi_reduction <add>, %620, %cst_114 [1] : vector<16x16xf32> to vector<16xf32>
    %622 = vector.shape_cast %621 : vector<16xf32> to vector<16x1xf32>
    %623 = tpu.reciprocal %622 {approx = true} : vector<16x1xf32> -> vector<16x1xf32>
    %624 = vector.broadcast %623 : vector<16x1xf32> to vector<16x16xf32>
    %625 = arith.mulf %620, %624 : vector<16x16xf32>
    %cst_115 = arith.constant dense<0.000000e+00> : vector<16x32xf32>
    %626 = tpu.matmul %625, %607, %cst_115 {dimension_numbers = #tpu.dot_dimension_numbers<[1], [0], [0], [1], [0, 0, 1, 1], [], []>} : vector<16x16xf32>, vector<16x32xf32>, vector<16x32xf32> -> vector<16x32xf32>
    %627 = arith.addf %626, %525 : vector<16x32xf32>
    %628 = math.tanh %627 : vector<16x32xf32>
    %629 = tpu.iota {dimensions = array<i32: 0>} : vector<3x1xi32>
    %cst_116 = arith.constant 0.000000e+00 : f32
    %630 = vector.broadcast %cst_116 : f32 to vector<3x32xf32>
    %631 = tpu.iota {dimensions = array<i32: 1>} : vector<1x16xi32>
    %632 = vector.extract_strided_slice %29 {offsets = [0, 0], sizes = [1, 1], strides = [1, 1]} : vector<3x1xi32> to vector<1x1xi32>
    %633 = vector.broadcast %632 : vector<1x1xi32> to vector<1x16xi32>
    %634 = arith.cmpi eq, %631, %633 : vector<1x16xi32>
    %635 = arith.extui %634 : vector<1x16xi1> to vector<1x16xi32>
    %636 = arith.sitofp %635 : vector<1x16xi32> to vector<1x16xf32>
    %c0_i32_117 = arith.constant 0 : i32
    %637 = vector.broadcast %c0_i32_117 : i32 to vector<3x1xi32>
    %638 = arith.cmpi eq, %629, %637 : vector<3x1xi32>
    %639 = arith.extui %638 : vector<3x1xi1> to vector<3x1xi32>
    %640 = arith.sitofp %639 : vector<3x1xi32> to vector<3x1xf32>
    %cst_118 = arith.constant dense<0.000000e+00> : vector<1x32xf32>
    %641 = tpu.matmul %636, %266, %cst_118 {dimension_numbers = #tpu.dot_dimension_numbers<[1], [0], [0], [1], [0, 0, 1, 1], [], []>} : vector<1x16xf32>, vector<16x32xf32>, vector<1x32xf32> -> vector<1x32xf32>
    %642 = vector.broadcast %640 : vector<3x1xf32> to vector<3x32xf32>
    %643 = vector.broadcast %641 : vector<1x32xf32> to vector<3x32xf32>
    %644 = arith.mulf %642, %643 : vector<3x32xf32>
    %645 = arith.addf %630, %644 : vector<3x32xf32>
    %646 = tpu.iota {dimensions = array<i32: 1>} : vector<1x16xi32>
    %647 = vector.extract_strided_slice %29 {offsets = [1, 0], sizes = [1, 1], strides = [1, 1]} : vector<3x1xi32> to vector<1x1xi32>
    %648 = vector.broadcast %647 : vector<1x1xi32> to vector<1x16xi32>
    %649 = arith.cmpi eq, %646, %648 : vector<1x16xi32>
    %650 = arith.extui %649 : vector<1x16xi1> to vector<1x16xi32>
    %651 = arith.sitofp %650 : vector<1x16xi32> to vector<1x16xf32>
    %c1_i32 = arith.constant 1 : i32
    %652 = vector.broadcast %c1_i32 : i32 to vector<3x1xi32>
    %653 = arith.cmpi eq, %629, %652 : vector<3x1xi32>
    %654 = arith.extui %653 : vector<3x1xi1> to vector<3x1xi32>
    %655 = arith.sitofp %654 : vector<3x1xi32> to vector<3x1xf32>
    %cst_119 = arith.constant dense<0.000000e+00> : vector<1x32xf32>
    %656 = tpu.matmul %651, %291, %cst_119 {dimension_numbers = #tpu.dot_dimension_numbers<[1], [0], [0], [1], [0, 0, 1, 1], [], []>} : vector<1x16xf32>, vector<16x32xf32>, vector<1x32xf32> -> vector<1x32xf32>
    %657 = vector.broadcast %655 : vector<3x1xf32> to vector<3x32xf32>
    %658 = vector.broadcast %656 : vector<1x32xf32> to vector<3x32xf32>
    %659 = arith.mulf %657, %658 : vector<3x32xf32>
    %660 = arith.addf %645, %659 : vector<3x32xf32>
    %661 = tpu.iota {dimensions = array<i32: 1>} : vector<1x16xi32>
    %662 = vector.extract_strided_slice %29 {offsets = [2, 0], sizes = [1, 1], strides = [1, 1]} : vector<3x1xi32> to vector<1x1xi32>
    %663 = vector.broadcast %662 : vector<1x1xi32> to vector<1x16xi32>
    %664 = arith.cmpi eq, %661, %663 : vector<1x16xi32>
    %665 = arith.extui %664 : vector<1x16xi1> to vector<1x16xi32>
    %666 = arith.sitofp %665 : vector<1x16xi32> to vector<1x16xf32>
    %c2_i32 = arith.constant 2 : i32
    %667 = vector.broadcast %c2_i32 : i32 to vector<3x1xi32>
    %668 = arith.cmpi eq, %629, %667 : vector<3x1xi32>
    %669 = arith.extui %668 : vector<3x1xi1> to vector<3x1xi32>
    %670 = arith.sitofp %669 : vector<3x1xi32> to vector<3x1xf32>
    %cst_120 = arith.constant dense<0.000000e+00> : vector<1x32xf32>
    %671 = tpu.matmul %666, %316, %cst_120 {dimension_numbers = #tpu.dot_dimension_numbers<[1], [0], [0], [1], [0, 0, 1, 1], [], []>} : vector<1x16xf32>, vector<16x32xf32>, vector<1x32xf32> -> vector<1x32xf32>
    %672 = vector.broadcast %670 : vector<3x1xf32> to vector<3x32xf32>
    %673 = vector.broadcast %671 : vector<1x32xf32> to vector<3x32xf32>
    %674 = arith.mulf %672, %673 : vector<3x32xf32>
    %675 = arith.addf %660, %674 : vector<3x32xf32>
    %cst_121 = arith.constant dense<0.000000e+00> : vector<3x128xf32>
    %676 = tpu.matmul %675, %12, %cst_121 {dimension_numbers = #tpu.dot_dimension_numbers<[1], [0], [0], [1], [0, 0, 1, 1], [], []>} : vector<3x32xf32>, vector<32x128xf32>, vector<3x128xf32> -> vector<3x128xf32>
    %cst_122 = arith.constant dense<0.000000e+00> : vector<3x128xf32>
    %677 = tpu.matmul %364, %13, %cst_122 {dimension_numbers = #tpu.dot_dimension_numbers<[1], [0], [0], [1], [0, 0, 1, 1], [], []>} : vector<3x32xf32>, vector<32x128xf32>, vector<3x128xf32> -> vector<3x128xf32>
    %678 = arith.addf %676, %677 : vector<3x128xf32>
    %679 = vector.broadcast %14 : vector<1x128xf32> to vector<3x128xf32>
    %680 = arith.addf %678, %679 : vector<3x128xf32>
    %681 = vector.extract_strided_slice %680 {offsets = [0, 0], sizes = [3, 32], strides = [1, 1]} : vector<3x128xf32> to vector<3x32xf32>
    %682 = arith.negf %681 : vector<3x32xf32>
    %683 = math.exp %682 : vector<3x32xf32>
    %cst_123 = arith.constant 1.000000e+00 : f32
    %684 = vector.broadcast %cst_123 : f32 to vector<3x32xf32>
    %685 = arith.addf %684, %683 : vector<3x32xf32>
    %686 = arith.divf %684, %685 : vector<3x32xf32>
    %687 = vector.extract_strided_slice %680 {offsets = [0, 32], sizes = [3, 32], strides = [1, 1]} : vector<3x128xf32> to vector<3x32xf32>
    %688 = arith.negf %687 : vector<3x32xf32>
    %689 = math.exp %688 : vector<3x32xf32>
    %cst_124 = arith.constant 1.000000e+00 : f32
    %690 = vector.broadcast %cst_124 : f32 to vector<3x32xf32>
    %691 = arith.addf %690, %689 : vector<3x32xf32>
    %692 = arith.divf %690, %691 : vector<3x32xf32>
    %693 = vector.extract_strided_slice %680 {offsets = [0, 64], sizes = [3, 32], strides = [1, 1]} : vector<3x128xf32> to vector<3x32xf32>
    %694 = math.tanh %693 : vector<3x32xf32>
    %695 = vector.extract_strided_slice %680 {offsets = [0, 96], sizes = [3, 32], strides = [1, 1]} : vector<3x128xf32> to vector<3x32xf32>
    %696 = arith.negf %695 : vector<3x32xf32>
    %697 = math.exp %696 : vector<3x32xf32>
    %cst_125 = arith.constant 1.000000e+00 : f32
    %698 = vector.broadcast %cst_125 : f32 to vector<3x32xf32>
    %699 = arith.addf %698, %697 : vector<3x32xf32>
    %700 = arith.divf %698, %699 : vector<3x32xf32>
    %701 = arith.mulf %692, %368 : vector<3x32xf32>
    %702 = arith.mulf %686, %694 : vector<3x32xf32>
    %703 = arith.addf %701, %702 : vector<3x32xf32>
    %704 = math.tanh %703 : vector<3x32xf32>
    %705 = arith.mulf %700, %704 : vector<3x32xf32>
    %cst_126 = arith.constant dense<0.000000e+00> : vector<3x32xf32>
    %706 = tpu.matmul %705, %16, %cst_126 {dimension_numbers = #tpu.dot_dimension_numbers<[1], [0], [0], [1], [0, 0, 1, 1], [], []>} : vector<3x32xf32>, vector<32x32xf32>, vector<3x32xf32> -> vector<3x32xf32>
    %707 = tpu.concatenate %578, %603, %628 in 0 : vector<16x32xf32>, vector<16x32xf32>, vector<16x32xf32> -> vector<48x32xf32>
    %cst_127 = arith.constant dense<0.000000e+00> : vector<48x32xf32>
    %708 = tpu.matmul %707, %15, %cst_127 {dimension_numbers = #tpu.dot_dimension_numbers<[1], [0], [0], [1], [0, 0, 1, 1], [], []>} : vector<48x32xf32>, vector<32x32xf32>, vector<48x32xf32> -> vector<48x32xf32>
    %cst_128 = arith.constant 0.000000e+00 : f32
    %709 = vector.broadcast %cst_128 : f32 to vector<3x16xf32>
    %cst_129 = arith.constant -1.000000e+09 : f32
    %710 = vector.broadcast %cst_129 : f32 to vector<3x16xf32>
    %711 = vector.extract_strided_slice %345 {offsets = [0, 0], sizes = [1, 16], strides = [1, 1]} : vector<3x16xf32> to vector<1x16xf32>
    %712 = vector.extract_strided_slice %708 {offsets = [0, 0], sizes = [16, 32], strides = [1, 1]} : vector<48x32xf32> to vector<16x32xf32>
    %713 = vector.extract_strided_slice %706 {offsets = [0, 0], sizes = [1, 32], strides = [1, 1]} : vector<3x32xf32> to vector<1x32xf32>
    %714 = vector.broadcast %713 : vector<1x32xf32> to vector<16x32xf32>
    %715 = arith.addf %712, %714 : vector<16x32xf32>
    %716 = math.tanh %715 : vector<16x32xf32>
    %717 = tpu.transpose %716, [1, 0] : vector<16x32xf32> -> vector<32x16xf32>
    %cst_130 = arith.constant dense<0.000000e+00> : vector<1x16xf32>
    %718 = tpu.matmul %17, %717, %cst_130 {dimension_numbers = #tpu.dot_dimension_numbers<[1], [0], [0], [1], [0, 0, 1, 1], [], []>} : vector<1x32xf32>, vector<32x16xf32>, vector<1x16xf32> -> vector<1x16xf32>
    %cst_131 = arith.constant 0.000000e+00 : f32
    %719 = vector.broadcast %cst_131 : f32 to vector<1x16xf32>
    %720 = arith.cmpf ogt, %711, %719 : vector<1x16xf32>
    %cst_132 = arith.constant -1.000000e+09 : f32
    %721 = vector.broadcast %cst_132 : f32 to vector<1x16xf32>
    %722 = arith.select %720, %718, %721 : vector<1x16xi1>, vector<1x16xf32>
    %cst_133 = arith.constant dense<0xFF800000> : vector<1xf32>
    %723 = vector.multi_reduction <maximumf>, %722, %cst_133 [1] : vector<1x16xf32> to vector<1xf32>
    %724 = vector.shape_cast %723 : vector<1xf32> to vector<1x1xf32>
    %725 = vector.broadcast %724 : vector<1x1xf32> to vector<1x16xf32>
    %726 = arith.subf %722, %725 : vector<1x16xf32>
    %727 = math.exp %726 : vector<1x16xf32>
    %cst_134 = arith.constant dense<0.000000e+00> : vector<1xf32>
    %728 = vector.multi_reduction <add>, %727, %cst_134 [1] : vector<1x16xf32> to vector<1xf32>
    %729 = vector.shape_cast %728 : vector<1xf32> to vector<1x1xf32>
    %730 = tpu.reciprocal %729 {approx = true} : vector<1x1xf32> -> vector<1x1xf32>
    %731 = vector.broadcast %730 : vector<1x1xf32> to vector<1x16xf32>
    %732 = arith.mulf %727, %731 : vector<1x16xf32>
    %cst_135 = arith.constant 0.000000e+00 : f32
    %733 = vector.broadcast %cst_135 : f32 to vector<1x16xf32>
    %734 = arith.cmpf ogt, %711, %733 : vector<1x16xf32>
    %735 = vector.extract_strided_slice %23 {offsets = [0, 0], sizes = [1, 1], strides = [1, 1]} : vector<3x1xf32> to vector<1x1xf32>
    %cst_136 = arith.constant 0.000000e+00 : f32
    %736 = vector.broadcast %cst_136 : f32 to vector<1x1xf32>
    %737 = arith.cmpf ogt, %735, %736 : vector<1x1xf32>
    %738 = vector.broadcast %737 : vector<1x1xi1> to vector<1x16xi1>
    %739 = arith.andi %734, %738 : vector<1x16xi1>
    %740 = vector.extract_strided_slice %30 {offsets = [0, 0], sizes = [1, 1], strides = [1, 1]} : vector<3x1xf32> to vector<1x1xf32>
    %cst_137 = arith.constant 1.000000e-30 : f32
    %741 = vector.broadcast %cst_137 : f32 to vector<1x16xf32>
    %742 = arith.maximumf %732, %741 : vector<1x16xf32>
    %743 = math.log %742 : vector<1x16xf32>
    %744 = vector.broadcast %740 : vector<1x1xf32> to vector<1x16xf32>
    %745 = arith.addf %744, %743 : vector<1x16xf32>
    %cst_138 = arith.constant -1.000000e+09 : f32
    %746 = vector.broadcast %cst_138 : f32 to vector<1x16xf32>
    %747 = arith.select %739, %745, %746 : vector<1x16xi1>, vector<1x16xf32>
    %c0_i32_139 = arith.constant 0 : i32
    %748 = vector.broadcast %c0_i32_139 : i32 to vector<3x1xi32>
    %749 = arith.cmpi eq, %629, %748 : vector<3x1xi32>
    %750 = vector.shape_cast %749 : vector<3x1xi1> to vector<3x1xi1>
    %751 = vector.broadcast %750 : vector<3x1xi1> to vector<3x16xi1>
    %752 = vector.shape_cast %732 : vector<1x16xf32> to vector<1x16xf32>
    %753 = vector.broadcast %752 : vector<1x16xf32> to vector<3x16xf32>
    %754 = arith.select %751, %753, %709 : vector<3x16xi1>, vector<3x16xf32>
    %755 = vector.shape_cast %749 : vector<3x1xi1> to vector<3x1xi1>
    %756 = vector.broadcast %755 : vector<3x1xi1> to vector<3x16xi1>
    %757 = vector.shape_cast %747 : vector<1x16xf32> to vector<1x16xf32>
    %758 = vector.broadcast %757 : vector<1x16xf32> to vector<3x16xf32>
    %759 = arith.select %756, %758, %710 : vector<3x16xi1>, vector<3x16xf32>
    %760 = vector.extract_strided_slice %345 {offsets = [1, 0], sizes = [1, 16], strides = [1, 1]} : vector<3x16xf32> to vector<1x16xf32>
    %761 = vector.extract_strided_slice %708 {offsets = [16, 0], sizes = [16, 32], strides = [1, 1]} : vector<48x32xf32> to vector<16x32xf32>
    %762 = vector.extract_strided_slice %706 {offsets = [1, 0], sizes = [1, 32], strides = [1, 1]} : vector<3x32xf32> to vector<1x32xf32>
    %763 = vector.broadcast %762 : vector<1x32xf32> to vector<16x32xf32>
    %764 = arith.addf %761, %763 : vector<16x32xf32>
    %765 = math.tanh %764 : vector<16x32xf32>
    %766 = tpu.transpose %765, [1, 0] : vector<16x32xf32> -> vector<32x16xf32>
    %cst_140 = arith.constant dense<0.000000e+00> : vector<1x16xf32>
    %767 = tpu.matmul %17, %766, %cst_140 {dimension_numbers = #tpu.dot_dimension_numbers<[1], [0], [0], [1], [0, 0, 1, 1], [], []>} : vector<1x32xf32>, vector<32x16xf32>, vector<1x16xf32> -> vector<1x16xf32>
    %cst_141 = arith.constant 0.000000e+00 : f32
    %768 = vector.broadcast %cst_141 : f32 to vector<1x16xf32>
    %769 = arith.cmpf ogt, %760, %768 : vector<1x16xf32>
    %cst_142 = arith.constant -1.000000e+09 : f32
    %770 = vector.broadcast %cst_142 : f32 to vector<1x16xf32>
    %771 = arith.select %769, %767, %770 : vector<1x16xi1>, vector<1x16xf32>
    %cst_143 = arith.constant dense<0xFF800000> : vector<1xf32>
    %772 = vector.multi_reduction <maximumf>, %771, %cst_143 [1] : vector<1x16xf32> to vector<1xf32>
    %773 = vector.shape_cast %772 : vector<1xf32> to vector<1x1xf32>
    %774 = vector.broadcast %773 : vector<1x1xf32> to vector<1x16xf32>
    %775 = arith.subf %771, %774 : vector<1x16xf32>
    %776 = math.exp %775 : vector<1x16xf32>
    %cst_144 = arith.constant dense<0.000000e+00> : vector<1xf32>
    %777 = vector.multi_reduction <add>, %776, %cst_144 [1] : vector<1x16xf32> to vector<1xf32>
    %778 = vector.shape_cast %777 : vector<1xf32> to vector<1x1xf32>
    %779 = tpu.reciprocal %778 {approx = true} : vector<1x1xf32> -> vector<1x1xf32>
    %780 = vector.broadcast %779 : vector<1x1xf32> to vector<1x16xf32>
    %781 = arith.mulf %776, %780 : vector<1x16xf32>
    %cst_145 = arith.constant 0.000000e+00 : f32
    %782 = vector.broadcast %cst_145 : f32 to vector<1x16xf32>
    %783 = arith.cmpf ogt, %760, %782 : vector<1x16xf32>
    %784 = vector.extract_strided_slice %23 {offsets = [1, 0], sizes = [1, 1], strides = [1, 1]} : vector<3x1xf32> to vector<1x1xf32>
    %cst_146 = arith.constant 0.000000e+00 : f32
    %785 = vector.broadcast %cst_146 : f32 to vector<1x1xf32>
    %786 = arith.cmpf ogt, %784, %785 : vector<1x1xf32>
    %787 = vector.broadcast %786 : vector<1x1xi1> to vector<1x16xi1>
    %788 = arith.andi %783, %787 : vector<1x16xi1>
    %789 = vector.extract_strided_slice %30 {offsets = [1, 0], sizes = [1, 1], strides = [1, 1]} : vector<3x1xf32> to vector<1x1xf32>
    %cst_147 = arith.constant 1.000000e-30 : f32
    %790 = vector.broadcast %cst_147 : f32 to vector<1x16xf32>
    %791 = arith.maximumf %781, %790 : vector<1x16xf32>
    %792 = math.log %791 : vector<1x16xf32>
    %793 = vector.broadcast %789 : vector<1x1xf32> to vector<1x16xf32>
    %794 = arith.addf %793, %792 : vector<1x16xf32>
    %cst_148 = arith.constant -1.000000e+09 : f32
    %795 = vector.broadcast %cst_148 : f32 to vector<1x16xf32>
    %796 = arith.select %788, %794, %795 : vector<1x16xi1>, vector<1x16xf32>
    %c1_i32_149 = arith.constant 1 : i32
    %797 = vector.broadcast %c1_i32_149 : i32 to vector<3x1xi32>
    %798 = arith.cmpi eq, %629, %797 : vector<3x1xi32>
    %799 = vector.shape_cast %798 : vector<3x1xi1> to vector<3x1xi1>
    %800 = vector.broadcast %799 : vector<3x1xi1> to vector<3x16xi1>
    %801 = vector.shape_cast %781 : vector<1x16xf32> to vector<1x16xf32>
    %802 = vector.broadcast %801 : vector<1x16xf32> to vector<3x16xf32>
    %803 = arith.select %800, %802, %754 : vector<3x16xi1>, vector<3x16xf32>
    %804 = vector.shape_cast %798 : vector<3x1xi1> to vector<3x1xi1>
    %805 = vector.broadcast %804 : vector<3x1xi1> to vector<3x16xi1>
    %806 = vector.shape_cast %796 : vector<1x16xf32> to vector<1x16xf32>
    %807 = vector.broadcast %806 : vector<1x16xf32> to vector<3x16xf32>
    %808 = arith.select %805, %807, %759 : vector<3x16xi1>, vector<3x16xf32>
    %809 = vector.extract_strided_slice %345 {offsets = [2, 0], sizes = [1, 16], strides = [1, 1]} : vector<3x16xf32> to vector<1x16xf32>
    %810 = vector.extract_strided_slice %708 {offsets = [32, 0], sizes = [16, 32], strides = [1, 1]} : vector<48x32xf32> to vector<16x32xf32>
    %811 = vector.extract_strided_slice %706 {offsets = [2, 0], sizes = [1, 32], strides = [1, 1]} : vector<3x32xf32> to vector<1x32xf32>
    %812 = vector.broadcast %811 : vector<1x32xf32> to vector<16x32xf32>
    %813 = arith.addf %810, %812 : vector<16x32xf32>
    %814 = math.tanh %813 : vector<16x32xf32>
    %815 = tpu.transpose %814, [1, 0] : vector<16x32xf32> -> vector<32x16xf32>
    %cst_150 = arith.constant dense<0.000000e+00> : vector<1x16xf32>
    %816 = tpu.matmul %17, %815, %cst_150 {dimension_numbers = #tpu.dot_dimension_numbers<[1], [0], [0], [1], [0, 0, 1, 1], [], []>} : vector<1x32xf32>, vector<32x16xf32>, vector<1x16xf32> -> vector<1x16xf32>
    %cst_151 = arith.constant 0.000000e+00 : f32
    %817 = vector.broadcast %cst_151 : f32 to vector<1x16xf32>
    %818 = arith.cmpf ogt, %809, %817 : vector<1x16xf32>
    %cst_152 = arith.constant -1.000000e+09 : f32
    %819 = vector.broadcast %cst_152 : f32 to vector<1x16xf32>
    %820 = arith.select %818, %816, %819 : vector<1x16xi1>, vector<1x16xf32>
    %cst_153 = arith.constant dense<0xFF800000> : vector<1xf32>
    %821 = vector.multi_reduction <maximumf>, %820, %cst_153 [1] : vector<1x16xf32> to vector<1xf32>
    %822 = vector.shape_cast %821 : vector<1xf32> to vector<1x1xf32>
    %823 = vector.broadcast %822 : vector<1x1xf32> to vector<1x16xf32>
    %824 = arith.subf %820, %823 : vector<1x16xf32>
    %825 = math.exp %824 : vector<1x16xf32>
    %cst_154 = arith.constant dense<0.000000e+00> : vector<1xf32>
    %826 = vector.multi_reduction <add>, %825, %cst_154 [1] : vector<1x16xf32> to vector<1xf32>
    %827 = vector.shape_cast %826 : vector<1xf32> to vector<1x1xf32>
    %828 = tpu.reciprocal %827 {approx = true} : vector<1x1xf32> -> vector<1x1xf32>
    %829 = vector.broadcast %828 : vector<1x1xf32> to vector<1x16xf32>
    %830 = arith.mulf %825, %829 : vector<1x16xf32>
    %cst_155 = arith.constant 0.000000e+00 : f32
    %831 = vector.broadcast %cst_155 : f32 to vector<1x16xf32>
    %832 = arith.cmpf ogt, %809, %831 : vector<1x16xf32>
    %833 = vector.extract_strided_slice %23 {offsets = [2, 0], sizes = [1, 1], strides = [1, 1]} : vector<3x1xf32> to vector<1x1xf32>
    %cst_156 = arith.constant 0.000000e+00 : f32
    %834 = vector.broadcast %cst_156 : f32 to vector<1x1xf32>
    %835 = arith.cmpf ogt, %833, %834 : vector<1x1xf32>
    %836 = vector.broadcast %835 : vector<1x1xi1> to vector<1x16xi1>
    %837 = arith.andi %832, %836 : vector<1x16xi1>
    %838 = vector.extract_strided_slice %30 {offsets = [2, 0], sizes = [1, 1], strides = [1, 1]} : vector<3x1xf32> to vector<1x1xf32>
    %cst_157 = arith.constant 1.000000e-30 : f32
    %839 = vector.broadcast %cst_157 : f32 to vector<1x16xf32>
    %840 = arith.maximumf %830, %839 : vector<1x16xf32>
    %841 = math.log %840 : vector<1x16xf32>
    %842 = vector.broadcast %838 : vector<1x1xf32> to vector<1x16xf32>
    %843 = arith.addf %842, %841 : vector<1x16xf32>
    %cst_158 = arith.constant -1.000000e+09 : f32
    %844 = vector.broadcast %cst_158 : f32 to vector<1x16xf32>
    %845 = arith.select %837, %843, %844 : vector<1x16xi1>, vector<1x16xf32>
    %c2_i32_159 = arith.constant 2 : i32
    %846 = vector.broadcast %c2_i32_159 : i32 to vector<3x1xi32>
    %847 = arith.cmpi eq, %629, %846 : vector<3x1xi32>
    %848 = vector.shape_cast %847 : vector<3x1xi1> to vector<3x1xi1>
    %849 = vector.broadcast %848 : vector<3x1xi1> to vector<3x16xi1>
    %850 = vector.shape_cast %830 : vector<1x16xf32> to vector<1x16xf32>
    %851 = vector.broadcast %850 : vector<1x16xf32> to vector<3x16xf32>
    %852 = arith.select %849, %851, %803 : vector<3x16xi1>, vector<3x16xf32>
    %853 = vector.shape_cast %847 : vector<3x1xi1> to vector<3x1xi1>
    %854 = vector.broadcast %853 : vector<3x1xi1> to vector<3x16xi1>
    %855 = vector.shape_cast %845 : vector<1x16xf32> to vector<1x16xf32>
    %856 = vector.broadcast %855 : vector<1x16xf32> to vector<3x16xf32>
    %857 = arith.select %854, %856, %808 : vector<3x16xi1>, vector<3x16xf32>
    %858 = tpu.iota {dimensions = array<i32: 0>} : vector<3x1xi32>
    %859 = arith.sitofp %858 : vector<3x1xi32> to vector<3x1xf32>
    %860 = tpu.iota {dimensions = array<i32: 0>} : vector<3x16xi32>
    %861 = arith.sitofp %860 : vector<3x16xi32> to vector<3x16xf32>
    %862 = tpu.iota {dimensions = array<i32: 1>} : vector<3x16xi32>
    %863 = arith.sitofp %862 : vector<3x16xi32> to vector<3x16xf32>
    %864 = tpu.iota {dimensions = array<i32: 1>} : vector<1x3xi32>
    %865 = arith.sitofp %864 : vector<1x3xi32> to vector<1x3xf32>
    %866 = arith.sitofp %29 : vector<3x1xi32> to vector<3x1xf32>
    %c0_i32_160 = arith.constant 0 : i32
    %867 = vector.broadcast %c0_i32_160 : i32 to vector<3x1xi32>
    %c0_i32_161 = arith.constant 0 : i32
    %868 = vector.broadcast %c0_i32_161 : i32 to vector<3x1xi32>
    %cst_162 = arith.constant 0.000000e+00 : f32
    %869 = vector.broadcast %cst_162 : f32 to vector<3x1xf32>
    %cst_163 = arith.constant 0.000000e+00 : f32
    %870 = vector.broadcast %cst_163 : f32 to vector<3x1xf32>
    %cst_164 = arith.constant 0.000000e+00 : f32
    %871 = vector.broadcast %cst_164 : f32 to vector<3x16xf32>
    %cst_165 = arith.constant 0.000000e+00 : f32
    %872 = vector.broadcast %cst_165 : f32 to vector<3x1xf32>
    %c0_i32_166 = arith.constant 0 : i32
    %873 = vector.broadcast %c0_i32_166 : i32 to vector<3x1xi32>
    %cst_167 = arith.constant 0.000000e+00 : f32
    %874 = vector.broadcast %cst_167 : f32 to vector<3x1xf32>
    %cst_168 = arith.constant 0.000000e+00 : f32
    %875 = vector.broadcast %cst_168 : f32 to vector<3x32xf32>
    %cst_169 = arith.constant 0.000000e+00 : f32
    %876 = vector.broadcast %cst_169 : f32 to vector<3x32xf32>
    %cst_170 = arith.constant dense<0xFF800000> : vector<3xf32>
    %877 = vector.multi_reduction <maximumf>, %857, %cst_170 [1] : vector<3x16xf32> to vector<3xf32>
    %878 = vector.shape_cast %877 : vector<3xf32> to vector<3x1xf32>
    %cst_171 = arith.constant dense<0xFF800000> : vector<1xf32>
    %879 = vector.multi_reduction <maximumf>, %878, %cst_171 [0] : vector<3x1xf32> to vector<1xf32>
    %880 = vector.shape_cast %879 : vector<1xf32> to vector<1x1xf32>
    %881 = vector.broadcast %880 : vector<1x1xf32> to vector<3x16xf32>
    %882 = arith.cmpf oge, %857, %881 : vector<3x16xf32>
    %cst_172 = arith.constant 1.000000e+00 : f32
    %cst_173 = arith.constant 0.000000e+00 : f32
    %883 = vector.broadcast %cst_172 : f32 to vector<3x16xf32>
    %884 = vector.broadcast %cst_173 : f32 to vector<3x16xf32>
    %885 = arith.select %882, %883, %884 : vector<3x16xi1>, vector<3x16xf32>
    %cst_174 = arith.constant dense<0xFF800000> : vector<3xf32>
    %886 = vector.multi_reduction <maximumf>, %885, %cst_174 [1] : vector<3x16xf32> to vector<3xf32>
    %887 = vector.shape_cast %886 : vector<3xf32> to vector<3x1xf32>
    %cst_175 = arith.constant 5.000000e-01 : f32
    %888 = vector.broadcast %cst_175 : f32 to vector<3x1xf32>
    %889 = arith.cmpf ogt, %887, %888 : vector<3x1xf32>
    %cst_176 = arith.constant 3.000000e+00 : f32
    %890 = vector.broadcast %cst_176 : f32 to vector<3x1xf32>
    %891 = arith.select %889, %859, %890 : vector<3x1xi1>, vector<3x1xf32>
    %cst_177 = arith.constant dense<0x7F800000> : vector<1xf32>
    %892 = vector.multi_reduction <minimumf>, %891, %cst_177 [0] : vector<3x1xf32> to vector<1xf32>
    %893 = vector.shape_cast %892 : vector<1xf32> to vector<1x1xf32>
    %894 = vector.broadcast %893 : vector<1x1xf32> to vector<3x16xf32>
    %895 = arith.cmpf oeq, %861, %894 : vector<3x16xf32>
    %896 = arith.andi %882, %895 : vector<3x16xi1>
    %cst_178 = arith.constant 1.600000e+01 : f32
    %897 = vector.broadcast %cst_178 : f32 to vector<3x16xf32>
    %898 = arith.select %896, %863, %897 : vector<3x16xi1>, vector<3x16xf32>
    %cst_179 = arith.constant dense<0x7F800000> : vector<3xf32>
    %899 = vector.multi_reduction <minimumf>, %898, %cst_179 [1] : vector<3x16xf32> to vector<3xf32>
    %900 = vector.shape_cast %899 : vector<3xf32> to vector<3x1xf32>
    %cst_180 = arith.constant dense<0x7F800000> : vector<1xf32>
    %901 = vector.multi_reduction <minimumf>, %900, %cst_180 [0] : vector<3x1xf32> to vector<1xf32>
    %902 = vector.shape_cast %901 : vector<1xf32> to vector<1x1xf32>
    %903 = vector.broadcast %893 : vector<1x1xf32> to vector<3x16xf32>
    %904 = arith.cmpf oeq, %861, %903 : vector<3x16xf32>
    %905 = vector.broadcast %902 : vector<1x1xf32> to vector<3x16xf32>
    %906 = arith.cmpf oeq, %863, %905 : vector<3x16xf32>
    %907 = arith.andi %904, %906 : vector<3x16xi1>
    %cst_181 = arith.constant 0.000000e+00 : f32
    %908 = vector.broadcast %cst_181 : f32 to vector<3x16xf32>
    %909 = arith.select %907, %852, %908 : vector<3x16xi1>, vector<3x16xf32>
    %cst_182 = arith.constant dense<0.000000e+00> : vector<3xf32>
    %910 = vector.multi_reduction <add>, %909, %cst_182 [1] : vector<3x16xf32> to vector<3xf32>
    %911 = vector.shape_cast %910 : vector<3xf32> to vector<3x1xf32>
    %cst_183 = arith.constant dense<0.000000e+00> : vector<1xf32>
    %912 = vector.multi_reduction <add>, %911, %cst_183 [0] : vector<3x1xf32> to vector<1xf32>
    %913 = vector.shape_cast %912 : vector<1xf32> to vector<1x1xf32>
    %cst_184 = arith.constant -5.000000e+08 : f32
    %914 = vector.broadcast %cst_184 : f32 to vector<1x1xf32>
    %915 = arith.cmpf ogt, %880, %914 : vector<1x1xf32>
    %916 = arith.extui %915 : vector<1x1xi1> to vector<1x1xi32>
    %917 = arith.sitofp %916 : vector<1x1xi32> to vector<1x1xf32>
    %cst_185 = arith.constant 1.000000e-30 : f32
    %918 = vector.broadcast %cst_185 : f32 to vector<1x1xf32>
    %919 = arith.maximumf %913, %918 : vector<1x1xf32>
    %920 = math.log %919 : vector<1x1xf32>
    %cst_186 = arith.constant -1.000000e+09 : f32
    %921 = vector.broadcast %cst_186 : f32 to vector<3x16xf32>
    %922 = arith.select %907, %921, %857 : vector<3x16xi1>, vector<3x16xf32>
    %c0_i32_187 = arith.constant 0 : i32
    %923 = vector.broadcast %c0_i32_187 : i32 to vector<3x1xi32>
    %924 = arith.cmpi eq, %858, %923 : vector<3x1xi32>
    %925 = arith.fptosi %893 : vector<1x1xf32> to vector<1x1xi32>
    %926 = vector.shape_cast %925 : vector<1x1xi32> to vector<1x1xi32>
    %927 = vector.broadcast %926 : vector<1x1xi32> to vector<3x1xi32>
    %928 = arith.select %924, %927, %867 : vector<3x1xi1>, vector<3x1xi32>
    %929 = arith.fptosi %902 : vector<1x1xf32> to vector<1x1xi32>
    %930 = vector.shape_cast %929 : vector<1x1xi32> to vector<1x1xi32>
    %931 = vector.broadcast %930 : vector<1x1xi32> to vector<3x1xi32>
    %932 = arith.select %924, %931, %868 : vector<3x1xi1>, vector<3x1xi32>
    %933 = vector.shape_cast %920 : vector<1x1xf32> to vector<1x1xf32>
    %934 = vector.broadcast %933 : vector<1x1xf32> to vector<3x1xf32>
    %935 = arith.select %924, %934, %869 : vector<3x1xi1>, vector<3x1xf32>
    %936 = vector.shape_cast %917 : vector<1x1xf32> to vector<1x1xf32>
    %937 = vector.broadcast %936 : vector<1x1xf32> to vector<3x1xf32>
    %938 = arith.select %924, %937, %870 : vector<3x1xi1>, vector<3x1xf32>
    %939 = vector.broadcast %893 : vector<1x1xf32> to vector<1x3xf32>
    %940 = arith.cmpf oeq, %865, %939 : vector<1x3xf32>
    %941 = arith.extui %940 : vector<1x3xi1> to vector<1x3xi32>
    %942 = arith.sitofp %941 : vector<1x3xi32> to vector<1x3xf32>
    %cst_188 = arith.constant dense<0.000000e+00> : vector<1x16xf32>
    %943 = tpu.matmul %942, %345, %cst_188 {dimension_numbers = #tpu.dot_dimension_numbers<[1], [0], [0], [1], [0, 0, 1, 1], [], []>} : vector<1x3xf32>, vector<3x16xf32>, vector<1x16xf32> -> vector<1x16xf32>
    %cst_189 = arith.constant dense<0.000000e+00> : vector<1x32xf32>
    %944 = tpu.matmul %942, %705, %cst_189 {dimension_numbers = #tpu.dot_dimension_numbers<[1], [0], [0], [1], [0, 0, 1, 1], [], []>} : vector<1x3xf32>, vector<3x32xf32>, vector<1x32xf32> -> vector<1x32xf32>
    %cst_190 = arith.constant dense<0.000000e+00> : vector<1x32xf32>
    %945 = tpu.matmul %942, %703, %cst_190 {dimension_numbers = #tpu.dot_dimension_numbers<[1], [0], [0], [1], [0, 0, 1, 1], [], []>} : vector<1x3xf32>, vector<3x32xf32>, vector<1x32xf32> -> vector<1x32xf32>
    %cst_191 = arith.constant 0.000000e+00 : f32
    %946 = vector.broadcast %cst_191 : f32 to vector<1x1xf32>
    %cst_192 = arith.constant 0.000000e+00 : f32
    %947 = vector.broadcast %cst_192 : f32 to vector<1x1xf32>
    %cst_193 = arith.constant 0.000000e+00 : f32
    %948 = vector.broadcast %cst_193 : f32 to vector<1x1xf32>
    %cst_194 = arith.constant 0.000000e+00 : f32
    %949 = vector.broadcast %cst_194 : f32 to vector<16x32xf32>
    %cst_195 = arith.constant 0.000000e+00 : f32
    %950 = vector.broadcast %cst_195 : f32 to vector<1x1xf32>
    %951 = arith.cmpf oeq, %893, %950 : vector<1x1xf32>
    %952 = arith.extui %951 : vector<1x1xi1> to vector<1x1xi32>
    %953 = arith.sitofp %952 : vector<1x1xi32> to vector<1x1xf32>
    %954 = vector.extract_strided_slice %18 {offsets = [0, 0], sizes = [1, 1], strides = [1, 1]} : vector<3x1xf32> to vector<1x1xf32>
    %955 = arith.mulf %953, %954 : vector<1x1xf32>
    %956 = arith.addf %946, %955 : vector<1x1xf32>
    %957 = vector.extract_strided_slice %30 {offsets = [0, 0], sizes = [1, 1], strides = [1, 1]} : vector<3x1xf32> to vector<1x1xf32>
    %958 = arith.mulf %953, %957 : vector<1x1xf32>
    %959 = arith.addf %947, %958 : vector<1x1xf32>
    %960 = vector.extract_strided_slice %866 {offsets = [0, 0], sizes = [1, 1], strides = [1, 1]} : vector<3x1xf32> to vector<1x1xf32>
    %961 = arith.mulf %953, %960 : vector<1x1xf32>
    %962 = arith.addf %948, %961 : vector<1x1xf32>
    %963 = vector.broadcast %953 : vector<1x1xf32> to vector<16x32xf32>
    %964 = arith.mulf %963, %578 : vector<16x32xf32>
    %965 = arith.addf %949, %964 : vector<16x32xf32>
    %cst_196 = arith.constant 1.000000e+00 : f32
    %966 = vector.broadcast %cst_196 : f32 to vector<1x1xf32>
    %967 = arith.cmpf oeq, %893, %966 : vector<1x1xf32>
    %968 = arith.extui %967 : vector<1x1xi1> to vector<1x1xi32>
    %969 = arith.sitofp %968 : vector<1x1xi32> to vector<1x1xf32>
    %970 = vector.extract_strided_slice %18 {offsets = [1, 0], sizes = [1, 1], strides = [1, 1]} : vector<3x1xf32> to vector<1x1xf32>
    %971 = arith.mulf %969, %970 : vector<1x1xf32>
    %972 = arith.addf %956, %971 : vector<1x1xf32>
    %973 = vector.extract_strided_slice %30 {offsets = [1, 0], sizes = [1, 1], strides = [1, 1]} : vector<3x1xf32> to vector<1x1xf32>
    %974 = arith.mulf %969, %973 : vector<1x1xf32>
    %975 = arith.addf %959, %974 : vector<1x1xf32>
    %976 = vector.extract_strided_slice %866 {offsets = [1, 0], sizes = [1, 1], strides = [1, 1]} : vector<3x1xf32> to vector<1x1xf32>
    %977 = arith.mulf %969, %976 : vector<1x1xf32>
    %978 = arith.addf %962, %977 : vector<1x1xf32>
    %979 = vector.broadcast %969 : vector<1x1xf32> to vector<16x32xf32>
    %980 = arith.mulf %979, %603 : vector<16x32xf32>
    %981 = arith.addf %965, %980 : vector<16x32xf32>
    %cst_197 = arith.constant 2.000000e+00 : f32
    %982 = vector.broadcast %cst_197 : f32 to vector<1x1xf32>
    %983 = arith.cmpf oeq, %893, %982 : vector<1x1xf32>
    %984 = arith.extui %983 : vector<1x1xi1> to vector<1x1xi32>
    %985 = arith.sitofp %984 : vector<1x1xi32> to vector<1x1xf32>
    %986 = vector.extract_strided_slice %18 {offsets = [2, 0], sizes = [1, 1], strides = [1, 1]} : vector<3x1xf32> to vector<1x1xf32>
    %987 = arith.mulf %985, %986 : vector<1x1xf32>
    %988 = arith.addf %972, %987 : vector<1x1xf32>
    %989 = vector.extract_strided_slice %30 {offsets = [2, 0], sizes = [1, 1], strides = [1, 1]} : vector<3x1xf32> to vector<1x1xf32>
    %990 = arith.mulf %985, %989 : vector<1x1xf32>
    %991 = arith.addf %975, %990 : vector<1x1xf32>
    %992 = vector.extract_strided_slice %866 {offsets = [2, 0], sizes = [1, 1], strides = [1, 1]} : vector<3x1xf32> to vector<1x1xf32>
    %993 = arith.mulf %985, %992 : vector<1x1xf32>
    %994 = arith.addf %978, %993 : vector<1x1xf32>
    %995 = vector.broadcast %985 : vector<1x1xf32> to vector<16x32xf32>
    %996 = arith.mulf %995, %628 : vector<16x32xf32>
    %997 = arith.addf %981, %996 : vector<16x32xf32>
    %998 = vector.broadcast %917 : vector<1x1xf32> to vector<1x16xf32>
    %999 = arith.mulf %943, %998 : vector<1x16xf32>
    %1000 = vector.shape_cast %924 : vector<3x1xi1> to vector<3x1xi1>
    %1001 = vector.broadcast %1000 : vector<3x1xi1> to vector<3x16xi1>
    %1002 = vector.shape_cast %999 : vector<1x16xf32> to vector<1x16xf32>
    %1003 = vector.broadcast %1002 : vector<1x16xf32> to vector<3x16xf32>
    %1004 = arith.select %1001, %1003, %871 : vector<3x16xi1>, vector<3x16xf32>
    %1005 = vector.shape_cast %988 : vector<1x1xf32> to vector<1x1xf32>
    %1006 = vector.broadcast %1005 : vector<1x1xf32> to vector<3x1xf32>
    %1007 = arith.select %924, %1006, %872 : vector<3x1xi1>, vector<3x1xf32>
    %1008 = arith.fptosi %994 : vector<1x1xf32> to vector<1x1xi32>
    %1009 = vector.shape_cast %1008 : vector<1x1xi32> to vector<1x1xi32>
    %1010 = vector.broadcast %1009 : vector<1x1xi32> to vector<3x1xi32>
    %1011 = arith.select %924, %1010, %873 : vector<3x1xi1>, vector<3x1xi32>
    %1012 = arith.addf %991, %920 : vector<1x1xf32>
    %1013 = vector.shape_cast %1012 : vector<1x1xf32> to vector<1x1xf32>
    %1014 = vector.broadcast %1013 : vector<1x1xf32> to vector<3x1xf32>
    %1015 = arith.select %924, %1014, %874 : vector<3x1xi1>, vector<3x1xf32>
    %1016 = vector.shape_cast %924 : vector<3x1xi1> to vector<3x1xi1>
    %1017 = vector.broadcast %1016 : vector<3x1xi1> to vector<3x32xi1>
    %1018 = vector.shape_cast %944 : vector<1x32xf32> to vector<1x32xf32>
    %1019 = vector.broadcast %1018 : vector<1x32xf32> to vector<3x32xf32>
    %1020 = arith.select %1017, %1019, %875 : vector<3x32xi1>, vector<3x32xf32>
    %1021 = vector.shape_cast %924 : vector<3x1xi1> to vector<3x1xi1>
    %1022 = vector.broadcast %1021 : vector<3x1xi1> to vector<3x32xi1>
    %1023 = vector.shape_cast %945 : vector<1x32xf32> to vector<1x32xf32>
    %1024 = vector.broadcast %1023 : vector<1x32xf32> to vector<3x32xf32>
    %1025 = arith.select %1022, %1024, %876 : vector<3x32xi1>, vector<3x32xf32>
    %c0_198 = arith.constant 0 : index
    %c0_199 = arith.constant 0 : index
    %c0_200 = arith.constant 0 : index
    %1026 = vector.load %arg25[%c0_198, %c0_199, %c0_200] : memref<3x16x32xf32, #tpu.memory_space<vmem>>, vector<1x16x32xf32>
    %1027 = vector.shape_cast %1026 : vector<1x16x32xf32> to vector<16x32xf32>
    %1028 = vector.shape_cast %997 : vector<16x32xf32> to vector<1x16x32xf32>
    tpu.vector_store %arg25[%c0_198, %c0_199, %c0_200], %1028 {strides = array<i32>} : memref<3x16x32xf32, #tpu.memory_space<vmem>>, vector<1x16x32xf32>,
    %cst_201 = arith.constant dense<0xFF800000> : vector<3xf32>
    %1029 = vector.multi_reduction <maximumf>, %922, %cst_201 [1] : vector<3x16xf32> to vector<3xf32>
    %1030 = vector.shape_cast %1029 : vector<3xf32> to vector<3x1xf32>
    %cst_202 = arith.constant dense<0xFF800000> : vector<1xf32>
    %1031 = vector.multi_reduction <maximumf>, %1030, %cst_202 [0] : vector<3x1xf32> to vector<1xf32>
    %1032 = vector.shape_cast %1031 : vector<1xf32> to vector<1x1xf32>
    %1033 = vector.broadcast %1032 : vector<1x1xf32> to vector<3x16xf32>
    %1034 = arith.cmpf oge, %922, %1033 : vector<3x16xf32>
    %cst_203 = arith.constant 1.000000e+00 : f32
    %cst_204 = arith.constant 0.000000e+00 : f32
    %1035 = vector.broadcast %cst_203 : f32 to vector<3x16xf32>
    %1036 = vector.broadcast %cst_204 : f32 to vector<3x16xf32>
    %1037 = arith.select %1034, %1035, %1036 : vector<3x16xi1>, vector<3x16xf32>
    %cst_205 = arith.constant dense<0xFF800000> : vector<3xf32>
    %1038 = vector.multi_reduction <maximumf>, %1037, %cst_205 [1] : vector<3x16xf32> to vector<3xf32>
    %1039 = vector.shape_cast %1038 : vector<3xf32> to vector<3x1xf32>
    %cst_206 = arith.constant 5.000000e-01 : f32
    %1040 = vector.broadcast %cst_206 : f32 to vector<3x1xf32>
    %1041 = arith.cmpf ogt, %1039, %1040 : vector<3x1xf32>
    %cst_207 = arith.constant 3.000000e+00 : f32
    %1042 = vector.broadcast %cst_207 : f32 to vector<3x1xf32>
    %1043 = arith.select %1041, %859, %1042 : vector<3x1xi1>, vector<3x1xf32>
    %cst_208 = arith.constant dense<0x7F800000> : vector<1xf32>
    %1044 = vector.multi_reduction <minimumf>, %1043, %cst_208 [0] : vector<3x1xf32> to vector<1xf32>
    %1045 = vector.shape_cast %1044 : vector<1xf32> to vector<1x1xf32>
    %1046 = vector.broadcast %1045 : vector<1x1xf32> to vector<3x16xf32>
    %1047 = arith.cmpf oeq, %861, %1046 : vector<3x16xf32>
    %1048 = arith.andi %1034, %1047 : vector<3x16xi1>
    %cst_209 = arith.constant 1.600000e+01 : f32
    %1049 = vector.broadcast %cst_209 : f32 to vector<3x16xf32>
    %1050 = arith.select %1048, %863, %1049 : vector<3x16xi1>, vector<3x16xf32>
    %cst_210 = arith.constant dense<0x7F800000> : vector<3xf32>
    %1051 = vector.multi_reduction <minimumf>, %1050, %cst_210 [1] : vector<3x16xf32> to vector<3xf32>
    %1052 = vector.shape_cast %1051 : vector<3xf32> to vector<3x1xf32>
    %cst_211 = arith.constant dense<0x7F800000> : vector<1xf32>
    %1053 = vector.multi_reduction <minimumf>, %1052, %cst_211 [0] : vector<3x1xf32> to vector<1xf32>
    %1054 = vector.shape_cast %1053 : vector<1xf32> to vector<1x1xf32>
    %1055 = vector.broadcast %1045 : vector<1x1xf32> to vector<3x16xf32>
    %1056 = arith.cmpf oeq, %861, %1055 : vector<3x16xf32>
    %1057 = vector.broadcast %1054 : vector<1x1xf32> to vector<3x16xf32>
    %1058 = arith.cmpf oeq, %863, %1057 : vector<3x16xf32>
    %1059 = arith.andi %1056, %1058 : vector<3x16xi1>
    %cst_212 = arith.constant 0.000000e+00 : f32
    %1060 = vector.broadcast %cst_212 : f32 to vector<3x16xf32>
    %1061 = arith.select %1059, %852, %1060 : vector<3x16xi1>, vector<3x16xf32>
    %cst_213 = arith.constant dense<0.000000e+00> : vector<3xf32>
    %1062 = vector.multi_reduction <add>, %1061, %cst_213 [1] : vector<3x16xf32> to vector<3xf32>
    %1063 = vector.shape_cast %1062 : vector<3xf32> to vector<3x1xf32>
    %cst_214 = arith.constant dense<0.000000e+00> : vector<1xf32>
    %1064 = vector.multi_reduction <add>, %1063, %cst_214 [0] : vector<3x1xf32> to vector<1xf32>
    %1065 = vector.shape_cast %1064 : vector<1xf32> to vector<1x1xf32>
    %cst_215 = arith.constant -5.000000e+08 : f32
    %1066 = vector.broadcast %cst_215 : f32 to vector<1x1xf32>
    %1067 = arith.cmpf ogt, %1032, %1066 : vector<1x1xf32>
    %1068 = arith.extui %1067 : vector<1x1xi1> to vector<1x1xi32>
    %1069 = arith.sitofp %1068 : vector<1x1xi32> to vector<1x1xf32>
    %cst_216 = arith.constant 1.000000e-30 : f32
    %1070 = vector.broadcast %cst_216 : f32 to vector<1x1xf32>
    %1071 = arith.maximumf %1065, %1070 : vector<1x1xf32>
    %1072 = math.log %1071 : vector<1x1xf32>
    %cst_217 = arith.constant -1.000000e+09 : f32
    %1073 = vector.broadcast %cst_217 : f32 to vector<3x16xf32>
    %1074 = arith.select %1059, %1073, %922 : vector<3x16xi1>, vector<3x16xf32>
    %c1_i32_218 = arith.constant 1 : i32
    %1075 = vector.broadcast %c1_i32_218 : i32 to vector<3x1xi32>
    %1076 = arith.cmpi eq, %858, %1075 : vector<3x1xi32>
    %1077 = arith.fptosi %1045 : vector<1x1xf32> to vector<1x1xi32>
    %1078 = vector.shape_cast %1077 : vector<1x1xi32> to vector<1x1xi32>
    %1079 = vector.broadcast %1078 : vector<1x1xi32> to vector<3x1xi32>
    %1080 = arith.select %1076, %1079, %928 : vector<3x1xi1>, vector<3x1xi32>
    %1081 = arith.fptosi %1054 : vector<1x1xf32> to vector<1x1xi32>
    %1082 = vector.shape_cast %1081 : vector<1x1xi32> to vector<1x1xi32>
    %1083 = vector.broadcast %1082 : vector<1x1xi32> to vector<3x1xi32>
    %1084 = arith.select %1076, %1083, %932 : vector<3x1xi1>, vector<3x1xi32>
    %1085 = vector.shape_cast %1072 : vector<1x1xf32> to vector<1x1xf32>
    %1086 = vector.broadcast %1085 : vector<1x1xf32> to vector<3x1xf32>
    %1087 = arith.select %1076, %1086, %935 : vector<3x1xi1>, vector<3x1xf32>
    %1088 = vector.shape_cast %1069 : vector<1x1xf32> to vector<1x1xf32>
    %1089 = vector.broadcast %1088 : vector<1x1xf32> to vector<3x1xf32>
    %1090 = arith.select %1076, %1089, %938 : vector<3x1xi1>, vector<3x1xf32>
    %1091 = vector.broadcast %1045 : vector<1x1xf32> to vector<1x3xf32>
    %1092 = arith.cmpf oeq, %865, %1091 : vector<1x3xf32>
    %1093 = arith.extui %1092 : vector<1x3xi1> to vector<1x3xi32>
    %1094 = arith.sitofp %1093 : vector<1x3xi32> to vector<1x3xf32>
    %cst_219 = arith.constant dense<0.000000e+00> : vector<1x16xf32>
    %1095 = tpu.matmul %1094, %345, %cst_219 {dimension_numbers = #tpu.dot_dimension_numbers<[1], [0], [0], [1], [0, 0, 1, 1], [], []>} : vector<1x3xf32>, vector<3x16xf32>, vector<1x16xf32> -> vector<1x16xf32>
    %cst_220 = arith.constant dense<0.000000e+00> : vector<1x32xf32>
    %1096 = tpu.matmul %1094, %705, %cst_220 {dimension_numbers = #tpu.dot_dimension_numbers<[1], [0], [0], [1], [0, 0, 1, 1], [], []>} : vector<1x3xf32>, vector<3x32xf32>, vector<1x32xf32> -> vector<1x32xf32>
    %cst_221 = arith.constant dense<0.000000e+00> : vector<1x32xf32>
    %1097 = tpu.matmul %1094, %703, %cst_221 {dimension_numbers = #tpu.dot_dimension_numbers<[1], [0], [0], [1], [0, 0, 1, 1], [], []>} : vector<1x3xf32>, vector<3x32xf32>, vector<1x32xf32> -> vector<1x32xf32>
    %cst_222 = arith.constant 0.000000e+00 : f32
    %1098 = vector.broadcast %cst_222 : f32 to vector<1x1xf32>
    %cst_223 = arith.constant 0.000000e+00 : f32
    %1099 = vector.broadcast %cst_223 : f32 to vector<1x1xf32>
    %cst_224 = arith.constant 0.000000e+00 : f32
    %1100 = vector.broadcast %cst_224 : f32 to vector<1x1xf32>
    %cst_225 = arith.constant 0.000000e+00 : f32
    %1101 = vector.broadcast %cst_225 : f32 to vector<16x32xf32>
    %cst_226 = arith.constant 0.000000e+00 : f32
    %1102 = vector.broadcast %cst_226 : f32 to vector<1x1xf32>
    %1103 = arith.cmpf oeq, %1045, %1102 : vector<1x1xf32>
    %1104 = arith.extui %1103 : vector<1x1xi1> to vector<1x1xi32>
    %1105 = arith.sitofp %1104 : vector<1x1xi32> to vector<1x1xf32>
    %1106 = vector.extract_strided_slice %18 {offsets = [0, 0], sizes = [1, 1], strides = [1, 1]} : vector<3x1xf32> to vector<1x1xf32>
    %1107 = arith.mulf %1105, %1106 : vector<1x1xf32>
    %1108 = arith.addf %1098, %1107 : vector<1x1xf32>
    %1109 = vector.extract_strided_slice %30 {offsets = [0, 0], sizes = [1, 1], strides = [1, 1]} : vector<3x1xf32> to vector<1x1xf32>
    %1110 = arith.mulf %1105, %1109 : vector<1x1xf32>
    %1111 = arith.addf %1099, %1110 : vector<1x1xf32>
    %1112 = vector.extract_strided_slice %866 {offsets = [0, 0], sizes = [1, 1], strides = [1, 1]} : vector<3x1xf32> to vector<1x1xf32>
    %1113 = arith.mulf %1105, %1112 : vector<1x1xf32>
    %1114 = arith.addf %1100, %1113 : vector<1x1xf32>
    %1115 = vector.broadcast %1105 : vector<1x1xf32> to vector<16x32xf32>
    %1116 = arith.mulf %1115, %578 : vector<16x32xf32>
    %1117 = arith.addf %1101, %1116 : vector<16x32xf32>
    %cst_227 = arith.constant 1.000000e+00 : f32
    %1118 = vector.broadcast %cst_227 : f32 to vector<1x1xf32>
    %1119 = arith.cmpf oeq, %1045, %1118 : vector<1x1xf32>
    %1120 = arith.extui %1119 : vector<1x1xi1> to vector<1x1xi32>
    %1121 = arith.sitofp %1120 : vector<1x1xi32> to vector<1x1xf32>
    %1122 = vector.extract_strided_slice %18 {offsets = [1, 0], sizes = [1, 1], strides = [1, 1]} : vector<3x1xf32> to vector<1x1xf32>
    %1123 = arith.mulf %1121, %1122 : vector<1x1xf32>
    %1124 = arith.addf %1108, %1123 : vector<1x1xf32>
    %1125 = vector.extract_strided_slice %30 {offsets = [1, 0], sizes = [1, 1], strides = [1, 1]} : vector<3x1xf32> to vector<1x1xf32>
    %1126 = arith.mulf %1121, %1125 : vector<1x1xf32>
    %1127 = arith.addf %1111, %1126 : vector<1x1xf32>
    %1128 = vector.extract_strided_slice %866 {offsets = [1, 0], sizes = [1, 1], strides = [1, 1]} : vector<3x1xf32> to vector<1x1xf32>
    %1129 = arith.mulf %1121, %1128 : vector<1x1xf32>
    %1130 = arith.addf %1114, %1129 : vector<1x1xf32>
    %1131 = vector.broadcast %1121 : vector<1x1xf32> to vector<16x32xf32>
    %1132 = arith.mulf %1131, %603 : vector<16x32xf32>
    %1133 = arith.addf %1117, %1132 : vector<16x32xf32>
    %cst_228 = arith.constant 2.000000e+00 : f32
    %1134 = vector.broadcast %cst_228 : f32 to vector<1x1xf32>
    %1135 = arith.cmpf oeq, %1045, %1134 : vector<1x1xf32>
    %1136 = arith.extui %1135 : vector<1x1xi1> to vector<1x1xi32>
    %1137 = arith.sitofp %1136 : vector<1x1xi32> to vector<1x1xf32>
    %1138 = vector.extract_strided_slice %18 {offsets = [2, 0], sizes = [1, 1], strides = [1, 1]} : vector<3x1xf32> to vector<1x1xf32>
    %1139 = arith.mulf %1137, %1138 : vector<1x1xf32>
    %1140 = arith.addf %1124, %1139 : vector<1x1xf32>
    %1141 = vector.extract_strided_slice %30 {offsets = [2, 0], sizes = [1, 1], strides = [1, 1]} : vector<3x1xf32> to vector<1x1xf32>
    %1142 = arith.mulf %1137, %1141 : vector<1x1xf32>
    %1143 = arith.addf %1127, %1142 : vector<1x1xf32>
    %1144 = vector.extract_strided_slice %866 {offsets = [2, 0], sizes = [1, 1], strides = [1, 1]} : vector<3x1xf32> to vector<1x1xf32>
    %1145 = arith.mulf %1137, %1144 : vector<1x1xf32>
    %1146 = arith.addf %1130, %1145 : vector<1x1xf32>
    %1147 = vector.broadcast %1137 : vector<1x1xf32> to vector<16x32xf32>
    %1148 = arith.mulf %1147, %628 : vector<16x32xf32>
    %1149 = arith.addf %1133, %1148 : vector<16x32xf32>
    %1150 = vector.broadcast %1069 : vector<1x1xf32> to vector<1x16xf32>
    %1151 = arith.mulf %1095, %1150 : vector<1x16xf32>
    %1152 = vector.shape_cast %1076 : vector<3x1xi1> to vector<3x1xi1>
    %1153 = vector.broadcast %1152 : vector<3x1xi1> to vector<3x16xi1>
    %1154 = vector.shape_cast %1151 : vector<1x16xf32> to vector<1x16xf32>
    %1155 = vector.broadcast %1154 : vector<1x16xf32> to vector<3x16xf32>
    %1156 = arith.select %1153, %1155, %1004 : vector<3x16xi1>, vector<3x16xf32>
    %1157 = vector.shape_cast %1140 : vector<1x1xf32> to vector<1x1xf32>
    %1158 = vector.broadcast %1157 : vector<1x1xf32> to vector<3x1xf32>
    %1159 = arith.select %1076, %1158, %1007 : vector<3x1xi1>, vector<3x1xf32>
    %1160 = arith.fptosi %1146 : vector<1x1xf32> to vector<1x1xi32>
    %1161 = vector.shape_cast %1160 : vector<1x1xi32> to vector<1x1xi32>
    %1162 = vector.broadcast %1161 : vector<1x1xi32> to vector<3x1xi32>
    %1163 = arith.select %1076, %1162, %1011 : vector<3x1xi1>, vector<3x1xi32>
    %1164 = arith.addf %1143, %1072 : vector<1x1xf32>
    %1165 = vector.shape_cast %1164 : vector<1x1xf32> to vector<1x1xf32>
    %1166 = vector.broadcast %1165 : vector<1x1xf32> to vector<3x1xf32>
    %1167 = arith.select %1076, %1166, %1015 : vector<3x1xi1>, vector<3x1xf32>
    %1168 = vector.shape_cast %1076 : vector<3x1xi1> to vector<3x1xi1>
    %1169 = vector.broadcast %1168 : vector<3x1xi1> to vector<3x32xi1>
    %1170 = vector.shape_cast %1096 : vector<1x32xf32> to vector<1x32xf32>
    %1171 = vector.broadcast %1170 : vector<1x32xf32> to vector<3x32xf32>
    %1172 = arith.select %1169, %1171, %1020 : vector<3x32xi1>, vector<3x32xf32>
    %1173 = vector.shape_cast %1076 : vector<3x1xi1> to vector<3x1xi1>
    %1174 = vector.broadcast %1173 : vector<3x1xi1> to vector<3x32xi1>
    %1175 = vector.shape_cast %1097 : vector<1x32xf32> to vector<1x32xf32>
    %1176 = vector.broadcast %1175 : vector<1x32xf32> to vector<3x32xf32>
    %1177 = arith.select %1174, %1176, %1025 : vector<3x32xi1>, vector<3x32xf32>
    %c1 = arith.constant 1 : index
    %c0_229 = arith.constant 0 : index
    %c0_230 = arith.constant 0 : index
    %1178 = vector.load %arg25[%c1, %c0_229, %c0_230] : memref<3x16x32xf32, #tpu.memory_space<vmem>>, vector<1x16x32xf32>
    %1179 = vector.shape_cast %1178 : vector<1x16x32xf32> to vector<16x32xf32>
    %1180 = vector.shape_cast %1149 : vector<16x32xf32> to vector<1x16x32xf32>
    tpu.vector_store %arg25[%c1, %c0_229, %c0_230], %1180 {strides = array<i32>} : memref<3x16x32xf32, #tpu.memory_space<vmem>>, vector<1x16x32xf32>,
    %cst_231 = arith.constant dense<0xFF800000> : vector<3xf32>
    %1181 = vector.multi_reduction <maximumf>, %1074, %cst_231 [1] : vector<3x16xf32> to vector<3xf32>
    %1182 = vector.shape_cast %1181 : vector<3xf32> to vector<3x1xf32>
    %cst_232 = arith.constant dense<0xFF800000> : vector<1xf32>
    %1183 = vector.multi_reduction <maximumf>, %1182, %cst_232 [0] : vector<3x1xf32> to vector<1xf32>
    %1184 = vector.shape_cast %1183 : vector<1xf32> to vector<1x1xf32>
    %1185 = vector.broadcast %1184 : vector<1x1xf32> to vector<3x16xf32>
    %1186 = arith.cmpf oge, %1074, %1185 : vector<3x16xf32>
    %cst_233 = arith.constant 1.000000e+00 : f32
    %cst_234 = arith.constant 0.000000e+00 : f32
    %1187 = vector.broadcast %cst_233 : f32 to vector<3x16xf32>
    %1188 = vector.broadcast %cst_234 : f32 to vector<3x16xf32>
    %1189 = arith.select %1186, %1187, %1188 : vector<3x16xi1>, vector<3x16xf32>
    %cst_235 = arith.constant dense<0xFF800000> : vector<3xf32>
    %1190 = vector.multi_reduction <maximumf>, %1189, %cst_235 [1] : vector<3x16xf32> to vector<3xf32>
    %1191 = vector.shape_cast %1190 : vector<3xf32> to vector<3x1xf32>
    %cst_236 = arith.constant 5.000000e-01 : f32
    %1192 = vector.broadcast %cst_236 : f32 to vector<3x1xf32>
    %1193 = arith.cmpf ogt, %1191, %1192 : vector<3x1xf32>
    %cst_237 = arith.constant 3.000000e+00 : f32
    %1194 = vector.broadcast %cst_237 : f32 to vector<3x1xf32>
    %1195 = arith.select %1193, %859, %1194 : vector<3x1xi1>, vector<3x1xf32>
    %cst_238 = arith.constant dense<0x7F800000> : vector<1xf32>
    %1196 = vector.multi_reduction <minimumf>, %1195, %cst_238 [0] : vector<3x1xf32> to vector<1xf32>
    %1197 = vector.shape_cast %1196 : vector<1xf32> to vector<1x1xf32>
    %1198 = vector.broadcast %1197 : vector<1x1xf32> to vector<3x16xf32>
    %1199 = arith.cmpf oeq, %861, %1198 : vector<3x16xf32>
    %1200 = arith.andi %1186, %1199 : vector<3x16xi1>
    %cst_239 = arith.constant 1.600000e+01 : f32
    %1201 = vector.broadcast %cst_239 : f32 to vector<3x16xf32>
    %1202 = arith.select %1200, %863, %1201 : vector<3x16xi1>, vector<3x16xf32>
    %cst_240 = arith.constant dense<0x7F800000> : vector<3xf32>
    %1203 = vector.multi_reduction <minimumf>, %1202, %cst_240 [1] : vector<3x16xf32> to vector<3xf32>
    %1204 = vector.shape_cast %1203 : vector<3xf32> to vector<3x1xf32>
    %cst_241 = arith.constant dense<0x7F800000> : vector<1xf32>
    %1205 = vector.multi_reduction <minimumf>, %1204, %cst_241 [0] : vector<3x1xf32> to vector<1xf32>
    %1206 = vector.shape_cast %1205 : vector<1xf32> to vector<1x1xf32>
    %1207 = vector.broadcast %1197 : vector<1x1xf32> to vector<3x16xf32>
    %1208 = arith.cmpf oeq, %861, %1207 : vector<3x16xf32>
    %1209 = vector.broadcast %1206 : vector<1x1xf32> to vector<3x16xf32>
    %1210 = arith.cmpf oeq, %863, %1209 : vector<3x16xf32>
    %1211 = arith.andi %1208, %1210 : vector<3x16xi1>
    %cst_242 = arith.constant 0.000000e+00 : f32
    %1212 = vector.broadcast %cst_242 : f32 to vector<3x16xf32>
    %1213 = arith.select %1211, %852, %1212 : vector<3x16xi1>, vector<3x16xf32>
    %cst_243 = arith.constant dense<0.000000e+00> : vector<3xf32>
    %1214 = vector.multi_reduction <add>, %1213, %cst_243 [1] : vector<3x16xf32> to vector<3xf32>
    %1215 = vector.shape_cast %1214 : vector<3xf32> to vector<3x1xf32>
    %cst_244 = arith.constant dense<0.000000e+00> : vector<1xf32>
    %1216 = vector.multi_reduction <add>, %1215, %cst_244 [0] : vector<3x1xf32> to vector<1xf32>
    %1217 = vector.shape_cast %1216 : vector<1xf32> to vector<1x1xf32>
    %cst_245 = arith.constant -5.000000e+08 : f32
    %1218 = vector.broadcast %cst_245 : f32 to vector<1x1xf32>
    %1219 = arith.cmpf ogt, %1184, %1218 : vector<1x1xf32>
    %1220 = arith.extui %1219 : vector<1x1xi1> to vector<1x1xi32>
    %1221 = arith.sitofp %1220 : vector<1x1xi32> to vector<1x1xf32>
    %cst_246 = arith.constant 1.000000e-30 : f32
    %1222 = vector.broadcast %cst_246 : f32 to vector<1x1xf32>
    %1223 = arith.maximumf %1217, %1222 : vector<1x1xf32>
    %1224 = math.log %1223 : vector<1x1xf32>
    %c2_i32_247 = arith.constant 2 : i32
    %1225 = vector.broadcast %c2_i32_247 : i32 to vector<3x1xi32>
    %1226 = arith.cmpi eq, %858, %1225 : vector<3x1xi32>
    %1227 = arith.fptosi %1197 : vector<1x1xf32> to vector<1x1xi32>
    %1228 = vector.shape_cast %1227 : vector<1x1xi32> to vector<1x1xi32>
    %1229 = vector.broadcast %1228 : vector<1x1xi32> to vector<3x1xi32>
    %1230 = arith.select %1226, %1229, %1080 : vector<3x1xi1>, vector<3x1xi32>
    %1231 = arith.fptosi %1206 : vector<1x1xf32> to vector<1x1xi32>
    %1232 = vector.shape_cast %1231 : vector<1x1xi32> to vector<1x1xi32>
    %1233 = vector.broadcast %1232 : vector<1x1xi32> to vector<3x1xi32>
    %1234 = arith.select %1226, %1233, %1084 : vector<3x1xi1>, vector<3x1xi32>
    %1235 = vector.shape_cast %1224 : vector<1x1xf32> to vector<1x1xf32>
    %1236 = vector.broadcast %1235 : vector<1x1xf32> to vector<3x1xf32>
    %1237 = arith.select %1226, %1236, %1087 : vector<3x1xi1>, vector<3x1xf32>
    %1238 = vector.shape_cast %1221 : vector<1x1xf32> to vector<1x1xf32>
    %1239 = vector.broadcast %1238 : vector<1x1xf32> to vector<3x1xf32>
    %1240 = arith.select %1226, %1239, %1090 : vector<3x1xi1>, vector<3x1xf32>
    %1241 = vector.broadcast %1197 : vector<1x1xf32> to vector<1x3xf32>
    %1242 = arith.cmpf oeq, %865, %1241 : vector<1x3xf32>
    %1243 = arith.extui %1242 : vector<1x3xi1> to vector<1x3xi32>
    %1244 = arith.sitofp %1243 : vector<1x3xi32> to vector<1x3xf32>
    %cst_248 = arith.constant dense<0.000000e+00> : vector<1x16xf32>
    %1245 = tpu.matmul %1244, %345, %cst_248 {dimension_numbers = #tpu.dot_dimension_numbers<[1], [0], [0], [1], [0, 0, 1, 1], [], []>} : vector<1x3xf32>, vector<3x16xf32>, vector<1x16xf32> -> vector<1x16xf32>
    %cst_249 = arith.constant dense<0.000000e+00> : vector<1x32xf32>
    %1246 = tpu.matmul %1244, %705, %cst_249 {dimension_numbers = #tpu.dot_dimension_numbers<[1], [0], [0], [1], [0, 0, 1, 1], [], []>} : vector<1x3xf32>, vector<3x32xf32>, vector<1x32xf32> -> vector<1x32xf32>
    %cst_250 = arith.constant dense<0.000000e+00> : vector<1x32xf32>
    %1247 = tpu.matmul %1244, %703, %cst_250 {dimension_numbers = #tpu.dot_dimension_numbers<[1], [0], [0], [1], [0, 0, 1, 1], [], []>} : vector<1x3xf32>, vector<3x32xf32>, vector<1x32xf32> -> vector<1x32xf32>
    %cst_251 = arith.constant 0.000000e+00 : f32
    %1248 = vector.broadcast %cst_251 : f32 to vector<1x1xf32>
    %cst_252 = arith.constant 0.000000e+00 : f32
    %1249 = vector.broadcast %cst_252 : f32 to vector<1x1xf32>
    %cst_253 = arith.constant 0.000000e+00 : f32
    %1250 = vector.broadcast %cst_253 : f32 to vector<1x1xf32>
    %cst_254 = arith.constant 0.000000e+00 : f32
    %1251 = vector.broadcast %cst_254 : f32 to vector<16x32xf32>
    %cst_255 = arith.constant 0.000000e+00 : f32
    %1252 = vector.broadcast %cst_255 : f32 to vector<1x1xf32>
    %1253 = arith.cmpf oeq, %1197, %1252 : vector<1x1xf32>
    %1254 = arith.extui %1253 : vector<1x1xi1> to vector<1x1xi32>
    %1255 = arith.sitofp %1254 : vector<1x1xi32> to vector<1x1xf32>
    %1256 = vector.extract_strided_slice %18 {offsets = [0, 0], sizes = [1, 1], strides = [1, 1]} : vector<3x1xf32> to vector<1x1xf32>
    %1257 = arith.mulf %1255, %1256 : vector<1x1xf32>
    %1258 = arith.addf %1248, %1257 : vector<1x1xf32>
    %1259 = vector.extract_strided_slice %30 {offsets = [0, 0], sizes = [1, 1], strides = [1, 1]} : vector<3x1xf32> to vector<1x1xf32>
    %1260 = arith.mulf %1255, %1259 : vector<1x1xf32>
    %1261 = arith.addf %1249, %1260 : vector<1x1xf32>
    %1262 = vector.extract_strided_slice %866 {offsets = [0, 0], sizes = [1, 1], strides = [1, 1]} : vector<3x1xf32> to vector<1x1xf32>
    %1263 = arith.mulf %1255, %1262 : vector<1x1xf32>
    %1264 = arith.addf %1250, %1263 : vector<1x1xf32>
    %1265 = vector.broadcast %1255 : vector<1x1xf32> to vector<16x32xf32>
    %1266 = arith.mulf %1265, %578 : vector<16x32xf32>
    %1267 = arith.addf %1251, %1266 : vector<16x32xf32>
    %cst_256 = arith.constant 1.000000e+00 : f32
    %1268 = vector.broadcast %cst_256 : f32 to vector<1x1xf32>
    %1269 = arith.cmpf oeq, %1197, %1268 : vector<1x1xf32>
    %1270 = arith.extui %1269 : vector<1x1xi1> to vector<1x1xi32>
    %1271 = arith.sitofp %1270 : vector<1x1xi32> to vector<1x1xf32>
    %1272 = vector.extract_strided_slice %18 {offsets = [1, 0], sizes = [1, 1], strides = [1, 1]} : vector<3x1xf32> to vector<1x1xf32>
    %1273 = arith.mulf %1271, %1272 : vector<1x1xf32>
    %1274 = arith.addf %1258, %1273 : vector<1x1xf32>
    %1275 = vector.extract_strided_slice %30 {offsets = [1, 0], sizes = [1, 1], strides = [1, 1]} : vector<3x1xf32> to vector<1x1xf32>
    %1276 = arith.mulf %1271, %1275 : vector<1x1xf32>
    %1277 = arith.addf %1261, %1276 : vector<1x1xf32>
    %1278 = vector.extract_strided_slice %866 {offsets = [1, 0], sizes = [1, 1], strides = [1, 1]} : vector<3x1xf32> to vector<1x1xf32>
    %1279 = arith.mulf %1271, %1278 : vector<1x1xf32>
    %1280 = arith.addf %1264, %1279 : vector<1x1xf32>
    %1281 = vector.broadcast %1271 : vector<1x1xf32> to vector<16x32xf32>
    %1282 = arith.mulf %1281, %603 : vector<16x32xf32>
    %1283 = arith.addf %1267, %1282 : vector<16x32xf32>
    %cst_257 = arith.constant 2.000000e+00 : f32
    %1284 = vector.broadcast %cst_257 : f32 to vector<1x1xf32>
    %1285 = arith.cmpf oeq, %1197, %1284 : vector<1x1xf32>
    %1286 = arith.extui %1285 : vector<1x1xi1> to vector<1x1xi32>
    %1287 = arith.sitofp %1286 : vector<1x1xi32> to vector<1x1xf32>
    %1288 = vector.extract_strided_slice %18 {offsets = [2, 0], sizes = [1, 1], strides = [1, 1]} : vector<3x1xf32> to vector<1x1xf32>
    %1289 = arith.mulf %1287, %1288 : vector<1x1xf32>
    %1290 = arith.addf %1274, %1289 : vector<1x1xf32>
    %1291 = vector.extract_strided_slice %30 {offsets = [2, 0], sizes = [1, 1], strides = [1, 1]} : vector<3x1xf32> to vector<1x1xf32>
    %1292 = arith.mulf %1287, %1291 : vector<1x1xf32>
    %1293 = arith.addf %1277, %1292 : vector<1x1xf32>
    %1294 = vector.extract_strided_slice %866 {offsets = [2, 0], sizes = [1, 1], strides = [1, 1]} : vector<3x1xf32> to vector<1x1xf32>
    %1295 = arith.mulf %1287, %1294 : vector<1x1xf32>
    %1296 = arith.addf %1280, %1295 : vector<1x1xf32>
    %1297 = vector.broadcast %1287 : vector<1x1xf32> to vector<16x32xf32>
    %1298 = arith.mulf %1297, %628 : vector<16x32xf32>
    %1299 = arith.addf %1283, %1298 : vector<16x32xf32>
    %1300 = vector.broadcast %1221 : vector<1x1xf32> to vector<1x16xf32>
    %1301 = arith.mulf %1245, %1300 : vector<1x16xf32>
    %1302 = vector.shape_cast %1226 : vector<3x1xi1> to vector<3x1xi1>
    %1303 = vector.broadcast %1302 : vector<3x1xi1> to vector<3x16xi1>
    %1304 = vector.shape_cast %1301 : vector<1x16xf32> to vector<1x16xf32>
    %1305 = vector.broadcast %1304 : vector<1x16xf32> to vector<3x16xf32>
    %1306 = arith.select %1303, %1305, %1156 : vector<3x16xi1>, vector<3x16xf32>
    %1307 = vector.shape_cast %1290 : vector<1x1xf32> to vector<1x1xf32>
    %1308 = vector.broadcast %1307 : vector<1x1xf32> to vector<3x1xf32>
    %1309 = arith.select %1226, %1308, %1159 : vector<3x1xi1>, vector<3x1xf32>
    %1310 = arith.fptosi %1296 : vector<1x1xf32> to vector<1x1xi32>
    %1311 = vector.shape_cast %1310 : vector<1x1xi32> to vector<1x1xi32>
    %1312 = vector.broadcast %1311 : vector<1x1xi32> to vector<3x1xi32>
    %1313 = arith.select %1226, %1312, %1163 : vector<3x1xi1>, vector<3x1xi32>
    %1314 = arith.addf %1293, %1224 : vector<1x1xf32>
    %1315 = vector.shape_cast %1314 : vector<1x1xf32> to vector<1x1xf32>
    %1316 = vector.broadcast %1315 : vector<1x1xf32> to vector<3x1xf32>
    %1317 = arith.select %1226, %1316, %1167 : vector<3x1xi1>, vector<3x1xf32>
    %1318 = vector.shape_cast %1226 : vector<3x1xi1> to vector<3x1xi1>
    %1319 = vector.broadcast %1318 : vector<3x1xi1> to vector<3x32xi1>
    %1320 = vector.shape_cast %1246 : vector<1x32xf32> to vector<1x32xf32>
    %1321 = vector.broadcast %1320 : vector<1x32xf32> to vector<3x32xf32>
    %1322 = arith.select %1319, %1321, %1172 : vector<3x32xi1>, vector<3x32xf32>
    %1323 = vector.shape_cast %1226 : vector<3x1xi1> to vector<3x1xi1>
    %1324 = vector.broadcast %1323 : vector<3x1xi1> to vector<3x32xi1>
    %1325 = vector.shape_cast %1247 : vector<1x32xf32> to vector<1x32xf32>
    %1326 = vector.broadcast %1325 : vector<1x32xf32> to vector<3x32xf32>
    %1327 = arith.select %1324, %1326, %1177 : vector<3x32xi1>, vector<3x32xf32>
    %c2 = arith.constant 2 : index
    %c0_258 = arith.constant 0 : index
    %c0_259 = arith.constant 0 : index
    %1328 = vector.load %arg25[%c2, %c0_258, %c0_259] : memref<3x16x32xf32, #tpu.memory_space<vmem>>, vector<1x16x32xf32>
    %1329 = vector.shape_cast %1328 : vector<1x16x32xf32> to vector<16x32xf32>
    %1330 = vector.shape_cast %1299 : vector<16x32xf32> to vector<1x16x32xf32>
    tpu.vector_store %arg25[%c2, %c0_258, %c0_259], %1330 {strides = array<i32>} : memref<3x16x32xf32, #tpu.memory_space<vmem>>, vector<1x16x32xf32>,
    %c0_260 = arith.constant 0 : index
    %c0_261 = arith.constant 0 : index
    %1331 = vector.load %arg18[%c0_260, %c0_261] : memref<3x16xf32, #tpu.memory_space<vmem>>, vector<3x16xf32>
    tpu.vector_store %arg18[%c0_260, %c0_261], %1306 {strides = array<i32>} : memref<3x16xf32, #tpu.memory_space<vmem>>, vector<3x16xf32>,
    %c0_262 = arith.constant 0 : index
    %c0_263 = arith.constant 0 : index
    %1332 = vector.load %arg19[%c0_262, %c0_263] : memref<3x1xf32, #tpu.memory_space<vmem>>, vector<3x1xf32>
    tpu.vector_store %arg19[%c0_262, %c0_263], %1309 {strides = array<i32>} : memref<3x1xf32, #tpu.memory_space<vmem>>, vector<3x1xf32>,
    %c0_264 = arith.constant 0 : index
    %c0_265 = arith.constant 0 : index
    %1333 = vector.load %arg20[%c0_264, %c0_265] : memref<3x1xi32, #tpu.memory_space<vmem>>, vector<3x1xi32>
    tpu.vector_store %arg20[%c0_264, %c0_265], %1313 {strides = array<i32>} : memref<3x1xi32, #tpu.memory_space<vmem>>, vector<3x1xi32>,
    %c0_266 = arith.constant 0 : index
    %c0_267 = arith.constant 0 : index
    %1334 = vector.load %arg21[%c0_266, %c0_267] : memref<3x1xf32, #tpu.memory_space<vmem>>, vector<3x1xf32>
    tpu.vector_store %arg21[%c0_266, %c0_267], %1240 {strides = array<i32>} : memref<3x1xf32, #tpu.memory_space<vmem>>, vector<3x1xf32>,
    %c0_268 = arith.constant 0 : index
    %c0_269 = arith.constant 0 : index
    %1335 = vector.load %arg22[%c0_268, %c0_269] : memref<3x1xf32, #tpu.memory_space<vmem>>, vector<3x1xf32>
    tpu.vector_store %arg22[%c0_268, %c0_269], %1317 {strides = array<i32>} : memref<3x1xf32, #tpu.memory_space<vmem>>, vector<3x1xf32>,
    %c0_270 = arith.constant 0 : index
    %c0_271 = arith.constant 0 : index
    %1336 = vector.load %arg23[%c0_270, %c0_271] : memref<3x32xf32, #tpu.memory_space<vmem>>, vector<3x32xf32>
    tpu.vector_store %arg23[%c0_270, %c0_271], %1322 {strides = array<i32>} : memref<3x32xf32, #tpu.memory_space<vmem>>, vector<3x32xf32>,
    %c0_272 = arith.constant 0 : index
    %c0_273 = arith.constant 0 : index
    %1337 = vector.load %arg24[%c0_272, %c0_273] : memref<3x32xf32, #tpu.memory_space<vmem>>, vector<3x32xf32>
    tpu.vector_store %arg24[%c0_272, %c0_273], %1327 {strides = array<i32>} : memref<3x32xf32, #tpu.memory_space<vmem>>, vector<3x32xf32>,
    %c0_274 = arith.constant 0 : index
    %c0_275 = arith.constant 0 : index
    %1338 = vector.load %arg26[%c0_274, %c0_275] : memref<3x1xi32, #tpu.memory_space<vmem>>, vector<3x1xi32>
    tpu.vector_store %arg26[%c0_274, %c0_275], %1234 {strides = array<i32>} : memref<3x1xi32, #tpu.memory_space<vmem>>, vector<3x1xi32>,
    %c0_276 = arith.constant 0 : index
    %c0_277 = arith.constant 0 : index
    %1339 = vector.load %arg27[%c0_276, %c0_277] : memref<3x1xf32, #tpu.memory_space<vmem>>, vector<3x1xf32>
    tpu.vector_store %arg27[%c0_276, %c0_277], %1237 {strides = array<i32>} : memref<3x1xf32, #tpu.memory_space<vmem>>, vector<3x1xf32>,
    %c0_278 = arith.constant 0 : index
    %c0_279 = arith.constant 0 : index
    %1340 = vector.load %arg28[%c0_278, %c0_279] : memref<3x1xi32, #tpu.memory_space<vmem>>, vector<3x1xi32>
    tpu.vector_store %arg28[%c0_278, %c0_279], %1230 {strides = array<i32>} : memref<3x1xi32, #tpu.memory_space<vmem>>, vector<3x1xi32>,
    return
  }
}

</mosaic_0001>

<bundles_post_ra>
// kernel: _beam_search_run.1
= control target key start
LH: loop header
LB: loop body
LE: loop exit
PB: predicated region body
PF: predicated region fallthrough
CT: control target
= control target key end

     0   :  { %s4864_s6 = smov 1   ;;  %s4865_s10 = smov 2   ;;  %s6057_s0 = inlined_call_operand.smem [shape: u32[30], index: -1, kind: input, shape index: {}] }
   0x1   :  { %s4910_s5 = sld [smem:[%s6057_s0]]   ;;  %s4866_s14 = smov 3  }
   0x2   :  { %s4915_s9 = sld [smem:[%s6057_s0 + %s4864_s6]]   ;;  %s4867_s18 = smov 4  }
   0x3   :  { %s4920_s13 = sld [smem:[%s6057_s0 + %s4865_s10]]   ;;  %s4868_s22 = smov 5  }
   0x4   :  { %s4925_s17 = sld [smem:[%s6057_s0 + %s4866_s14]]   ;;  %s4869_s26 = smov 6  }
   0x5   :  { %s4930_s21 = sld [smem:[%s6057_s0 + %s4867_s18]]   ;;  %s4870_s30 = smov 7  }
   0x6   :  { %s4935_s25 = sld [smem:[%s6057_s0 + %s4868_s22]]   ;;  %s4871_s4 = smov 8  }
   0x7   :  { %s4940_s29 = sld [smem:[%s6057_s0 + %s4869_s26]]   ;;  %s4872_s10 = smov 9  }
   0x8   :  { %s4945_s3 = sld [smem:[%s6057_s0 + %s4870_s30]]   ;;  %s4873_s15 = smov 10  }
   0x9   :  { %s4950_s8 = sld [smem:[%s6057_s0 + %s4871_s4]]   ;;  %s4874_s20 = smov 11  }
   0xa   :  { %s4955_s14 = sld [smem:[%s6057_s0 + %s4872_s10]]   ;;  %s4875_s26 = smov 12  }
   0xb   :  { %s4960_s19 = sld [smem:[%s6057_s0 + %s4873_s15]]   ;;  %s4876_s1 = smov 13  }
   0xc   :  { %s4965_s24 = sld [smem:[%s6057_s0 + %s4874_s20]]   ;;  %s4877_s7 = smov 14  }
   0xd   :  { %s4970_s30 = sld [smem:[%s6057_s0 + %s4875_s26]]   ;;  %s4878_s15 = smov 15  }
   0xe   :  { %s4975_s6 = sld [smem:[%s6057_s0 + %s4876_s1]]   ;;  %s4879_s22 = smov 16  }
   0xf   :  { %s4980_s12 = sld [smem:[%s6057_s0 + %s4877_s7]]   ;;  %s4880_s28 = smov 17  }
  0x10   :  { %s4985_s20 = sld [smem:[%s6057_s0 + %s4878_s15]]   ;;  %s4881_s7 = smov 18  }
  0x11   :  { %s4990_s27 = sld [smem:[%s6057_s0 + %s4879_s22]]   ;;  %s4882_s15 = smov 19  }
  0x12   :  { %6061 = sst [smem:[#allocation5_spill]] %s4965_s24  ;;  %s4883_s22 = smov 20  }
  0x13   :  { %s4995_s4 = sld [smem:[%s6057_s0 + %s4880_s28]]   ;;  %s4884_s28 = smov 21  }
  0x14   :  { %6062 = sst [smem:[#allocation6_spill]] %s4975_s6 }
  0x15   :  { %6063 = sst [smem:[#allocation7_spill]] %s4980_s12 }
  0x16   :  { %s5000_s12 = sld [smem:[%s6057_s0 + %s4881_s7]]   ;;  %s4885_s7 = smov 22  }
  0x17   :  { %6064 = sst [smem:[#allocation8_spill]] %s4990_s27 }
  0x18   :  { %s5005_s6 = sld [smem:[%s6057_s0 + %s4882_s15]]   ;;  %s4886_s15 = smov 23  }
  0x19   :  { %s5010_s24 = sld [smem:[%s6057_s0 + %s4883_s22]]   ;;  %s4887_s22 = smov 24  }
  0x1a   :  { %s5015_s27 = sld [smem:[%s6057_s0 + %s4884_s28]]   ;;  %s4888_s28 = smov 25  }
  0x1c   :  { %6065 = sst [smem:[#allocation9_spill]] %s5000_s12 }
  0x1d   :  { %s5020_s12 = sld [smem:[%s6057_s0 + %s4885_s7]]   ;;  %s4889_s7 = smov 26  }
  0x1e   :  { %6066 = sst [smem:[#allocation10_spill]] %s5005_s6 }
  0x1f   :  { %6067 = sst [smem:[#allocation11_spill]] %s5010_s24 }
  0x20   :  { %6068 = sst [smem:[#allocation12_spill]] %s5015_s27 }
  0x21   :  { %s5025_s6 = sld [smem:[%s6057_s0 + %s4886_s15]]   ;;  %s4890_s15 = smov 27  }
  0x22   :  { %s5030_s24 = sld [smem:[%s6057_s0 + %s4887_s22]]   ;;  %s4891_s22 = smov 28  }
  0x23   :  { %6069 = sst [smem:[#allocation13_spill]] %s5020_s12 }
  0x24   :  { %s5035_s27 = sld [smem:[%s6057_s0 + %s4888_s28]]   ;;  %s4892_s28 = smov 29  }
  0x25   :  { %s5040_s12 = sld [smem:[%s6057_s0 + %s4889_s7]]  }
  0x27   :  { %6070 = sst [smem:[#allocation14_spill]] %s5025_s6 }
  0x28   :  { %6071 = sst [smem:[#allocation15_spill]] %s5030_s24 }
  0x29   :  { %s5045_s6 = sld [smem:[%s6057_s0 + %s4890_s15]]  }
  0x2a   :  { %6072 = sst [smem:[#allocation16_spill]] %s5035_s27 }
  0x2b   :  { %s5050_s24 = sld [smem:[%s6057_s0 + %s4891_s22]]  }
  0x2c   :  { %s5055_s27 = sld [smem:[%s6057_s0 + %s4892_s28]]  }
  0x2d   :  { %v139_v0 = vlaneseq  ;;  %v105_v1 = vld [vmem:[%s4915_s9] sm:$0xff]  ;;  %vm154_vm0 = vcmask 130048   ;;  %v4893_v3 = vmov 0.0|0.0   ;;  %v5064_v4 = vld [vmem:[%s4910_s5 + $0x8] sm:$0xff]  ;;  %vm4894_vm1 = vmmov 0  }
  0x2e   :  { %v5059_v2 = vld [vmem:[%s4910_s5] sm:$0xff]  ;;  %4305 = vmatprep.mubr.msk.f32.mxu1 %vm154_vm0, %v105_v1  ;;  %4535 = vmatprep.subr.bf16.mxu0 %v4893_v3  ;;  %v4895_v8 = vmov 0.0   ;;  %v4896_v10 = vmov 0  }
  0x2f   :  { %v5067_v5 = vld [vmem:[%s4995_s4] sm:$0x7]  ;;  %v5069_v6 = vshrl.u32 %v139_v0, 7  ;;  %v4536_v7 = vpack.c.bf16 %v5064_v4, %v5059_v2  ;;  %4300 = vmatprep.mubr.msk.f32.mxu0 %vm4894_vm1, %v4895_v8  ;;  %v5075_v9 = vand.u32 127, %v139_v0  ;;  %4691 = vset.pattern.permute.xlu0 %v4896_v10 }
  0x30   :  { %65 = vsyncpa [#allocation3], 0  ;;  %151 = vperm.xlu0 %4691, %v5067_v5   ;;  %4692 = vset.pattern.permute.xlu1 %v4896_v10  ;;  %v106_v11 = vld [vmem:[%s4915_s9 + $0x8] sm:$0xff]  ;;  %v4897_v12 = vmov 1.0   ;;  %v102_v17 = vld [vmem:[%s4920_s13] sm:$0xf] }
  0x31   :  { %vm141_vm2 = vcmp.eq.s32.totalorder %v5069_v6, 0  ;;  %4537 = vmatpush3.bf16.msra.mxu0 %v4536_v7  ;;  %vm146_vm3 = vcmp.eq.s32.totalorder %v5075_v9, 0  ;;  %v5104_v14 = vsub.s32 0, %v5069_v6  ;;  %v5109_v16 = vsub.s32 1, %v5069_v6  ;;  %v5113_v19 = vld [vmem:[%s4925_s17 + $0x8] sm:$0xff]  ;;  %v5118_v23 = vld [vmem:[%s4925_s17] sm:$0xff] }
  0x32   :  { %4303 = vmatprep.subr.msk.mxu1 %vm141_vm2, %v4897_v12  ;;  %4313 = vmatprep.subr.msk.mxu0 %vm141_vm2, %v4897_v12  ;;  %v5088_v13 = vsel %vm146_vm3, 1.0, %v4895_v8  ;;  %v244_v30 = vsub.s32 3, %v5069_v6  ;;  %v5128_v40 = vld [vmem:[%s4930_s21 + $0x8] sm:$0xff]  ;;  %v5133_v43 = vld [vmem:[%s4930_s21] sm:$0xff]  ;;  %v5143_v49 = vsub.s32 2, %v5069_v6  ;;  %v5154_v55 = vsel %vm141_vm2, 1.0, %v4895_v8 }
  0x33   :  { %4304 = vmatpush3.msk.msra.mxu1 %vm141_vm2, %v4897_v12  ;;  %v259_v15 = vrot.slane %v5067_v5, %v5104_v14  ;;  %v231_v24 = vrot.slane %v102_v17, %v5104_v14  ;;  %v470_v26 = vrot.slane %v5067_v5, %v5109_v16  ;;  %v5136_v46 = vrot.slane %v102_v17, %v5109_v16  ;;  %v116_v56 = vld [vmem:[%s4950_s8] sm:$0xff]  ;;  %v117_v57 = vld [vmem:[%s4950_s8 + $0x8] sm:$0xff]  ;;  %v119_v7 = vld [vmem:[%s4950_s8 + $0x18] sm:$0xff]  ;;  %s4898_s0 = smov 96   ;;  %s4899_s5 = smov 64  }
  0x34   :  { %4306 = vmatmul.mubr.msk.f32.vlgmr.msra.gmra.mrb[0].mxu1 %vm154_vm0, %v106_v11  ;;  %4308 = vmatprep.subr.msk.mxu1 %vm141_vm2, %v4897_v12  ;;  %v5138_v47 = vrot.slane %v102_v17, %v244_v30  ;;  %v650_v58 = vrot.slane %v5067_v5, %v5143_v49  ;;  %v4538_v62 = vpack.c.bf16 %v117_v57, %v116_v56  ;;  %v1559_v10 = vsub.f32 1.0, %v5088_v13  ;;  %s6079_s9 = sld [smem:[#allocation8_spill]]  ;;  %s4900_s13 = smov 32  }
  0x35   :  { %4309 = vmatpush3.msk.msra.mxu1 %vm141_vm2, %v4897_v12  ;;  %4310 = vmatprep.mubr.msk.f32.mxu1 %vm154_vm0, %v105_v1  ;;  %vm827_vm6 = vcmask 261120   ;;  %s6080_s17 = sld [smem:[#allocation5_spill]]  ;;  %s6081_s21 = sld [smem:[#allocation6_spill]] }
  0x36   :  { %4301 = vmatmul.mubr.msk.f32.vlgmr.msra.gmra.mrb[0].mxu0 %vm154_vm0, %v5088_v13  ;;  %4539 = vmatprep.subr.bf16.mxu1 %v4538_v62  ;;  %vm5272_vm7 = vmpackc.low %vm827_vm6, %vm827_vm6 }
  0x37   :  { %4314 = vmatpush3.msk.msra.mxu0 %vm141_vm2, %v4897_v12  ;;  %4315 = vmatprep.mubr.msk.f32.mxu0 %vm154_vm0, %v105_v1  ;;  %v118_v1 = vld [vmem:[%s4950_s8 + $0x10] sm:$0xff]  ;;  %s6089_s8 = sld [smem:[#allocation10_spill]] }
  0x38   :  { %4311 = vmatmul.mubr.msk.f32.vlgmr.msra.gmra.mrb[2].mxu1 %vm154_vm0, %v106_v11  ;;  %v4542_v12 = vpack.c.bf16 %v119_v7, %v118_v1  ;;  %v114_v1 = vld [vmem:[%s4940_s29 + $0x8] sm:$0xff]  ;;  %v113_v7 = vld [vmem:[%s4940_s29] sm:$0xff]  ;;  %s6083_s29 = sld [smem:[#allocation16_spill]] }
  0x39   :  { %4541 = vmatpush3.bf16.msra.mxu1 %v4538_v62 }
  0x3a   :  { %4316 = vmatmul.mubr.msk.f32.vlgmr.msra.gmra.mrb[2].mxu0 %vm154_vm0, %v106_v11  ;;  %4543 = vmatprep.subr.bf16.mxu1 %v4542_v12 }
  0x3d   :  { %4545 = vmatpush3.bf16.msra.mxu1 %v4542_v12 }
  0xaf   :  { %v5115_v20 = vpop.permute.xlu0 %151 }
 0x107   :  { %v4307_v18 = vpop.f32.mrb[0].mxu1 }
 0x108   :  { %v338_v21 = vadd.f32 %v4307_v18, %v259_v15  ;;  %v332_v22 = vpop.f32.mrb[1].mxu1 }
 0x109   :  { %v333_v25 = vadd.f32 %v332_v22, %v259_v15  ;;  %v224_v27 = vpop.f32.mrb[0].mxu0 }
 0x10a   :  { %356 = vperm.xlu1 %4692, %v338_v21   ;;  %v342_v28 = vsub.f32 %v5113_v19, %v338_v21  ;;  %v4302_v29 = vpop.f32.mrb[1].mxu0  ;;  %v225_v31 = vadd.f32 %v224_v27, %v5115_v20 }
 0x10b   :  { %351 = vperm.xlu0 %4691, %v333_v25   ;;  %v4312_v32 = vpop.f32.mrb[2].mxu1  ;;  %v341_v33 = vsub.f32 %v5118_v23, %v333_v25 }
 0x10c   :  { %v537_v34 = vpop.f32.mrb[3].mxu1  ;;  %v344_v35 = vmax.f32 %v342_v28, 0.0  ;;  %v232_v36 = vsub.f32 %v231_v24, %v225_v31  ;;  %v543_v37 = vadd.f32 %v4312_v32, %v470_v26 }
 0x10d   :  { %v538_v38 = vadd.f32 %v537_v34, %v470_v26  ;;  %v343_v39 = vmax.f32 %v341_v33, 0.0  ;;  %v4317_v41 = vpop.f32.mrb[2].mxu0 }
 0x10e   :  { %372 = vperm.xlu1 %4692, %v344_v35   ;;  %v5130_v42 = vadd.f32 %v344_v35, %v338_v21  ;;  %v717_v44 = vpop.f32.mrb[3].mxu0  ;;  %v233_v45 = vmax.f32 %v232_v36, 0.0  ;;  %v547_v53 = vsub.f32 %v5113_v19, %v543_v37  ;;  %v723_v15 = vadd.f32 %v4317_v41, %v650_v58 }
 0x10f   :  { %367 = vperm.xlu0 %4691, %v343_v39   ;;  %v5140_v48 = vadd.f32 %v343_v39, %v333_v25  ;;  %v546_v54 = vsub.f32 %v5118_v23, %v538_v38  ;;  %v718_v5 = vadd.f32 %v717_v44, %v650_v58 }
 0x110   :  { %v348_v50 = vsub.f32 %v5128_v40, %v5130_v42  ;;  %v234_v51 = vadd.f32 %v233_v45, %v225_v31  ;;  %v549_v63 = vmax.f32 %v547_v53, 0.0  ;;  %v727_v25 = vsub.f32 %v5113_v19, %v723_v15 }
 0x111   :  { %v347_v52 = vsub.f32 %v5133_v43, %v5140_v48  ;;  %v548_v0 = vmax.f32 %v546_v54, 0.0  ;;  %v726_v24 = vsub.f32 %v5118_v23, %v718_v5 }
 0x112   :  { %vm239_vm4 = vcmp.le.f32.partialorder %v234_v51, %v5136_v46  ;;  %vm246_vm5 = vcmp.le.f32.partialorder %v234_v51, %v5138_v47  ;;  %v5171_v18 = vadd.f32 %v549_v63, %v543_v37  ;;  %v729_v31 = vmax.f32 %v727_v25, 0.0 }
 0x113   :  { %390 = vperm.xlu0 %4691, %v348_v50   ;;  %385 = vperm.xlu1 %4692, %v347_v52   ;;  %v4058_v59 = vsel %vm239_vm4, 1.0, %v4895_v8  ;;  %v4059_v60 = vsel %vm246_vm5, 1.0, %v4895_v8  ;;  %v5173_v21 = vadd.f32 %v548_v0, %v538_v38  ;;  %v728_v30 = vmax.f32 %v726_v24, 0.0 }
 0x114   :  { %v249_v61 = vmul.f32 %v4058_v59, %v5154_v55  ;;  %v553_v27 = vsub.f32 %v5128_v40, %v5171_v18  ;;  %v5184_v32 = vadd.f32 %v729_v31, %v723_v15  ;;  %vm5332_vm4 = vcmp.eq.s32.totalorder %v5069_v6, %v5075_v9 }
 0x115   :  { %v552_v28 = vsub.f32 %v5133_v43, %v5173_v21  ;;  %v5186_v33 = vadd.f32 %v728_v30, %v718_v5 }
 0x116   :  { %v250_v11 = vmul.f32 %v4059_v60, %v249_v61  ;;  %v733_v34 = vsub.f32 %v5128_v40, %v5184_v32 }
 0x117   :  { %573 = vperm.xlu0 %4691, %v549_v63   ;;  %556 = vperm.xlu1 %4692, %v538_v38   ;;  %v732_v35 = vsub.f32 %v5133_v43, %v5186_v33 }
 0x118   :  { %v5169_v17 = vmul.f32 %v5154_v55, %v250_v11 }
 0x11a   :  { %v1560_v22 = vmul.f32 %v1559_v10, %v5169_v17 }
 0x11b   :  { %568 = vperm.xlu0 %4691, %v548_v0   ;;  %561 = vperm.xlu1 %4692, %v543_v37   ;;  %v5193_v37 = vld [vmem:[%s4945_s3] sm:$0xf]  ;;  %s6088_s3 = sld [smem:[#allocation12_spill]] }
 0x11c   :  { %v1561_v26 = vmul.f32 %v4058_v59, %v1560_v22  ;;  %v378_v39 = vrot.slane %v5193_v37, %v5109_v16  ;;  %v402_v41 = vrot.slane %v5193_v37, 3  ;;  %v362_v44 = vrot.slane %v5193_v37, %v5104_v14 }
 0x11d   :  { %v396_v51 = vrot.slane %v5193_v37, %v5143_v49 }
 0x11e   :  { %v5182_v29 = vmul.f32 %v4059_v60, %v1561_v26  ;;  %v404_v52 = vmul.f32 %v402_v41, %v5115_v20 }
 0x11f   :  { %587 = vperm.xlu0 %4691, %v553_v27   ;;  %582 = vperm.xlu1 %4692, %v552_v28  }
 0x120   :  { %v408_v62 = vrot.slane %v404_v52, %v5104_v14 }
 0x123   :  { %736 = vperm.xlu1 %4692, %v718_v5   ;;  %748 = vperm.xlu0 %4691, %v728_v30   ;;  %v594_v5 = vrot.slane %v5193_v37, 2 }
 0x125   :  { %v596_v30 = vmul.f32 %v594_v5, %v5115_v20 }
 0x127   :  { %741 = vperm.xlu1 %4692, %v723_v15   ;;  %753 = vperm.xlu0 %4691, %v729_v31  }
 0x12b   :  { %767 = vperm.xlu0 %4691, %v733_v34   ;;  %762 = vperm.xlu1 %4692, %v732_v35  }
 0x189   :  { %v357_v36 = vpop.permute.xlu1 %356 }
 0x18a   :  { %v352_v38 = vpop.permute.xlu0 %351  ;;  %v364_v53 = vmul.f32 %v362_v44, %v357_v36 }
 0x18b   :  { %v363_v54 = vmul.f32 %v362_v44, %v352_v38 }
 0x18d   :  { %v373_v45 = vpop.permute.xlu1 %372 }
 0x18e   :  { %v368_v50 = vpop.permute.xlu0 %367  ;;  %v380_v40 = vmul.f32 %v378_v39, %v373_v45 }
 0x18f   :  { %v379_v43 = vmul.f32 %v378_v39, %v368_v50 }
 0x190   :  { %v382_v58 = vadd.f32 %v380_v40, %v364_v53  ;;  %v600_v40 = vrot.slane %v596_v30, %v5109_v16 }
 0x191   :  { %v381_v59 = vadd.f32 %v379_v43, %v363_v54 }
 0x192   :  { %v391_v56 = vpop.permute.xlu0 %390  ;;  %v386_v57 = vpop.permute.xlu1 %385 }
 0x193   :  { %v398_v60 = vmul.f32 %v396_v51, %v391_v56  ;;  %v397_v61 = vmul.f32 %v396_v51, %v386_v57 }
 0x195   :  { %v400_v63 = vadd.f32 %v398_v60, %v382_v58  ;;  %v399_v0 = vadd.f32 %v397_v61, %v381_v59  ;;  %v774_v58 = vrot.slane %v5193_v37, 1 }
 0x196   :  { %v574_v10 = vpop.permute.xlu0 %573  ;;  %v557_v11 = vpop.permute.xlu1 %556 }
 0x197   :  { %v410_v12 = vadd.f32 %v408_v62, %v400_v63  ;;  %v409_v15 = vadd.f32 %v408_v62, %v399_v0  ;;  %v577_v31 = vmul.f32 %v574_v10, %v378_v39  ;;  %v564_v34 = vmul.f32 %v557_v11, %v362_v44 }
 0x199   :  { %v5207_v22 = vadd.f32 %v410_v12, %v114_v1  ;;  %v5209_v24 = vadd.f32 %v409_v15, %v113_v7  ;;  %v776_v12 = vmul.f32 %v774_v58, %v5115_v20 }
 0x19a   :  { %v569_v25 = vpop.permute.xlu0 %568  ;;  %v562_v26 = vpop.permute.xlu1 %561 }
 0x19b   :  { %v576_v27 = vmul.f32 %v569_v25, %v378_v39  ;;  %v565_v28 = vmul.f32 %v562_v26, %v362_v44  ;;  %4326 = vmatprep.mubr.msk.f32.mxu1 %vm827_vm6, %v5209_v24 }
 0x19c   :  { %4327 = vmatmul.mubr.msk.f32.vlgmr.msra.gmra.mrb[4].mxu1 %vm827_vm6, %v5207_v22 }
 0x19d   :  { %v578_v38 = vadd.f32 %v576_v27, %v564_v34  ;;  %v579_v41 = vadd.f32 %v577_v31, %v565_v28  ;;  %v780_v28 = vrot.slane %v776_v12, %v5143_v49 }
 0x19e   :  { %v588_v35 = vpop.permute.xlu0 %587  ;;  %v583_v36 = vpop.permute.xlu1 %582 }
 0x19f   :  { %v591_v45 = vmul.f32 %v588_v35, %v396_v51  ;;  %v590_v50 = vmul.f32 %v583_v36, %v396_v51 }
 0x1a1   :  { %v593_v43 = vadd.f32 %v591_v45, %v579_v41  ;;  %v592_v52 = vadd.f32 %v590_v50, %v578_v38  ;;  %v5240_v38 = vld [vmem:[%s4935_s25] sm:$0xff] }
 0x1a2   :  { %v737_v53 = vpop.permute.xlu1 %736  ;;  %v749_v54 = vpop.permute.xlu0 %748  ;;  %v605_v50 = vadd.f32 %v5173_v21, %v5240_v38 }
 0x1a3   :  { %v602_v56 = vadd.f32 %v600_v40, %v593_v43  ;;  %v601_v57 = vadd.f32 %v600_v40, %v592_v52  ;;  %v744_v63 = vmul.f32 %v737_v53, %v362_v44  ;;  %v756_v0 = vmul.f32 %v749_v54, %v378_v39  ;;  %v5253_v40 = vld [vmem:[%s4935_s25 + $0x8] sm:$0xff]  ;;  %s6082_s25 = sld [smem:[#allocation7_spill]] }
 0x1a4   :  { %v606_v21 = vadd.f32 %v5171_v18, %v5253_v40 }
 0x1a5   :  { %v5218_v59 = vadd.f32 %v602_v56, %v114_v1  ;;  %v5220_v60 = vadd.f32 %v601_v57, %v113_v7  ;;  %v758_v5 = vadd.f32 %v756_v0, %v744_v63 }
 0x1a6   :  { %v742_v61 = vpop.permute.xlu1 %741  ;;  %v754_v62 = vpop.permute.xlu0 %753 }
 0x1a7   :  { %v745_v10 = vmul.f32 %v742_v61, %v362_v44  ;;  %v757_v11 = vmul.f32 %v754_v62, %v378_v39  ;;  %4329 = vmatprep.mubr.msk.f32.mxu1 %vm827_vm6, %v5220_v60 }
 0x1a8   :  { %4330 = vmatmul.mubr.msk.f32.gmra.mrb[6].mxu1 %vm827_vm6, %v5218_v59 }
 0x1a9   :  { %v759_v25 = vadd.f32 %v757_v11, %v745_v10  ;;  %v5291_v11 = vmul.f32 %v5154_v55, %v5182_v29 }
 0x1aa   :  { %v768_v15 = vpop.permute.xlu0 %767  ;;  %v763_v37 = vpop.permute.xlu1 %762 }
 0x1ab   :  { %v771_v26 = vmul.f32 %v768_v15, %v396_v51  ;;  %v770_v27 = vmul.f32 %v763_v37, %v396_v51 }
 0x1ad   :  { %v773_v30 = vadd.f32 %v771_v26, %v759_v25  ;;  %v772_v44 = vadd.f32 %v770_v27, %v758_v5  ;;  %v1597_v26 = vrot.slane %v5291_v11, %v5104_v14 }
 0x1af   :  { %v782_v39 = vadd.f32 %v780_v28, %v773_v30  ;;  %v781_v31 = vadd.f32 %v780_v28, %v772_v44 }
 0x1b1   :  { %v5228_v34 = vadd.f32 %v782_v39, %v114_v1  ;;  %v5230_v35 = vadd.f32 %v781_v31, %v113_v7  ;;  %v413_v1 = vadd.f32 %v5140_v48, %v5240_v38  ;;  %v414_v48 = vadd.f32 %v5130_v42, %v5253_v40 }
 0x1b3   :  { %4332 = vmatprep.mubr.msk.f32.mxu1 %vm827_vm6, %v5230_v35 }
 0x1b4   :  { %4333 = vmatmul.mubr.msk.f32.gmra.mrb[8].mxu1 %vm827_vm6, %v5228_v34 }
 0x26f   :  { %v4328_v20 = vpop.f32.mrb[4].mxu1 }
 0x270   :  { %v912_v36 = vpop.f32.mrb[5].mxu1 }
 0x271   :  { %v5236_v51 = vpack.i.bf16 %v4328_v20, %v912_v36  ;;  %4339 = vmatprep.mubr.msk.f32.mxu0 %vm827_vm6, %v912_v36 }
 0x273   :  { %4694 = vrot.lane.b32.xlu1 %v5236_v51, %s4898_s0 }
 0x277   :  { %417 = vperm.xlu1 %4692, %v413_v1   ;;  %v1607_v1 = vrot.slane %v5291_v11, %v5109_v16 }
 0x27b   :  { %v4331_v7 = vpop.f32.mrb[6].mxu1  ;;  %429 = vperm.xlu1 %4692, %v5118_v23  }
 0x27c   :  { %v922_v41 = vpop.f32.mrb[7].mxu1 }
 0x27d   :  { %v5247_v45 = vpack.i.bf16 %v4331_v7, %v922_v41  ;;  %4353 = vmatprep.mubr.msk.f32.mxu1 %vm827_vm6, %v922_v41 }
 0x27f   :  { %4699 = vrot.lane.b32.xlu0 %v5247_v45, %s4898_s0  ;;  %609 = vperm.xlu1 %4692, %v605_v50  }
 0x283   :  { %422 = vperm.xlu0 %4691, %v414_v48  }
 0x287   :  { %434 = vperm.xlu0 %4691, %v5113_v19   ;;  %v5260_v23 = vpop.f32.mrb[8].mxu1 }
 0x288   :  { %v5262_v43 = vpop.f32.mrb[9].mxu1 }
 0x289   :  { %v5266_v52 = vpack.i.bf16 %v5260_v23, %v5262_v43 }
 0x28b   :  { %614 = vperm.xlu0 %4691, %v606_v21  }
 0x2e5   :  { %v4695_v53 = vpop.permute.xlu1 %4694 }
 0x2e6   :  { %v4697_v54 = vunpack.i.h.bf16 %v4695_v53  ;;  %v4696_v56 = vunpack.i.l.bf16 %v4695_v53 }
 0x2e8   :  { %v4546_v19 = vpack.c.bf16 %v4697_v54, %v4696_v56 }
 0x2ea   :  { %4548 = vmatprep.subr.msk.bf16.mxu0 %vm5272_vm7, %v4546_v19 }
 0x2eb   :  { %4551 = vmatpush3.bf16.xpose.msk.msra.mxu0 %vm5272_vm7, %v4546_v19 }
 0x2f1   :  { %v4700_v57 = vpop.permute.xlu0 %4699 }
 0x2f2   :  { %v4702_v58 = vunpack.i.h.bf16 %v4700_v57  ;;  %v4701_v18 = vunpack.i.l.bf16 %v4700_v57  ;;  %4340 = vmatmul.mubr.msk.f32.vlgmr.msra.gmra.mrb[4].mxu0 %vm827_vm6, %v4328_v20 }
 0x2f4   :  { %v4556_v61 = vpack.c.bf16 %v4702_v58, %v4701_v18 }
 0x2f6   :  { %4558 = vmatprep.subr.msk.bf16.mxu1 %vm5272_vm7, %v4556_v61  ;;  %v418_v62 = vpop.permute.xlu1 %417 }
 0x2f7   :  { %4561 = vmatpush3.bf16.xpose.msk.msra.mxu1 %vm5272_vm7, %v4556_v61  ;;  %v425_v63 = vadd.f32 %v418_v62, %v5059_v2 }
 0x2fa   :  { %v5286_v0 = vpop.permute.xlu1 %429 }
 0x2fb   :  { %v437_v10 = vsub.f32 %v5286_v0, %v425_v63 }
 0x2fd   :  { %v439_v12 = vmax.f32 %v437_v10, 0.0 }
 0x2fe   :  { %4354 = vmatmul.mubr.msk.f32.vlgmr.msra.gmra.mrb[10].mxu1 %vm827_vm6, %v4331_v7  ;;  %v610_v15 = vpop.permute.xlu1 %609 }
 0x2ff   :  { %v441_v37 = vadd.f32 %v439_v12, %v425_v63  ;;  %v617_v5 = vadd.f32 %v610_v15, %v5059_v2 }
 0x301   :  { %vm443_vm8 = vcmp.le.f32.partialorder %v441_v37, %v5136_v46  ;;  %v619_v25 = vsub.f32 %v5286_v0, %v617_v5  ;;  %vm449_vm9 = vcmp.le.f32.partialorder %v441_v37, %v5138_v47 }
 0x302   :  { %v423_v27 = vpop.permute.xlu0 %422  ;;  %v4063_v29 = vsel %vm443_vm8, 1.0, %v4895_v8  ;;  %v4065_v44 = vsel %vm449_vm9, 1.0, %v4895_v8 }
 0x303   :  { %v621_v28 = vmax.f32 %v619_v25, 0.0  ;;  %v1598_v30 = vmul.f32 %v4063_v29, %v1597_v26  ;;  %v426_v31 = vadd.f32 %v423_v27, %v5064_v4  ;;  %v458_v25 = vrot.slane %v5169_v17, %v5104_v14 }
 0x305   :  { %v623_v39 = vadd.f32 %v621_v28, %v617_v5  ;;  %v1600_v20 = vmul.f32 %v4065_v44, %v1598_v30  ;;  %v459_v28 = vmul.f32 %v4063_v29, %v458_v25 }
 0x306   :  { %v5303_v36 = vpop.permute.xlu0 %434 }
 0x307   :  { %vm625_vm10 = vcmp.le.f32.partialorder %v623_v39, %v5136_v46  ;;  %vm631_vm11 = vcmp.le.f32.partialorder %v623_v39, %v5138_v47  ;;  %v438_v7 = vsub.f32 %v5303_v36, %v426_v31  ;;  %v461_v39 = vmul.f32 %v4065_v44, %v459_v28 }
 0x308   :  { %v4070_v41 = vsel %vm625_vm10, 1.0, %v4895_v8  ;;  %v4072_v21 = vsel %vm631_vm11, 1.0, %v4895_v8 }
 0x309   :  { %v1608_v50 = vmul.f32 %v4070_v41, %v1607_v1  ;;  %v440_v48 = vmax.f32 %v438_v7, 0.0  ;;  %v465_v29 = vsel %vm5332_vm4, 1.0, %v461_v39 }
 0x30a   :  { %v615_v53 = vpop.permute.xlu0 %614  ;;  %vm1032_vm8 = vcmp.gt.f32.partialorder %v465_v29, 0.0 }
 0x30b   :  { %v442_v54 = vadd.f32 %v440_v48, %v426_v31  ;;  %v618_v56 = vadd.f32 %v615_v53, %v5064_v4  ;;  %v1610_v19 = vmul.f32 %v4072_v21, %v1608_v50  ;;  %v1602_v48 = vsel %vm5332_vm4, 1.0, %v1600_v20 }
 0x30c   :  { %v640_v53 = vrot.slane %v5169_v17, %v5109_v16  ;;  %vm1624_vm10 = vcmp.gt.f32.partialorder %v1602_v48, 0.0 }
 0x30d   :  { %vm444_vm12 = vcmp.le.f32.partialorder %v442_v54, %v5136_v46  ;;  %v620_v57 = vsub.f32 %v5303_v36, %v618_v56  ;;  %vm450_vm13 = vcmp.le.f32.partialorder %v442_v54, %v5138_v47 }
 0x30e   :  { %v4064_v58 = vsel %vm444_vm12, 1.0, %v4895_v8  ;;  %v4066_v62 = vsel %vm450_vm13, 1.0, %v4895_v8 }
 0x30f   :  { %v622_v18 = vmax.f32 %v620_v57, 0.0  ;;  %v1599_v61 = vmul.f32 %v4064_v58, %v1597_v26  ;;  %v460_v27 = vmul.f32 %v4064_v58, %v458_v25  ;;  %v252_v26 = vadd.s32 8, %v5069_v6 }
 0x311   :  { %v624_v63 = vadd.f32 %v622_v18, %v618_v56  ;;  %v1601_v10 = vmul.f32 %v4066_v62, %v1599_v61  ;;  %v462_v30 = vmul.f32 %v4066_v62, %v460_v27  ;;  %vm5326_vm3 = vcmp.eq.s32.totalorder %v252_v26, %v5075_v9 }
 0x312   :  { %v641_v62 = vmul.f32 %v4070_v41, %v640_v53 }
 0x313   :  { %vm626_vm14 = vcmp.le.f32.partialorder %v624_v63, %v5136_v46  ;;  %vm632_vm15 = vcmp.le.f32.partialorder %v624_v63, %v5138_v47  ;;  %v466_v7 = vsel %vm5326_vm3, 1.0, %v462_v30  ;;  %v1603_v44 = vsel %vm5326_vm3, 1.0, %v1601_v10 }
 0x314   :  { %v4071_v12 = vsel %vm626_vm14, 1.0, %v4895_v8  ;;  %v4073_v37 = vsel %vm632_vm15, 1.0, %v4895_v8  ;;  %vm1033_vm5 = vcmp.gt.f32.partialorder %v466_v7, 0.0  ;;  %vm1625_vm9 = vcmp.gt.f32.partialorder %v1603_v44, 0.0 }
 0x315   :  { %v1609_v15 = vmul.f32 %v4071_v12, %v1607_v1  ;;  %v642_v58 = vmul.f32 %v4071_v12, %v640_v53  ;;  %v643_v27 = vmul.f32 %v4072_v21, %v641_v62  ;;  %v1612_v30 = vsel %vm5332_vm4, 1.0, %v1610_v19 }
 0x316   :  { %vm1733_vm14 = vcmp.gt.f32.partialorder %v1612_v30, 0.0 }
 0x317   :  { %v1611_v5 = vmul.f32 %v4073_v37, %v1609_v15  ;;  %v644_v25 = vmul.f32 %v4073_v37, %v642_v58  ;;  %v645_v41 = vsel %vm5332_vm4, 1.0, %v643_v27 }
 0x318   :  { %vm1238_vm13 = vcmp.gt.f32.partialorder %v645_v41, 0.0 }
 0x319   :  { %v646_v28 = vsel %vm5326_vm3, 1.0, %v644_v25  ;;  %v1613_v12 = vsel %vm5326_vm3, 1.0, %v1611_v5 }
 0x31a   :  { %vm1239_vm11 = vcmp.gt.f32.partialorder %v646_v28, 0.0  ;;  %vm1734_vm12 = vcmp.gt.f32.partialorder %v1613_v12, 0.0 }
 0x3c5   :  { %v4341_v50 = vpop.f32.mrb[4].mxu0 }
 0x3c6   :  { %v1031_v54 = vmul.f32 0.17677669, %v4341_v50  ;;  %v1021_v56 = vpop.f32.mrb[5].mxu0 }
 0x3c7   :  { %v1030_v57 = vmul.f32 0.17677669, %v1021_v56 }
 0x3c8   :  { %v1035_v18 = vsel %vm1033_vm5, %v1031_v54, -1e+09  ;;  %v5346_v61 = vsel %vm1625_vm9, %v1031_v54, -1e+09 }
 0x3c9   :  { %v1039_v63 = vsel %vm154_vm0, %v1035_v18, -inf  ;;  %v1034_v10 = vsel %vm1032_vm8, %v1030_v57, -1e+09  ;;  %v5349_v15 = vsel %vm1624_vm10, %v1030_v57, -1e+09 }
 0x3ca   :  { %1040 = vmax.xlane.f32.xlu0 %v1039_v63  ;;  %v1036_v20 = vsel %vm154_vm0, %v1034_v10, -inf }
 0x3cb   :  { %1037 = vmax.xlane.f32.xlu1 %v1036_v20 }
 0x3d1   :  { %v4355_v26 = vpop.f32.mrb[10].mxu1 }
 0x3d2   :  { %v1237_v39 = vmul.f32 0.17677669, %v4355_v26  ;;  %v1227_v7 = vpop.f32.mrb[11].mxu1 }
 0x3d3   :  { %v1236_v29 = vmul.f32 0.17677669, %v1227_v7 }
 0x3d4   :  { %v1241_v37 = vsel %vm1239_vm11, %v1237_v39, -1e+09  ;;  %v5360_v21 = vsel %vm1734_vm12, %v1237_v39, -1e+09 }
 0x3d5   :  { %v1245_v44 = vsel %vm154_vm0, %v1241_v37, -inf  ;;  %v1240_v5 = vsel %vm1238_vm13, %v1236_v29, -1e+09  ;;  %v5363_v50 = vsel %vm1733_vm14, %v1236_v29, -1e+09  ;;  %v786_v29 = vadd.f32 %v5184_v32, %v5253_v40 }
 0x3d6   :  { %1246 = vmax.xlane.f32.xlu1 %v1245_v44  ;;  %v1242_v48 = vsel %vm154_vm0, %v1240_v5, -inf  ;;  %vm2912_vm13 = vcmask 1042432   ;;  %vm2641_vm14 = vcmp.gt.f32.partialorder %v5291_v11, 0.0 }
 0x3d7   :  { %1243 = vmax.xlane.f32.xlu0 %v1242_v48 }
 0x457   :  { %v1041_v19 = vpop.xlane.xlu0 %1040 }
 0x458   :  { %v1043_v53 = vsub.f32 %v1035_v18, %v1041_v19  ;;  %v1038_v54 = vpop.xlane.xlu1 %1037 }
 0x459   :  { %v1042_v56 = vsub.f32 %v1034_v10, %v1038_v54 }
 0x45a   :  { %v1046_v57 = vmul.f32 1.442695, %v1043_v53 }
 0x45b   :  { %v1044_v58 = vmul.f32 1.442695, %v1042_v56 }
 0x45c   :  { %4723 = vpow2.f32 %v1046_v57 }
 0x45d   :  { %4725 = vpow2.f32 %v1044_v58 }
 0x463   :  { %v1247_v62 = vpop.xlane.xlu1 %1246 }
 0x464   :  { %v1249_v63 = vsub.f32 %v1241_v37, %v1247_v62  ;;  %v1244_v20 = vpop.xlane.xlu0 %1243  ;;  %v785_v37 = vadd.f32 %v5186_v33, %v5240_v38 }
 0x465   :  { %v1248_v25 = vsub.f32 %v1240_v5, %v1244_v20 }
 0x466   :  { %v4724_v27 = vpop.eup %4723  ;;  %v1252_v28 = vmul.f32 1.442695, %v1249_v63 }
 0x467   :  { %v4726_v12 = vpop.eup %4725  ;;  %v1250_v26 = vmul.f32 1.442695, %v1248_v25  ;;  %v1051_v41 = vsel %vm154_vm0, %v4724_v27, 0.0 }
 0x468   :  { %4727 = vpow2.f32 %v1252_v28  ;;  %1052 = vadd.xlane.f32.xlu1 %v1051_v41  ;;  %v1048_v18 = vsel %vm154_vm0, %v4726_v12, 0.0 }
 0x469   :  { %4729 = vpow2.f32 %v1250_v26  ;;  %1049 = vadd.xlane.f32.xlu0 %v1048_v18 }
 0x472   :  { %v4728_v10 = vpop.eup %4727 }
 0x473   :  { %v4730_v30 = vpop.eup %4729  ;;  %v1257_v39 = vsel %vm154_vm0, %v4728_v10, 0.0 }
 0x474   :  { %1258 = vadd.xlane.f32.xlu1 %v1257_v39  ;;  %v1254_v7 = vsel %vm154_vm0, %v4730_v30, 0.0 }
 0x475   :  { %1255 = vadd.xlane.f32.xlu0 %v1254_v7 }
 0x485   :  { %4709 = vrot.lane.b32.xlu1 %v5247_v45, %s4899_s5 }
 0x489   :  { %4714 = vrot.lane.b32.xlu1 %v5266_v52, %s4898_s0 }
 0x48b   :  { %4704 = vrot.lane.b32.xlu0 %v5236_v51, %s4899_s5 }
 0x48d   :  { %794 = vperm.xlu1 %4692, %v786_v29  }
 0x48f   :  { %789 = vperm.xlu0 %4691, %v785_v37  }
 0x4f5   :  { %v1053_v5 = vpop.xlane.xlu1 %1052 }
 0x4f6   :  { %v1050_v44 = vpop.xlane.xlu0 %1049 }
 0x4f7   :  { %4731 = vrcp.f32 %v1050_v44 }
 0x4f8   :  { %4733 = vrcp.f32 %v1053_v5 }
 0x501   :  { %v4732_v48 = vpop.eup %4731  ;;  %v1259_v45 = vpop.xlane.xlu1 %1258 }
 0x502   :  { %v1256_v19 = vpop.xlane.xlu0 %1255  ;;  %v1056_v53 = vmul.f32 %v4732_v48, %v4726_v12  ;;  %v4734_v58 = vpop.eup %4733 }
 0x503   :  { %4735 = vrcp.f32 %v1256_v19  ;;  %v1057_v28 = vmul.f32 %v4734_v58, %v4724_v27 }
 0x504   :  { %4737 = vrcp.f32 %v1259_v45  ;;  %4346 = vmatprep.mubr.msk.f32.mxu0 %vm154_vm0, %v1056_v53 }
 0x505   :  { %v4710_v51 = vpop.permute.xlu1 %4709 }
 0x506   :  { %v4705_v54 = vpop.permute.xlu0 %4704  ;;  %v4712_v32 = vunpack.i.h.bf16 %v4710_v51  ;;  %v4711_v40 = vunpack.i.l.bf16 %v4710_v51 }
 0x507   :  { %v4707_v56 = vunpack.i.h.bf16 %v4705_v54  ;;  %v4706_v57 = vunpack.i.l.bf16 %v4705_v54 }
 0x508   :  { %v4562_v62 = vpack.c.bf16 %v4712_v32, %v4711_v40 }
 0x509   :  { %v5381_v33 = vpack.c.bf16 %v4707_v56, %v4706_v57  ;;  %v4715_v38 = vpop.permute.xlu1 %4714 }
 0x50a   :  { %v4717_v63 = vunpack.i.h.bf16 %v4715_v38  ;;  %v4716_v20 = vunpack.i.l.bf16 %v4715_v38 }
 0x50b   :  { %4553 = vmatprep.subr.bf16.mxu0 %v5381_v33 }
 0x50c   :  { %4555 = vmatpush3.bf16.msra.mxu0 %v5381_v33  ;;  %v4566_v39 = vpack.c.bf16 %v4717_v63, %v4716_v20 }
 0x50d   :  { %v4736_v25 = vpop.eup %4735  ;;  %v795_v12 = vpop.permute.xlu1 %794  ;;  %4563 = vmatprep.subr.bf16.mxu0 %v4562_v62 }
 0x50e   :  { %v4738_v26 = vpop.eup %4737  ;;  %v798_v41 = vadd.f32 %v795_v12, %v5064_v4  ;;  %v1262_v18 = vmul.f32 %v4736_v25, %v4730_v30  ;;  %v1617_v4 = vrot.slane %v5291_v11, %v5143_v49 }
 0x50f   :  { %4347 = vmatmul.mubr.msk.f32.vlgmr.msra.gmra.mrb[6].mxu0 %vm154_vm0, %v1057_v28  ;;  %v1263_v29 = vmul.f32 %v4738_v26, %v4728_v10 }
 0x510   :  { %v800_v7 = vsub.f32 %v5303_v36, %v798_v41  ;;  %4565 = vmatpush3.bf16.msra.mxu0 %v4562_v62  ;;  %4360 = vmatprep.mubr.msk.f32.mxu0 %vm154_vm0, %v1262_v18 }
 0x511   :  { %4568 = vmatprep.subr.msk.bf16.mxu0 %vm5272_vm7, %v4566_v39 }
 0x512   :  { %v802_v37 = vmax.f32 %v800_v7, 0.0 }
 0x513   :  { %4361 = vmatmul.mubr.msk.f32.vlgmr.msra.gmra.mrb[8].mxu0 %vm154_vm0, %v1263_v29 }
 0x514   :  { %v804_v27 = vadd.f32 %v802_v37, %v798_v41  ;;  %4367 = vmatprep.mubr.msk.f32.mxu0 %vm827_vm6, %v5262_v43  ;;  %v790_v43 = vpop.permute.xlu0 %789 }
 0x515   :  { %v797_v5 = vadd.f32 %v790_v43, %v5059_v2  ;;  %v820_v2 = vrot.slane %v5169_v17, %v5143_v49 }
 0x516   :  { %vm806_vm15 = vcmp.le.f32.partialorder %v804_v27, %v5136_v46  ;;  %vm812_vm5 = vcmp.le.f32.partialorder %v804_v27, %v5138_v47 }
 0x517   :  { %v4078_v36 = vsel %vm806_vm15, 1.0, %v4895_v8  ;;  %v4080_v30 = vsel %vm812_vm5, 1.0, %v4895_v8  ;;  %v799_v48 = vsub.f32 %v5286_v0, %v797_v5  ;;  %vm2763_vm15 = vcmask 123905  }
 0x518   :  { %v1619_v10 = vmul.f32 %v4078_v36, %v1617_v4  ;;  %v822_v38 = vmul.f32 %v4078_v36, %v820_v2  ;;  %vm2879_vm5 = vcmask 124930  }
 0x519   :  { %4571 = vmatpush3.bf16.xpose.msk.msra.mxu0 %vm5272_vm7, %v4566_v39  ;;  %v801_v45 = vmax.f32 %v799_v48, 0.0 }
 0x51a   :  { %4581 = vmatprep.subr.bf16.mxu0 %v4562_v62  ;;  %v1621_v44 = vmul.f32 %v4080_v30, %v1619_v10 }
 0x51b   :  { %v803_v19 = vadd.f32 %v801_v45, %v797_v5 }
 0x51c   :  { %v1623_v12 = vsel %vm5326_vm3, 1.0, %v1621_v44 }
 0x51d   :  { %vm805_vm8 = vcmp.le.f32.partialorder %v803_v19, %v5136_v46  ;;  %vm811_vm9 = vcmp.le.f32.partialorder %v803_v19, %v5138_v47  ;;  %vm1843_vm11 = vcmp.gt.f32.partialorder %v1623_v12, 0.0 }
 0x51e   :  { %v4077_v0 = vsel %vm805_vm8, 1.0, %v4895_v8  ;;  %v4079_v46 = vsel %vm811_vm9, 1.0, %v4895_v8  ;;  %vm2655_vm8 = vcmp.gt.f32.partialorder %v5154_v55, 0.0 }
 0x51f   :  { %v821_v58 = vmul.f32 %v4077_v0, %v820_v2  ;;  %v1618_v44 = vmul.f32 %v4077_v0, %v1617_v4  ;;  %vm2658_vm9 = vmand %vm2641_vm14, %vm2655_vm8 }
 0x520   :  { %4368 = vmatmul.mubr.msk.f32.vlgmr.msra.gmra.mrb[10].mxu0 %vm827_vm6, %v5260_v23 }
 0x521   :  { %4583 = vmatpush3.bf16.msra.mxu0 %v4562_v62  ;;  %v824_v62 = vmul.f32 %v4080_v30, %v822_v38  ;;  %v823_v20 = vmul.f32 %v4079_v46, %v821_v58  ;;  %v1620_v43 = vmul.f32 %v4079_v46, %v1618_v44  ;;  %v1628_v38 = vsel %vm154_vm0, %v5349_v15, -inf }
 0x522   :  { %4588 = vmatprep.subr.bf16.mxu0 %v4893_v3  ;;  %v1631_v58 = vsel %vm154_vm0, %v5346_v61, -inf  ;;  %v1737_v46 = vsel %vm154_vm0, %v5363_v50, -inf }
 0x523   :  { %v826_v28 = vsel %vm5326_vm3, 1.0, %v824_v62  ;;  %v825_v41 = vsel %vm5332_vm4, 1.0, %v823_v20  ;;  %v1622_v5 = vsel %vm5332_vm4, 1.0, %v1620_v43  ;;  %v1740_v62 = vsel %vm154_vm0, %v5360_v21, -inf }
 0x524   :  { %vm1445_vm10 = vcmp.gt.f32.partialorder %v826_v28, 0.0  ;;  %vm1444_vm12 = vcmp.gt.f32.partialorder %v825_v41, 0.0  ;;  %vm1842_vm3 = vcmp.gt.f32.partialorder %v1622_v5, 0.0  ;;  %vm2106_vm4 = vcmp.eq.s32.totalorder %v5069_v6, 2 }
 0x5e2   :  { %v4348_v53 = vpop.f32.mrb[6].mxu0 }
 0x5e3   :  { %v1142_v51 = vadd.f32 %v4348_v53, %v5207_v22  ;;  %v1136_v54 = vpop.f32.mrb[7].mxu0 }
 0x5e4   :  { %v1137_v32 = vadd.f32 %v1136_v54, %v5209_v24 }
 0x5e5   :  { %4739 = vtanh.f32 %v1142_v51 }
 0x5e6   :  { %4741 = vtanh.f32 %v1137_v32  ;;  %v4362_v23 = vpop.f32.mrb[8].mxu0 }
 0x5e7   :  { %v1348_v40 = vadd.f32 %v4362_v23, %v5218_v59  ;;  %v1342_v56 = vpop.f32.mrb[9].mxu0 }
 0x5e8   :  { %v1343_v57 = vadd.f32 %v1342_v56, %v5220_v60 }
 0x5e9   :  { %4743 = vtanh.f32 %v1348_v40 }
 0x5ea   :  { %4745 = vtanh.f32 %v1343_v57 }
 0x5ef   :  { %v5417_v63 = vpop.eup %4739 }
 0x5f0   :  { %v5419_v25 = vpop.eup %4741 }
 0x5f1   :  { %v4589_v17 = vpack.c.bf16 %v5417_v63, %v5419_v25 }
 0x5f3   :  { %v5427_v26 = vpop.eup %4743  ;;  %v4369_v47 = vpop.f32.mrb[10].mxu0 }
 0x5f4   :  { %v5431_v18 = vpop.eup %4745  ;;  %v1443_v39 = vmul.f32 0.17677669, %v4369_v47  ;;  %v1433_v7 = vpop.f32.mrb[11].mxu0 }
 0x5f5   :  { %v1442_v29 = vmul.f32 0.17677669, %v1433_v7  ;;  %v4592_v37 = vpack.c.bf16 %v5427_v26, %v5431_v18 }
 0x5f6   :  { %v1447_v27 = vsel %vm1445_vm10, %v1443_v39, -1e+09  ;;  %v5435_v31 = vsel %vm1843_vm11, %v1443_v39, -1e+09  ;;  %vm1568_vm10 = vcmask 124928  }
 0x5f7   :  { %v1451_v36 = vsel %vm154_vm0, %v1447_v27, -inf  ;;  %v1446_v10 = vsel %vm1444_vm12, %v1442_v29, -1e+09  ;;  %v5443_v48 = vsel %vm1842_vm3, %v1442_v29, -1e+09  ;;  %v1849_v20 = vsel %vm154_vm0, %v5435_v31, -inf }
 0x5f8   :  { %1452 = vmax.xlane.f32.xlu1 %v1451_v36  ;;  %v1448_v30 = vsel %vm154_vm0, %v1446_v10, -inf  ;;  %v1846_v45 = vsel %vm154_vm0, %v5443_v48, -inf  ;;  %vm2976_vm3 = vcmask 23552  }
 0x5f9   :  { %1449 = vmax.xlane.f32.xlu0 %v1448_v30 }
 0x609   :  { %4719 = vrot.lane.b32.xlu1 %v5266_v52, %s4899_s5 }
 0x62d   :  { %1847 = vmax.xlane.f32.xlu1 %v1846_v45 }
 0x685   :  { %v1453_v19 = vpop.xlane.xlu1 %1452 }
 0x686   :  { %v1455_v53 = vsub.f32 %v1447_v27, %v1453_v19  ;;  %v1450_v51 = vpop.xlane.xlu0 %1449 }
 0x687   :  { %v1454_v54 = vsub.f32 %v1446_v10, %v1450_v51 }
 0x688   :  { %v1458_v32 = vmul.f32 1.442695, %v1455_v53 }
 0x689   :  { %v1456_v23 = vmul.f32 1.442695, %v1454_v54  ;;  %v4720_v40 = vpop.permute.xlu1 %4719 }
 0x68a   :  { %v4722_v52 = vunpack.i.h.bf16 %v4720_v40  ;;  %v4721_v4 = vunpack.i.l.bf16 %v4720_v40 }
 0x68b   :  { %4747 = vpow2.f32 %v1456_v23 }
 0x68c   :  { %v5447_v56 = vpack.c.bf16 %v4722_v52, %v4721_v4  ;;  %4749 = vpow2.f32 %v1458_v32 }
 0x68e   :  { %4573 = vmatprep.subr.bf16.mxu1 %v5447_v56 }
 0x68f   :  { %4575 = vmatpush3.bf16.msra.mxu1 %v5447_v56 }
 0x690   :  { %4577 = vmatprep.subr.bf16.mxu1 %v5381_v33 }
 0x695   :  { %v4748_v1 = vpop.eup %4747 }
 0x696   :  { %v1460_v2 = vsel %vm154_vm0, %v4748_v1, 0.0  ;;  %v4750_v0 = vpop.eup %4749 }
 0x697   :  { %1461 = vadd.xlane.f32.xlu0 %v1460_v2  ;;  %v1463_v57 = vsel %vm154_vm0, %v4750_v0, 0.0 }
 0x69b   :  { %1464 = vadd.xlane.f32.xlu0 %v1463_v57 }
 0x69f   :  { %1629 = vmax.xlane.f32.xlu0 %v1628_v38 }
 0x6a3   :  { %1632 = vmax.xlane.f32.xlu0 %v1631_v58 }
 0x6a7   :  { %1738 = vmax.xlane.f32.xlu0 %v1737_v46 }
 0x6ab   :  { %1741 = vmax.xlane.f32.xlu0 %v1740_v62 }
 0x6af   :  { %1850 = vmax.xlane.f32.xlu0 %v1849_v20 }
 0x6ba   :  { %v1848_v44 = vpop.xlane.xlu1 %1847 }
 0x724   :  { %v1462_v28 = vpop.xlane.xlu0 %1461 }
 0x725   :  { %4751 = vrcp.f32 %v1462_v28 }
 0x728   :  { %v1465_v12 = vpop.xlane.xlu0 %1464 }
 0x729   :  { %4753 = vrcp.f32 %v1465_v12 }
 0x72c   :  { %v1630_v47 = vpop.xlane.xlu0 %1629 }
 0x72d   :  { %v1634_v41 = vsub.f32 %v5349_v15, %v1630_v47  ;;  %v1852_v15 = vsub.f32 %v5443_v48, %v1848_v44 }
 0x72f   :  { %v4752_v39 = vpop.eup %4751  ;;  %v1636_v7 = vmul.f32 1.442695, %v1634_v41  ;;  %v1854_v54 = vmul.f32 1.442695, %v1852_v15  ;;  %v121_v15 = vld [vmem:[%s4955_s14 + $0x8] sm:$0xff] }
 0x730   :  { %v1633_v29 = vpop.xlane.xlu0 %1632  ;;  %v1468_v27 = vmul.f32 %v4752_v39, %v4748_v1 }
 0x731   :  { %4755 = vpow2.f32 %v1636_v7  ;;  %v1635_v36 = vsub.f32 %v5346_v61, %v1633_v29 }
 0x732   :  { %4374 = vmatprep.mubr.msk.f32.mxu1 %vm154_vm0, %v1468_v27 }
 0x733   :  { %v4754_v10 = vpop.eup %4753  ;;  %v1638_v30 = vmul.f32 1.442695, %v1635_v36 }
 0x734   :  { %v1469_v43 = vmul.f32 %v4754_v10, %v4750_v0  ;;  %v1739_v5 = vpop.xlane.xlu0 %1738 }
 0x735   :  { %4757 = vpow2.f32 %v1638_v30  ;;  %v1743_v45 = vsub.f32 %v5363_v50, %v1739_v5 }
 0x736   :  { %4375 = vmatmul.mubr.msk.f32.vlgmr.msra.gmra.mrb[12].mxu1 %vm154_vm0, %v1469_v43 }
 0x737   :  { %v1745_v19 = vmul.f32 1.442695, %v1743_v45  ;;  %4579 = vmatpush3.bf16.msra.mxu1 %v5381_v33  ;;  %v120_v45 = vld [vmem:[%s4955_s14] sm:$0xff] }
 0x738   :  { %4585 = vmatprep.subr.bf16.mxu1 %v5447_v56  ;;  %v1742_v61 = vpop.xlane.xlu0 %1741 }
 0x739   :  { %4759 = vpow2.f32 %v1745_v19  ;;  %v1744_v53 = vsub.f32 %v5360_v21, %v1742_v61  ;;  %v4604_v19 = vpack.c.bf16 %v121_v15, %v120_v45  ;;  %v124_v61 = vld [vmem:[%s4960_s19] sm:$0xff] }
 0x73b   :  { %v4756_v51 = vpop.eup %4755  ;;  %v1747_v32 = vmul.f32 1.442695, %v1744_v53  ;;  %v125_v53 = vld [vmem:[%s4960_s19 + $0x8] sm:$0xff] }
 0x73c   :  { %v1851_v23 = vpop.xlane.xlu0 %1850  ;;  %v1640_v40 = vsel %vm154_vm0, %v4756_v51, 0.0 }
 0x73d   :  { %4761 = vpow2.f32 %v1747_v32  ;;  %v1853_v50 = vsub.f32 %v5435_v31, %v1851_v23  ;;  %1641 = vadd.xlane.f32.xlu0 %v1640_v40  ;;  %v123_v32 = vld [vmem:[%s4955_s14 + $0x18] sm:$0xff] }
 0x73e   :  { %4763 = vpow2.f32 %v1854_v54  ;;  %v122_v54 = vld [vmem:[%s4955_s14 + $0x10] sm:$0xff]  ;;  %v127_v40 = vld [vmem:[%s4960_s19 + $0x18] sm:$0xff]  ;;  %s6090_s14 = sld [smem:[#allocation11_spill]] }
 0x73f   :  { %v4758_v48 = vpop.eup %4757  ;;  %v1856_v52 = vmul.f32 1.442695, %v1853_v50  ;;  %v4607_v23 = vpack.c.bf16 %v123_v32, %v122_v54  ;;  %v129_v50 = vld [vmem:[%s4970_s30] sm:$0xff] }
 0x740   :  { %v1643_v33 = vsel %vm154_vm0, %v4758_v48, 0.0 }
 0x741   :  { %1644 = vadd.xlane.f32.xlu0 %v1643_v33  ;;  %4765 = vpow2.f32 %v1856_v52 }
 0x743   :  { %v4760_v4 = vpop.eup %4759 }
 0x744   :  { %v1749_v21 = vsel %vm154_vm0, %v4760_v4, 0.0 }
 0x745   :  { %1750 = vadd.xlane.f32.xlu0 %v1749_v21  ;;  %v4108_v21 = vld [vmem:[%s6079_s9] ss:$0 sm:$0xff] }
 0x746   :  { %2346 = vrot.lane.b32.xlu1 %v4108_v21, %s4900_s13 }
 0x747   :  { %v4762_v1 = vpop.eup %4761 }
 0x748   :  { %v1752_v2 = vsel %vm154_vm0, %v4762_v1, 0.0  ;;  %v4764_v0 = vpop.eup %4763 }
 0x749   :  { %1753 = vadd.xlane.f32.xlu0 %v1752_v2  ;;  %v1858_v57 = vsel %vm154_vm0, %v4764_v0, 0.0 }
 0x74b   :  { %v4766_v31 = vpop.eup %4765 }
 0x74c   :  { %v1861_v38 = vsel %vm154_vm0, %v4766_v31, 0.0 }
 0x74d   :  { %1859 = vadd.xlane.f32.xlu0 %v1858_v57 }
 0x751   :  { %1862 = vadd.xlane.f32.xlu0 %v1861_v38 }
 0x7ca   :  { %v1642_v58 = vpop.xlane.xlu0 %1641 }
 0x7cb   :  { %4767 = vrcp.f32 %v1642_v58 }
 0x7ce   :  { %v1645_v46 = vpop.xlane.xlu0 %1644 }
 0x7cf   :  { %4769 = vrcp.f32 %v1645_v46 }
 0x7d2   :  { %v1751_v62 = vpop.xlane.xlu0 %1750 }
 0x7d3   :  { %4771 = vrcp.f32 %v1751_v62 }
 0x7d5   :  { %v4768_v20 = vpop.eup %4767 }
 0x7d6   :  { %v1754_v28 = vpop.xlane.xlu0 %1753  ;;  %v1648_v12 = vmul.f32 %v4768_v20, %v4756_v51  ;;  %v4598_v51 = vpack.c.bf16 %v125_v53, %v124_v61 }
 0x7d7   :  { %4773 = vrcp.f32 %v1754_v28 }
 0x7d8   :  { %4381 = vmatprep.mubr.msk.f32.mxu1 %vm154_vm0, %v1648_v12 }
 0x7d9   :  { %v4770_v47 = vpop.eup %4769 }
 0x7da   :  { %v1649_v41 = vmul.f32 %v4770_v47, %v4758_v48  ;;  %v1860_v39 = vpop.xlane.xlu0 %1859  ;;  %v130_v48 = vld [vmem:[%s4970_s30 + $0x8] sm:$0xff] }
 0x7db   :  { %4775 = vrcp.f32 %v1860_v39  ;;  %v4615_v33 = vpack.c.bf16 %v130_v48, %v129_v50 }
 0x7dc   :  { %4382 = vmatmul.mubr.msk.f32.vlgmr.msra.gmra.mrb[14].mxu1 %vm154_vm0, %v1649_v41 }
 0x7dd   :  { %v4772_v7 = vpop.eup %4771  ;;  %4587 = vmatpush3.bf16.msra.mxu1 %v5447_v56 }
 0x7de   :  { %v1863_v29 = vpop.xlane.xlu0 %1862  ;;  %v1757_v27 = vmul.f32 %v4772_v7, %v4760_v4  ;;  %4591 = vmatprep.subr.bf16.mxu1 %v4893_v3  ;;  %v4107_v4 = vld [vmem:[%s4985_s20] ss:$0 sm:$0xff] }
 0x7df   :  { %4777 = vrcp.f32 %v1863_v29 }
 0x7e0   :  { %4388 = vmatprep.mubr.msk.f32.mxu0 %vm154_vm0, %v1757_v27 }
 0x7e1   :  { %v4774_v36 = vpop.eup %4773 }
 0x7e2   :  { %v1758_v10 = vmul.f32 %v4774_v36, %v4762_v1  ;;  %v4118_v36 = vsel %vm2106_vm4, 1.0, %v4895_v8 }
 0x7e4   :  { %4389 = vmatmul.mubr.msk.f32.vlgmr.msra.gmra.mrb[12].mxu0 %vm154_vm0, %v1758_v10 }
 0x7e5   :  { %v4776_v30 = vpop.eup %4775  ;;  %4590 = vmatpush3.bf16.msra.mxu0 %v4589_v17  ;;  %4402 = vmatprep.mubr.msk.f32.mxu0 %vm4894_vm1, %v4895_v8 }
 0x7e6   :  { %v1866_v56 = vmul.f32 %v4776_v30, %v4764_v0  ;;  %4594 = vmatprep.subr.bf16.mxu0 %v4893_v3 }
 0x7e8   :  { %4395 = vmatprep.mubr.msk.f32.mxu1 %vm154_vm0, %v1866_v56  ;;  %4403 = vmatmul.mubr.msk.f32.vlgmr.msra.gmra.mrb[14].mxu0 %vm154_vm0, %v5088_v13 }
 0x7e9   :  { %v4778_v44 = vpop.eup %4777  ;;  %4416 = vmatprep.mubr.msk.f32.mxu0 %vm4894_vm1, %v4895_v8 }
 0x7ea   :  { %v1867_v43 = vmul.f32 %v4778_v44, %v4766_v31 }
 0x7ec   :  { %4396 = vmatmul.mubr.msk.f32.vlgmr.msra.gmra.mrb[16].mxu1 %vm154_vm0, %v1867_v43  ;;  %v131_v43 = vld [vmem:[%s4970_s30 + $0x10] sm:$0xff] }
 0x7ed   :  { %4593 = vmatpush3.bf16.msra.mxu1 %v4592_v37  ;;  %4409 = vmatprep.mubr.msk.f32.mxu1 %vm4894_vm1, %v4895_v8 }
 0x7ee   :  { %4597 = vmatprep.subr.bf16.mxu1 %v4893_v3 }
 0x7f0   :  { %4410 = vmatmul.mubr.msk.f32.vlgmr.msra.gmra.mrb[18].mxu1 %vm154_vm0, %v5088_v13 }
 0x7f1   :  { %4427 = vmatprep.mubr.msk.f32.mxu1 %vm4894_vm1, %v4895_v8  ;;  %4599 = vmatpush3.bf16.msra.mxu1 %v4598_v51 }
 0x7f2   :  { %4600 = vmatprep.subr.bf16.mxu1 %v4893_v3 }
 0x809   :  { %v4376_v63 = vpop.f32.mrb[12].mxu1 }
 0x80a   :  { %v1554_v25 = vadd.f32 %v4376_v63, %v5228_v34  ;;  %v1548_v17 = vpop.f32.mrb[13].mxu1  ;;  %v132_v63 = vld [vmem:[%s4970_s30 + $0x18] sm:$0xff] }
 0x80b   :  { %v1549_v26 = vadd.f32 %v1548_v17, %v5230_v35 }
 0x80c   :  { %4779 = vtanh.f32 %v1554_v25 }
 0x80d   :  { %4781 = vtanh.f32 %v1549_v26  ;;  %v4619_v26 = vpack.c.bf16 %v132_v63, %v131_v43 }
 0x816   :  { %v4780_v18 = vpop.eup %4779 }
 0x817   :  { %v4782_v37 = vpop.eup %4781 }
 0x818   :  { %v4595_v5 = vpack.c.bf16 %v4780_v18, %v4782_v37 }
 0x81a   :  { %4596 = vmatpush3.bf16.msra.mxu0 %v4595_v5 }
 0x81b   :  { %4603 = vmatprep.subr.bf16.mxu0 %v4893_v3 }
 0x81d   :  { %4417 = vmatmul.mubr.msk.f32.vlgmr.msra.gmra.mrb[16].mxu0 %vm154_vm0, %v5088_v13  ;;  %v126_v13 = vld [vmem:[%s4960_s19 + $0x10] sm:$0xff]  ;;  %vm6060_vm0 = vcmp.eq.s32.totalorder %v5069_v6, 1  ;;  %s4901_s19 = smov [#allocation2]  }
 0x81e   :  { %4438 = vmatprep.mubr.msk.f32.mxu0 %vm4894_vm1, %v4895_v8  ;;  %4605 = vmatpush3.bf16.msra.mxu0 %v4604_v19  ;;  %v4601_v52 = vpack.c.bf16 %v127_v40, %v126_v13  ;;  %v4116_v20 = vsel %vm6060_vm0, 1.0, %v4895_v8  ;;  %v4122_v19 = vld [vmem:[%s6080_s17] ss:$0 sm:$0xff]  ;;  %s3994_s30 = sshll.u32 %s4901_s19, 4  ;;  %s3995_s30 = int_to_ptr.vmem [resolvable:$true] %s3994_s30 }
 0x81f   :  { %4606 = vmatprep.subr.bf16.mxu0 %v4893_v3  ;;  %s4840_s20 = scalar_lea.vmem %s3995_s30, 64  ;;  %p4845_p1 = scmp.lt.s32.totalorder %s3995_s30, %s3995_s30 }
 0x820   :  { %4602 = vmatpush3.bf16.msra.mxu1 %v4601_v52  ;;  %p4841_p0 = scmp.ne.s32.totalorder %s3995_s30, %s4840_s20  ;;  %p4846_p2 = scmp.lt.s32.totalorder %s4840_s20, %s4840_s20 }
 0x821   :  { %4609 = vmatprep.subr.bf16.mxu1 %v4893_v3 }
 0x822   :  { %4608 = vmatpush3.bf16.msra.mxu0 %v4607_v23  ;;  %p4847_p3 = por %p4846_p2, %p4845_p1 }
 0x823   :  { %4616 = vmatprep.subr.bf16.mxu0 %v4615_v33  ;;  %4428 = vmatmul.mubr.msk.f32.vlgmr.msra.gmra.mrb[20].mxu1 %vm827_vm6, %v4107_v4 }
 0x824   :  { %4449 = vmatprep.mubr.msk.f32.mxu1 %vm4894_vm1, %v4895_v8  ;;  %p4848_p4 = pnand %p4847_p3, %p4841_p0 }
 0x8af   :  { %v4383_v1 = vpop.f32.mrb[14].mxu1 }
 0x8b0   :  { %v1722_v2 = vpop.f32.mrb[15].mxu1  ;;  %v1728_v27 = vadd.f32 %v4383_v1, %v5207_v22 }
 0x8b1   :  { %v1723_v29 = vadd.f32 %v1722_v2, %v5209_v24 }
 0x8b3   :  { %4783 = vtanh.f32 %v1723_v29 }
 0x8b4   :  { %4785 = vtanh.f32 %v1728_v27 }
 0x8b7   :  { %v4390_v0 = vpop.f32.mrb[12].mxu0 }
 0x8b8   :  { %v1831_v57 = vpop.f32.mrb[13].mxu0  ;;  %v1837_v24 = vadd.f32 %v4390_v0, %v5218_v59 }
 0x8b9   :  { %v1832_v30 = vadd.f32 %v1831_v57, %v5220_v60  ;;  %v2347_v57 = vpop.permute.xlu1 %2346 }
 0x8bb   :  { %v2017_v31 = vpop.f32.mrb[14].mxu0  ;;  %4787 = vtanh.f32 %v1832_v30 }
 0x8bc   :  { %v4404_v38 = vpop.f32.mrb[15].mxu0  ;;  %v2024_v62 = vrot.slane %v2017_v31, %v5104_v14  ;;  %4789 = vtanh.f32 %v1837_v24 }
 0x8bd   :  { %v5553_v18 = vpop.eup %4783 }
 0x8be   :  { %v2025_v12 = vmul.f32 %v5154_v55, %v2024_v62  ;;  %v5560_v59 = vpop.eup %4785  ;;  %v134_v62 = vld [vmem:[%s6081_s21 + $0x8] sm:$0xff] }
 0x8bf   :  { %v4397_v58 = vpop.f32.mrb[16].mxu1 }
 0x8c0   :  { %v1940_v46 = vpop.f32.mrb[17].mxu1  ;;  %v1946_v60 = vadd.f32 %v4397_v58, %v5228_v34 }
 0x8c1   :  { %v1941_v17 = vadd.f32 %v1940_v46, %v5230_v35  ;;  %v133_v46 = vld [vmem:[%s6081_s21] sm:$0xff] }
 0x8c3   :  { %v2096_v28 = vpop.f32.mrb[18].mxu1  ;;  %4791 = vtanh.f32 %v1941_v17 }
 0x8c4   :  { %v2103_v47 = vrot.slane %v2096_v28, %v5104_v14  ;;  %v4411_v41 = vpop.f32.mrb[19].mxu1  ;;  %4793 = vtanh.f32 %v1946_v60  ;;  %v4610_v28 = vpack.c.bf16 %v134_v62, %v133_v46 }
 0x8c5   :  { %v5562_v35 = vpop.eup %4787 }
 0x8c6   :  { %v2104_v39 = vmul.f32 %v4116_v20, %v2103_v47  ;;  %v5568_v34 = vpop.eup %4789  ;;  %v135_v20 = vld [vmem:[%s6081_s21 + $0x10] sm:$0xff]  ;;  %4611 = vmatpush3.bf16.msra.mxu1 %v4610_v28 }
 0x8c7   :  { %4612 = vmatprep.subr.bf16.mxu1 %v4893_v3 }
 0x8c8   :  { %v2105_v7 = vadd.f32 %v2104_v39, %v2025_v12  ;;  %v136_v12 = vld [vmem:[%s6081_s21 + $0x18] sm:$0xff] }
 0x8c9   :  { %v4613_v47 = vpack.c.bf16 %v136_v12, %v135_v20 }
 0x8cb   :  { %4614 = vmatpush3.bf16.msra.mxu1 %v4613_v47 }
 0x8cc   :  { %4623 = vmatprep.subr.bf16.mxu1 %v4893_v3 }
 0x8cd   :  { %v5570_v37 = vpop.eup %4791 }
 0x8ce   :  { %v5576_v5 = vpop.eup %4793 }
 0x8f0   :  { %v2175_v10 = vpop.f32.mrb[16].mxu0 }
 0x8f1   :  { %v2182_v56 = vrot.slane %v2175_v10, %v5104_v14  ;;  %v4418_v44 = vpop.f32.mrb[17].mxu0 }
 0x8f3   :  { %v2183_v25 = vmul.f32 %v4118_v36, %v2182_v56 }
 0x8f5   :  { %v2184_v22 = vadd.f32 %v2183_v25, %v2105_v7 }
 0x8f6   :  { %v2254_v45 = vpop.f32.mrb[20].mxu1 }
 0x8f7   :  { %4439 = vmatmul.mubr.msk.f32.vlgmr.msra.gmra.mrb[18].mxu0 %vm827_vm6, %v2184_v22  ;;  %v4429_v15 = vpop.f32.mrb[21].mxu1 }
 0x8f8   :  { %4618 = vmatpush3.bf16.msra.mxu0 %v4615_v33  ;;  %4460 = vmatprep.mubr.msk.f32.mxu0 %vm827_vm6, %v5553_v18 }
 0x8f9   :  { %4620 = vmatprep.subr.bf16.mxu0 %v4619_v26 }
 0x8fc   :  { %4622 = vmatpush3.bf16.msra.mxu0 %v4619_v26 }
 0x8fd   :  { %4627 = vmatprep.subr.bf16.mxu0 %v4893_v3 }
 0x8ff   :  { %4461 = vmatmul.mubr.msk.f32.vlgmr.msra.gmra.mrb[20].mxu0 %vm827_vm6, %v5560_v59 }
 0x900   :  { %4463 = vmatprep.mubr.msk.f32.mxu0 %vm827_vm6, %v5562_v35 }
 0x903   :  { %4464 = vmatmul.mubr.msk.f32.gmra.mrb[22].mxu0 %vm827_vm6, %v5568_v34 }
 0x904   :  { %4466 = vmatprep.mubr.msk.f32.mxu0 %vm827_vm6, %v5570_v37 }
 0x907   :  { %4467 = vmatmul.mubr.msk.f32.gmra.mrb[24].mxu0 %vm827_vm6, %v5576_v5 }
 0x908   :  { %4480 = vmatprep.mubr.msk.f32.mxu0 %vm4894_vm1, %v4895_v8 }
 0x9ca   :  { %v2327_v61 = vpop.f32.mrb[18].mxu0 }
 0x9cb   :  { %v2328_v53 = vadd.f32 %v2327_v61, %v2254_v45  ;;  %v4440_v51 = vpop.f32.mrb[19].mxu0 }
 0x9cd   :  { %v2337_v54 = vadd.f32 %v4122_v19, %v2328_v53 }
 0x9cf   :  { %4795 = vtanh.f32 %v2337_v54  ;;  %v4123_v33 = vmul.f32 -1.442695, %v2337_v54  ;;  %v137_v54 = vld [vmem:[%s6082_s25] sm:$0x1] }
 0x9d1   :  { %4797 = vpow2.f32 %v4123_v33 }
 0x9d2   :  { %v4462_v32 = vpop.f32.mrb[20].mxu0 }
 0x9d3   :  { %v2525_v13 = vpop.f32.mrb[21].mxu0 }
 0x9d6   :  { %v4465_v23 = vpop.f32.mrb[22].mxu0 }
 0x9d7   :  { %v2535_v40 = vpop.f32.mrb[23].mxu0 }
 0x9d9   :  { %v4796_v50 = vpop.eup %4795 }
 0x9da   :  { %v4468_v48 = vpop.f32.mrb[24].mxu0  ;;  %2351 = vrot.lane.b32.xlu0 %v4796_v50, %s4899_s5 }
 0x9db   :  { %v2545_v52 = vpop.f32.mrb[25].mxu0  ;;  %v4798_v4 = vpop.eup %4797 }
 0x9dc   :  { %v2341_v21 = vadd.f32 1.0, %v4798_v4 }
 0x9de   :  { %4799 = vrcp.f32 %v2341_v21 }
 0x9e8   :  { %v4800_v1 = vpop.eup %4799 }
 0x9e9   :  { %v2349_v31 = vmul.f32 %v4800_v1, %v2347_v57 }
 0xa4c   :  { %v2352_v2 = vpop.permute.xlu0 %2351 }
 0xa4d   :  { %v2354_v0 = vmul.f32 %v4800_v1, %v2352_v2 }
 0xa4f   :  { %2356 = vrot.lane.b32.xlu0 %v2354_v0, %s4900_s13 }
 0xac1   :  { %v2357_v38 = vpop.permute.xlu0 %2356 }
 0xac2   :  { %v5585_v58 = vadd.f32 %v2357_v38, %v2349_v31 }
 0xac4   :  { %4801 = vtanh.f32 %v5585_v58 }
 0xace   :  { %v4802_v41 = vpop.eup %4801 }
 0xacf   :  { %2362 = vrot.lane.b32.xlu1 %v4802_v41, %s4899_s5 }
 0xb41   :  { %v2363_v39 = vpop.permute.xlu1 %2362 }
 0xb42   :  { %v2365_v7 = vmul.f32 %v4800_v1, %v2363_v39 }
 0xb44   :  { %2367 = vrot.lane.b32.xlu0 %v2365_v7, %s4900_s13 }
 0xbb6   :  { %v5596_v29 = vpop.permute.xlu0 %2367 }
 0xbb7   :  { %4450 = vmatmul.mubr.msk.f32.vlgmr.msra.gmra.mrb[22].mxu1 %vm827_vm6, %v5596_v29 }
 0xbb8   :  { %4473 = vmatprep.mubr.msk.f32.mxu1 %vm4894_vm1, %v4895_v8 }
 0xc8a   :  { %v2437_v27 = vpop.f32.mrb[22].mxu1 }
 0xc8b   :  { %v2557_v36 = vrot.slane %v2437_v27, %v5104_v14  ;;  %v2678_v10 = vrot.slane %v2437_v27, %v5109_v16  ;;  %v2794_v30 = vrot.slane %v2437_v27, %v5143_v49  ;;  %v4451_v56 = vpop.f32.mrb[23].mxu1 }
 0xc8d   :  { %v2558_v44 = vadd.f32 %v2557_v36, %v2525_v13  ;;  %v2559_v43 = vadd.f32 %v4462_v32, %v2557_v36  ;;  %v2679_v63 = vadd.f32 %v2678_v10, %v2535_v40  ;;  %v2680_v25 = vadd.f32 %v4465_v23, %v2678_v10 }
 0xc8e   :  { %v2795_v24 = vadd.f32 %v2794_v30, %v2545_v52  ;;  %v2796_v17 = vadd.f32 %v4468_v48, %v2794_v30 }
 0xc8f   :  { %4803 = vtanh.f32 %v2558_v44 }
 0xc90   :  { %4805 = vtanh.f32 %v2559_v43 }
 0xc91   :  { %4807 = vtanh.f32 %v2679_v63 }
 0xc92   :  { %4809 = vtanh.f32 %v2680_v25 }
 0xc93   :  { %4811 = vtanh.f32 %v2795_v24 }
 0xc94   :  { %4813 = vtanh.f32 %v2796_v17 }
 0xc99   :  { %v4804_v22 = vpop.eup %4803 }
 0xc9a   :  { %v4806_v26 = vpop.eup %4805 }
 0xc9b   :  { %v4808_v60 = vpop.eup %4807  ;;  %v4624_v45 = vpack.c.bf16 %v4806_v26, %v4804_v22 }
 0xc9c   :  { %v4810_v15 = vpop.eup %4809 }
 0xc9d   :  { %v4812_v19 = vpop.eup %4811  ;;  %4626 = vmatpush3.bf16.xpose.msk.msra.mxu1 %vm5272_vm7, %v4624_v45  ;;  %v4628_v61 = vpack.c.bf16 %v4810_v15, %v4808_v60 }
 0xc9e   :  { %v4814_v53 = vpop.eup %4813  ;;  %4631 = vmatprep.subr.bf16.mxu1 %v4893_v3 }
 0xc9f   :  { %4630 = vmatpush3.bf16.xpose.msk.msra.mxu0 %vm5272_vm7, %v4628_v61  ;;  %v4632_v51 = vpack.c.bf16 %v4814_v53, %v4812_v19 }
 0xca0   :  { %4490 = vmatprep.subr.mxu0 %v4895_v8 }
 0xca4   :  { %4474 = vmatmul.mubr.msk.f32.vlgmr.msra.gmra.mrb[24].mxu1 %vm827_vm6, %v137_v54 }
 0xca5   :  { %4634 = vmatpush3.bf16.xpose.msk.msra.mxu1 %vm5272_vm7, %v4632_v51  ;;  %4487 = vmatprep.mubr.msk.f32.mxu1 %vm4894_vm1, %v4895_v8  ;;  %vm2643_vm7 = vcmask 122880  }
 0xca6   :  { %4481 = vmatmul.mubr.msk.f32.vlgmr.msra.gmra.mrb[26].mxu0 %vm827_vm6, %v137_v54  ;;  %4495 = vmatprep.subr.mxu1 %v4895_v8 }
 0xca7   :  { %4491 = vmatpush3.msk.msra.mxu0 %vm2912_vm13, %v5291_v11  ;;  %4492 = vmatprep.mubr.msk.f32.mxu0 %vm4894_vm1, %v4895_v8 }
 0xca8   :  { %4500 = vmatprep.subr.mxu0 %v4895_v8 }
 0xcac   :  { %4488 = vmatmul.mubr.msk.f32.vlgmr.msra.gmra.mrb[26].mxu1 %vm827_vm6, %v137_v54 }
 0xcad   :  { %4496 = vmatpush3.msk.msra.mxu1 %vm2912_vm13, %v5596_v29  ;;  %4497 = vmatprep.mubr.msk.f32.mxu1 %vm4894_vm1, %v4895_v8 }
 0xcae   :  { %4505 = vmatprep.subr.mxu1 %v4895_v8 }
 0xd77   :  { %v2637_v3 = vpop.f32.mrb[24].mxu1 }
 0xd78   :  { %v2642_v42 = vsel %vm2641_vm14, %v2637_v3, -1e+09  ;;  %v4475_v32 = vpop.f32.mrb[25].mxu1 }
 0xd79   :  { %v2755_v13 = vpop.f32.mrb[26].mxu0  ;;  %v2644_v23 = vsel %vm2643_vm7, %v2642_v42, -inf }
 0xd7a   :  { %v2760_v40 = vrot.slane %v2755_v13, 7  ;;  %2645 = vmax.xlane.f32.xlu1 %v2644_v23  ;;  %v4482_v50 = vpop.f32.mrb[27].mxu0 }
 0xd7c   :  { %v2762_v48 = vsel %vm2641_vm14, %v2760_v40, -1e+09 }
 0xd7d   :  { %v2764_v52 = vsel %vm2763_vm15, %v2762_v48, -inf }
 0xd7e   :  { %2765 = vmax.xlane.f32.xlu0 %v2764_v52 }
 0xd7f   :  { %v2871_v33 = vpop.f32.mrb[26].mxu1 }
 0xd80   :  { %v2876_v4 = vrot.slane %v2871_v33, 6  ;;  %v4489_v21 = vpop.f32.mrb[27].mxu1 }
 0xd82   :  { %v2878_v1 = vsel %vm2641_vm14, %v2876_v4, -1e+09 }
 0xd83   :  { %v2880_v2 = vsel %vm2879_vm5, %v2878_v1, -inf }
 0xd84   :  { %2881 = vmax.xlane.f32.xlu0 %v2880_v2 }
 0xe07   :  { %v2646_v0 = vpop.xlane.xlu1 %2645 }
 0xe08   :  { %v2647_v57 = vsub.f32 %v2642_v42, %v2646_v0 }
 0xe0a   :  { %v2648_v31 = vmul.f32 1.442695, %v2647_v57 }
 0xe0b   :  { %v2766_v38 = vpop.xlane.xlu0 %2765 }
 0xe0c   :  { %4815 = vpow2.f32 %v2648_v31  ;;  %v2767_v46 = vsub.f32 %v2762_v48, %v2766_v38 }
 0xe0e   :  { %v2768_v62 = vmul.f32 1.442695, %v2767_v46 }
 0xe10   :  { %4817 = vpow2.f32 %v2768_v62 }
 0xe11   :  { %v2882_v20 = vpop.xlane.xlu0 %2881 }
 0xe12   :  { %v2883_v28 = vsub.f32 %v2878_v1, %v2882_v20 }
 0xe14   :  { %v2884_v12 = vmul.f32 1.442695, %v2883_v28 }
 0xe16   :  { %v4816_v47 = vpop.eup %4815  ;;  %4819 = vpow2.f32 %v2884_v12 }
 0xe17   :  { %v2650_v41 = vsel %vm2643_vm7, %v4816_v47, 0.0 }
 0xe18   :  { %2651 = vadd.xlane.f32.xlu1 %v2650_v41 }
 0xe1a   :  { %v4818_v39 = vpop.eup %4817 }
 0xe1b   :  { %v2770_v7 = vsel %vm2763_vm15, %v4818_v39, 0.0 }
 0xe1c   :  { %2771 = vadd.xlane.f32.xlu0 %v2770_v7 }
 0xe20   :  { %v4820_v27 = vpop.eup %4819 }
 0xe21   :  { %v2886_v36 = vsel %vm2879_vm5, %v4820_v27, 0.0 }
 0xe22   :  { %2887 = vadd.xlane.f32.xlu1 %v2886_v36 }
 0xea5   :  { %v2652_v10 = vpop.xlane.xlu1 %2651 }
 0xea6   :  { %4821 = vrcp.f32 %v2652_v10 }
 0xea9   :  { %v2772_v30 = vpop.xlane.xlu0 %2771 }
 0xeaa   :  { %4823 = vrcp.f32 %v2772_v30 }
 0xeaf   :  { %v2888_v56 = vpop.xlane.xlu1 %2887 }
 0xeb0   :  { %v4822_v44 = vpop.eup %4821  ;;  %4825 = vrcp.f32 %v2888_v56  ;;  %v5686_v56 = vcvt.s32.f32 %v5075_v9 }
 0xeb1   :  { %v2654_v43 = vmul.f32 %v4822_v44, %v4816_v47  ;;  %v5681_v47 = vcvt.s32.f32 %v5069_v6 }
 0xeb3   :  { %v2659_v63 = vmax.f32 %v2654_v43, 1e-30  ;;  %v2668_v25 = vrot.slane %v2654_v43, %v5104_v14 }
 0xeb4   :  { %v4824_v24 = vpop.eup %4823 }
 0xeb5   :  { %4827 = vlog2.f32 %v2659_v63  ;;  %v2774_v17 = vmul.f32 %v4824_v24, %v4818_v39  ;;  %v2669_v22 = vsel %vm141_vm2, %v2668_v25, 0.0 }
 0xeb7   :  { %v2775_v26 = vmax.f32 %v2774_v17, 1e-30  ;;  %v2784_v60 = vrot.slane %v2774_v17, %v5109_v16 }
 0xeb9   :  { %4829 = vlog2.f32 %v2775_v26  ;;  %v2785_v45 = vsel %vm6060_vm0, %v2784_v60, %v2669_v22 }
 0xeba   :  { %v4826_v15 = vpop.eup %4825 }
 0xebb   :  { %v2890_v19 = vmul.f32 %v4826_v15, %v4820_v27  ;;  %v5721_v15 = vld [vmem:[%s4995_s4] sm:$0x7] }
 0xebd   :  { %v2891_v61 = vmax.f32 %v2890_v19, 1e-30  ;;  %v2900_v53 = vrot.slane %v2890_v19, %v5143_v49 }
 0xebf   :  { %v4828_v51 = vpop.eup %4827  ;;  %4831 = vlog2.f32 %v2891_v61  ;;  %v5652_v54 = vsel %vm2106_vm4, %v2900_v53, %v2785_v45 }
 0xec0   :  { %v2661_v3 = vmul.f32 0.6931472, %v4828_v51 }
 0xec2   :  { %v2663_v32 = vsel %vm2658_vm9, %v2661_v3, -1e+09 }
 0xec3   :  { %v4830_v42 = vpop.eup %4829  ;;  %v2673_v23 = vrot.slane %v2663_v32, %v5104_v14 }
 0xec4   :  { %v2777_v13 = vmul.f32 0.6931472, %v4830_v42 }
 0xec5   :  { %v2674_v33 = vsel %vm141_vm2, %v2673_v23, -1e+09 }
 0xec6   :  { %v2779_v40 = vsel %vm2658_vm9, %v2777_v13, -1e+09 }
 0xec7   :  { %v2789_v48 = vrot.slane %v2779_v40, %v5109_v16 }
 0xec9   :  { %v4832_v50 = vpop.eup %4831  ;;  %v2790_v1 = vsel %vm6060_vm0, %v2789_v48, %v2674_v33 }
 0xeca   :  { %v2893_v52 = vmul.f32 0.6931472, %v4832_v50 }
 0xecc   :  { %v2895_v4 = vsel %vm2658_vm9, %v2893_v52, -1e+09 }
 0xecd   :  { %v2905_v21 = vrot.slane %v2895_v4, %v5143_v49 }
 0xecf   :  { %v5666_v2 = vsel %vm2106_vm4, %v2905_v21, %v2790_v1 }
 0xed0   :  { %v2909_v0 = vsel %vm1568_vm10, %v5666_v2, -inf }
 0xed1   :  { %2910 = vmax.xlane.f32.xlu0 %v2909_v0 }
 0xf5e   :  { %v2911_v16 = vpop.xlane.xlu0 %2910 }
 0xf5f   :  { %v2913_v57 = vsel %vm2912_vm13, %v2911_v16, -inf }
 0xf60   :  { %v2914_v31 = vrot.slane %v2913_v57, 4 }
 0xf62   :  { %v2915_v38 = vmax.f32 %v2913_v57, %v2914_v31 }
 0xf64   :  { %v2916_v46 = vrot.slane %v2915_v38, 2 }
 0xf66   :  { %v2917_v62 = vmax.f32 %v2915_v38, %v2916_v46 }
 0xf68   :  { %v2918_v49 = vrot.slane %v2917_v62, 1 }
 0xf6a   :  { %v5671_v20 = vmax.f32 %v2917_v62, %v2918_v49 }
 0xf6c   :  { %vm2920_vm11 = vcmp.ge.f32.partialorder %v5666_v2, %v5671_v20 }
 0xf6d   :  { %v2921_v28 = vsel %vm2920_vm11, 1.0, %v4895_v8 }
 0xf6e   :  { %v2922_v12 = vsel %vm1568_vm10, %v2921_v28, -inf }
 0xf6f   :  { %2923 = vmax.xlane.f32.xlu1 %v2922_v12 }
 0xffc   :  { %v2924_v41 = vpop.xlane.xlu1 %2923 }
 0xffd   :  { %vm2925_vm12 = vcmp.gt.f32.partialorder %v2924_v41, 0.5 }
 0xffe   :  { %v2926_v39 = vsel %vm2925_vm12, %v5681_v47, 3.0 }
 0xfff   :  { %v2927_v7 = vsel %vm2912_vm13, %v2926_v39, inf }
0x1000   :  { %v2928_v27 = vrot.slane %v2927_v7, 4 }
0x1002   :  { %v2929_v36 = vmin.f32 %v2927_v7, %v2928_v27 }
0x1004   :  { %v2930_v10 = vrot.slane %v2929_v36, 2 }
0x1006   :  { %v2931_v30 = vmin.f32 %v2929_v36, %v2930_v10 }
0x1008   :  { %v2932_v44 = vrot.slane %v2931_v30, 1 }
0x100a   :  { %v5688_v43 = vmin.f32 %v2931_v30, %v2932_v44 }
0x100c   :  { %vm2973_vm7 = vcmp.eq.f32.partialorder %v5686_v56, %v5688_v43  ;;  %vm2934_vm14 = vcmp.eq.f32.partialorder %v5681_v47, %v5688_v43  ;;  %vm3200_vm15 = vcmp.eq.f32.partialorder %v5688_v43, 0.0  ;;  %vm3211_vm5 = vcmp.eq.f32.partialorder %v5688_v43, 1.0 }
0x100d   :  { %v5697_v63 = vsel %vm2973_vm7, 1.0, %v4895_v8  ;;  %vm2935_vm8 = vmand %vm2920_vm11, %vm2934_vm14  ;;  %v4148_v25 = vsel %vm3200_vm15, 1.0, %v4895_v8  ;;  %v4149_v24 = vsel %vm3211_vm5, 1.0, %v4895_v8  ;;  %vm3225_vm9 = vcmp.eq.f32.partialorder %v5688_v43, 2.0 }
0x100e   :  { %4493 = vmatmul.mubr.msk.f32.vlgmr.msra.gmra.mrb[28].mxu0 %vm2976_vm3, %v5697_v63  ;;  %4498 = vmatmul.mubr.msk.f32.vlgmr.msra.gmra.mrb[28].mxu1 %vm2976_vm3, %v5697_v63  ;;  %v2936_v17 = vsel %vm2935_vm8, %v5686_v56, 16.0  ;;  %v3205_v22 = vmul.f32 0.0, %v4148_v25  ;;  %v3207_v26 = vmul.f32 %v5553_v18, %v4148_v25  ;;  %v3208_v45 = vmul.f32 %v5560_v59, %v4148_v25 }
0x100f   :  { %4506 = vmatpush3.msk.msra.mxu1 %vm2912_vm13, %v5291_v11  ;;  %v2937_v60 = vsel %vm1568_vm10, %v2936_v17, inf  ;;  %4507 = vmatprep.mubr.msk.f32.mxu1 %vm4894_vm1, %v4895_v8  ;;  %v3214_v19 = vmul.f32 %v5721_v15, %v4149_v24  ;;  %v3219_v61 = vmul.f32 0.0, %v4149_v24  ;;  %v3203_v53 = vmul.f32 %v5721_v15, %v4148_v25 }
0x1010   :  { %2938 = vmin.xlane.f32.xlu0 %v2937_v60  ;;  %4515 = vmatprep.subr.mxu1 %v4895_v8  ;;  %v3221_v51 = vmul.f32 %v5562_v35, %v4149_v24  ;;  %v3222_v3 = vmul.f32 %v5568_v34, %v4149_v24  ;;  %v4150_v42 = vsel %vm3225_vm9, 1.0, %v4895_v8 }
0x1011   :  { %4502 = vmatprep.mubr.msk.f32.mxu0 %vm4894_vm1, %v4895_v8  ;;  %v3216_v32 = vrot.slane %v3214_v19, 1  ;;  %v3220_v13 = vadd.f32 %v3219_v61, %v3205_v22  ;;  %v3228_v23 = vmul.f32 %v5721_v15, %v4150_v42  ;;  %v3233_v40 = vmul.f32 0.0, %v4150_v42 }
0x1012   :  { %v3223_v50 = vadd.f32 %v3221_v51, %v3207_v26  ;;  %v3224_v48 = vadd.f32 %v3222_v3, %v3208_v45  ;;  %v3235_v52 = vmul.f32 %v5570_v37, %v4150_v42  ;;  %v3236_v33 = vmul.f32 %v5576_v5, %v4150_v42 }
0x1013   :  { %v3218_v4 = vadd.f32 %v3216_v32, %v3203_v53  ;;  %v3230_v21 = vrot.slane %v3228_v23, 2  ;;  %v5736_v1 = vadd.f32 %v3233_v40, %v3220_v13  ;;  %v4635_v40 = vtrunc.f32 %v5688_v43 }
0x1014   :  { %v3237_v0 = vadd.f32 %v3235_v52, %v3223_v50  ;;  %v3238_v16 = vadd.f32 %v3236_v33, %v3224_v48 }
0x1015   :  { %v5738_v57 = vadd.f32 %v3230_v21, %v3218_v4  ;;  %v4636_v52 = vcvt.f32.s32 %v4635_v40 }
0x1016   :  { %3264 = vst.msk [vmem:[%s6083_s29] sm:$0xff] %vm827_vm6, %v3237_v0  ;;  %3265 = vst.msk [vmem:[%s6083_s29 + $0x8] sm:$0xff] %vm827_vm6, %v3238_v16 }
0x109d   :  { %v2939_v31 = vpop.xlane.xlu0 %2938 }
0x109e   :  { %v2940_v38 = vsel %vm2912_vm13, %v2939_v31, inf }
0x109f   :  { %v2941_v46 = vrot.slane %v2940_v38, 4 }
0x10a1   :  { %v2942_v62 = vmin.f32 %v2940_v38, %v2941_v46 }
0x10a3   :  { %v2943_v49 = vrot.slane %v2942_v62, 2 }
0x10a5   :  { %v2944_v28 = vmin.f32 %v2942_v62, %v2943_v49 }
0x10a7   :  { %v2945_v12 = vrot.slane %v2944_v28, 1 }
0x10a9   :  { %v5745_v41 = vmin.f32 %v2944_v28, %v2945_v12 }
0x10ab   :  { %vm2947_vm11 = vcmp.eq.f32.partialorder %v5686_v56, %v5745_v41 }
0x10ac   :  { %vm5752_vm12 = vmand %vm2934_vm14, %vm2947_vm11 }
0x10ad   :  { %v5759_v7 = vsel %vm5752_vm12, -1e+09, %v5666_v2 }
0x10ae   :  { %v3266_v27 = vsel %vm1568_vm10, %v5759_v7, -inf }
0x10af   :  { %3267 = vmax.xlane.f32.xlu1 %v3266_v27 }
0x10e1   :  { %v5763_v36 = vpop.f32.mrb[28].mxu0  ;;  %v5765_v10 = vpop.f32.mrb[28].mxu1 }
0x10e2   :  { %v4494_v30 = vpop.f32.mrb[29].mxu0  ;;  %v4499_v44 = vpop.f32.mrb[29].mxu1 }
0x113c   :  { %v3268_v25 = vpop.xlane.xlu1 %3267 }
0x113d   :  { %v3269_v24 = vsel %vm2912_vm13, %v3268_v25, -inf }
0x113e   :  { %v3270_v17 = vrot.slane %v3269_v24, 4 }
0x1140   :  { %v3271_v22 = vmax.f32 %v3269_v24, %v3270_v17 }
0x1142   :  { %v3272_v26 = vrot.slane %v3271_v22, 2 }
0x1144   :  { %v3273_v60 = vmax.f32 %v3271_v22, %v3272_v26 }
0x1146   :  { %v3274_v45 = vrot.slane %v3273_v60, 1 }
0x1148   :  { %v5768_v2 = vmax.f32 %v3273_v60, %v3274_v45 }
0x114a   :  { %vm3276_vm7 = vcmp.ge.f32.partialorder %v5759_v7, %v5768_v2 }
0x114b   :  { %v3277_v19 = vsel %vm3276_vm7, 1.0, %v4895_v8 }
0x114c   :  { %v3278_v61 = vsel %vm1568_vm10, %v3277_v19, -inf }
0x114d   :  { %3279 = vmax.xlane.f32.xlu0 %v3278_v61 }
0x11da   :  { %v3280_v53 = vpop.xlane.xlu0 %3279 }
0x11db   :  { %vm3281_vm14 = vcmp.gt.f32.partialorder %v3280_v53, 0.5 }
0x11dc   :  { %v3282_v51 = vsel %vm3281_vm14, %v5681_v47, 3.0 }
0x11dd   :  { %v3283_v3 = vsel %vm2912_vm13, %v3282_v51, inf }
0x11de   :  { %v3284_v42 = vrot.slane %v3283_v3, 4 }
0x11e0   :  { %v3285_v32 = vmin.f32 %v3283_v3, %v3284_v42  ;;  %v3248_v3 = vrot.slane %v5738_v57, %v5104_v14 }
0x11e2   :  { %v3286_v13 = vrot.slane %v3285_v32, 2 }
0x11e4   :  { %v3287_v23 = vmin.f32 %v3285_v32, %v3286_v13  ;;  %v2968_v13 = vsel %vm141_vm2, %v4636_v52, 0 }
0x11e6   :  { %v3288_v50 = vrot.slane %v3287_v23, 1 }
0x11e8   :  { %v3289_v48 = vmin.f32 %v3287_v23, %v3288_v50 }
0x11ea   :  { %vm3329_vm15 = vcmp.eq.f32.partialorder %v5686_v56, %v3289_v48  ;;  %vm3290_vm5 = vcmp.eq.f32.partialorder %v5681_v47, %v3289_v48  ;;  %vm3545_vm8 = vcmp.eq.f32.partialorder %v3289_v48, 0.0  ;;  %vm3556_vm9 = vcmp.eq.f32.partialorder %v3289_v48, 1.0 }
0x11eb   :  { %v5783_v33 = vsel %vm3329_vm15, 1.0, %v4895_v8  ;;  %vm3291_vm11 = vmand %vm3276_vm7, %vm3290_vm5  ;;  %v4159_v43 = vsel %vm3545_vm8, 1.0, %v4895_v8  ;;  %v4160_v4 = vsel %vm3556_vm9, 1.0, %v4895_v8  ;;  %vm3570_vm14 = vcmp.eq.f32.partialorder %v3289_v48, 2.0 }
0x11ec   :  { %4508 = vmatmul.mubr.msk.f32.vlgmr.msra.gmra.mrb[30].mxu1 %vm2976_vm3, %v5783_v33  ;;  %v3292_v21 = vsel %vm3291_vm11, %v5686_v56, 16.0  ;;  %v3548_v0 = vmul.f32 %v5721_v15, %v4159_v43  ;;  %v3550_v16 = vmul.f32 0.0, %v4159_v43  ;;  %v3552_v31 = vmul.f32 %v5553_v18, %v4159_v43 }
0x11ed   :  { %v3293_v38 = vsel %vm1568_vm10, %v3292_v21, inf  ;;  %4517 = vmatprep.mubr.msk.f32.mxu1 %vm4894_vm1, %v4895_v8  ;;  %v3553_v46 = vmul.f32 %v5560_v59, %v4159_v43  ;;  %v3559_v62 = vmul.f32 %v5721_v15, %v4160_v4  ;;  %v3564_v49 = vmul.f32 0.0, %v4160_v4 }
0x11ee   :  { %3294 = vmin.xlane.f32.xlu1 %v3293_v38  ;;  %v3566_v28 = vmul.f32 %v5562_v35, %v4160_v4  ;;  %v3567_v12 = vmul.f32 %v5568_v34, %v4160_v4  ;;  %v4161_v27 = vsel %vm3570_vm14, 1.0, %v4895_v8  ;;  %v4641_v30 = vtrunc.f32 %v3289_v48 }
0x11ef   :  { %v3561_v44 = vrot.slane %v3559_v62, 1  ;;  %v3565_v25 = vadd.f32 %v3564_v49, %v3550_v16  ;;  %v3573_v24 = vmul.f32 %v5721_v15, %v4161_v27  ;;  %v3578_v17 = vmul.f32 0.0, %v4161_v27 }
0x11f0   :  { %v3568_v22 = vadd.f32 %v3566_v28, %v3552_v31  ;;  %v3569_v26 = vadd.f32 %v3567_v12, %v3553_v46  ;;  %v3580_v60 = vmul.f32 %v5570_v37, %v4161_v27  ;;  %v3581_v45 = vmul.f32 %v5576_v5, %v4161_v27 }
0x11f1   :  { %v3563_v19 = vadd.f32 %v3561_v44, %v3548_v0  ;;  %v3575_v61 = vrot.slane %v3573_v24, 2  ;;  %v5808_v53 = vadd.f32 %v3578_v17, %v3565_v25  ;;  %v4642_v51 = vcvt.f32.s32 %v4641_v30 }
0x11f2   :  { %v3582_v42 = vadd.f32 %v3580_v60, %v3568_v22  ;;  %v3583_v32 = vadd.f32 %v3581_v45, %v3569_v26  ;;  %v3249_v43 = vsel %vm141_vm2, %v3248_v3, 0.0  ;;  %v4637_v38 = vtrunc.f32 %v5745_v41 }
0x11f3   :  { %v3577_v23 = vadd.f32 %v3575_v61, %v3563_v19  ;;  %v5816_v40 = vsel %vm6060_vm0, %v4642_v51, %v2968_v13  ;;  %vm3316_vm8 = vcmp.gt.f32.partialorder %v5768_v2, -5e+08  ;;  %vm1576_vm11 = vcmask 2048  }
0x11f4   :  { %4162 = vst.msk [vmem:[%s6083_s29 + $0x10] sm:$0xff] %vm827_vm6, %v3582_v42  ;;  %4163 = vst.msk [vmem:[%s6083_s29 + $0x18] sm:$0xff] %vm827_vm6, %v3583_v32  ;;  %v4638_v49 = vcvt.f32.s32 %v4637_v38  ;;  %v4151_v17 = vsel %vm3316_vm8, 1.0, %v4895_v8 }
0x11f5   :  { %v3593_v50 = vrot.slane %v3577_v23, %v5104_v14 }
0x11f6   :  { %v2970_v41 = vsel %vm141_vm2, %v4638_v49, 0  ;;  %v2949_v49 = vsel %vm5752_vm12, %v5652_v54, 0.0 }
0x11f7   :  { %v5827_v57 = vsel %vm6060_vm0, %v3593_v50, %v3249_v43 }
0x127b   :  { %v3295_v4 = vpop.xlane.xlu1 %3294 }
0x127c   :  { %v3296_v52 = vsel %vm2912_vm13, %v3295_v4, inf }
0x127d   :  { %v3297_v21 = vrot.slane %v3296_v52, 4 }
0x127f   :  { %v3298_v0 = vmin.f32 %v3296_v52, %v3297_v21 }
0x1281   :  { %v3299_v16 = vrot.slane %v3298_v0, 2 }
0x1283   :  { %v3300_v31 = vmin.f32 %v3298_v0, %v3299_v16 }
0x1285   :  { %v3301_v46 = vrot.slane %v3300_v31, 1 }
0x1287   :  { %v3302_v62 = vmin.f32 %v3300_v31, %v3301_v46  ;;  %v4639_v46 = vtrunc.f32 %v5736_v1 }
0x1289   :  { %vm3303_vm7 = vcmp.eq.f32.partialorder %v5686_v56, %v3302_v62  ;;  %v4643_v28 = vtrunc.f32 %v3302_v62 }
0x128a   :  { %vm5834_vm15 = vmand %vm3290_vm5, %vm3303_vm7  ;;  %vm2960_vm5 = vcmp.gt.f32.partialorder %v5671_v20, -5e+08 }
0x128b   :  { %v5841_v27 = vsel %vm5834_vm15, -1e+09, %v5759_v7  ;;  %v4644_v30 = vcvt.f32.s32 %v4643_v28  ;;  %v4140_v7 = vsel %vm2960_vm5, 1.0, %v4895_v8 }
0x128c   :  { %v3612_v44 = vsel %vm1568_vm10, %v5841_v27, -inf  ;;  %v3239_v48 = vmul.f32 %v4140_v7, %v5763_v36  ;;  %v2972_v32 = vsel %vm141_vm2, %v4140_v7, 0.0 }
0x128d   :  { %v5849_v25 = vsel %vm6060_vm0, %v4644_v30, %v2970_v41  ;;  %3613 = vmax.xlane.f32.xlu0 %v3612_v44  ;;  %v2950_v30 = vsel %vm1568_vm10, %v2949_v49, 0.0  ;;  %v4640_v41 = vcvt.f32.s32 %v4639_v46  ;;  %v4645_v44 = vtrunc.f32 %v5808_v53 }
0x128e   :  { %v3243_v24 = vrot.slane %v3239_v48, %v5104_v14 }
0x12a3   :  { %3126 = vrot.lane.b32.xlu0 %v5585_v58, %s4898_s0  ;;  %v3244_v58 = vsel %vm141_vm2, %v3243_v24, 0.0 }
0x12bf   :  { %v3401_v22 = vpop.f32.mrb[30].mxu1 }
0x12c0   :  { %v3584_v26 = vmul.f32 %v4151_v17, %v3401_v22  ;;  %v4509_v60 = vpop.f32.mrb[31].mxu1 }
0x12c2   :  { %v3588_v45 = vrot.slane %v3584_v26, %v5104_v14 }
0x12c4   :  { %v5864_v20 = vsel %vm6060_vm0, %v3588_v45, %v3244_v58 }
0x131a   :  { %v3614_v19 = vpop.xlane.xlu0 %3613 }
0x131b   :  { %v3615_v36 = vsel %vm2912_vm13, %v3614_v19, -inf }
0x131c   :  { %v3616_v2 = vrot.slane %v3615_v36, 4 }
0x131e   :  { %v3617_v61 = vmax.f32 %v3615_v36, %v3616_v2  ;;  %v3127_v51 = vpop.permute.xlu0 %3126 }
0x131f   :  { %4501 = vmatpush3.msk.msra.mxu0 %vm2912_vm13, %v3127_v51  ;;  %4516 = vmatpush3.msk.msra.mxu1 %vm2912_vm13, %v3127_v51 }
0x1320   :  { %v3618_v3 = vrot.slane %v3617_v61, 2  ;;  %4503 = vmatmul.mubr.msk.f32.vlgmr.msra.gmra.mrb[30].mxu0 %vm2976_vm3, %v5697_v63  ;;  %4510 = vmatprep.subr.mxu0 %v4895_v8 }
0x1321   :  { %4518 = vmatmul.mubr.msk.f32.vlgmr.msra.gmra.mrb[32].mxu1 %vm2976_vm3, %v5783_v33  ;;  %4525 = vmatprep.subr.mxu1 %v4895_v8 }
0x1322   :  { %v3619_v42 = vmax.f32 %v3617_v61, %v3618_v3  ;;  %4511 = vmatpush3.msk.msra.mxu0 %vm2912_vm13, %v5596_v29  ;;  %4526 = vmatpush3.msk.msra.mxu1 %vm2912_vm13, %v5596_v29 }
0x1323   :  { %4512 = vmatprep.mubr.msk.f32.mxu0 %vm4894_vm1, %v4895_v8  ;;  %4520 = vmatprep.subr.mxu0 %v4895_v8 }
0x1324   :  { %v3620_v63 = vrot.slane %v3619_v42, 1  ;;  %4513 = vmatmul.mubr.msk.f32.vlgmr.msra.gmra.mrb[32].mxu0 %vm2976_vm3, %v5783_v33  ;;  %4527 = vmatprep.mubr.msk.f32.mxu1 %vm4894_vm1, %v4895_v8  ;;  %v3328_v33 = vsel %vm6060_vm0, %v4151_v17, %v2972_v32 }
0x1325   :  { %4521 = vmatpush3.msk.msra.mxu0 %vm2912_vm13, %v5291_v11  ;;  %4522 = vmatprep.mubr.msk.f32.mxu0 %vm4894_vm1, %v4895_v8 }
0x1326   :  { %v3621_v29 = vmax.f32 %v3619_v42, %v3620_v63  ;;  %4530 = vmatprep.subr.mxu0 %v4895_v8 }
0x1328   :  { %vm3622_vm9 = vcmp.ge.f32.partialorder %v5841_v27, %v3621_v29  ;;  %vm3662_vm14 = vcmp.gt.f32.partialorder %v3621_v29, -5e+08 }
0x1329   :  { %v3623_v13 = vsel %vm3622_vm9, 1.0, %v4895_v8  ;;  %v5900_v23 = vsel %vm3662_vm14, 1.0, %v4895_v8 }
0x132a   :  { %v3624_v50 = vsel %vm1568_vm10, %v3623_v13, -inf  ;;  %v3673_v43 = vsel %vm2106_vm4, %v5900_v23, %v3328_v33 }
0x132b   :  { %3625 = vmax.xlane.f32.xlu1 %v3624_v50  ;;  %3960 = vst.msk [vmem:[%s6088_s3] sm:$0x7] %vm1576_vm11, %v3673_v43  ;;  %v4646_v50 = vcvt.f32.s32 %v4645_v44 }
0x13b8   :  { %v3626_v4 = vpop.xlane.xlu1 %3625 }
0x13b9   :  { %vm3627_vm7 = vcmp.gt.f32.partialorder %v3626_v4, 0.5 }
0x13ba   :  { %v3628_v52 = vsel %vm3627_vm7, %v5681_v47, 3.0 }
0x13bb   :  { %v3629_v21 = vsel %vm2912_vm13, %v3628_v52, inf }
0x13bc   :  { %v3630_v0 = vrot.slane %v3629_v21, 4 }
0x13be   :  { %v3631_v16 = vmin.f32 %v3629_v21, %v3630_v0  ;;  %v3251_v21 = vsel %vm141_vm2, %v4640_v41, 0  ;;  %v3257_v41 = vrot.slane %v5765_v10, %v5104_v14 }
0x13c0   :  { %v3632_v31 = vrot.slane %v3631_v16, 2 }
0x13c2   :  { %v3633_v38 = vmin.f32 %v3631_v16, %v3632_v31 }
0x13c4   :  { %v3634_v62 = vrot.slane %v3633_v38, 1 }
0x13c6   :  { %v5914_v28 = vmin.f32 %v3633_v38, %v3634_v62 }
0x13c8   :  { %vm3674_vm5 = vcmp.eq.f32.partialorder %v5686_v56, %v5914_v28  ;;  %vm3636_vm8 = vcmp.eq.f32.partialorder %v5681_v47, %v5914_v28  ;;  %vm3890_vm14 = vcmp.eq.f32.partialorder %v5914_v28, 0.0  ;;  %vm3901_vm7 = vcmp.eq.f32.partialorder %v5914_v28, 1.0 }
0x13c9   :  { %v4165_v39 = vsel %vm3674_vm5, 1.0, %v4895_v8  ;;  %vm3637_vm12 = vmand %vm3622_vm9, %vm3636_vm8  ;;  %v4172_v7 = vsel %vm3890_vm14, 1.0, %v4895_v8  ;;  %v4173_v48 = vsel %vm3901_vm7, 1.0, %v4895_v8  ;;  %vm3915_vm0 = vcmp.eq.f32.partialorder %v5914_v28, 2.0 }
0x13ca   :  { %4523 = vmatmul.mubr.msk.f32.vlgmr.msra.gmra.mrb[34].mxu0 %vm2976_vm3, %v4165_v39  ;;  %4528 = vmatmul.mubr.msk.f32.vlgmr.msra.gmra.mrb[34].mxu1 %vm2976_vm3, %v4165_v39  ;;  %v3638_v24 = vsel %vm3637_vm12, %v5686_v56, 16.0  ;;  %v3893_v17 = vmul.f32 %v5721_v15, %v4172_v7  ;;  %v3895_v22 = vmul.f32 0.0, %v4172_v7  ;;  %v3897_v26 = vmul.f32 %v5553_v18, %v4172_v7 }
0x13cb   :  { %4531 = vmatpush3.msk.msra.mxu0 %vm2912_vm13, %v3127_v51  ;;  %v3639_v27 = vsel %vm1568_vm10, %v3638_v24, inf  ;;  %4532 = vmatprep.mubr.msk.f32.mxu0 %vm4894_vm1, %v4895_v8  ;;  %v3898_v60 = vmul.f32 %v5560_v59, %v4172_v7  ;;  %v3904_v45 = vmul.f32 %v5721_v15, %v4173_v48  ;;  %v3909_v58 = vmul.f32 0.0, %v4173_v48 }
0x13cc   :  { %3640 = vmin.xlane.f32.xlu1 %v3639_v27  ;;  %v3911_v19 = vmul.f32 %v5562_v35, %v4173_v48  ;;  %v3912_v36 = vmul.f32 %v5568_v34, %v4173_v48  ;;  %v4174_v18 = vsel %vm3915_vm0, 1.0, %v4895_v8  ;;  %v4647_v2 = vtrunc.f32 %v5914_v28 }
0x13cd   :  { %v3906_v61 = vrot.slane %v3904_v45, 1  ;;  %v3910_v51 = vadd.f32 %v3909_v58, %v3895_v22  ;;  %v3918_v3 = vmul.f32 %v5721_v15, %v4174_v18  ;;  %v3923_v42 = vmul.f32 0.0, %v4174_v18 }
0x13ce   :  { %4533 = vmatmul.mubr.msk.f32.vlgmr.msra.gmra.mrb[36].mxu0 %vm2976_vm3, %v4165_v39  ;;  %v3913_v59 = vadd.f32 %v3911_v19, %v3897_v26  ;;  %v3914_v63 = vadd.f32 %v3912_v36, %v3898_v60  ;;  %v3925_v35 = vmul.f32 %v5570_v37, %v4174_v18  ;;  %v3926_v34 = vmul.f32 %v5576_v5, %v4174_v18 }
0x13cf   :  { %v3908_v29 = vadd.f32 %v3906_v61, %v3893_v17  ;;  %v3920_v32 = vrot.slane %v3918_v3, 2  ;;  %v5954_v33 = vadd.f32 %v3923_v42, %v3910_v51  ;;  %v4648_v13 = vcvt.f32.s32 %v4647_v2 }
0x13d0   :  { %2951 = vadd.xlane.f32.xlu1 %v2950_v30  ;;  %v3305_v15 = vsel %vm5834_vm15, %v5652_v54, 0.0  ;;  %v3927_v43 = vadd.f32 %v3925_v35, %v3913_v59  ;;  %v3928_v4 = vadd.f32 %v3926_v34, %v3914_v63  ;;  %vm6091_vm1 = vcmp.eq.s32.totalorder %v5069_v6, 1 }
0x13d1   :  { %v3922_v52 = vadd.f32 %v3920_v32, %v3908_v29  ;;  %v4651_v37 = vtrunc.f32 %v5954_v33  ;;  %v3669_v5 = vsel %vm2106_vm4, %v4648_v13, %v5816_v40  ;;  %v3306_v12 = vsel %vm1568_vm10, %v3305_v15, 0.0  ;;  %vm6093_vm0 = vmmov %vm6091_vm1 }
0x13d2   :  { %4175 = vst.msk [vmem:[%s6083_s29 + $0x20] sm:$0xff] %vm827_vm6, %v3927_v43  ;;  %4176 = vst.msk [vmem:[%s6083_s29 + $0x28] sm:$0xff] %vm827_vm6, %v3928_v4  ;;  %v3596_v31 = vsel %vm6091_vm1, %v4646_v50, %v3251_v21  ;;  %v3258_v22 = vsel %vm141_vm2, %v3257_v41, 0.0  ;;  %vm1564_vm3 = vcmp.eq.s32.totalorder %v5075_v9, 15 }
0x13d3   :  { %3967 = vst.msk [vmem:[#allocation2] sm:$0x7] %vm1576_vm11, %v3669_v5  ;;  %v3938_v0 = vrot.slane %v3922_v52, %v5104_v14  ;;  %v4652_v16 = vcvt.f32.s32 %v4651_v37  ;;  %vm6092_vm6 = vmmov %vm6091_vm1  ;;  %v4105_v61 = vsel %vm1564_vm3, 1.0, %v4895_v8 }
0x13d4   :  { %3307 = vadd.xlane.f32.xlu1 %v3306_v12  ;;  %v1567_v59 = vmul.f32 %v4105_v61, %v5291_v11 }
0x13d5   :  { %v3939_v40 = vsel %vm2106_vm4, %v3938_v0, %v5827_v57  ;;  %v3941_v38 = vsel %vm2106_vm4, %v4652_v16, %v3596_v31 }
0x13d6   :  { %3958 = vst.msk [vmem:[%s6089_s8] sm:$0x7] %vm1576_vm11, %v3939_v40  ;;  %3959 = vst.msk [vmem:[%s6090_s14] sm:$0x7] %vm1576_vm11, %v3941_v38 }
0x13f3   :  { %v3196_v46 = vpop.f32.mrb[30].mxu0 }
0x13f4   :  { %v3262_v62 = vrot.slane %v3196_v46, %v5104_v14  ;;  %v3541_v49 = vpop.f32.mrb[32].mxu1  ;;  %v4504_v30 = vpop.f32.mrb[31].mxu0 }
0x13f5   :  { %v3607_v44 = vrot.slane %v3541_v49, %v5104_v14  ;;  %v4519_v39 = vpop.f32.mrb[33].mxu1 }
0x13f6   :  { %v3263_v57 = vsel %vm141_vm2, %v3262_v62, 0.0 }
0x13f7   :  { %v3608_v7 = vsel %vm6092_vm6, %v3607_v44, %v3263_v57  ;;  %v3471_v48 = vpop.f32.mrb[32].mxu0 }
0x13f8   :  { %v3602_v24 = vrot.slane %v3471_v48, %v5104_v14  ;;  %v4514_v17 = vpop.f32.mrb[33].mxu0 }
0x13fa   :  { %v3603_v26 = vsel %vm6093_vm0, %v3602_v24, %v3258_v22 }
0x1459   :  { %v3641_v10 = vpop.xlane.xlu1 %3640 }
0x145a   :  { %v3642_v27 = vsel %vm2912_vm13, %v3641_v10, inf }
0x145b   :  { %v3643_v60 = vrot.slane %v3642_v27, 4 }
0x145d   :  { %v3644_v45 = vmin.f32 %v3642_v27, %v3643_v60 }
0x145f   :  { %v3645_v58 = vrot.slane %v3644_v45, 2 }
0x1461   :  { %v3646_v19 = vmin.f32 %v3644_v45, %v3645_v58 }
0x1463   :  { %v3647_v36 = vrot.slane %v3646_v19, 1 }
0x1465   :  { %v3648_v18 = vmin.f32 %v3646_v19, %v3647_v36 }
0x1467   :  { %vm3649_vm15 = vcmp.eq.f32.partialorder %v5686_v56, %v3648_v18  ;;  %v4649_v2 = vtrunc.f32 %v3648_v18  ;;  %v1569_v56 = vsel %vm1568_vm10, %v1567_v59, 0.0 }
0x1468   :  { %vm3650_vm9 = vmand %vm3636_vm8, %vm3649_vm15 }
0x1469   :  { %v3651_v51 = vsel %vm3650_vm9, %v5652_v54, 0.0  ;;  %v4650_v3 = vcvt.f32.s32 %v4649_v2 }
0x146a   :  { %v3652_v42 = vsel %vm1568_vm10, %v3651_v51, 0.0 }
0x146b   :  { %v3671_v9 = vsel %vm2106_vm4, %v4650_v3, %v5849_v25  ;;  %3653 = vadd.xlane.f32.xlu1 %v3652_v42 }
0x146c   :  { %3965 = vst.msk [vmem:[%s5040_s12] sm:$0x7] %vm1576_vm11, %v3671_v9 }
0x146f   :  { %1570 = vadd.xlane.f32.xlu1 %v1569_v56 }
0x1470   :  { %4851 = shalt.err (!%p4848_p4)
}
0x1471   :  { %s4852_s4 = scalar_lea.hbm %s5050_s24, 64 }
0x1472   :  { %p4853_p5 = scmp.ne.s32.totalorder %s5050_s24, %s4852_s4  ;;  %p4856_p6 = scmp.lt.u32.totalorder %s4852_s4, %s5050_s24 }
0x1474   :  { %p4858_p7 = pnand %p4856_p6, %p4853_p5 }
0x1476   :  { %4861 = shalt.err (!%p4858_p7)
}
0x1477   :  { %s6094_s12 = sld [smem:[#allocation14_spill]]  ;;  %s6095_s7 = sld [smem:[#allocation9_spill]]  ;;  %vm3962_vm5 = vcmask 256000   ;;  %v2952_v50 = vpop.xlane.xlu1 %2951  ;;  %vm6099_vm8 = vmmov %vm6093_vm0 }
0x1478   :  { %3997 = dma.vmem_to_hbm [thread:$0]  %s3995_s30, 64, %s5050_s24, [#allocation3]   ;;  %v2953_v4 = vsel %vm2912_vm13, %v2952_v50, 0.0 }
0x1479   :  { %s6096_s10 = sld [smem:[#allocation15_spill]]  ;;  %v2954_v37 = vrot.slane %v2953_v4, 4  ;;  %s6097_s24 = sld [smem:[#allocation13_spill]] }
0x147b   :  { %v3308_v43 = vpop.xlane.xlu1 %3307  ;;  %v2955_v12 = vadd.f32 %v2954_v37, %v2953_v4 }
0x147c   :  { %v3309_v52 = vsel %vm2912_vm13, %v3308_v43, 0.0 }
0x147d   :  { %v3310_v5 = vrot.slane %v3309_v52, 4 }
0x147f   :  { %v3311_v21 = vadd.f32 %v3310_v5, %v3309_v52 }
0x1481   :  { %v3312_v0 = vrot.slane %v3311_v21, 2 }
0x1483   :  { %v3313_v16 = vadd.f32 %v3312_v0, %v3311_v21 }
0x1485   :  { %v3314_v40 = vrot.slane %v3313_v16, 1 }
0x1487   :  { %v3315_v62 = vadd.f32 %v3314_v40, %v3313_v16 }
0x1489   :  { %v3319_v57 = vmax.f32 %v3315_v62, 1e-30 }
0x149d   :  { %v3746_v11 = vpop.f32.mrb[34].mxu0  ;;  %v3816_v54 = vpop.f32.mrb[34].mxu1 }
0x149e   :  { %v3929_v47 = vmul.f32 %v5900_v23, %v3746_v11  ;;  %v3947_v25 = vrot.slane %v3816_v54, %v5104_v14  ;;  %v4524_v28 = vpop.f32.mrb[35].mxu0  ;;  %v4529_v63 = vpop.f32.mrb[35].mxu1 }
0x14a0   :  { %v3933_v35 = vrot.slane %v3929_v47, %v5104_v14  ;;  %v3948_v34 = vsel %vm2106_vm4, %v3947_v25, %v3603_v26 }
0x14a1   :  { %3963 = vst.msk [vmem:[%s6094_s12] sm:$0x7] %vm3962_vm5, %v3948_v34  ;;  %v3886_v29 = vpop.f32.mrb[36].mxu0 }
0x14a2   :  { %v3934_v32 = vsel %vm2106_vm4, %v3933_v35, %v5864_v20  ;;  %v3952_v13 = vrot.slane %v3886_v29, %v5104_v14  ;;  %v4534_v15 = vpop.f32.mrb[37].mxu0  ;;  %v2956_v20 = vrot.slane %v2955_v12, 2 }
0x14a3   :  { %3957 = vst.msk [vmem:[%s6095_s7] sm:$0x7] %vm1568_vm10, %v3934_v32 }
0x14a4   :  { %v3953_v23 = vsel %vm2106_vm4, %v3952_v13, %v3608_v7  ;;  %v2957_v14 = vadd.f32 %v2956_v20, %v2955_v12 }
0x14a5   :  { %3964 = vst.msk [vmem:[%s6096_s10] sm:$0x7] %vm3962_vm5, %v3953_v23 }
0x14a6   :  { %v2958_v31 = vrot.slane %v2957_v14, 1 }
0x14a8   :  { %v2959_v38 = vadd.f32 %v2958_v31, %v2957_v14 }
0x14aa   :  { %v2963_v41 = vmax.f32 %v2959_v38, 1e-30 }
0x14ac   :  { %4833 = vlog2.f32 %v2963_v41 }
0x14ad   :  { %4835 = vlog2.f32 %v3319_v57 }
0x14b6   :  { %v4834_v27 = vpop.eup %4833 }
0x14b7   :  { %v4836_v60 = vpop.eup %4835  ;;  %v2965_v45 = vmul.f32 0.6931472, %v4834_v27 }
0x14b8   :  { %v3321_v58 = vmul.f32 0.6931472, %v4836_v60 }
0x14b9   :  { %v3252_v19 = vadd.f32 %v5736_v1, %v2965_v45  ;;  %v2971_v36 = vsel %vm141_vm2, %v2965_v45, 0.0 }
0x14bb   :  { %v3253_v61 = vsel %vm141_vm2, %v3252_v19, 0.0 }
0x14f8   :  { %v3654_v46 = vpop.xlane.xlu1 %3653 }
0x14f9   :  { %v3655_v49 = vsel %vm2912_vm13, %v3654_v46, 0.0  ;;  %vm6098_vm13 = vmmov %vm6093_vm0 }
0x14fa   :  { %v3656_v30 = vrot.slane %v3655_v49, 4  ;;  %v3327_v2 = vsel %vm6098_vm13, %v3321_v58, %v2971_v36 }
0x14fc   :  { %v3657_v44 = vadd.f32 %v3656_v30, %v3655_v49  ;;  %v1571_v39 = vpop.xlane.xlu1 %1570 }
0x14fd   :  { %vm1572_vm10 = vcmp.gt.f32.partialorder %v1571_v39, 0.5 }
0x14fe   :  { %v3658_v7 = vrot.slane %v3657_v44, 2  ;;  %v4106_v48 = vsel %vm1572_vm10, 1.0, %v4895_v8 }
0x14ff   :  { %v1575_v24 = vmul.f32 %v4106_v48, %v5154_v55  ;;  %v3597_v55 = vadd.f32 %v5808_v53, %v3321_v58 }
0x1500   :  { %v3659_v17 = vadd.f32 %v3658_v7, %v3657_v44 }
0x1501   :  { %1577 = vst.msk [vmem:[%s5055_s27] sm:$0x7] %vm1576_vm11, %v1575_v24  ;;  %v3598_v1 = vsel %vm6099_vm8, %v3597_v55, %v3253_v61 }
0x1502   :  { %v3660_v22 = vrot.slane %v3659_v17, 1 }
0x1504   :  { %v3661_v26 = vadd.f32 %v3660_v22, %v3659_v17 }
0x1506   :  { %v3665_v10 = vmax.f32 %v3661_v26, 1e-30 }
0x1508   :  { %4837 = vlog2.f32 %v3665_v10 }
0x1512   :  { %v4838_v8 = vpop.eup %4837 }
0x1513   :  { %v3667_v18 = vmul.f32 0.6931472, %v4838_v8 }
0x1515   :  { %v3672_v51 = vsel %vm2106_vm4, %v3667_v18, %v3327_v2  ;;  %v3942_v3 = vadd.f32 %v5954_v33, %v3667_v18 }
0x1516   :  { %3966 = vst.msk [vmem:[%s5045_s6] sm:$0x7] %vm1576_vm11, %v3672_v51 }
0x1517   :  { %v3943_v53 = vsel %vm2106_vm4, %v3942_v3, %v3598_v1 }
0x1518   :  { %3961 = vst.msk [vmem:[%s6097_s24] sm:$0x7] %vm1576_vm11, %v3943_v53 }
0x1519   :  { %4862 = dma.done.wait [#allocation3], 64  }
0x151a   :  { %4863 = vsyncadd [#allocation3], 4294967232 }
0x151b   :  { %4025 = vsyncpa [#allocation3], 1 }

// kernel: body.6
= control target key start
LH: loop header
LB: loop body
LE: loop exit
PB: predicated region body
PF: predicated region fallthrough
CT: control target
= control target key end

     0   :  { %v4705_v0 = vmov 0   ;;  %s4706_s3 = smov 17   ;;  %s4707_s7 = smov 23   ;;  %v4708_v1 = vmov 0.0|0.0   ;;  %vm4709_vm0 = vmmov 0   ;;  %v4710_v7 = vmov 0.0   ;;  %s5834_s0 = inlined_call_operand.smem [shape: u32[37], index: -1, kind: input, shape index: {}] }
   0x1   :  { %4591 = vset.pattern.permute.xlu0 %v4705_v0  ;;  %s3933_s6 = sld [smem:[%s5834_s0 + %s4706_s3]]   ;;  %4427 = vmatprep.subr.bf16.mxu0 %v4708_v1  ;;  %s4711_s14 = smov 2   ;;  %v171_v8 = vlaneseq  ;;  %vm185_vm1 = vcmask 130048   ;;  %vm260_vm4 = vcmask 124928   ;;  %v4713_v26 = vmov 1.0|1.0  }
   0x2   :  { %s4760_s10 = sld [smem:[%s5834_s0 + %s4707_s7]]   ;;  %4430 = vmatprep.subr.bf16.mxu1 %v4708_v1  ;;  %4592 = vset.pattern.permute.xlu1 %v4705_v0  ;;  %s4712_s18 = smov 1   ;;  %vm1020_vm14 = vcmask 261120  }
   0x3   :  { %s1_s13 = sld [smem:[%s5834_s0]]   ;;  %4200 = vmatprep.mubr.msk.f32.mxu0 %vm4709_vm0, %v4710_v7  ;;  %4207 = vmatprep.mubr.msk.f32.mxu1 %vm4709_vm0, %v4710_v7  ;;  %v4782_v9 = vshrl.u32 %v171_v8, 7  ;;  %v4784_v10 = vand.u32 127, %v171_v8  ;;  %s4714_s22 = smov 16   ;;  %vm5014_vm15 = vmpackc.low %vm1020_vm14, %vm1020_vm14 }
   0x4   :  { %s3918_s17 = sld [smem:[%s5834_s0 + %s4711_s14]]   ;;  %s4715_s26 = smov 3  }
   0x5   :  { %v4787_v11 = vsub.s32 2, %v4782_v9  ;;  %v4805_v20 = vsub.s32 0, %v4782_v9  ;;  %v4808_v21 = vsub.s32 1, %v4782_v9  ;;  %v4811_v22 = vadd.s32 8, %v4782_v9  ;;  %s3917_s21 = sld [smem:[%s5834_s0 + %s4712_s18]]   ;;  %s4716_s30 = smov 4  }
   0x6   :  { %s3932_s25 = sld [smem:[%s5834_s0 + %s4714_s22]]   ;;  %s4717_s4 = smov 5  }
   0x7   :  { %v165_v2 = vld [vmem:[%s3933_s6] sm:$0x7]  ;;  %s3919_s29 = sld [smem:[%s5834_s0 + %s4715_s26]]   ;;  %s4718_s8 = smov 8  }
   0x8   :  { %174 = vperm.xlu0 %4591, %v165_v2   ;;  %v170_v5 = vld [vmem:[%s4760_s10] sm:$0x7]  ;;  %s4855_s3 = sld [smem:[%s5834_s0 + %s4716_s30]]   ;;  %s4722_s22 = smov 18  }
   0x9   :  { %v4768_v3 = vld [vmem:[%s1_s13] sm:$0xff]  ;;  %v4770_v4 = vld [vmem:[%s1_s13 + $0x8] sm:$0xff]  ;;  %v422_v23 = vrot.slane %v170_v5, %v4805_v20  ;;  %v643_v24 = vrot.slane %v170_v5, %v4808_v21  ;;  %v833_v25 = vrot.slane %v170_v5, %v4787_v11  ;;  %s3921_s7 = sld [smem:[%s5834_s0 + %s4717_s4]]   ;;  %s4719_s13 = smov 7  }
   0xa   :  { %v4428_v6 = vpack.c.bf16 %v4770_v4, %v4768_v3  ;;  %v4789_v13 = vld [vmem:[%s3918_s17] sm:$0xf]  ;;  %s3924_s12 = sld [smem:[%s5834_s0 + %s4718_s8]]   ;;  %s4720_s17 = smov 6  }
   0xb   :  { %v275_v15 = vrot.slane %v4789_v13, %v4787_v11  ;;  %vm423_vm5 = vcmp.eq.s32.totalorder %v4782_v9, %v422_v23  ;;  %vm424_vm6 = vcmp.eq.s32.totalorder %v4811_v22, %v422_v23  ;;  %vm644_vm8 = vcmp.eq.s32.totalorder %v4782_v9, %v643_v24  ;;  %v130_v27 = vld [vmem:[%s3917_s21] sm:$0xff]  ;;  %v131_v28 = vld [vmem:[%s3917_s21 + $0x8] sm:$0xff]  ;;  %s3923_s16 = sld [smem:[%s5834_s0 + %s4719_s13]]   ;;  %s4721_s21 = smov 96  }
   0xc   :  { %4429 = vmatpush3.bf16.msra.mxu0 %v4428_v6  ;;  %4432 = vmatpush3.bf16.msra.mxu1 %v4428_v6  ;;  %vm4433_vm7 = vmpackc.low %vm424_vm6, %vm423_vm5  ;;  %vm645_vm9 = vcmp.eq.s32.totalorder %v4811_v22, %v643_v24  ;;  %vm834_vm11 = vcmp.eq.s32.totalorder %v4782_v9, %v833_v25  ;;  %vm835_vm12 = vcmp.eq.s32.totalorder %v4811_v22, %v833_v25  ;;  %v164_v44 = vld [vmem:[%s3932_s25] sm:$0x7]  ;;  %s4923_s20 = sld [smem:[%s5834_s0 + %s4720_s17]]   ;;  %s4723_s26 = smov 15  }
   0xd   :  { %180 = vperm.xlu0 %4591, %v170_v5   ;;  %4434 = vmatprep.subr.msk.bf16.mxu0 %vm4433_vm7, %v4713_v26  ;;  %vm4437_vm10 = vmpackc.low %vm645_vm9, %vm644_vm8  ;;  %v4833_v29 = vrot.slane %v4789_v13, %v4805_v20  ;;  %v4864_v56 = vld [vmem:[%s3919_s29] sm:$0xff]  ;;  %v4866_v57 = vld [vmem:[%s3919_s29 + $0x8] sm:$0xff]  ;;  %s4986_s25 = sld [smem:[%s5834_s0 + %s4722_s22]]   ;;  %vm637_vm9 = vcmp.eq.s32.totalorder %v4811_v22, %v4784_v10  ;;  %s4724_s30 = smov 64  }
   0xe   :  { %4438 = vmatprep.subr.msk.bf16.mxu1 %vm4437_vm10, %v4713_v26  ;;  %vm4441_vm13 = vmpackc.low %vm835_vm12, %vm834_vm11  ;;  %s3931_s29 = sld [smem:[%s5834_s0 + %s4723_s26]]   ;;  %vm636_vm11 = vcmp.eq.s32.totalorder %v4782_v9, %v4784_v10  ;;  %s4725_s1 = smov 22  }
   0xf   :  { %s5121_s4 = sld [smem:[%s5834_s0 + %s4725_s1]]   ;;  %s4726_s5 = smov 9  }
  0x10   :  { %s3925_s8 = sld [smem:[%s5834_s0 + %s4726_s5]]   ;;  %s4727_s9 = smov 10  }
  0x11   :  { %s3926_s13 = sld [smem:[%s5834_s0 + %s4727_s9]]   ;;  %s4728_s14 = smov 12  }
  0x12   :  { %s5204_s17 = sld [smem:[%s5834_s0 + %s4728_s14]]   ;;  %s4729_s18 = smov 20  }
  0x13   :  { %s3936_s22 = sld [smem:[%s5834_s0 + %s4729_s18]]   ;;  %s4730_s23 = smov 21  }
  0x14   :  { %s3937_s27 = sld [smem:[%s5834_s0 + %s4730_s23]]   ;;  %s4731_s28 = smov 32  }
  0x15   :  { %s4745_s24 = smov 30  }
  0x87   :  { %v175_v12 = vpop.permute.xlu0 %174 }
  0x88   :  { %vm176_vm2 = vcmp.eq.s32.totalorder %v4784_v10, %v175_v12 }
  0x89   :  { %v3953_v14 = vsel %vm176_vm2, 1.0, %v4710_v7 }
  0x8a   :  { %4201 = vmatmul.mubr.msk.f32.vlgmr.msra.gmra.mrb[0].mxu0 %vm185_vm1, %v3953_v14 }
  0x8b   :  { %4436 = vmatpush3.bf16.msk.msra.mxu0 %vm4433_vm7, %v4713_v26  ;;  %4214 = vmatprep.mubr.msk.f32.mxu0 %vm185_vm1, %v130_v27 }
  0x8c   :  { %v181_v16 = vpop.permute.xlu0 %180  ;;  %4442 = vmatprep.subr.msk.bf16.mxu0 %vm4441_vm13, %v4713_v26 }
  0x8d   :  { %vm182_vm3 = vcmp.eq.s32.totalorder %v4784_v10, %v181_v16  ;;  %v134_v16 = vld [vmem:[%s4855_s3] sm:$0xff] }
  0x8e   :  { %v4798_v17 = vsel %vm182_vm3, 1.0, %v4710_v7  ;;  %4215 = vmatmul.mubr.msk.f32.vlgmr.msra.gmra.mrb[2].mxu0 %vm185_vm1, %v131_v28 }
  0x8f   :  { %4208 = vmatmul.mubr.msk.f32.vlgmr.msra.gmra.mrb[0].mxu1 %vm185_vm1, %v4798_v17  ;;  %v276_v18 = vmul.f32 %v4798_v17, %v275_v15  ;;  %4444 = vmatpush3.bf16.msk.msra.mxu0 %vm4441_vm13, %v4713_v26  ;;  %v268_v34 = vmul.f32 %v4798_v17, %v4833_v29 }
  0x90   :  { %4440 = vmatpush3.bf16.msk.msra.mxu1 %vm4437_vm10, %v4713_v26  ;;  %4221 = vmatprep.mubr.msk.f32.mxu1 %vm185_vm1, %v130_v27 }
  0x91   :  { %v277_v19 = vsel %vm260_vm4, %v276_v18, 0.0  ;;  %4228 = vmatprep.mubr.msk.f32.mxu0 %vm185_vm1, %v130_v27  ;;  %v269_v37 = vsel %vm260_vm4, %v268_v34, 0.0  ;;  %v4882_v27 = vld [vmem:[%s3921_s7] sm:$0xff] }
  0x92   :  { %278 = vadd.xlane.f32.xlu0 %v277_v19  ;;  %4229 = vmatmul.mubr.msk.f32.vlgmr.msra.gmra.mrb[4].mxu0 %vm185_vm1, %v131_v28 }
  0x93   :  { %4222 = vmatmul.mubr.msk.f32.vlgmr.msra.gmra.mrb[2].mxu1 %vm185_vm1, %v131_v28  ;;  %v4884_v28 = vld [vmem:[%s3921_s7 + $0x8] sm:$0xff] }
 0x11f   :  { %v279_v51 = vpop.xlane.xlu0 %278 }
 0x15d   :  { %v255_v30 = vpop.f32.mrb[0].mxu0 }
 0x15e   :  { %v259_v31 = vmul.f32 %v4798_v17, %v255_v30  ;;  %v4202_v32 = vpop.f32.mrb[1].mxu0 }
 0x160   :  { %v261_v33 = vsel %vm260_vm4, %v259_v31, 0.0 }
 0x161   :  { %262 = vadd.xlane.f32.xlu1 %v261_v33  ;;  %v4216_v38 = vpop.f32.mrb[2].mxu0 }
 0x162   :  { %v4839_v35 = vpop.f32.mrb[0].mxu1  ;;  %v505_v39 = vpop.f32.mrb[3].mxu0 }
 0x163   :  { %v4209_v36 = vpop.f32.mrb[1].mxu1 }
 0x165   :  { %270 = vadd.xlane.f32.xlu1 %v269_v37  ;;  %v4230_v41 = vpop.f32.mrb[4].mxu0  ;;  %v135_v37 = vld [vmem:[%s4855_s3 + $0x8] sm:$0xff] }
 0x166   :  { %v4842_v40 = vpop.f32.mrb[2].mxu1  ;;  %v910_v43 = vpop.f32.mrb[5].mxu0 }
 0x167   :  { %v720_v42 = vpop.f32.mrb[3].mxu1 }
 0x1ee   :  { %v263_v45 = vpop.xlane.xlu1 %262 }
 0x1ef   :  { %v280_v46 = vadd.f32 %v263_v45, %v164_v44 }
 0x1f2   :  { %v271_v47 = vpop.xlane.xlu1 %270 }
 0x1f3   :  { %v281_v48 = vsub.f32 %v271_v47, %v280_v46 }
 0x1f5   :  { %v282_v49 = vmax.f32 %v281_v48, 0.0 }
 0x1f7   :  { %v283_v50 = vadd.f32 %v282_v49, %v280_v46  ;;  %v143_v46 = vld [vmem:[%s3924_s12 + $0x10] sm:$0xff] }
 0x1f9   :  { %v4850_v52 = vadd.f32 %v283_v50, %v279_v51 }
 0x1fb   :  { %v432_v53 = vrot.slane %v4850_v52, %v4805_v20  ;;  %v653_v54 = vrot.slane %v4850_v52, %v4808_v21  ;;  %287 = vperm.xlu1 %4592, %v4850_v52   ;;  %v843_v55 = vrot.slane %v4850_v52, %v4787_v11 }
 0x1fd   :  { %v506_v58 = vadd.f32 %v505_v39, %v432_v53  ;;  %v916_v59 = vadd.f32 %v4230_v41, %v843_v55  ;;  %v721_v60 = vadd.f32 %v720_v42, %v653_v54  ;;  %v911_v61 = vadd.f32 %v910_v43, %v843_v55  ;;  %v141_v42 = vld [vmem:[%s3924_s12] sm:$0xff]  ;;  %v142_v43 = vld [vmem:[%s3924_s12 + $0x8] sm:$0xff] }
 0x1fe   :  { %v511_v6 = vadd.f32 %v4216_v38, %v432_v53  ;;  %v726_v34 = vadd.f32 %v4842_v40, %v653_v54  ;;  %v4445_v44 = vpack.c.bf16 %v142_v43, %v141_v42  ;;  %v144_v40 = vld [vmem:[%s3924_s12 + $0x18] sm:$0xff]  ;;  %v140_v55 = vld [vmem:[%s3923_s16] sm:$0xf]  ;;  %s4735_s12 = smov 35   ;;  %s4736_s16 = smov 36  }
 0x1ff   :  { %524 = vperm.xlu1 %4592, %v506_v58   ;;  %v514_v62 = vsub.f32 %v4864_v56, %v506_v58  ;;  %v920_v63 = vsub.f32 %v4866_v57, %v916_v59  ;;  %v729_v2 = vsub.f32 %v4864_v56, %v721_v60  ;;  %v919_v5 = vsub.f32 %v4864_v56, %v911_v61  ;;  %s3951_s15 = sld [smem:[%s5834_s0 + %s4735_s12]]  }
 0x200   :  { %v515_v26 = vsub.f32 %v4866_v57, %v511_v6  ;;  %v730_v41 = vsub.f32 %v4866_v57, %v726_v34  ;;  %4446 = vmatprep.subr.bf16.mxu1 %v4445_v44  ;;  %v4449_v47 = vpack.c.bf16 %v144_v40, %v143_v46  ;;  %s3952_s19 = sld [smem:[%s5834_s0 + %s4736_s16]]  }
 0x201   :  { %v516_v8 = vmax.f32 %v514_v62, 0.0  ;;  %v922_v12 = vmax.f32 %v920_v63, 0.0  ;;  %v731_v14 = vmax.f32 %v729_v2, 0.0  ;;  %v921_v15 = vmax.f32 %v919_v5, 0.0  ;;  %4448 = vmatpush3.bf16.msra.mxu1 %v4445_v44 }
 0x202   :  { %v517_v32 = vmax.f32 %v515_v26, 0.0  ;;  %v732_v45 = vmax.f32 %v730_v41, 0.0  ;;  %4450 = vmatprep.subr.bf16.mxu1 %v4449_v47 }
 0x203   :  { %529 = vperm.xlu1 %4592, %v511_v6   ;;  %v4876_v18 = vadd.f32 %v516_v8, %v506_v58  ;;  %v923_v19 = vadd.f32 %v921_v15, %v911_v61  ;;  %v924_v23 = vadd.f32 %v922_v12, %v916_v59  ;;  %v4878_v24 = vadd.f32 %v731_v14, %v721_v60 }
 0x204   :  { %v4897_v36 = vadd.f32 %v517_v32, %v511_v6  ;;  %v4902_v48 = vadd.f32 %v732_v45, %v726_v34 }
 0x205   :  { %v520_v25 = vsub.f32 %v134_v16, %v4876_v18  ;;  %v4887_v30 = vadd.f32 %v924_v23, %v4884_v28  ;;  %v4890_v31 = vadd.f32 %v923_v19, %v4882_v27  ;;  %v735_v33 = vsub.f32 %v134_v16, %v4878_v24  ;;  %4452 = vmatpush3.bf16.msra.mxu1 %v4449_v47 }
 0x206   :  { %v521_v38 = vsub.f32 %v135_v37, %v4897_v36  ;;  %v925_v39 = vsub.f32 %v134_v16, %v923_v19  ;;  %v736_v49 = vsub.f32 %v135_v37, %v4902_v48  ;;  %v926_v50 = vsub.f32 %v135_v37, %v924_v23  ;;  %v138_v19 = vld [vmem:[%s4923_s20] sm:$0xff] }
 0x207   :  { %540 = vperm.xlu1 %4592, %v516_v8   ;;  %558 = vperm.xlu0 %4591, %v520_v25  }
 0x20b   :  { %545 = vperm.xlu1 %4592, %v517_v32   ;;  %765 = vperm.xlu0 %4591, %v735_v33   ;;  %v777_v32 = vrot.slane %v140_v55, 2 }
 0x20f   :  { %739 = vperm.xlu1 %4592, %v721_v60   ;;  %929 = vperm.xlu0 %4591, %v911_v61   ;;  %v4915_v60 = vrot.slane %v140_v55, %v4805_v20  ;;  %v4918_v61 = vrot.slane %v140_v55, %v4808_v21 }
 0x213   :  { %751 = vperm.xlu1 %4592, %v731_v14   ;;  %934 = vperm.xlu0 %4591, %v916_v59   ;;  %v575_v59 = vrot.slane %v140_v55, 3 }
 0x217   :  { %563 = vperm.xlu1 %4592, %v521_v38   ;;  %955 = vperm.xlu0 %4591, %v925_v39  }
 0x21b   :  { %744 = vperm.xlu1 %4592, %v726_v34  }
 0x21f   :  { %756 = vperm.xlu1 %4592, %v732_v45  }
 0x223   :  { %770 = vperm.xlu1 %4592, %v736_v49  }
 0x227   :  { %941 = vperm.xlu1 %4592, %v921_v15  }
 0x22b   :  { %946 = vperm.xlu1 %4592, %v922_v12  }
 0x22f   :  { %960 = vperm.xlu1 %4592, %v926_v50  }
 0x27a   :  { %v4908_v51 = vpop.permute.xlu1 %287 }
 0x27b   :  { %v4912_v53 = vadd.f32 %v4839_v35, %v4908_v51  ;;  %v4926_v35 = vrot.slane %v140_v55, %v4787_v11  ;;  %v577_v2 = vmul.f32 %v575_v59, %v4908_v51  ;;  %v779_v41 = vmul.f32 %v777_v32, %v4908_v51 }
 0x27d   :  { %v581_v15 = vrot.slane %v577_v2, %v4805_v20  ;;  %v783_v49 = vrot.slane %v779_v41, %v4808_v21 }
 0x27e   :  { %v525_v54 = vpop.permute.xlu1 %524 }
 0x27f   :  { %v536_v5 = vmul.f32 %v4915_v60, %v525_v54 }
 0x282   :  { %v530_v58 = vpop.permute.xlu1 %529 }
 0x283   :  { %v537_v42 = vmul.f32 %v4915_v60, %v530_v58 }
 0x286   :  { %v541_v62 = vpop.permute.xlu1 %540  ;;  %v559_v63 = vpop.permute.xlu0 %558 }
 0x287   :  { %v552_v6 = vmul.f32 %v4918_v61, %v541_v62  ;;  %v570_v12 = vmul.f32 %v4926_v35, %v559_v63  ;;  %v139_v62 = vld [vmem:[%s4923_s20 + $0x8] sm:$0xff]  ;;  %s4737_s20 = smov 19  }
 0x289   :  { %v554_v8 = vadd.f32 %v552_v6, %v536_v5 }
 0x28a   :  { %v546_v14 = vpop.permute.xlu1 %545  ;;  %v766_v33 = vpop.permute.xlu0 %765 }
 0x28b   :  { %v572_v16 = vadd.f32 %v570_v12, %v554_v8  ;;  %v553_v37 = vmul.f32 %v4918_v61, %v546_v14  ;;  %v773_v43 = vmul.f32 %v766_v33, %v4926_v35 }
 0x28d   :  { %v582_v23 = vadd.f32 %v581_v15, %v572_v16  ;;  %v555_v46 = vadd.f32 %v553_v37, %v537_v42 }
 0x28e   :  { %v740_v25 = vpop.permute.xlu1 %739  ;;  %v930_v54 = vpop.permute.xlu0 %929 }
 0x28f   :  { %v4934_v26 = vadd.f32 %v582_v23, %v138_v19  ;;  %v747_v38 = vmul.f32 %v740_v25, %v4915_v60  ;;  %v967_v23 = vrot.slane %v140_v55, 1 }
 0x291   :  { %4239 = vmatprep.mubr.msk.f32.mxu1 %vm1020_vm14, %v4934_v26  ;;  %v969_v37 = vmul.f32 %v967_v23, %v4908_v51 }
 0x292   :  { %v752_v34 = vpop.permute.xlu1 %751  ;;  %v935_v12 = vpop.permute.xlu0 %934 }
 0x293   :  { %v759_v39 = vmul.f32 %v752_v34, %v4918_v61  ;;  %v973_v55 = vrot.slane %v969_v37, %v4787_v11  ;;  %v938_v51 = vmul.f32 %v935_v12, %v4915_v60  ;;  %v166_v12 = vld [vmem:[%s4986_s25] sm:$0x7]  ;;  %v363_v37 = vsub.f32 %v4833_v29, %v4912_v53 }
 0x295   :  { %v761_v44 = vadd.f32 %v759_v39, %v747_v38  ;;  %v937_v38 = vmul.f32 %v930_v54, %v4915_v60 }
 0x296   :  { %v564_v45 = vpop.permute.xlu1 %563  ;;  %v956_v33 = vpop.permute.xlu0 %955 }
 0x297   :  { %v775_v40 = vadd.f32 %v773_v43, %v761_v44  ;;  %v571_v47 = vmul.f32 %v4926_v35, %v564_v45  ;;  %v963_v42 = vmul.f32 %v956_v33, %v4926_v35 }
 0x299   :  { %v573_v50 = vadd.f32 %v571_v47, %v555_v46  ;;  %v784_v59 = vadd.f32 %v783_v49, %v775_v40 }
 0x29a   :  { %v745_v63 = vpop.permute.xlu1 %744 }
 0x29b   :  { %v583_v2 = vadd.f32 %v581_v15, %v573_v50  ;;  %v4949_v58 = vadd.f32 %v784_v59, %v138_v19  ;;  %v748_v14 = vmul.f32 %v745_v63, %v4915_v60 }
 0x29d   :  { %v4947_v5 = vadd.f32 %v583_v2, %v139_v62 }
 0x29e   :  { %v757_v6 = vpop.permute.xlu1 %756 }
 0x29f   :  { %v760_v8 = vmul.f32 %v757_v6, %v4918_v61  ;;  %4240 = vmatmul.mubr.msk.f32.vlgmr.msra.gmra.mrb[4].mxu1 %vm1020_vm14, %v4947_v5 }
 0x2a0   :  { %4242 = vmatprep.mubr.msk.f32.mxu1 %vm1020_vm14, %v4949_v58 }
 0x2a1   :  { %v762_v25 = vadd.f32 %v760_v8, %v748_v14 }
 0x2a2   :  { %v771_v16 = vpop.permute.xlu1 %770 }
 0x2a3   :  { %v774_v15 = vmul.f32 %v771_v16, %v4926_v35  ;;  %v789_v16 = vadd.f32 %v4902_v48, %v4884_v28 }
 0x2a5   :  { %v776_v32 = vadd.f32 %v774_v15, %v762_v25  ;;  %v788_v15 = vadd.f32 %v4878_v24, %v4882_v27 }
 0x2a6   :  { %v942_v34 = vpop.permute.xlu1 %941 }
 0x2a7   :  { %v785_v39 = vadd.f32 %v783_v49, %v776_v32  ;;  %v949_v41 = vmul.f32 %v942_v34, %v4918_v61 }
 0x2a9   :  { %v4962_v43 = vadd.f32 %v785_v39, %v139_v62  ;;  %v951_v44 = vadd.f32 %v949_v41, %v937_v38  ;;  %v364_v39 = vmax.f32 %v363_v37, 0.0 }
 0x2aa   :  { %v947_v45 = vpop.permute.xlu1 %946 }
 0x2ab   :  { %v965_v46 = vadd.f32 %v963_v42, %v951_v44  ;;  %v950_v40 = vmul.f32 %v947_v45, %v4918_v61  ;;  %4243 = vmatmul.mubr.msk.f32.gmra.mrb[6].mxu1 %vm1020_vm14, %v4962_v43  ;;  %v5035_v42 = vrot.slane %v4789_v13, %v4808_v21  ;;  %v365_v45 = vadd.f32 %v364_v39, %v4912_v53 }
 0x2ad   :  { %v974_v47 = vadd.f32 %v973_v55, %v965_v46  ;;  %v952_v50 = vadd.f32 %v950_v40, %v938_v51  ;;  %vm370_vm2 = vcmp.le.f32.partialorder %v365_v45, %v5035_v42  ;;  %v380_v51 = vsub.f32 1.0, %v4798_v17 }
 0x2ae   :  { %v961_v49 = vpop.permute.xlu1 %960 }
 0x2af   :  { %v964_v54 = vmul.f32 %v961_v49, %v4926_v35  ;;  %v4970_v59 = vadd.f32 %v974_v47, %v138_v19  ;;  %v586_v35 = vadd.f32 %v4876_v18, %v4882_v27  ;;  %v587_v18 = vadd.f32 %v4897_v36, %v4884_v28  ;;  %v163_v47 = vld [vmem:[%s3931_s29] sm:$0x7]  ;;  %s4732_s29 = smov 11  }
 0x2b0   :  { %s3927_s3 = sld [smem:[%s5834_s0 + %s4732_s29]]   ;;  %s4746_s29 = smov 33  }
 0x2b1   :  { %v966_v63 = vadd.f32 %v964_v54, %v952_v50  ;;  %4245 = vmatprep.mubr.msk.f32.mxu1 %vm1020_vm14, %v4970_v59 }
 0x2b3   :  { %v975_v2 = vadd.f32 %v973_v55, %v966_v63  ;;  %v375_v55 = vsub.s32 3, %v4782_v9  ;;  %v3957_v63 = vsel %vm370_vm2, 1.0, %v4710_v7 }
 0x2b5   :  { %v4974_v6 = vadd.f32 %v975_v2, %v139_v62  ;;  %v5049_v50 = vrot.slane %v4789_v13, %v375_v55  ;;  %v381_v2 = vmul.f32 %v380_v51, %v163_v47 }
 0x2b7   :  { %4246 = vmatmul.mubr.msk.f32.gmra.mrb[8].mxu1 %vm1020_vm14, %v4974_v6  ;;  %vm377_vm3 = vcmp.le.f32.partialorder %v365_v45, %v5049_v50 }
 0x372   :  { %v4241_v61 = vpop.f32.mrb[4].mxu1 }
 0x373   :  { %v1105_v8 = vpop.f32.mrb[5].mxu1 }
 0x374   :  { %v4978_v60 = vpack.i.bf16 %v4241_v61, %v1105_v8  ;;  %4252 = vmatprep.mubr.msk.f32.mxu0 %vm1020_vm14, %v1105_v8 }
 0x376   :  { %4594 = vrot.lane.b32.xlu0 %v4978_v60, %s4721_s21 }
 0x37a   :  { %590 = vperm.xlu0 %4591, %v586_v35   ;;  %v382_v35 = vmul.f32 %v3957_v63, %v381_v2 }
 0x37e   :  { %602 = vperm.xlu0 %4591, %v4864_v56   ;;  %v4244_v19 = vpop.f32.mrb[6].mxu1 }
 0x37f   :  { %v1115_v62 = vpop.f32.mrb[7].mxu1 }
 0x380   :  { %v4992_v14 = vpack.i.bf16 %v4244_v19, %v1115_v62  ;;  %4266 = vmatprep.mubr.msk.f32.mxu1 %vm1020_vm14, %v1115_v62 }
 0x382   :  { %386 = vperm.xlu0 %4591, %v166_v12   ;;  %4599 = vrot.lane.b32.xlu1 %v4992_v14, %s4721_s21  ;;  %v3958_v12 = vsel %vm377_vm3, 1.0, %v4710_v7 }
 0x386   :  { %797 = vperm.xlu0 %4591, %v789_v16   ;;  %595 = vperm.xlu1 %4592, %v587_v18  }
 0x38a   :  { %607 = vperm.xlu1 %4592, %v4866_v57   ;;  %v5002_v56 = vpop.f32.mrb[8].mxu1 }
 0x38b   :  { %v5004_v23 = vpop.f32.mrb[9].mxu1 }
 0x38c   :  { %v5008_v25 = vpack.i.bf16 %v5002_v56, %v5004_v23 }
 0x38e   :  { %792 = vperm.xlu1 %4592, %v788_v15   ;;  %v383_v15 = vmul.f32 %v3958_v12, %v382_v35 }
 0x3e8   :  { %v4595_v48 = vpop.permute.xlu0 %4594 }
 0x3e9   :  { %v4597_v32 = vunpack.i.h.bf16 %v4595_v48  ;;  %v4596_v33 = vunpack.i.l.bf16 %v4595_v48 }
 0x3eb   :  { %v4453_v57 = vpack.c.bf16 %v4597_v32, %v4596_v33 }
 0x3ed   :  { %4455 = vmatprep.subr.msk.bf16.mxu0 %vm5014_vm15, %v4453_v57 }
 0x3ee   :  { %4458 = vmatpush3.bf16.xpose.msk.msra.mxu0 %vm5014_vm15, %v4453_v57 }
 0x3f4   :  { %v4600_v36 = vpop.permute.xlu1 %4599 }
 0x3f5   :  { %v4602_v34 = vunpack.i.h.bf16 %v4600_v36  ;;  %v4601_v24 = vunpack.i.l.bf16 %v4600_v36  ;;  %4253 = vmatmul.mubr.msk.f32.vlgmr.msra.gmra.mrb[6].mxu0 %vm1020_vm14, %v4241_v61 }
 0x3f7   :  { %v4463_v27 = vpack.c.bf16 %v4602_v34, %v4601_v24 }
 0x3f9   :  { %4465 = vmatprep.subr.msk.bf16.mxu1 %vm5014_vm15, %v4463_v27  ;;  %v591_v38 = vpop.permute.xlu0 %590 }
 0x3fa   :  { %4468 = vmatpush3.bf16.xpose.msk.msra.mxu1 %vm5014_vm15, %v4463_v27  ;;  %v598_v40 = vadd.f32 %v591_v38, %v4768_v3 }
 0x3fd   :  { %v5037_v44 = vpop.permute.xlu0 %602 }
 0x3fe   :  { %v610_v53 = vsub.f32 %v5037_v44, %v598_v40 }
 0x400   :  { %v612_v8 = vmax.f32 %v610_v53, 0.0 }
 0x401   :  { %4267 = vmatmul.mubr.msk.f32.vlgmr.msra.gmra.mrb[10].mxu1 %vm1020_vm14, %v4244_v19  ;;  %v387_v54 = vpop.permute.xlu0 %386 }
 0x402   :  { %v614_v18 = vadd.f32 %v612_v8, %v598_v40  ;;  %v5057_v32 = vmul.f32 %v387_v54, %v383_v15 }
 0x404   :  { %vm616_vm6 = vcmp.le.f32.partialorder %v614_v18, %v5035_v42  ;;  %v631_v34 = vrot.slane %v5057_v32, %v4805_v20  ;;  %vm622_vm8 = vcmp.le.f32.partialorder %v614_v18, %v5049_v50  ;;  %v823_v2 = vrot.slane %v5057_v32, %v4808_v21 }
 0x405   :  { %v596_v41 = vpop.permute.xlu1 %595  ;;  %v798_v62 = vpop.permute.xlu0 %797  ;;  %v3972_v27 = vsel %vm616_vm6, 1.0, %v4710_v7  ;;  %v3974_v40 = vsel %vm622_vm8, 1.0, %v4710_v7 }
 0x406   :  { %v599_v29 = vadd.f32 %v596_v41, %v4770_v4  ;;  %v801_v48 = vadd.f32 %v798_v62, %v4770_v4  ;;  %v632_v39 = vmul.f32 %v3972_v27, %v631_v34 }
 0x408   :  { %v634_v51 = vmul.f32 %v3974_v40, %v632_v39 }
 0x409   :  { %v5041_v46 = vpop.permute.xlu1 %607 }
 0x40a   :  { %v611_v49 = vsub.f32 %v5041_v46, %v599_v29  ;;  %v803_v33 = vsub.f32 %v5041_v46, %v801_v48  ;;  %v638_v53 = vsel %vm636_vm11, 1.0, %v634_v51 }
 0x40b   :  { %vm1225_vm2 = vcmp.gt.f32.partialorder %v638_v53, 0.0 }
 0x40c   :  { %v613_v61 = vmax.f32 %v611_v49, 0.0  ;;  %v805_v24 = vmax.f32 %v803_v33, 0.0 }
 0x40d   :  { %v793_v19 = vpop.permute.xlu1 %792 }
 0x40e   :  { %v615_v16 = vadd.f32 %v613_v61, %v599_v29  ;;  %v800_v13 = vadd.f32 %v793_v19, %v4768_v3  ;;  %v807_v41 = vadd.f32 %v805_v24, %v801_v48 }
 0x410   :  { %vm617_vm5 = vcmp.le.f32.partialorder %v615_v16, %v5035_v42  ;;  %v802_v57 = vsub.f32 %v5037_v44, %v800_v13  ;;  %vm623_vm7 = vcmp.le.f32.partialorder %v615_v16, %v5049_v50  ;;  %vm809_vm10 = vcmp.le.f32.partialorder %v807_v41, %v5035_v42 }
 0x411   :  { %v3973_v36 = vsel %vm617_vm5, 1.0, %v4710_v7  ;;  %v3975_v55 = vsel %vm623_vm7, 1.0, %v4710_v7  ;;  %v3983_v54 = vsel %vm809_vm10, 1.0, %v4710_v7  ;;  %vm815_vm3 = vcmp.le.f32.partialorder %v807_v41, %v5049_v50 }
 0x412   :  { %v804_v37 = vmax.f32 %v802_v57, 0.0  ;;  %v633_v38 = vmul.f32 %v3973_v36, %v631_v34  ;;  %v825_v62 = vmul.f32 %v3983_v54, %v823_v2 }
 0x414   :  { %v806_v45 = vadd.f32 %v804_v37, %v800_v13  ;;  %v635_v29 = vmul.f32 %v3975_v55, %v633_v38  ;;  %v3985_v13 = vsel %vm815_vm3, 1.0, %v4710_v7 }
 0x415   :  { %v827_v33 = vmul.f32 %v3985_v13, %v825_v62 }
 0x416   :  { %vm808_vm12 = vcmp.le.f32.partialorder %v806_v45, %v5035_v42  ;;  %v639_v47 = vsel %vm637_vm9, 1.0, %v635_v29  ;;  %vm814_vm5 = vcmp.le.f32.partialorder %v806_v45, %v5049_v50 }
 0x417   :  { %v3982_v63 = vsel %vm808_vm12, 1.0, %v4710_v7  ;;  %vm1226_vm13 = vcmp.gt.f32.partialorder %v639_v47, 0.0  ;;  %v3984_v48 = vsel %vm814_vm5, 1.0, %v4710_v7  ;;  %v829_v36 = vsel %vm637_vm9, 1.0, %v827_v33 }
 0x418   :  { %v824_v12 = vmul.f32 %v3982_v63, %v823_v2  ;;  %vm1432_vm6 = vcmp.gt.f32.partialorder %v829_v36, 0.0  ;;  %vm2731_vm5 = vcmask 1042432  }
 0x41a   :  { %v826_v57 = vmul.f32 %v3984_v48, %v824_v12 }
 0x41c   :  { %v828_v24 = vsel %vm636_vm11, 1.0, %v826_v57 }
 0x41d   :  { %vm1431_vm7 = vcmp.gt.f32.partialorder %v828_v24, 0.0 }
 0x4c8   :  { %v4254_v49 = vpop.f32.mrb[6].mxu0 }
 0x4c9   :  { %v1224_v61 = vmul.f32 0.17677669, %v4254_v49  ;;  %v1214_v8 = vpop.f32.mrb[7].mxu0 }
 0x4ca   :  { %v1223_v35 = vmul.f32 0.17677669, %v1214_v8 }
 0x4cb   :  { %v1228_v19 = vsel %vm1226_vm13, %v1224_v61, -1e+09 }
 0x4cc   :  { %v1232_v16 = vsel %vm185_vm1, %v1228_v19, -inf  ;;  %v1227_v18 = vsel %vm1225_vm2, %v1223_v35, -1e+09 }
 0x4cd   :  { %1233 = vmax.xlane.f32.xlu0 %v1232_v16  ;;  %v1229_v15 = vsel %vm185_vm1, %v1227_v18, -inf }
 0x4ce   :  { %1230 = vmax.xlane.f32.xlu1 %v1229_v15 }
 0x4d4   :  { %v4268_v34 = vpop.f32.mrb[10].mxu1 }
 0x4d5   :  { %v1430_v27 = vmul.f32 0.17677669, %v4268_v34  ;;  %v1420_v37 = vpop.f32.mrb[11].mxu1 }
 0x4d6   :  { %v1429_v38 = vmul.f32 0.17677669, %v1420_v37 }
 0x4d7   :  { %v1434_v39 = vsel %vm1432_vm6, %v1430_v27, -1e+09  ;;  %vm2451_vm6 = vcmp.gt.f32.partialorder %v5057_v32, 0.0 }
 0x4d8   :  { %v1438_v41 = vsel %vm185_vm1, %v1434_v39, -inf  ;;  %v1433_v45 = vsel %vm1431_vm7, %v1429_v38, -1e+09  ;;  %vm2581_vm7 = vcmask 123905  }
 0x4d9   :  { %1439 = vmax.xlane.f32.xlu1 %v1438_v41  ;;  %v1435_v55 = vsel %vm185_vm1, %v1433_v45, -inf }
 0x4da   :  { %1436 = vmax.xlane.f32.xlu0 %v1435_v55 }
 0x55a   :  { %v1234_v29 = vpop.xlane.xlu0 %1233 }
 0x55b   :  { %v1236_v40 = vsub.f32 %v1228_v19, %v1234_v29  ;;  %v1231_v51 = vpop.xlane.xlu1 %1230 }
 0x55c   :  { %v1235_v47 = vsub.f32 %v1227_v18, %v1231_v51 }
 0x55d   :  { %v1239_v49 = vmul.f32 1.442695, %v1236_v40 }
 0x55e   :  { %v1237_v53 = vmul.f32 1.442695, %v1235_v47 }
 0x55f   :  { %4623 = vpow2.f32 %v1239_v49 }
 0x560   :  { %4625 = vpow2.f32 %v1237_v53 }
 0x566   :  { %v1440_v54 = vpop.xlane.xlu1 %1439 }
 0x567   :  { %v1442_v63 = vsub.f32 %v1434_v39, %v1440_v54  ;;  %v1437_v2 = vpop.xlane.xlu0 %1436 }
 0x568   :  { %v1441_v61 = vsub.f32 %v1433_v45, %v1437_v2  ;;  %v3962_v2 = vld [vmem:[%s5121_s4 + $0x10] sm:$0xff] }
 0x569   :  { %v4624_v8 = vpop.eup %4623  ;;  %v1445_v35 = vmul.f32 1.442695, %v1442_v63 }
 0x56a   :  { %v4626_v62 = vpop.eup %4625  ;;  %v1443_v12 = vmul.f32 1.442695, %v1441_v61  ;;  %v1244_v16 = vsel %vm185_vm1, %v4624_v8, 0.0  ;;  %v3963_v61 = vld [vmem:[%s5121_s4 + $0x18] sm:$0xff] }
 0x56b   :  { %4627 = vpow2.f32 %v1445_v35  ;;  %1245 = vadd.xlane.f32.xlu1 %v1244_v16  ;;  %v1241_v19 = vsel %vm185_vm1, %v4626_v62, 0.0  ;;  %v1834_v35 = vrot.slane %v4798_v17, 1 }
 0x56c   :  { %4629 = vpow2.f32 %v1443_v12  ;;  %1242 = vadd.xlane.f32.xlu0 %v1241_v19 }
 0x575   :  { %v4628_v18 = vpop.eup %4627 }
 0x576   :  { %v4630_v15 = vpop.eup %4629  ;;  %v1450_v13 = vsel %vm185_vm1, %v4628_v18, 0.0 }
 0x577   :  { %1451 = vadd.xlane.f32.xlu1 %v1450_v13  ;;  %v1447_v48 = vsel %vm185_vm1, %v4630_v15, 0.0 }
 0x578   :  { %1448 = vadd.xlane.f32.xlu0 %v1447_v48 }
 0x588   :  { %4609 = vrot.lane.b32.xlu1 %v4992_v14, %s4724_s30 }
 0x58c   :  { %4614 = vrot.lane.b32.xlu1 %v5008_v25, %s4721_s21 }
 0x58e   :  { %4604 = vrot.lane.b32.xlu0 %v4978_v60, %s4724_s30 }
 0x590   :  { %987 = vperm.xlu1 %4592, %v4887_v30  }
 0x592   :  { %982 = vperm.xlu0 %4591, %v4890_v31  }
 0x5f8   :  { %v1246_v57 = vpop.xlane.xlu1 %1245 }
 0x5f9   :  { %v1243_v33 = vpop.xlane.xlu0 %1242 }
 0x5fa   :  { %4631 = vrcp.f32 %v1243_v33 }
 0x5fb   :  { %4633 = vrcp.f32 %v1246_v57 }
 0x604   :  { %v4632_v36 = vpop.eup %4631  ;;  %v1452_v34 = vpop.xlane.xlu1 %1451 }
 0x605   :  { %v1449_v24 = vpop.xlane.xlu0 %1448  ;;  %v1249_v27 = vmul.f32 %v4632_v36, %v4626_v62  ;;  %v4634_v45 = vpop.eup %4633 }
 0x606   :  { %4635 = vrcp.f32 %v1449_v24  ;;  %v1250_v47 = vmul.f32 %v4634_v45, %v4624_v8  ;;  %v4487_v8 = vpack.c.bf16 %v3963_v61, %v3962_v2 }
 0x607   :  { %4637 = vrcp.f32 %v1452_v34  ;;  %4259 = vmatprep.mubr.msk.f32.mxu0 %vm185_vm1, %v1249_v27 }
 0x608   :  { %v4610_v14 = vpop.permute.xlu1 %4609 }
 0x609   :  { %v4605_v37 = vpop.permute.xlu0 %4604  ;;  %v4612_v38 = vunpack.i.h.bf16 %v4610_v14  ;;  %v4611_v60 = vunpack.i.l.bf16 %v4610_v14 }
 0x60a   :  { %v4607_v39 = vunpack.i.h.bf16 %v4605_v37  ;;  %v4606_v30 = vunpack.i.l.bf16 %v4605_v37 }
 0x60b   :  { %v4469_v55 = vpack.c.bf16 %v4612_v38, %v4611_v60 }
 0x60c   :  { %v4459_v41 = vpack.c.bf16 %v4607_v39, %v4606_v30  ;;  %v4615_v31 = vpop.permute.xlu1 %4614 }
 0x60d   :  { %v4617_v29 = vunpack.i.h.bf16 %v4615_v31  ;;  %v4616_v40 = vunpack.i.l.bf16 %v4615_v31 }
 0x60e   :  { %4460 = vmatprep.subr.bf16.mxu0 %v4459_v41 }
 0x60f   :  { %4462 = vmatpush3.bf16.msra.mxu0 %v4459_v41  ;;  %v4473_v54 = vpack.c.bf16 %v4617_v29, %v4616_v40 }
 0x610   :  { %v4636_v51 = vpop.eup %4635  ;;  %4470 = vmatprep.subr.bf16.mxu0 %v4469_v55 }
 0x611   :  { %v4638_v49 = vpop.eup %4637  ;;  %v1455_v53 = vmul.f32 %v4636_v51, %v4630_v15  ;;  %v983_v62 = vpop.permute.xlu0 %982 }
 0x612   :  { %4260 = vmatmul.mubr.msk.f32.vlgmr.msra.gmra.mrb[8].mxu0 %vm185_vm1, %v1250_v47  ;;  %v1456_v63 = vmul.f32 %v4638_v49, %v4628_v18  ;;  %v990_v16 = vadd.f32 %v983_v62, %v4768_v3 }
 0x613   :  { %4472 = vmatpush3.bf16.msra.mxu0 %v4469_v55  ;;  %4273 = vmatprep.mubr.msk.f32.mxu0 %vm185_vm1, %v1455_v53 }
 0x614   :  { %4475 = vmatprep.subr.msk.bf16.mxu0 %vm5014_vm15, %v4473_v54  ;;  %v992_v19 = vsub.f32 %v5037_v44, %v990_v16  ;;  %v1013_v44 = vrot.slane %v5057_v32, %v4787_v11 }
 0x616   :  { %4274 = vmatmul.mubr.msk.f32.vlgmr.msra.gmra.mrb[10].mxu0 %vm185_vm1, %v1456_v63  ;;  %v994_v15 = vmax.f32 %v992_v19, 0.0 }
 0x617   :  { %4280 = vmatprep.mubr.msk.f32.mxu0 %vm1020_vm14, %v5004_v23  ;;  %v988_v23 = vpop.permute.xlu1 %987 }
 0x618   :  { %v991_v12 = vadd.f32 %v988_v23, %v4770_v4  ;;  %v996_v48 = vadd.f32 %v994_v15, %v990_v16  ;;  %v408_v15 = vld [vmem:[%s5121_s4] sm:$0xff] }
 0x61a   :  { %vm998_vm10 = vcmp.le.f32.partialorder %v996_v48, %v5035_v42  ;;  %vm1004_vm13 = vcmp.le.f32.partialorder %v996_v48, %v5049_v50 }
 0x61c   :  { %4478 = vmatpush3.bf16.xpose.msk.msra.mxu0 %vm5014_vm15, %v4473_v54 }
 0x61d   :  { %4486 = vmatprep.subr.bf16.mxu0 %v4708_v1 }
 0x623   :  { %4281 = vmatmul.mubr.msk.f32.vlgmr.msra.gmra.mrb[12].mxu0 %vm1020_vm14, %v5002_v56  ;;  %v993_v56 = vsub.f32 %v5041_v46, %v991_v12  ;;  %v3992_v46 = vsel %vm998_vm10, 1.0, %v4710_v7  ;;  %vm2697_vm10 = vcmask 124930  }
 0x624   :  { %4488 = vmatpush3.bf16.msra.mxu0 %v4487_v8  ;;  %4301 = vmatprep.mubr.msk.f32.mxu0 %vm4709_vm0, %v4710_v7  ;;  %v1014_v24 = vmul.f32 %v3992_v46, %v1013_v44  ;;  %v3964_v46 = vld [vmem:[%s5121_s4 + $0x20] sm:$0xff] }
 0x625   :  { %4492 = vmatprep.subr.bf16.mxu0 %v4708_v1  ;;  %v995_v18 = vmax.f32 %v993_v56, 0.0 }
 0x627   :  { %4302 = vmatmul.mubr.msk.f32.vlgmr.msra.gmra.mrb[14].mxu0 %vm185_vm1, %v1834_v35  ;;  %v997_v13 = vadd.f32 %v995_v18, %v991_v12 }
 0x628   :  { %4319 = vmatprep.mubr.msk.f32.mxu0 %vm4709_vm0, %v4710_v7 }
 0x629   :  { %vm999_vm8 = vcmp.le.f32.partialorder %v997_v13, %v5035_v42  ;;  %vm1005_vm12 = vcmp.le.f32.partialorder %v997_v13, %v5049_v50  ;;  %v3994_v42 = vsel %vm1004_vm13, 1.0, %v4710_v7  ;;  %v409_v13 = vld [vmem:[%s5121_s4 + $0x8] sm:$0xff] }
 0x62a   :  { %v3993_v3 = vsel %vm999_vm8, 1.0, %v4710_v7  ;;  %v3995_v27 = vsel %vm1005_vm12, 1.0, %v4710_v7  ;;  %v1016_v37 = vmul.f32 %v3994_v42, %v1014_v24  ;;  %v145_v42 = vld [vmem:[%s3925_s8] sm:$0xff]  ;;  %vm390_vm8 = vcmp.eq.s32.totalorder %v4784_v10, 15 }
 0x62b   :  { %v1015_v34 = vmul.f32 %v3993_v3, %v1013_v44  ;;  %v4484_v3 = vpack.c.bf16 %v409_v13, %v408_v15  ;;  %v157_v15 = vld [vmem:[%s5204_s17 + $0x18] sm:$0xff] }
 0x62c   :  { %v1018_v39 = vsel %vm636_vm11, 1.0, %v1016_v37  ;;  %vm1913_vm11 = vcmp.eq.s32.totalorder %v4782_v9, 2 }
 0x62d   :  { %v1017_v14 = vmul.f32 %v3995_v27, %v1015_v34  ;;  %vm1637_vm3 = vcmp.gt.f32.partialorder %v1018_v39, 0.0  ;;  %v3965_v34 = vld [vmem:[%s5121_s4 + $0x28] sm:$0xff]  ;;  %v1916_v27 = vrot.slane %v4798_v17, 2  ;;  %v147_v39 = vld [vmem:[%s3925_s8 + $0x10] sm:$0xff]  ;;  %s4733_s4 = smov 13  }
 0x62e   :  { %v4490_v24 = vpack.c.bf16 %v3965_v34, %v3964_v46  ;;  %s3929_s7 = sld [smem:[%s5834_s0 + %s4733_s4]]   ;;  %s4747_s4 = smov 28  }
 0x62f   :  { %v1019_v38 = vsel %vm637_vm9, 1.0, %v1017_v14  ;;  %v146_v14 = vld [vmem:[%s3925_s8 + $0x8] sm:$0xff]  ;;  %vm1752_vm9 = vcmp.eq.s32.totalorder %v4782_v9, 0 }
 0x630   :  { %vm1638_vm2 = vcmp.gt.f32.partialorder %v1019_v38, 0.0  ;;  %v4499_v37 = vpack.c.bf16 %v146_v14, %v145_v42  ;;  %v150_v38 = vld [vmem:[%s3926_s13 + $0x8] sm:$0xff] }
 0x6e5   :  { %v5144_v33 = vpop.f32.mrb[8].mxu0 }
 0x6e6   :  { %v5146_v57 = vpop.f32.mrb[9].mxu0 }
 0x6e9   :  { %v5150_v36 = vpop.f32.mrb[10].mxu0 }
 0x6ea   :  { %v5153_v4 = vpop.f32.mrb[11].mxu0 }
 0x6f6   :  { %v4282_v60 = vpop.f32.mrb[12].mxu0 }
 0x6f7   :  { %v1636_v30 = vmul.f32 0.17677669, %v4282_v60  ;;  %v1626_v41 = vpop.f32.mrb[13].mxu0 }
 0x6f8   :  { %v1635_v31 = vmul.f32 0.17677669, %v1626_v41  ;;  %v151_v41 = vld [vmem:[%s3926_s13 + $0x10] sm:$0xff] }
 0x6f9   :  { %v1640_v50 = vsel %vm1638_vm2, %v1636_v30, -1e+09  ;;  %v148_v30 = vld [vmem:[%s3925_s8 + $0x18] sm:$0xff]  ;;  %vm5835_vm2 = vcmask 2048  }
 0x6fa   :  { %v5168_v45 = vpop.f32.mrb[14].mxu0  ;;  %v1644_v55 = vsel %vm185_vm1, %v1640_v50, -inf  ;;  %v1639_v29 = vsel %vm1637_vm3, %v1635_v31, -1e+09  ;;  %v4502_v31 = vpack.c.bf16 %v148_v30, %v147_v39 }
 0x6fb   :  { %1645 = vmax.xlane.f32.xlu1 %v1644_v55  ;;  %v4303_v40 = vpop.f32.mrb[15].mxu0  ;;  %v1641_v22 = vsel %vm185_vm1, %v1639_v29, -inf }
 0x6fc   :  { %1642 = vmax.xlane.f32.xlu0 %v1641_v22  ;;  %v155_v40 = vld [vmem:[%s5204_s17 + $0x8] sm:$0xff] }
 0x70c   :  { %4619 = vrot.lane.b32.xlu1 %v5008_v25, %s4724_s30 }
 0x788   :  { %v1646_v51 = vpop.xlane.xlu1 %1645 }
 0x789   :  { %v1648_v47 = vsub.f32 %v1640_v50, %v1646_v51  ;;  %v1643_v49 = vpop.xlane.xlu0 %1642  ;;  %v152_v50 = vld [vmem:[%s3926_s13 + $0x18] sm:$0xff]  ;;  %v168_v51 = vld [vmem:[%s3936_s22] sm:$0x7]  ;;  %s4744_s22 = smov 24  }
 0x78a   :  { %v1647_v53 = vsub.f32 %v1639_v29, %v1643_v49  ;;  %v4496_v55 = vpack.c.bf16 %v152_v50, %v151_v41  ;;  %v154_v29 = vld [vmem:[%s5204_s17] sm:$0xff] }
 0x78b   :  { %v1651_v54 = vmul.f32 1.442695, %v1648_v47  ;;  %v4510_v22 = vpack.c.bf16 %v155_v40, %v154_v29  ;;  %v169_v47 = vld [vmem:[%s3937_s27] sm:$0x7] }
 0x78c   :  { %v1649_v63 = vmul.f32 1.442695, %v1647_v53  ;;  %v4620_v2 = vpop.permute.xlu1 %4619  ;;  %2156 = vrot.lane.b32.xlu1 %v169_v47, %s4731_s28  ;;  %v1330_v53 = vadd.f32 %v5146_v57, %v4934_v26 }
 0x78d   :  { %v4622_v61 = vunpack.i.h.bf16 %v4620_v2  ;;  %v4621_v8 = vunpack.i.l.bf16 %v4620_v2 }
 0x78e   :  { %4639 = vpow2.f32 %v1649_v63  ;;  %v1910_v63 = vrot.slane %v5168_v45, %v4805_v20  ;;  %v1335_v45 = vadd.f32 %v5144_v33, %v4947_v5 }
 0x78f   :  { %v4479_v35 = vpack.c.bf16 %v4622_v61, %v4621_v8  ;;  %4641 = vpow2.f32 %v1651_v54  ;;  %v4020_v61 = vsel %vm1752_vm9, 1.0, %v4710_v7 }
 0x791   :  { %4480 = vmatprep.subr.bf16.mxu1 %v4479_v35 }
 0x792   :  { %4482 = vmatpush3.bf16.msra.mxu1 %v4479_v35 }
 0x793   :  { %4483 = vmatprep.subr.bf16.mxu1 %v4708_v1 }
 0x798   :  { %v4640_v23 = vpop.eup %4639 }
 0x799   :  { %v1653_v25 = vsel %vm185_vm1, %v4640_v23, 0.0  ;;  %v4642_v62 = vpop.eup %4641 }
 0x79a   :  { %1654 = vadd.xlane.f32.xlu0 %v1653_v25  ;;  %v1656_v12 = vsel %vm185_vm1, %v4642_v62, 0.0  ;;  %v4024_v25 = vsel %vm1913_vm11, 1.0, %v4710_v7 }
 0x79e   :  { %1657 = vadd.xlane.f32.xlu0 %v1656_v12  ;;  %v1536_v12 = vadd.f32 %v5153_v4, %v4949_v58 }
 0x7fe   :  { %v2157_v47 = vpop.permute.xlu1 %2156 }
 0x827   :  { %v1655_v16 = vpop.xlane.xlu0 %1654 }
 0x828   :  { %4643 = vrcp.f32 %v1655_v16 }
 0x82b   :  { %v1658_v56 = vpop.xlane.xlu0 %1657 }
 0x82c   :  { %4645 = vrcp.f32 %v1658_v56 }
 0x82d   :  { %4647 = vtanh.f32 %v1330_v53 }
 0x82e   :  { %4649 = vtanh.f32 %v1335_v45 }
 0x82f   :  { %4651 = vtanh.f32 %v1536_v12 }
 0x832   :  { %v4644_v19 = vpop.eup %4643 }
 0x833   :  { %v1661_v18 = vmul.f32 %v4644_v19, %v4640_v23 }
 0x835   :  { %4287 = vmatprep.mubr.msk.f32.mxu1 %vm185_vm1, %v1661_v18  ;;  %v156_v18 = vld [vmem:[%s5204_s17 + $0x10] sm:$0xff]  ;;  %s3948_s17 = sld [smem:[%s5834_s0 + %s4731_s28]]  }
 0x836   :  { %v4646_v48 = vpop.eup %4645 }
 0x837   :  { %v1662_v44 = vmul.f32 %v4646_v48, %v4642_v62  ;;  %v1541_v48 = vadd.f32 %v5150_v36, %v4962_v43 }
 0x839   :  { %4288 = vmatmul.mubr.msk.f32.vlgmr.msra.gmra.mrb[12].mxu1 %vm185_vm1, %v1662_v44  ;;  %v5248_v44 = vpop.eup %4647  ;;  %4653 = vtanh.f32 %v1541_v48 }
 0x83a   :  { %4485 = vmatpush3.bf16.msra.mxu1 %v4484_v3  ;;  %4294 = vmatprep.mubr.msk.f32.mxu1 %vm4709_vm0, %v4710_v7  ;;  %v4514_v3 = vpack.c.bf16 %v157_v15, %v156_v18  ;;  %v5255_v43 = vpop.eup %4649 }
 0x83b   :  { %4489 = vmatprep.subr.bf16.mxu1 %v4708_v1 }
 0x83d   :  { %4295 = vmatmul.mubr.msk.f32.vlgmr.msra.gmra.mrb[14].mxu1 %vm185_vm1, %v4798_v17  ;;  %v149_v17 = vld [vmem:[%s3926_s13] sm:$0xff] }
 0x83e   :  { %4491 = vmatpush3.bf16.msra.mxu1 %v4490_v24  ;;  %4308 = vmatprep.mubr.msk.f32.mxu1 %vm4709_vm0, %v4710_v7  ;;  %v4493_v60 = vpack.c.bf16 %v150_v38, %v149_v17  ;;  %v4028_v24 = vld [vmem:[%s3927_s3] ss:$0 sm:$0xff]  ;;  %s4740_s3 = smov 34  }
 0x83f   :  { %4498 = vmatprep.subr.bf16.mxu1 %v4708_v1  ;;  %s3950_s6 = sld [smem:[%s5834_s0 + %s4740_s3]]  }
 0x840   :  { %4494 = vmatpush3.bf16.msra.mxu0 %v4493_v60  ;;  %s3949_s3 = sld [smem:[%s5834_s0 + %s4746_s29]]  }
 0x841   :  { %4309 = vmatmul.mubr.msk.f32.vlgmr.msra.gmra.mrb[16].mxu1 %vm185_vm1, %v1916_v27  ;;  %4495 = vmatprep.subr.bf16.mxu0 %v4708_v1  ;;  %vm1831_vm1 = vcmp.eq.s32.totalorder %v4782_v9, 1 }
 0x842   :  { %4330 = vmatprep.mubr.msk.f32.mxu1 %vm4709_vm0, %v4710_v7  ;;  %4500 = vmatpush3.bf16.msra.mxu1 %v4499_v37  ;;  %v4022_v2 = vsel %vm1831_vm1, 1.0, %v4710_v7 }
 0x843   :  { %4501 = vmatprep.subr.bf16.mxu1 %v4708_v1  ;;  %v1911_v35 = vmul.f32 %v4022_v2, %v1910_v63  ;;  %v158_v63 = vld [vmem:[%s3929_s7] sm:$0xff]  ;;  %v159_v2 = vld [vmem:[%s3929_s7 + $0x8] sm:$0xff] }
 0x844   :  { %4497 = vmatpush3.bf16.msra.mxu0 %v4496_v55 }
 0x845   :  { %4504 = vmatprep.subr.bf16.mxu0 %v4708_v1 }
 0x846   :  { %4503 = vmatpush3.bf16.msra.mxu1 %v4502_v31 }
 0x847   :  { %4511 = vmatprep.subr.bf16.mxu1 %v4510_v22  ;;  %4320 = vmatmul.mubr.msk.f32.vlgmr.msra.gmra.mrb[16].mxu0 %vm1020_vm14, %v168_v51 }
 0x848   :  { %4341 = vmatprep.mubr.msk.f32.mxu0 %vm4709_vm0, %v4710_v7 }
 0x90c   :  { %v4289_v49 = vpop.f32.mrb[12].mxu1 }
 0x90d   :  { %v1741_v54 = vpop.f32.mrb[13].mxu1  ;;  %v1747_v58 = vadd.f32 %v4289_v49, %v4974_v6 }
 0x90e   :  { %v1742_v5 = vadd.f32 %v1741_v54, %v4970_v59  ;;  %v5257_v59 = vpop.eup %4651 }
 0x90f   :  { %v5263_v6 = vpop.eup %4653 }
 0x910   :  { %v1821_v8 = vpop.f32.mrb[14].mxu1  ;;  %4655 = vtanh.f32 %v1742_v5 }
 0x911   :  { %v1828_v26 = vrot.slane %v1821_v8, %v4805_v20  ;;  %v4296_v57 = vpop.f32.mrb[15].mxu1  ;;  %4657 = vtanh.f32 %v1747_v58  ;;  %v4505_v8 = vpack.c.bf16 %v159_v2, %v158_v63 }
 0x913   :  { %v1829_v23 = vmul.f32 %v4020_v61, %v1828_v26  ;;  %v160_v61 = vld [vmem:[%s3929_s7 + $0x10] sm:$0xff]  ;;  %v161_v26 = vld [vmem:[%s3929_s7 + $0x18] sm:$0xff]  ;;  %4506 = vmatpush3.bf16.msra.mxu0 %v4505_v8  ;;  %s4741_s7 = smov 25  }
 0x914   :  { %v1985_v62 = vpop.f32.mrb[16].mxu1  ;;  %4507 = vmatprep.subr.bf16.mxu0 %v4708_v1  ;;  %s3941_s9 = sld [smem:[%s5834_s0 + %s4741_s7]]  }
 0x915   :  { %v1912_v16 = vadd.f32 %v1911_v35, %v1829_v23  ;;  %v1992_v56 = vrot.slane %v1985_v62, %v4805_v20  ;;  %v4310_v19 = vpop.f32.mrb[17].mxu1  ;;  %v4508_v35 = vpack.c.bf16 %v161_v26, %v160_v61  ;;  %s3944_s7 = sld [smem:[%s5834_s0 + %s4747_s4]]  }
 0x917   :  { %v1993_v13 = vmul.f32 %v4024_v25, %v1992_v56  ;;  %4509 = vmatpush3.bf16.msra.mxu0 %v4508_v35 }
 0x918   :  { %4518 = vmatprep.subr.bf16.mxu0 %v4708_v1 }
 0x919   :  { %v1994_v33 = vadd.f32 %v1993_v13, %v1912_v16 }
 0x91a   :  { %v5265_v36 = vpop.eup %4655  ;;  %v2064_v46 = vpop.f32.mrb[16].mxu0 }
 0x91b   :  { %4331 = vmatmul.mubr.msk.f32.vlgmr.msra.gmra.mrb[18].mxu1 %vm1020_vm14, %v1994_v33  ;;  %v5271_v4 = vpop.eup %4657  ;;  %v4321_v34 = vpop.f32.mrb[17].mxu0 }
 0x91c   :  { %4513 = vmatpush3.bf16.msra.mxu1 %v4510_v22  ;;  %4352 = vmatprep.mubr.msk.f32.mxu1 %vm1020_vm14, %v5248_v44 }
 0x91d   :  { %4515 = vmatprep.subr.bf16.mxu1 %v4514_v3 }
 0x920   :  { %4517 = vmatpush3.bf16.msra.mxu1 %v4514_v3 }
 0x921   :  { %4522 = vmatprep.subr.bf16.mxu1 %v4708_v1 }
 0x923   :  { %4353 = vmatmul.mubr.msk.f32.vlgmr.msra.gmra.mrb[20].mxu1 %vm1020_vm14, %v5255_v43 }
 0x924   :  { %4355 = vmatprep.mubr.msk.f32.mxu1 %vm1020_vm14, %v5257_v59 }
 0x927   :  { %4356 = vmatmul.mubr.msk.f32.gmra.mrb[22].mxu1 %vm1020_vm14, %v5263_v6 }
 0x928   :  { %4358 = vmatprep.mubr.msk.f32.mxu1 %vm1020_vm14, %v5265_v36 }
 0x92b   :  { %4359 = vmatmul.mubr.msk.f32.gmra.mrb[24].mxu1 %vm1020_vm14, %v5271_v4 }
 0x92c   :  { %4372 = vmatprep.mubr.msk.f32.mxu1 %vm4709_vm0, %v4710_v7 }
 0x9ee   :  { %v2137_v27 = vpop.f32.mrb[18].mxu1 }
 0x9ef   :  { %v2138_v42 = vadd.f32 %v2137_v27, %v2064_v46  ;;  %v4332_v14 = vpop.f32.mrb[19].mxu1 }
 0x9f1   :  { %v2147_v17 = vadd.f32 %v4028_v24, %v2138_v42 }
 0x9f3   :  { %4659 = vtanh.f32 %v2147_v17  ;;  %v4029_v50 = vmul.f32 -1.442695, %v2147_v17 }
 0x9f5   :  { %4661 = vpow2.f32 %v4029_v50 }
 0x9f6   :  { %v4354_v37 = vpop.f32.mrb[20].mxu1 }
 0x9f7   :  { %v2335_v38 = vpop.f32.mrb[21].mxu1 }
 0x9fa   :  { %v4357_v60 = vpop.f32.mrb[22].mxu1 }
 0x9fb   :  { %v2345_v39 = vpop.f32.mrb[23].mxu1 }
 0x9fd   :  { %v4660_v30 = vpop.eup %4659 }
 0x9fe   :  { %v4360_v41 = vpop.f32.mrb[24].mxu1  ;;  %2161 = vrot.lane.b32.xlu0 %v4660_v30, %s4724_s30 }
 0x9ff   :  { %v2355_v31 = vpop.f32.mrb[25].mxu1  ;;  %v4662_v55 = vpop.eup %4661 }
 0xa00   :  { %v2151_v29 = vadd.f32 1.0, %v4662_v55 }
 0xa02   :  { %4663 = vrcp.f32 %v2151_v29 }
 0xa0c   :  { %v4664_v40 = vpop.eup %4663 }
 0xa0d   :  { %v2159_v49 = vmul.f32 %v4664_v40, %v2157_v47 }
 0xa70   :  { %v2162_v22 = vpop.permute.xlu0 %2161 }
 0xa71   :  { %v2164_v51 = vmul.f32 %v4664_v40, %v2162_v22  ;;  %v3959_v22 = vsel %vm390_vm8, 1.0, %v4710_v7 }
 0xa73   :  { %2166 = vrot.lane.b32.xlu1 %v2164_v51, %s4731_s28 }
 0xae5   :  { %v2167_v53 = vpop.permute.xlu1 %2166 }
 0xae6   :  { %v5282_v54 = vadd.f32 %v2167_v53, %v2159_v49  ;;  %v393_v49 = vmul.f32 %v3959_v22, %v5057_v32 }
 0xae8   :  { %4665 = vtanh.f32 %v5282_v54  ;;  %v394_v53 = vsel %vm260_vm4, %v393_v49, 0.0 }
 0xaf2   :  { %v4666_v57 = vpop.eup %4665 }
 0xaf3   :  { %2172 = vrot.lane.b32.xlu0 %v4666_v57, %s4724_s30  ;;  %s4734_s30 = smov 14  }
 0xaf4   :  { %s3930_s11 = sld [smem:[%s5834_s0 + %s4734_s30]]  }
 0xb65   :  { %v2173_v23 = vpop.permute.xlu0 %2172 }
 0xb66   :  { %v2175_v45 = vmul.f32 %v4664_v40, %v2173_v23 }
 0xb68   :  { %2177 = vrot.lane.b32.xlu1 %v2175_v45, %s4731_s28  ;;  %s4743_s28 = smov 29  }
 0xbda   :  { %v5292_v25 = vpop.permute.xlu1 %2177 }
 0xbdb   :  { %4342 = vmatmul.mubr.msk.f32.vlgmr.msra.gmra.mrb[18].mxu0 %vm1020_vm14, %v5292_v25 }
 0xbdc   :  { %4365 = vmatprep.mubr.msk.f32.mxu0 %vm4709_vm0, %v4710_v7 }
 0xcae   :  { %v2247_v62 = vpop.f32.mrb[18].mxu0 }
 0xcaf   :  { %v2367_v12 = vrot.slane %v2247_v62, %v4805_v20  ;;  %v2496_v16 = vrot.slane %v2247_v62, %v4808_v21  ;;  %v2612_v56 = vrot.slane %v2247_v62, %v4787_v11  ;;  %v4343_v19 = vpop.f32.mrb[19].mxu0 }
 0xcb1   :  { %v2368_v18 = vadd.f32 %v2367_v12, %v2335_v38  ;;  %v2369_v15 = vadd.f32 %v4354_v37, %v2367_v12  ;;  %v2497_v13 = vadd.f32 %v2496_v16, %v2345_v39  ;;  %v2498_v48 = vadd.f32 %v4357_v60, %v2496_v16  ;;  %v162_v37 = vld [vmem:[%s3930_s11] sm:$0x1]  ;;  %s4742_s11 = smov 26  }
 0xcb2   :  { %v2613_v5 = vadd.f32 %v2612_v56, %v2355_v31  ;;  %v2614_v33 = vadd.f32 %v4360_v41, %v2612_v56  ;;  %s3942_s14 = sld [smem:[%s5834_s0 + %s4742_s11]]  }
 0xcb3   :  { %4667 = vtanh.f32 %v2368_v18  ;;  %v4703_v18 = vld [vmem:[%s4986_s25] sm:$0x7]  ;;  %s3935_s25 = sld [smem:[%s5834_s0 + %s4737_s20]]  }
 0xcb4   :  { %4669 = vtanh.f32 %v2369_v15  ;;  %s3945_s20 = sld [smem:[%s5834_s0 + %s4743_s28]]  }
 0xcb5   :  { %4671 = vtanh.f32 %v2497_v13 }
 0xcb6   :  { %4673 = vtanh.f32 %v2498_v48 }
 0xcb7   :  { %4675 = vtanh.f32 %v2613_v5 }
 0xcb8   :  { %4677 = vtanh.f32 %v2614_v33 }
 0xcbd   :  { %v4668_v3 = vpop.eup %4667 }
 0xcbe   :  { %v4670_v58 = vpop.eup %4669 }
 0xcbf   :  { %v4672_v46 = vpop.eup %4671  ;;  %v4519_v34 = vpack.c.bf16 %v4670_v58, %v4668_v3  ;;  %v5359_v58 = vld [vmem:[%s3935_s25] sm:$0x7] }
 0xcc0   :  { %v4674_v24 = vpop.eup %4673 }
 0xcc1   :  { %v4676_v27 = vpop.eup %4675  ;;  %4521 = vmatpush3.bf16.xpose.msk.msra.mxu0 %vm5014_vm15, %v4519_v34  ;;  %v4523_v42 = vpack.c.bf16 %v4674_v24, %v4672_v46 }
 0xcc2   :  { %v4678_v14 = vpop.eup %4677  ;;  %4526 = vmatprep.subr.bf16.mxu0 %v4708_v1 }
 0xcc3   :  { %4525 = vmatpush3.bf16.xpose.msk.msra.mxu1 %vm5014_vm15, %v4523_v42  ;;  %v4527_v17 = vpack.c.bf16 %v4678_v14, %v4676_v27 }
 0xcc4   :  { %4382 = vmatprep.subr.mxu1 %v4710_v7 }
 0xcc8   :  { %4366 = vmatmul.mubr.msk.f32.vlgmr.msra.gmra.mrb[20].mxu0 %vm1020_vm14, %v162_v37 }
 0xcc9   :  { %4529 = vmatpush3.bf16.xpose.msk.msra.mxu0 %vm5014_vm15, %v4527_v17  ;;  %4379 = vmatprep.mubr.msk.f32.mxu0 %vm4709_vm0, %v4710_v7  ;;  %vm2453_vm15 = vcmask 122880  }
 0xcca   :  { %4373 = vmatmul.mubr.msk.f32.vlgmr.msra.gmra.mrb[26].mxu1 %vm1020_vm14, %v162_v37  ;;  %4387 = vmatprep.subr.mxu0 %v4710_v7 }
 0xccb   :  { %4383 = vmatpush3.msk.msra.mxu1 %vm2731_vm5, %v5057_v32  ;;  %4384 = vmatprep.mubr.msk.f32.mxu1 %vm4709_vm0, %v4710_v7 }
 0xccc   :  { %4392 = vmatprep.subr.mxu1 %v4710_v7 }
 0xcd0   :  { %4380 = vmatmul.mubr.msk.f32.vlgmr.msra.gmra.mrb[22].mxu0 %vm1020_vm14, %v162_v37 }
 0xcd1   :  { %4388 = vmatpush3.msk.msra.mxu0 %vm2731_vm5, %v5292_v25  ;;  %4389 = vmatprep.mubr.msk.f32.mxu0 %vm4709_vm0, %v4710_v7 }
 0xcd2   :  { %4397 = vmatprep.subr.mxu0 %v4710_v7 }
 0xd9b   :  { %v2447_v1 = vpop.f32.mrb[20].mxu0 }
 0xd9c   :  { %v2452_v28 = vsel %vm2451_vm6, %v2447_v1, -1e+09  ;;  %v4367_v38 = vpop.f32.mrb[21].mxu0 }
 0xd9d   :  { %v2573_v60 = vpop.f32.mrb[26].mxu1  ;;  %v2454_v39 = vsel %vm2453_vm15, %v2452_v28, -inf }
 0xd9e   :  { %v2578_v30 = vrot.slane %v2573_v60, 7  ;;  %2455 = vmax.xlane.f32.xlu0 %v2454_v39  ;;  %v4374_v41 = vpop.f32.mrb[27].mxu1 }
 0xda0   :  { %v2580_v31 = vsel %vm2451_vm6, %v2578_v30, -1e+09 }
 0xda1   :  { %v2582_v50 = vsel %vm2581_vm7, %v2580_v31, -inf }
 0xda2   :  { %2583 = vmax.xlane.f32.xlu1 %v2582_v50 }
 0xda3   :  { %v2689_v55 = vpop.f32.mrb[22].mxu0 }
 0xda4   :  { %v2694_v29 = vrot.slane %v2689_v55, 6  ;;  %v4381_v40 = vpop.f32.mrb[23].mxu0 }
 0xda6   :  { %v2696_v51 = vsel %vm2451_vm6, %v2694_v29, -1e+09 }
 0xda7   :  { %v2698_v47 = vsel %vm2697_vm10, %v2696_v51, -inf }
 0xda8   :  { %2699 = vmax.xlane.f32.xlu0 %v2698_v47 }
 0xdac   :  { %395 = vadd.xlane.f32.xlu0 %v394_v53 }
 0xe2b   :  { %v2456_v63 = vpop.xlane.xlu0 %2455 }
 0xe2c   :  { %v2457_v2 = vsub.f32 %v2452_v28, %v2456_v63 }
 0xe2e   :  { %v2458_v61 = vmul.f32 1.442695, %v2457_v2 }
 0xe2f   :  { %v2584_v8 = vpop.xlane.xlu1 %2583 }
 0xe30   :  { %4679 = vpow2.f32 %v2458_v61  ;;  %v2585_v26 = vsub.f32 %v2580_v31, %v2584_v8 }
 0xe32   :  { %v2586_v57 = vmul.f32 1.442695, %v2585_v26 }
 0xe34   :  { %4681 = vpow2.f32 %v2586_v57 }
 0xe35   :  { %v2700_v35 = vpop.xlane.xlu0 %2699 }
 0xe36   :  { %v2701_v23 = vsub.f32 %v2696_v51, %v2700_v35 }
 0xe38   :  { %v2702_v45 = vmul.f32 1.442695, %v2701_v23 }
 0xe39   :  { %v396_v62 = vpop.xlane.xlu0 %395 }
 0xe3a   :  { %v4680_v12 = vpop.eup %4679  ;;  %4683 = vpow2.f32 %v2702_v45  ;;  %vm397_vm12 = vcmp.le.f32.partialorder %v396_v62, 0.5  ;;  %vm401_vm13 = vcmp.gt.f32.partialorder %v396_v62, 0.5 }
 0xe3b   :  { %v3960_v16 = vsel %vm397_vm12, 1.0, %v4710_v7  ;;  %v3961_v56 = vsel %vm401_vm13, 1.0, %v4710_v7  ;;  %v2460_v19 = vsel %vm2453_vm15, %v4680_v12, 0.0 }
 0xe3c   :  { %v400_v15 = vmul.f32 %v4703_v18, %v3960_v16  ;;  %v404_v13 = vmul.f32 %v4703_v18, %v3961_v56  ;;  %2461 = vadd.xlane.f32.xlu1 %v2460_v19 }
 0xe3e   :  { %v4682_v48 = vpop.eup %4681  ;;  %406 = vst.msk [vmem:[%s3951_s15] sm:$0x7] %vm5835_vm2, %v400_v15  ;;  %407 = vst.msk [vmem:[%s3952_s19] sm:$0x7] %vm5835_vm2, %v404_v13  ;;  %vm2465_vm3 = vcmp.gt.f32.partialorder %v404_v13, 0.0 }
 0xe3f   :  { %v2588_v5 = vsel %vm2581_vm7, %v4682_v48, 0.0  ;;  %v2466_v46 = vsel %vm2465_vm3, 1, %v4705_v0 }
 0xe40   :  { %2589 = vadd.xlane.f32.xlu0 %v2588_v5 }
 0xe44   :  { %v4684_v33 = vpop.eup %4683 }
 0xe45   :  { %v2704_v3 = vsel %vm2697_vm10, %v4684_v33, 0.0  ;;  %vm2795_vm10 = vcmask 23552  }
 0xe46   :  { %2705 = vadd.xlane.f32.xlu1 %v2704_v3 }
 0xe56   :  { %2468 = vperm.xlu0 %4591, %v2466_v46  }
 0xe57   :  { %2477 = vperm.xlu1 %4592, %v5359_v58  }
 0xec9   :  { %v2462_v34 = vpop.xlane.xlu1 %2461 }
 0xeca   :  { %4685 = vrcp.f32 %v2462_v34  ;;  %v5400_v34 = vcvt.s32.f32 %v4782_v9 }
 0xecd   :  { %v2590_v24 = vpop.xlane.xlu0 %2589 }
 0xece   :  { %4687 = vrcp.f32 %v2590_v24 }
 0xed3   :  { %v2706_v27 = vpop.xlane.xlu1 %2705 }
 0xed4   :  { %v4686_v42 = vpop.eup %4685  ;;  %4689 = vrcp.f32 %v2706_v27 }
 0xed5   :  { %v2464_v14 = vmul.f32 %v4686_v42, %v4680_v12  ;;  %v2469_v29 = vpop.permute.xlu0 %2468 }
 0xed6   :  { %vm2470_vm15 = vcmp.eq.s32.totalorder %v2469_v29, 1 }
 0xed7   :  { %v2472_v17 = vmax.f32 %v2464_v14, 1e-30  ;;  %v2486_v37 = vrot.slane %v2464_v14, %v4805_v20  ;;  %v2478_v51 = vpop.permute.xlu1 %2477  ;;  %vm2471_vm7 = vmand %vm2451_vm6, %vm2470_vm15 }
 0xed8   :  { %v4688_v1 = vpop.eup %4687 }
 0xed9   :  { %4691 = vlog2.f32 %v2472_v17  ;;  %v2592_v28 = vmul.f32 %v4688_v1, %v4682_v48  ;;  %v2487_v0 = vsel %vm1752_vm9, %v2486_v37, 0.0 }
 0xedb   :  { %v2593_v38 = vmax.f32 %v2592_v28, 1e-30  ;;  %v2602_v60 = vrot.slane %v2592_v28, %v4808_v21  ;;  %v5405_v28 = vcvt.s32.f32 %v4784_v10 }
 0xedd   :  { %4693 = vlog2.f32 %v2593_v38  ;;  %v2603_v39 = vsel %vm1831_vm1, %v2602_v60, %v2487_v0  ;;  %v4704_v60 = vld [vmem:[%s4760_s10] sm:$0x7]  ;;  %s4738_s10 = smov 31  }
 0xede   :  { %v4690_v30 = vpop.eup %4689  ;;  %s5452_s27 = sld [smem:[%s5834_s0 + %s4738_s10]]  }
 0xedf   :  { %v2708_v41 = vmul.f32 %v4690_v30, %v4684_v33  ;;  %s3940_s10 = sld [smem:[%s5834_s0 + %s4744_s22]]  }
 0xee1   :  { %v2709_v31 = vmax.f32 %v2708_v41, 1e-30  ;;  %v2718_v50 = vrot.slane %v2708_v41, %v4787_v11 }
 0xee3   :  { %v4692_v55 = vpop.eup %4691  ;;  %4695 = vlog2.f32 %v2709_v31  ;;  %v5372_v40 = vsel %vm1913_vm11, %v2718_v50, %v2603_v39  ;;  %v5410_v39 = vcvt.s32.f32 %v4704_v60 }
 0xee4   :  { %v2474_v22 = vmul.f32 0.6931472, %v4692_v55 }
 0xee6   :  { %v2480_v47 = vadd.f32 %v2478_v51, %v2474_v22 }
 0xee7   :  { %v4694_v49 = vpop.eup %4693 }
 0xee8   :  { %v2595_v53 = vmul.f32 0.6931472, %v4694_v49  ;;  %v2481_v63 = vsel %vm2471_vm7, %v2480_v47, -1e+09 }
 0xee9   :  { %v2491_v8 = vrot.slane %v2481_v63, %v4805_v20 }
 0xeea   :  { %v2596_v2 = vadd.f32 %v2595_v53, %v2478_v51 }
 0xeeb   :  { %v2492_v45 = vsel %vm1752_vm9, %v2491_v8, -1e+09 }
 0xeec   :  { %v2597_v26 = vsel %vm2471_vm7, %v2596_v2, -1e+09 }
 0xeed   :  { %v4696_v61 = vpop.eup %4695  ;;  %v2607_v35 = vrot.slane %v2597_v26, %v4808_v21 }
 0xeee   :  { %v2711_v57 = vmul.f32 0.6931472, %v4696_v61 }
 0xeef   :  { %v2608_v16 = vsel %vm1831_vm1, %v2607_v35, %v2492_v45 }
 0xef0   :  { %v2712_v23 = vadd.f32 %v2711_v57, %v2478_v51 }
 0xef2   :  { %v2713_v62 = vsel %vm2471_vm7, %v2712_v23, -1e+09 }
 0xef3   :  { %v2723_v12 = vrot.slane %v2713_v62, %v4787_v11 }
 0xef5   :  { %v5385_v56 = vsel %vm1913_vm11, %v2723_v12, %v2608_v16 }
 0xef6   :  { %v2728_v19 = vsel %vm260_vm4, %v5385_v56, -inf }
 0xef7   :  { %2729 = vmax.xlane.f32.xlu1 %v2728_v19 }
 0xf84   :  { %v2730_v18 = vpop.xlane.xlu1 %2729 }
 0xf85   :  { %v2732_v21 = vsel %vm2731_vm5, %v2730_v18, -inf }
 0xf86   :  { %v2733_v15 = vrot.slane %v2732_v21, 4 }
 0xf88   :  { %v2734_v13 = vmax.f32 %v2732_v21, %v2733_v15 }
 0xf8a   :  { %v2735_v48 = vrot.slane %v2734_v13, 2 }
 0xf8c   :  { %v2736_v5 = vmax.f32 %v2734_v13, %v2735_v48 }
 0xf8e   :  { %v2737_v33 = vrot.slane %v2736_v5, 1 }
 0xf90   :  { %v5390_v11 = vmax.f32 %v2736_v5, %v2737_v33 }
 0xf92   :  { %vm2739_vm6 = vcmp.ge.f32.partialorder %v5385_v56, %v5390_v11 }
 0xf93   :  { %v2740_v3 = vsel %vm2739_vm6, 1.0, %v4710_v7 }
 0xf94   :  { %v2741_v46 = vsel %vm260_vm4, %v2740_v3, -inf }
 0xf95   :  { %2742 = vmax.xlane.f32.xlu0 %v2741_v46 }
0x1022   :  { %v2743_v24 = vpop.xlane.xlu0 %2742 }
0x1023   :  { %vm2744_vm8 = vcmp.gt.f32.partialorder %v2743_v24, 0.5 }
0x1024   :  { %v2745_v27 = vsel %vm2744_vm8, %v5400_v34, 3.0 }
0x1025   :  { %v2746_v42 = vsel %vm2731_vm5, %v2745_v27, inf }
0x1026   :  { %v2747_v14 = vrot.slane %v2746_v42, 4 }
0x1028   :  { %v2748_v17 = vmin.f32 %v2746_v42, %v2747_v14 }
0x102a   :  { %v2749_v37 = vrot.slane %v2748_v17, 2 }
0x102c   :  { %v2750_v1 = vmin.f32 %v2748_v17, %v2749_v37 }
0x102e   :  { %v2751_v0 = vrot.slane %v2750_v1, 1 }
0x1030   :  { %v5407_v38 = vmin.f32 %v2750_v1, %v2751_v0 }
0x1032   :  { %vm2792_vm12 = vcmp.eq.f32.partialorder %v5405_v28, %v5407_v38  ;;  %vm2753_vm13 = vcmp.eq.f32.partialorder %v5400_v34, %v5407_v38  ;;  %vm3019_vm3 = vcmp.eq.f32.partialorder %v5407_v38, 0.0  ;;  %vm3032_vm7 = vcmp.eq.f32.partialorder %v5407_v38, 1.0 }
0x1033   :  { %v5418_v30 = vsel %vm2792_vm12, 1.0, %v4710_v7  ;;  %vm2754_vm15 = vmand %vm2739_vm6, %vm2753_vm13  ;;  %v4054_v10 = vsel %vm3019_vm3, 1.0, %v4710_v7  ;;  %vm3054_vm8 = vcmp.eq.f32.partialorder %v5407_v38, 2.0  ;;  %v4055_v47 = vsel %vm3032_vm7, 1.0, %v4710_v7 }
0x1034   :  { %4385 = vmatmul.mubr.msk.f32.vlgmr.msra.gmra.mrb[28].mxu1 %vm2795_vm10, %v5418_v30  ;;  %4390 = vmatmul.mubr.msk.f32.vlgmr.msra.gmra.mrb[24].mxu0 %vm2795_vm10, %v5418_v30  ;;  %v2755_v41 = vsel %vm2754_vm15, %v5405_v28, 16.0  ;;  %v3022_v50 = vmul.f32 %v4054_v10, %v4850_v52  ;;  %v3024_v55 = vmul.f32 %v4054_v10, %v5359_v58  ;;  %v3028_v29 = vmul.f32 %v5248_v44, %v4054_v10 }
0x1035   :  { %4398 = vmatpush3.msk.msra.mxu0 %vm2731_vm5, %v5057_v32  ;;  %v2756_v31 = vsel %vm260_vm4, %v2755_v41, inf  ;;  %4399 = vmatprep.mubr.msk.f32.mxu0 %vm4709_vm0, %v4710_v7  ;;  %v3026_v22 = vmul.f32 %v4054_v10, %v5410_v39  ;;  %v3029_v51 = vmul.f32 %v5255_v43, %v4054_v10  ;;  %v4056_v49 = vsel %vm3054_vm8, 1.0, %v4710_v7 }
0x1036   :  { %2757 = vmin.xlane.f32.xlu0 %v2756_v31  ;;  %4407 = vmatprep.subr.mxu0 %v4710_v7  ;;  %v3035_v53 = vmul.f32 %v4055_v47, %v4850_v52  ;;  %v3040_v63 = vmul.f32 %v4055_v47, %v5359_v58  ;;  %v3045_v2 = vmul.f32 %v4055_v47, %v5410_v39 }
0x1037   :  { %4394 = vmatprep.mubr.msk.f32.mxu1 %vm4709_vm0, %v4710_v7  ;;  %v3050_v61 = vmul.f32 %v5257_v59, %v4055_v47  ;;  %v3051_v8 = vmul.f32 %v5263_v6, %v4055_v47  ;;  %v3057_v26 = vmul.f32 %v4056_v49, %v4850_v52  ;;  %v3062_v57 = vmul.f32 %v4056_v49, %v5359_v58 }
0x1038   :  { %v3067_v35 = vmul.f32 %v4056_v49, %v5410_v39  ;;  %v3037_v23 = vrot.slane %v3035_v53, 1  ;;  %v3042_v45 = vrot.slane %v3040_v63, 1  ;;  %v3047_v62 = vrot.slane %v3045_v2, 1 }
0x1039   :  { %v3052_v12 = vadd.f32 %v3050_v61, %v3028_v29  ;;  %v3053_v16 = vadd.f32 %v3051_v8, %v3029_v51  ;;  %v3059_v19 = vrot.slane %v3057_v26, 2  ;;  %v3064_v18 = vrot.slane %v3062_v57, 2 }
0x103a   :  { %v3069_v21 = vrot.slane %v3067_v35, 2  ;;  %v3039_v15 = vadd.f32 %v3037_v23, %v3022_v50  ;;  %v3044_v13 = vadd.f32 %v3042_v45, %v3024_v55  ;;  %v3049_v48 = vadd.f32 %v3047_v62, %v3026_v22 }
0x103b   :  { %v3072_v5 = vmul.f32 %v5265_v36, %v4056_v49  ;;  %v3073_v33 = vmul.f32 %v5271_v4, %v4056_v49 }
0x103c   :  { %v5464_v3 = vadd.f32 %v3059_v19, %v3039_v15  ;;  %v5466_v46 = vadd.f32 %v3064_v18, %v3044_v13  ;;  %v5468_v24 = vadd.f32 %v3069_v21, %v3049_v48  ;;  %v4530_v19 = vtrunc.f32 %v5407_v38 }
0x103d   :  { %v3074_v27 = vadd.f32 %v3072_v5, %v3052_v12  ;;  %v3075_v42 = vadd.f32 %v3073_v33, %v3053_v16 }
0x103e   :  { %v4531_v15 = vcvt.f32.s32 %v4530_v19 }
0x103f   :  { %3109 = vst.msk [vmem:[%s5452_s27] sm:$0xff] %vm1020_vm14, %v3074_v27  ;;  %3110 = vst.msk [vmem:[%s5452_s27 + $0x8] sm:$0xff] %vm1020_vm14, %v3075_v42 }
0x1040   :  { %v2787_v5 = vsel %vm1752_vm9, %v4531_v15, 0 }
0x10c3   :  { %v2758_v14 = vpop.xlane.xlu0 %2757 }
0x10c4   :  { %v2759_v17 = vsel %vm2731_vm5, %v2758_v14, inf }
0x10c5   :  { %v2760_v37 = vrot.slane %v2759_v17, 4 }
0x10c7   :  { %v2761_v1 = vmin.f32 %v2759_v17, %v2760_v37  ;;  %v4534_v17 = vtrunc.f32 %v5468_v24 }
0x10c9   :  { %v2762_v0 = vrot.slane %v2761_v1, 2 }
0x10cb   :  { %v2763_v60 = vmin.f32 %v2761_v1, %v2762_v0 }
0x10cd   :  { %v2764_v10 = vrot.slane %v2763_v60, 1 }
0x10cf   :  { %v5475_v41 = vmin.f32 %v2763_v60, %v2764_v10 }
0x10d1   :  { %vm2766_vm6 = vcmp.eq.f32.partialorder %v5405_v28, %v5475_v41 }
0x10d2   :  { %vm5482_vm12 = vmand %vm2753_vm13, %vm2766_vm6 }
0x10d3   :  { %v5489_v50 = vsel %vm5482_vm12, -1e+09, %v5385_v56 }
0x10d4   :  { %v3111_v55 = vsel %vm260_vm4, %v5489_v50, -inf }
0x10d5   :  { %3112 = vmax.xlane.f32.xlu1 %v3111_v55 }
0x1107   :  { %v5493_v29 = vpop.f32.mrb[28].mxu1  ;;  %v5495_v22 = vpop.f32.mrb[24].mxu0 }
0x1108   :  { %v4386_v51 = vpop.f32.mrb[29].mxu1  ;;  %v4391_v47 = vpop.f32.mrb[25].mxu0 }
0x1162   :  { %v3113_v49 = vpop.xlane.xlu1 %3112 }
0x1163   :  { %v3114_v53 = vsel %vm2731_vm5, %v3113_v49, -inf }
0x1164   :  { %v3115_v63 = vrot.slane %v3114_v53, 4 }
0x1166   :  { %v3116_v2 = vmax.f32 %v3114_v53, %v3115_v63 }
0x1168   :  { %v3117_v61 = vrot.slane %v3116_v2, 2 }
0x116a   :  { %v3118_v8 = vmax.f32 %v3116_v2, %v3117_v61 }
0x116c   :  { %v3119_v26 = vrot.slane %v3118_v8, 1 }
0x116e   :  { %v5498_v56 = vmax.f32 %v3118_v8, %v3119_v26 }
0x1170   :  { %vm3121_vm13 = vcmp.ge.f32.partialorder %v5489_v50, %v5498_v56 }
0x1171   :  { %v3122_v57 = vsel %vm3121_vm13, 1.0, %v4710_v7 }
0x1172   :  { %v3123_v35 = vsel %vm260_vm4, %v3122_v57, -inf }
0x1173   :  { %3124 = vmax.xlane.f32.xlu0 %v3123_v35 }
0x1200   :  { %v3125_v23 = vpop.xlane.xlu0 %3124 }
0x1201   :  { %vm3126_vm3 = vcmp.gt.f32.partialorder %v3125_v23, 0.5 }
0x1202   :  { %v3127_v45 = vsel %vm3126_vm3, %v5400_v34, 3.0 }
0x1203   :  { %v3128_v62 = vsel %vm2731_vm5, %v3127_v45, inf }
0x1204   :  { %v3129_v12 = vrot.slane %v3128_v62, 4 }
0x1206   :  { %v3130_v16 = vmin.f32 %v3128_v62, %v3129_v12 }
0x1208   :  { %v3131_v18 = vrot.slane %v3130_v16, 2 }
0x120a   :  { %v3132_v21 = vmin.f32 %v3130_v16, %v3131_v18 }
0x120c   :  { %v3133_v13 = vrot.slane %v3132_v21, 1 }
0x120e   :  { %v5510_v48 = vmin.f32 %v3132_v21, %v3133_v13 }
0x1210   :  { %v4536_v33 = vtrunc.f32 %v5510_v48  ;;  %vm3174_vm15 = vcmp.eq.f32.partialorder %v5405_v28, %v5510_v48  ;;  %vm3135_vm7 = vcmp.eq.f32.partialorder %v5400_v34, %v5510_v48  ;;  %vm3390_vm8 = vcmp.eq.f32.partialorder %v5510_v48, 0.0 }
0x1211   :  { %v5521_v38 = vsel %vm3174_vm15, 1.0, %v4710_v7  ;;  %vm3136_vm6 = vmand %vm3121_vm13, %vm3135_vm7  ;;  %v4065_v27 = vsel %vm3390_vm8, 1.0, %v4710_v7  ;;  %vm3403_vm3 = vcmp.eq.f32.partialorder %v5510_v48, 1.0  ;;  %vm3425_vm2 = vcmp.eq.f32.partialorder %v5510_v48, 2.0 }
0x1212   :  { %v4537_v42 = vcvt.f32.s32 %v4536_v33  ;;  %4400 = vmatmul.mubr.msk.f32.vlgmr.msra.gmra.mrb[26].mxu0 %vm2795_vm10, %v5521_v38  ;;  %v3137_v14 = vsel %vm3136_vm6, %v5405_v28, 16.0  ;;  %v3393_v37 = vmul.f32 %v4065_v27, %v4850_v52  ;;  %v3395_v0 = vmul.f32 %v4065_v27, %v5359_v58 }
0x1213   :  { %v3138_v1 = vsel %vm260_vm4, %v3137_v14, inf  ;;  %4409 = vmatprep.mubr.msk.f32.mxu0 %vm4709_vm0, %v4710_v7  ;;  %v3397_v60 = vmul.f32 %v4065_v27, %v5410_v39  ;;  %v3399_v10 = vmul.f32 %v5248_v44, %v4065_v27  ;;  %v3400_v24 = vmul.f32 %v5255_v43, %v4065_v27 }
0x1214   :  { %v5545_v55 = vsel %vm1831_vm1, %v4537_v42, %v2787_v5  ;;  %3139 = vmin.xlane.f32.xlu1 %v3138_v1  ;;  %v4066_v51 = vsel %vm3403_vm3, 1.0, %v4710_v7  ;;  %v4067_v47 = vsel %vm3425_vm2, 1.0, %v4710_v7  ;;  %v3085_v33 = vrot.slane %v5464_v3, %v4805_v20 }
0x1215   :  { %v3406_v49 = vmul.f32 %v4066_v51, %v4850_v52  ;;  %v3411_v53 = vmul.f32 %v4066_v51, %v5359_v58  ;;  %v3416_v63 = vmul.f32 %v4066_v51, %v5410_v39  ;;  %v3421_v2 = vmul.f32 %v5257_v59, %v4066_v51 }
0x1216   :  { %v3422_v61 = vmul.f32 %v5263_v6, %v4066_v51  ;;  %v3428_v8 = vmul.f32 %v4067_v47, %v4850_v52  ;;  %v3433_v26 = vmul.f32 %v4067_v47, %v5359_v58  ;;  %v3438_v57 = vmul.f32 %v4067_v47, %v5410_v39 }
0x1217   :  { %v3408_v35 = vrot.slane %v3406_v49, 1  ;;  %v3413_v23 = vrot.slane %v3411_v53, 1  ;;  %v3418_v45 = vrot.slane %v3416_v63, 1  ;;  %v3423_v62 = vadd.f32 %v3421_v2, %v3399_v10 }
0x1218   :  { %v3424_v12 = vadd.f32 %v3422_v61, %v3400_v24  ;;  %v3430_v16 = vrot.slane %v3428_v8, 2  ;;  %v3435_v19 = vrot.slane %v3433_v26, 2  ;;  %v3440_v18 = vrot.slane %v3438_v57, 2 }
0x1219   :  { %v3410_v21 = vadd.f32 %v3408_v35, %v3393_v37  ;;  %v3415_v15 = vadd.f32 %v3413_v23, %v3395_v0  ;;  %v3420_v13 = vadd.f32 %v3418_v45, %v3397_v60  ;;  %v3443_v5 = vmul.f32 %v5265_v36, %v4067_v47 }
0x121a   :  { %v4535_v27 = vcvt.f32.s32 %v4534_v17  ;;  %v3444_v42 = vmul.f32 %v5271_v4, %v4067_v47  ;;  %v3086_v0 = vsel %vm1752_vm9, %v3085_v33, 0.0  ;;  %v4532_v23 = vtrunc.f32 %v5475_v41 }
0x121b   :  { %v3432_v14 = vadd.f32 %v3430_v16, %v3410_v21  ;;  %v5562_v1 = vadd.f32 %v3435_v19, %v3415_v15  ;;  %v3442_v10 = vadd.f32 %v3440_v18, %v3420_v13  ;;  %v3445_v24 = vadd.f32 %v3443_v5, %v3423_v62 }
0x121c   :  { %v3446_v51 = vadd.f32 %v3444_v42, %v3424_v12  ;;  %v3091_v60 = vrot.slane %v4535_v27, %v4805_v20  ;;  %v4533_v12 = vcvt.f32.s32 %v4532_v23  ;;  %vm2779_vm15 = vcmp.gt.f32.partialorder %v5390_v11, -5e+08 }
0x121d   :  { %v3456_v49 = vrot.slane %v3432_v14, %v4805_v20  ;;  %v4540_v37 = vtrunc.f32 %v3442_v10  ;;  %4068 = vst.msk [vmem:[%s5452_s27 + $0x10] sm:$0xff] %vm1020_vm14, %v3445_v24  ;;  %vm5842_vm3 = vcmask 2048  }
0x121e   :  { %4069 = vst.msk [vmem:[%s5452_s27 + $0x18] sm:$0xff] %vm1020_vm14, %v3446_v51  ;;  %v3092_v53 = vsel %vm1752_vm9, %v3091_v60, 0  ;;  %v2789_v41 = vsel %vm1752_vm9, %v4533_v12, 0 }
0x121f   :  { %v5574_v3 = vsel %vm1831_vm1, %v3456_v49, %v3086_v0  ;;  %v4541_v17 = vcvt.f32.s32 %v4540_v37 }
0x1221   :  { %v3462_v47 = vrot.slane %v4541_v17, %v4805_v20 }
0x1223   :  { %v5581_v63 = vsel %vm1831_vm1, %v3462_v47, %v3092_v53 }
0x12a1   :  { %v3140_v2 = vpop.xlane.xlu1 %3139 }
0x12a2   :  { %v3141_v61 = vsel %vm2731_vm5, %v3140_v2, inf }
0x12a3   :  { %v3142_v8 = vrot.slane %v3141_v61, 4 }
0x12a5   :  { %v3143_v26 = vmin.f32 %v3141_v61, %v3142_v8 }
0x12a7   :  { %v3144_v57 = vrot.slane %v3143_v26, 2 }
0x12a9   :  { %v3145_v35 = vmin.f32 %v3143_v26, %v3144_v57 }
0x12ab   :  { %v3146_v45 = vrot.slane %v3145_v35, 1 }
0x12ad   :  { %v3147_v62 = vmin.f32 %v3145_v35, %v3146_v45 }
0x12af   :  { %vm3148_vm2 = vcmp.eq.f32.partialorder %v5405_v28, %v3147_v62  ;;  %v4538_v16 = vtrunc.f32 %v3147_v62  ;;  %v2768_v62 = vsel %vm5482_vm12, %v5372_v40, 0.0 }
0x12b0   :  { %vm5589_vm13 = vmand %vm3135_vm7, %vm3148_vm2  ;;  %vm3161_vm7 = vcmp.gt.f32.partialorder %v5498_v56, -5e+08 }
0x12b1   :  { %v5596_v18 = vsel %vm5589_vm13, -1e+09, %v5489_v50  ;;  %v4539_v21 = vcvt.f32.s32 %v4538_v16  ;;  %v4046_v50 = vsel %vm2779_vm15, 1.0, %v4710_v7  ;;  %v4057_v33 = vsel %vm3161_vm7, 1.0, %v4710_v7 }
0x12b2   :  { %v3483_v15 = vsel %vm260_vm4, %v5596_v18, -inf  ;;  %v3076_v48 = vmul.f32 %v4046_v50, %v5493_v29  ;;  %v2791_v60 = vsel %vm1752_vm9, %v4046_v50, 0.0  ;;  %v2769_v16 = vsel %vm260_vm4, %v2768_v62, 0.0 }
0x12b3   :  { %v5604_v13 = vsel %vm1831_vm1, %v4539_v21, %v2789_v41  ;;  %3484 = vmax.xlane.f32.xlu0 %v3483_v15 }
0x12b4   :  { %v3080_v5 = vrot.slane %v3076_v48, %v4805_v20  ;;  %v3150_v48 = vsel %vm5589_vm13, %v5372_v40, 0.0 }
0x12c9   :  { %2945 = vrot.lane.b32.xlu0 %v5282_v54, %s4721_s21  ;;  %v3081_v54 = vsel %vm1752_vm9, %v3080_v5, 0.0  ;;  %s4739_s21 = smov 27  }
0x12ca   :  { %s3943_s2 = sld [smem:[%s5834_s0 + %s4739_s21]]  }
0x12cb   :  { %s3946_s21 = sld [smem:[%s5834_s0 + %s4745_s24]]  }
0x12e5   :  { %v3246_v27 = vpop.f32.mrb[26].mxu0 }
0x12e6   :  { %v3447_v42 = vmul.f32 %v4057_v33, %v3246_v27  ;;  %v4401_v14 = vpop.f32.mrb[27].mxu0 }
0x12e8   :  { %v3451_v10 = vrot.slane %v3447_v42, %v4805_v20 }
0x12ea   :  { %v5619_v11 = vsel %vm1831_vm1, %v3451_v10, %v3081_v54 }
0x1340   :  { %v3485_v24 = vpop.xlane.xlu0 %3484 }
0x1341   :  { %v3486_v29 = vsel %vm2731_vm5, %v3485_v24, -inf }
0x1342   :  { %v3487_v56 = vrot.slane %v3486_v29, 4 }
0x1344   :  { %v3488_v51 = vmax.f32 %v3486_v29, %v3487_v56  ;;  %v2946_v49 = vpop.permute.xlu0 %2945 }
0x1345   :  { %4393 = vmatpush3.msk.msra.mxu1 %vm2731_vm5, %v2946_v49  ;;  %4408 = vmatpush3.msk.msra.mxu0 %vm2731_vm5, %v2946_v49 }
0x1346   :  { %v3489_v37 = vrot.slane %v3488_v51, 2  ;;  %4395 = vmatmul.mubr.msk.f32.vlgmr.msra.gmra.mrb[30].mxu1 %vm2795_vm10, %v5418_v30  ;;  %4402 = vmatprep.subr.mxu1 %v4710_v7 }
0x1347   :  { %4410 = vmatmul.mubr.msk.f32.vlgmr.msra.gmra.mrb[28].mxu0 %vm2795_vm10, %v5521_v38  ;;  %4417 = vmatprep.subr.mxu0 %v4710_v7 }
0x1348   :  { %v3490_v0 = vmax.f32 %v3488_v51, %v3489_v37  ;;  %4403 = vmatpush3.msk.msra.mxu1 %vm2731_vm5, %v5292_v25  ;;  %4418 = vmatpush3.msk.msra.mxu0 %vm2731_vm5, %v5292_v25 }
0x1349   :  { %4404 = vmatprep.mubr.msk.f32.mxu1 %vm4709_vm0, %v4710_v7  ;;  %4412 = vmatprep.subr.mxu1 %v4710_v7 }
0x134a   :  { %v3491_v30 = vrot.slane %v3490_v0, 1  ;;  %4405 = vmatmul.mubr.msk.f32.vlgmr.msra.gmra.mrb[32].mxu1 %vm2795_vm10, %v5521_v38  ;;  %4419 = vmatprep.mubr.msk.f32.mxu0 %vm4709_vm0, %v4710_v7  ;;  %v3173_v38 = vsel %vm1831_vm1, %v4057_v33, %v2791_v60 }
0x134b   :  { %4413 = vmatpush3.msk.msra.mxu1 %vm2731_vm5, %v5057_v32  ;;  %4414 = vmatprep.mubr.msk.f32.mxu1 %vm4709_vm0, %v4710_v7 }
0x134c   :  { %v3492_v25 = vmax.f32 %v3490_v0, %v3491_v30  ;;  %4422 = vmatprep.subr.mxu1 %v4710_v7 }
0x134e   :  { %vm3493_vm8 = vcmp.ge.f32.partialorder %v5596_v18, %v3492_v25  ;;  %vm3533_vm6 = vcmp.gt.f32.partialorder %v3492_v25, -5e+08 }
0x134f   :  { %v3494_v17 = vsel %vm3493_vm8, 1.0, %v4710_v7  ;;  %v5658_v32 = vsel %vm3533_vm6, 1.0, %v4710_v7 }
0x1350   :  { %v3495_v47 = vsel %vm260_vm4, %v3494_v17, -inf  ;;  %v3544_v53 = vsel %vm1913_vm11, %v5658_v32, %v3173_v38  ;;  %v3151_v17 = vsel %vm260_vm4, %v3150_v48, 0.0 }
0x1351   :  { %3496 = vmax.xlane.f32.xlu1 %v3495_v47  ;;  %3857 = vst.msk [vmem:[%s3943_s2] sm:$0x7] %vm5842_vm3, %v3544_v53 }
0x13de   :  { %v3497_v2 = vpop.xlane.xlu1 %3496 }
0x13df   :  { %vm3498_vm2 = vcmp.gt.f32.partialorder %v3497_v2, 0.5 }
0x13e0   :  { %v3499_v61 = vsel %vm3498_vm2, %v5400_v34, 3.0 }
0x13e1   :  { %v3500_v8 = vsel %vm2731_vm5, %v3499_v61, inf }
0x13e2   :  { %v3501_v26 = vrot.slane %v3500_v8, 4 }
0x13e4   :  { %v3502_v57 = vmin.f32 %v3500_v8, %v3501_v26 }
0x13e6   :  { %v3503_v35 = vrot.slane %v3502_v57, 2 }
0x13e8   :  { %v3504_v23 = vmin.f32 %v3502_v57, %v3503_v35 }
0x13ea   :  { %v3505_v45 = vrot.slane %v3504_v23, 1 }
0x13ec   :  { %v5673_v12 = vmin.f32 %v3504_v23, %v3505_v45 }
0x13ee   :  { %v4542_v21 = vtrunc.f32 %v5673_v12  ;;  %vm3545_vm15 = vcmp.eq.f32.partialorder %v5405_v28, %v5673_v12  ;;  %vm3507_vm7 = vcmp.eq.f32.partialorder %v5400_v34, %v5673_v12  ;;  %vm3761_vm6 = vcmp.eq.f32.partialorder %v5673_v12, 0.0 }
0x13ef   :  { %v4071_v31 = vsel %vm3545_vm15, 1.0, %v4710_v7  ;;  %vm3508_vm12 = vmand %vm3493_vm8, %vm3507_vm7  ;;  %v4078_v41 = vsel %vm3761_vm6, 1.0, %v4710_v7  ;;  %vm3774_vm3 = vcmp.eq.f32.partialorder %v5673_v12, 1.0  ;;  %vm3796_vm2 = vcmp.eq.f32.partialorder %v5673_v12, 2.0 }
0x13f0   :  { %v4543_v15 = vcvt.f32.s32 %v4542_v21  ;;  %4415 = vmatmul.mubr.msk.f32.vlgmr.msra.gmra.mrb[34].mxu1 %vm2795_vm10, %v4071_v31  ;;  %4420 = vmatmul.mubr.msk.f32.vlgmr.msra.gmra.mrb[30].mxu0 %vm2795_vm10, %v4071_v31  ;;  %v3509_v50 = vsel %vm3508_vm12, %v5405_v28, 16.0  ;;  %v3764_v18 = vmul.f32 %v4078_v41, %v4850_v52  ;;  %v3766_v33 = vmul.f32 %v4078_v41, %v5359_v58 }
0x13f1   :  { %4423 = vmatpush3.msk.msra.mxu1 %vm2731_vm5, %v2946_v49  ;;  %v3510_v5 = vsel %vm260_vm4, %v3509_v50, inf  ;;  %4424 = vmatprep.mubr.msk.f32.mxu1 %vm4709_vm0, %v4710_v7  ;;  %v3768_v27 = vmul.f32 %v4078_v41, %v5410_v39  ;;  %v3770_v42 = vmul.f32 %v5248_v44, %v4078_v41  ;;  %v3771_v14 = vmul.f32 %v5255_v43, %v4078_v41 }
0x13f2   :  { %v3540_v19 = vsel %vm1913_vm11, %v4543_v15, %v5545_v55  ;;  %3511 = vmin.xlane.f32.xlu1 %v3510_v5  ;;  %v4079_v10 = vsel %vm3774_vm3, 1.0, %v4710_v7  ;;  %v4080_v54 = vsel %vm3796_vm2, 1.0, %v4710_v7  ;;  %vm5843_vm0 = vcmask 2048  }
0x13f3   :  { %3864 = vst.msk [vmem:[%s3950_s6] sm:$0x7] %vm5843_vm0, %v3540_v19  ;;  %v3777_v24 = vmul.f32 %v4079_v10, %v4850_v52  ;;  %v3782_v44 = vmul.f32 %v4079_v10, %v5359_v58  ;;  %v3787_v29 = vmul.f32 %v4079_v10, %v5410_v39  ;;  %v3792_v55 = vmul.f32 %v5257_v59, %v4079_v10  ;;  %vm5845_vm13 = vmmov %vm5843_vm0 }
0x13f4   :  { %4425 = vmatmul.mubr.msk.f32.vlgmr.msra.gmra.mrb[36].mxu1 %vm2795_vm10, %v4071_v31  ;;  %v3793_v43 = vmul.f32 %v5263_v6, %v4079_v10  ;;  %v3799_v56 = vmul.f32 %v4080_v54, %v4850_v52  ;;  %v3804_v51 = vmul.f32 %v4080_v54, %v5359_v58  ;;  %v3809_v7 = vmul.f32 %v4080_v54, %v5410_v39  ;;  %vm5844_vm10 = vmmov %vm5843_vm0 }
0x13f5   :  { %v3779_v49 = vrot.slane %v3777_v24, 1  ;;  %v3784_v37 = vrot.slane %v3782_v44, 1  ;;  %v3789_v0 = vrot.slane %v3787_v29, 1  ;;  %v3794_v30 = vadd.f32 %v3792_v55, %v3770_v42  ;;  %vm5846_vm15 = vmmov %vm5843_vm0 }
0x13f6   :  { %2770 = vadd.xlane.f32.xlu1 %v2769_v16  ;;  %v3795_v59 = vadd.f32 %v3793_v43, %v3771_v14  ;;  %v3801_v25 = vrot.slane %v3799_v56, 2  ;;  %v3806_v60 = vrot.slane %v3804_v51, 2  ;;  %v3811_v6 = vrot.slane %v3809_v7, 2 }
0x13f7   :  { %v3781_v38 = vadd.f32 %v3779_v49, %v3764_v18  ;;  %v3786_v52 = vadd.f32 %v3784_v37, %v3766_v33  ;;  %v3791_v58 = vadd.f32 %v3789_v0, %v3768_v27  ;;  %v3814_v39 = vmul.f32 %v5265_v36, %v4080_v54 }
0x13f8   :  { %v3815_v47 = vmul.f32 %v5271_v4, %v4080_v54  ;;  %v3102_v41 = vrot.slane %v5495_v22, %v4805_v20 }
0x13f9   :  { %v3803_v53 = vadd.f32 %v3801_v25, %v3781_v38  ;;  %v5731_v2 = vadd.f32 %v3806_v60, %v3786_v52  ;;  %v3813_v61 = vadd.f32 %v3811_v6, %v3791_v58  ;;  %v3816_v8 = vadd.f32 %v3814_v39, %v3794_v30 }
0x13fa   :  { %3152 = vadd.xlane.f32.xlu1 %v3151_v17  ;;  %v3817_v26 = vadd.f32 %v3815_v47, %v3795_v59  ;;  %v3103_v33 = vsel %vm1752_vm9, %v3102_v41, 0.0 }
0x13fb   :  { %v3827_v57 = vrot.slane %v3803_v53, %v4805_v20  ;;  %v4546_v35 = vtrunc.f32 %v3813_v61  ;;  %4081 = vst.msk [vmem:[%s5452_s27 + $0x20] sm:$0xff] %vm1020_vm14, %v3816_v8 }
0x13fc   :  { %4082 = vst.msk [vmem:[%s5452_s27 + $0x28] sm:$0xff] %vm1020_vm14, %v3817_v26 }
0x13fd   :  { %v3828_v36 = vsel %vm1913_vm11, %v3827_v57, %v5574_v3  ;;  %v4547_v4 = vcvt.f32.s32 %v4546_v35 }
0x13fe   :  { %3855 = vst.msk [vmem:[%s3941_s9] sm:$0x7] %vm5844_vm10, %v3828_v36 }
0x13ff   :  { %v3833_v23 = vrot.slane %v4547_v4, %v4805_v20 }
0x1401   :  { %v3834_v45 = vsel %vm1913_vm11, %v3833_v23, %v5581_v63 }
0x1402   :  { %3856 = vst.msk [vmem:[%s3942_s14] sm:$0x7] %vm5845_vm13, %v3834_v45 }
0x1419   :  { %v3015_v62 = vpop.f32.mrb[30].mxu1 }
0x141a   :  { %v3107_v16 = vrot.slane %v3015_v62, %v4805_v20  ;;  %v3386_v21 = vpop.f32.mrb[28].mxu0  ;;  %v4396_v31 = vpop.f32.mrb[31].mxu1 }
0x141b   :  { %v3478_v3 = vrot.slane %v3386_v21, %v4805_v20  ;;  %v4411_v15 = vpop.f32.mrb[29].mxu0 }
0x141c   :  { %v3108_v50 = vsel %vm1752_vm9, %v3107_v16, 0.0 }
0x141d   :  { %v5758_v48 = vsel %vm1831_vm1, %v3478_v3, %v3108_v50  ;;  %v3316_v63 = vpop.f32.mrb[32].mxu1 }
0x141e   :  { %v3473_v18 = vrot.slane %v3316_v63, %v4805_v20  ;;  %v4406_v5 = vpop.f32.mrb[33].mxu1 }
0x1420   :  { %v5765_v22 = vsel %vm1831_vm1, %v3473_v18, %v3103_v33 }
0x147f   :  { %v3512_v27 = vpop.xlane.xlu1 %3511 }
0x1480   :  { %v3513_v42 = vsel %vm2731_vm5, %v3512_v27, inf }
0x1481   :  { %v3514_v19 = vrot.slane %v3513_v42, 4 }
0x1483   :  { %v3515_v14 = vmin.f32 %v3513_v42, %v3514_v19  ;;  %v2771_v10 = vpop.xlane.xlu1 %2770 }
0x1484   :  { %v2772_v54 = vsel %vm2731_vm5, %v2771_v10, 0.0 }
0x1485   :  { %v3516_v24 = vrot.slane %v3515_v14, 2  ;;  %v2773_v44 = vrot.slane %v2772_v54, 4 }
0x1487   :  { %v3517_v29 = vmin.f32 %v3515_v14, %v3516_v24  ;;  %v2774_v55 = vadd.f32 %v2773_v44, %v2772_v54  ;;  %v3153_v43 = vpop.xlane.xlu1 %3152 }
0x1488   :  { %v3154_v56 = vsel %vm2731_vm5, %v3153_v43, 0.0 }
0x1489   :  { %v3518_v51 = vrot.slane %v3517_v29, 1  ;;  %v2775_v7 = vrot.slane %v2774_v55, 2  ;;  %v3155_v49 = vrot.slane %v3154_v56, 4 }
0x148b   :  { %v2776_v37 = vadd.f32 %v2775_v7, %v2774_v55  ;;  %v3156_v0 = vadd.f32 %v3155_v49, %v3154_v56  ;;  %v3519_v30 = vmin.f32 %v3517_v29, %v3518_v51 }
0x148d   :  { %v2777_v59 = vrot.slane %v2776_v37, 1  ;;  %v3157_v25 = vrot.slane %v3156_v0, 2  ;;  %vm3520_vm14 = vcmp.eq.f32.partialorder %v5405_v28, %v3519_v30  ;;  %v4544_v60 = vtrunc.f32 %v3519_v30 }
0x148e   :  { %vm3521_vm8 = vmand %vm3507_vm7, %vm3520_vm14  ;;  %vm3859_vm7 = vcmask 256000  }
0x148f   :  { %v2778_v6 = vadd.f32 %v2777_v59, %v2776_v37  ;;  %v3158_v38 = vadd.f32 %v3157_v25, %v3156_v0  ;;  %v3522_v52 = vsel %vm3521_vm8, %v5372_v40, 0.0  ;;  %v4545_v58 = vcvt.f32.s32 %v4544_v60 }
0x1490   :  { %v3523_v39 = vsel %vm260_vm4, %v3522_v52, 0.0 }
0x1491   :  { %v2782_v17 = vmax.f32 %v2778_v6, 1e-30  ;;  %v3159_v47 = vrot.slane %v3158_v38, 1  ;;  %v3542_v53 = vsel %vm1913_vm11, %v4545_v58, %v5604_v13  ;;  %3524 = vadd.xlane.f32.xlu1 %v3523_v39 }
0x1492   :  { %3862 = vst.msk [vmem:[%s3948_s17] sm:$0x7] %vm5846_vm15, %v3542_v53 }
0x1493   :  { %4697 = vlog2.f32 %v2782_v17  ;;  %v3160_v28 = vadd.f32 %v3159_v47, %v3158_v38 }
0x1495   :  { %v3164_v34 = vmax.f32 %v3160_v28, 1e-30 }
0x1497   :  { %4699 = vlog2.f32 %v3164_v34 }
0x149d   :  { %v4698_v12 = vpop.eup %4697 }
0x149e   :  { %v2784_v61 = vmul.f32 0.6931472, %v4698_v12 }
0x14a0   :  { %v3093_v40 = vadd.f32 %v5466_v46, %v2784_v61 }
0x14a1   :  { %v4700_v8 = vpop.eup %4699 }
0x14a2   :  { %v3166_v26 = vmul.f32 0.6931472, %v4700_v8  ;;  %v3097_v57 = vrot.slane %v3093_v40, %v4805_v20 }
0x14a4   :  { %v3464_v35 = vadd.f32 %v5562_v1, %v3166_v26  ;;  %v3098_v13 = vsel %vm1752_vm9, %v3097_v57, 0.0 }
0x14a6   :  { %v3468_v36 = vrot.slane %v3464_v35, %v4805_v20 }
0x14a8   :  { %v3469_v4 = vsel %vm1831_vm1, %v3468_v36, %v3098_v13 }
0x14c3   :  { %v3617_v46 = vpop.f32.mrb[34].mxu1  ;;  %v3687_v1 = vpop.f32.mrb[30].mxu0 }
0x14c4   :  { %v3818_v23 = vmul.f32 %v5658_v32, %v3617_v46  ;;  %v3844_v45 = vrot.slane %v3687_v1, %v4805_v20  ;;  %v4416_v62 = vpop.f32.mrb[35].mxu1  ;;  %v4421_v16 = vpop.f32.mrb[31].mxu0 }
0x14c6   :  { %v3822_v21 = vrot.slane %v3818_v23, %v4805_v20  ;;  %v3845_v31 = vsel %vm1913_vm11, %v3844_v45, %v5765_v22 }
0x14c7   :  { %3860 = vst.msk [vmem:[%s3945_s20] sm:$0x7] %vm3859_vm7, %v3845_v31  ;;  %v3757_v41 = vpop.f32.mrb[36].mxu1 }
0x14c8   :  { %v3823_v3 = vsel %vm1913_vm11, %v3822_v21, %v5619_v11  ;;  %v3849_v15 = vrot.slane %v3757_v41, %v4805_v20  ;;  %v4426_v32 = vpop.f32.mrb[37].mxu1 }
0x14c9   :  { %3854 = vst.msk [vmem:[%s3940_s10] sm:$0x7] %vm260_vm4, %v3823_v3  ;;  %vm5847_vm4 = vmmov %vm5843_vm0 }
0x14ca   :  { %v3850_v50 = vsel %vm1913_vm11, %v3849_v15, %v5758_v48  ;;  %v2790_v48 = vsel %vm1752_vm9, %v2784_v61, 0.0 }
0x14cb   :  { %3861 = vst.msk [vmem:[%s3946_s21] sm:$0x7] %vm3859_vm7, %v3850_v50  ;;  %v3172_v54 = vsel %vm1831_vm1, %v3166_v26, %v2790_v48 }
0x151e   :  { %v3525_v63 = vpop.xlane.xlu1 %3524 }
0x151f   :  { %v3526_v18 = vsel %vm2731_vm5, %v3525_v63, 0.0  ;;  %vm5848_vm5 = vmmov %vm5843_vm0 }
0x1520   :  { %v3527_v5 = vrot.slane %v3526_v18, 4 }
0x1522   :  { %v3528_v33 = vadd.f32 %v3527_v5, %v3526_v18 }
0x1524   :  { %v3529_v22 = vrot.slane %v3528_v33, 2 }
0x1526   :  { %v3530_v27 = vadd.f32 %v3529_v22, %v3528_v33 }
0x1528   :  { %v3531_v42 = vrot.slane %v3530_v27, 1 }
0x152a   :  { %v3532_v19 = vadd.f32 %v3531_v42, %v3530_v27 }
0x152c   :  { %v3536_v11 = vmax.f32 %v3532_v19, 1e-30 }
0x152e   :  { %4701 = vlog2.f32 %v3536_v11 }
0x1538   :  { %v4702_v14 = vpop.eup %4701 }
0x1539   :  { %v3538_v10 = vmul.f32 0.6931472, %v4702_v14 }
0x153b   :  { %v3543_v24 = vsel %vm1913_vm11, %v3538_v10, %v3172_v54  ;;  %v3835_v44 = vadd.f32 %v5731_v2, %v3538_v10 }
0x153c   :  { %3863 = vst.msk [vmem:[%s3949_s3] sm:$0x7] %vm5847_vm4, %v3543_v24 }
0x153d   :  { %v3839_v29 = vrot.slane %v3835_v44, %v4805_v20 }
0x153f   :  { %v3840_v55 = vsel %vm1913_vm11, %v3839_v29, %v3469_v4 }
0x1540   :  { %3858 = vst.msk [vmem:[%s3944_s7] sm:$0x7] %vm5848_vm5, %v3840_v55 }

</bundles_post_ra>
